<compile_context>
chip_gen: v7x
topology: tpu7x:2x2x1
jax: 0.10.0
libtpu: 0.0.40
codegen_flags: <defaults>
</compile_context>

<pallas_src>
import functools

import jax
import jax.numpy as jnp
from jax import lax
from jax.experimental import pallas as pl
from jax.experimental.pallas import tpu as pltpu

LN_EPS = 1e-5
VMEM_BUDGET_BYTES = 40 * 1024 * 1024   # leaves headroom inside v7x's 64 MiB VMEM
VMEM_LIMIT_BYTES = 48 * 1024 * 1024    # explicit scoped-VMEM limit (> 16/32 MiB defaults)


def _round_up(x, m):
    return ((x + m - 1) // m) * m


def _gru_ln_kernel(gi_ref, w_ref, b_n_ref, gamma_ref, beta_ref, h0_ref,
                   out_ref, hN_ref, h_scratch, *, tc, tail, dp, inv_d):
    """One grid step = up to `tc` GRU timesteps + fused LayerNorm, one batch chunk.

    Shapes (padded): gi_ref (Tc, 3, Bc, Dp); w_ref (Dp, 3*Dp) with gates at
    0/Dp/2*Dp; b_n/gamma/beta (1, Dp); h0/hN/h_scratch (Bc, Dp); out_ref (Tc, Bc, Dp).
    """
    t_chunk = pl.program_id(1)
    n_t = pl.num_programs(1)

    @pl.when(t_chunk == 0)
    def _():
        h_scratch[...] = h0_ref[...]

    # Grid-invariant operands: load / broadcast ONCE per grid step (JAX does not
    # CSE broadcast_in_dim, so keep them out of the unrolled timestep loop).
    w_cat = w_ref[...]                                          # (Dp, 3*Dp), MXU dtype
    b_n = jnp.broadcast_to(b_n_ref[...], h_scratch.shape)       # (Bc, Dp), f32
    gamma = jnp.broadcast_to(gamma_ref[...], h_scratch.shape)   # (Bc, Dp), f32
    beta = jnp.broadcast_to(beta_ref[...], h_scratch.shape)     # (Bc, Dp), f32
    mxu_dtype = w_cat.dtype

    def step(i, h):
        # One fused MXU matmul per timestep covering all three gates.
        gh = jnp.dot(h.astype(mxu_dtype), w_cat,
                     preferred_element_type=jnp.float32)        # (Bc, 3*Dp)
        # Precomputed input gates (b_ih + b_hh[r,z] already folded in).
        g_r = gi_ref[i, 0].astype(jnp.float32)
        g_z = gi_ref[i, 1].astype(jnp.float32)
        g_n = gi_ref[i, 2].astype(jnp.float32)

        r = jax.nn.sigmoid(g_r + gh[:, :dp])
        z = jax.nn.sigmoid(g_z + gh[:, dp:2 * dp])
        n = jnp.tanh(g_n + r * (gh[:, 2 * dp:] + b_n))
        h_new = (1.0 - z) * n + z * h                           # f32 carry

        # Fused-statistic LayerNorm (f32) over the REAL feature width; padded
        # lanes of h_new are exactly 0, so summing over Dp with inv_d = 1/D is exact.
        mean = jnp.sum(h_new, axis=-1, keepdims=True) * inv_d
        var = jnp.maximum(
            jnp.sum(h_new * h_new, axis=-1, keepdims=True) * inv_d - mean * mean, 0.0)
        y = (h_new - mean) * lax.rsqrt(var + LN_EPS) * gamma + beta
        out_ref[i] = y.astype(out_ref.dtype)
        return h_new

    if tail == tc:
        # No padded timesteps anywhere: single unmasked unrolled loop.
        h_final = lax.fori_loop(0, tc, step, h_scratch[...], unroll=True)
        h_scratch[...] = h_final

        @pl.when(t_chunk == n_t - 1)
        def _():
            hN_ref[...] = h_final.astype(hN_ref.dtype)
    else:
        # Full chunks: unmasked loop. Last chunk: run exactly `tail` real steps
        # (padded timesteps are skipped entirely instead of masked per-step).
        @pl.when(t_chunk != n_t - 1)
        def _():
            h_scratch[...] = lax.fori_loop(0, tc, step, h_scratch[...], unroll=True)

        @pl.when(t_chunk == n_t - 1)
        def _():
            h_final = lax.fori_loop(0, tail, step, h_scratch[...], unroll=True)
            h_scratch[...] = h_final
            hN_ref[...] = h_final.astype(hN_ref.dtype)


def _vmem_bytes(tc, bc, dp, mxu_bytes):
    """Conservative estimate of scoped-VMEM use for one grid step."""
    gi_blk = 2 * tc * 3 * bc * dp * mxu_bytes        # double-buffered input gates
    out_blk = 2 * tc * bc * dp * 4                   # double-buffered output
    w = 2 * dp * 3 * dp * mxu_bytes                  # W_hh (worst case: double-buffered)
    smalls = 8 * dp * 4 + 5 * bc * dp * 4            # biases/ln params, h0, hN, scratch
    return gi_blk + out_blk + w + smalls


def _build_pallas_call(*, Tc, Bc, Dp, Tp, Bp, tail, d_real, single_buffer_weights):
    kernel = functools.partial(_gru_ln_kernel, tc=Tc, tail=tail, dp=Dp,
                               inv_d=1.0 / d_real)
    # Single-buffer grid-invariant inputs (their index_map is constant).
    const_kw = {"pipeline_mode": pl.Buffered(1)} if single_buffer_weights else {}
    f32 = jnp.float32
    return pl.pallas_call(
        kernel,
        out_shape=(
            jax.ShapeDtypeStruct((Tp, Bp, Dp), f32),
            jax.ShapeDtypeStruct((Bp, Dp), f32),
        ),
        grid_spec=pltpu.PrefetchScalarGridSpec(
            num_scalar_prefetch=0,
            grid=(Bp // Bc, Tp // Tc),
            in_specs=[
                pl.BlockSpec((Tc, 3, Bc, Dp), lambda b, t: (t, 0, b, 0)),     # input gates
                pl.BlockSpec((Dp, 3 * Dp), lambda b, t: (0, 0), **const_kw),  # fused W_hh^T
                pl.BlockSpec((1, Dp), lambda b, t: (0, 0), **const_kw),       # b_hh[n]
                pl.BlockSpec((1, Dp), lambda b, t: (0, 0), **const_kw),       # ln gamma
                pl.BlockSpec((1, Dp), lambda b, t: (0, 0), **const_kw),       # ln beta
                pl.BlockSpec((Bc, Dp), lambda b, t: (b, 0)),                  # h0
            ],
            out_specs=[
                pl.BlockSpec((Tc, Bc, Dp), lambda b, t: (t, b, 0)),           # per-step outputs
                pl.BlockSpec((Bc, Dp), lambda b, t: (b, 0)),                  # final hidden state
            ],
            scratch_shapes=[pltpu.VMEM((Bc, Dp), f32)],
        ),
        compiler_params=pltpu.CompilerParams(
            dimension_semantics=("parallel", "arbitrary"),
            vmem_limit_bytes=VMEM_LIMIT_BYTES,
        ),
    )


def predictor_forward(token_idxs, params, states=None, *, time_chunk=16,
                      compute_dtype=jnp.bfloat16):
    """token_idxs: (B, T) int32.  Returns (outputs (B, T, D), states (1, B, D)).

    compute_dtype controls the gi stream + MXU operand dtype (bf16 = native MXU
    rate and half the HBM traffic). The h carry, gates and LayerNorm stay in f32.
    """
    emb_table = params["embedding"]                      # (V, E)
    w_ih, w_hh = params["w_ih"], params["w_hh"]          # (3D, E), (3D, D)
    b_ih, b_hh = params["b_ih"], params["b_hh"]          # (1, 3D)
    gamma, beta = params["ln_gamma"], params["ln_beta"]  # (1, D)

    B, T = token_idxs.shape
    D = w_hh.shape[1]
    E = emb_table.shape[1]
    f32 = jnp.float32
    mxu_bytes = jnp.dtype(compute_dtype).itemsize

    # ---- padded / tiled sizes (VMEM-budget aware) ----------------------------
    Dp = _round_up(D, 128)                  # lane-dense feature width
    Bc = min(_round_up(B, 8), 256)          # batch chunk (sublane-aligned)
    Bp = _round_up(B, Bc)
    if Bp // Bc == 1 and B >= 16:           # v7x megacore: keep both TCs busy
        Bc = max(_round_up(Bc // 2, 8), 8)
        Bp = _round_up(B, Bc)
    Tc = max(min(time_chunk, T), 1)
    while _vmem_bytes(Tc, Bc, Dp, mxu_bytes) > VMEM_BUDGET_BYTES and Tc > 1:
        Tc = max(Tc // 2, 1)
    while _vmem_bytes(Tc, Bc, Dp, mxu_bytes) > VMEM_BUDGET_BYTES and Bc > 8:
        Bc = max(_round_up(Bc // 2, 8), 8)
        Bp = _round_up(B, Bc)
    Tp = _round_up(T, Tc)
    n_t = Tp // Tc
    tail = T - (n_t - 1) * Tc               # real timesteps in the last chunk

    # ---- glue: embedding gather + hoisted input projection -------------------
    # Produced directly in gate-leading, time-major layout (no extra HBM transpose).
    embs_tm = jnp.take(emb_table, token_idxs.T, axis=0).astype(f32)      # (T, B, E)
    w_ih3 = w_ih.astype(f32).reshape(3, D, E)
    gi = jnp.einsum("tbe,gde->tgbd", embs_tm, w_ih3)                     # (T, 3, B, D)
    # Fold b_ih (all gates) and b_hh (r, z only) into gi; b_hh[n] stays in-kernel.
    b_ih3 = b_ih.astype(f32).reshape(3, D)
    b_hh3 = b_hh.astype(f32).reshape(3, D)
    bias_fold = jnp.stack([b_ih3[0] + b_hh3[0], b_ih3[1] + b_hh3[1], b_ih3[2]])
    gi = gi + bias_fold[None, :, None, :]
    gi = jnp.pad(gi, ((0, Tp - T), (0, 0), (0, Bp - B), (0, Dp - D)))
    gi = gi.astype(compute_dtype)

    # Fused, pre-transposed hidden weights: gh = h @ w_cat, gates at 0/Dp/2*Dp.
    w_hh3_t = jnp.transpose(w_hh.astype(f32).reshape(3, D, D), (0, 2, 1))  # (3, Din, Dout)
    w_hh3_t = jnp.pad(w_hh3_t, ((0, 0), (0, Dp - D), (0, Dp - D)))
    w_cat = jnp.transpose(w_hh3_t, (1, 0, 2)).reshape(Dp, 3 * Dp).astype(compute_dtype)

    b_n_p = jnp.pad(b_hh3[2:3], ((0, 0), (0, Dp - D)))                   # (1, Dp) f32
    gamma_p = jnp.pad(gamma.astype(f32), ((0, 0), (0, Dp - D)))
    beta_p = jnp.pad(beta.astype(f32), ((0, 0), (0, Dp - D)))

    if states is None:
        h0 = jnp.zeros((Bp, Dp), f32)
    else:
        h0 = jnp.pad(jnp.asarray(states).reshape(B, D).astype(f32),
                     ((0, Bp - B), (0, Dp - D)))

    args = (gi, w_cat, b_n_p, gamma_p, beta_p, h0)
    build = functools.partial(_build_pallas_call, Tc=Tc, Bc=Bc, Dp=Dp, Tp=Tp,
                              Bp=Bp, tail=tail, d_real=D)
    try:
        out_tm, hN = build(single_buffer_weights=True)(*args)
        jax.block_until_ready((out_tm, hN))
    except Exception:
        # Fallback for jax versions where pipeline_mode=pl.Buffered(1) is not
        # supported on top-level pallas_call BlockSpecs.
        out_tm, hN = build(single_buffer_weights=False)(*args)

    # TODO(synk): consumers that accept time-major output could skip this transpose.
    outputs = jnp.transpose(out_tm[:T, :B, :D], (1, 0, 2))   # batch_first (B, T, D)
    return outputs, hN[:B, :D][None]                          # states: (1, B, D)


def init_params(key, num_embeddings, embedding_dim, d_model):
    ks = jax.random.split(key, 5)
    bound = 1.0 / jnp.sqrt(d_model)
    return {
        "embedding": jax.random.normal(ks[0], (num_embeddings, embedding_dim), jnp.float32),
        "w_ih": jax.random.uniform(ks[1], (3 * d_model, embedding_dim), jnp.float32, -bound, bound),
        "w_hh": jax.random.uniform(ks[2], (3 * d_model, d_model), jnp.float32, -bound, bound),
        "b_ih": jax.random.uniform(ks[3], (1, 3 * d_model), jnp.float32, -bound, bound),
        "b_hh": jax.random.uniform(ks[4], (1, 3 * d_model), jnp.float32, -bound, bound),
        "ln_gamma": jnp.ones((1, d_model), jnp.float32),
        "ln_beta": jnp.zeros((1, d_model), jnp.float32),
    }


def _reference_forward(token_idxs, params):
    """Pure-JAX reference (same math as PyTorch GRU + LayerNorm) for correctness."""
    emb = jnp.take(params["embedding"], token_idxs, axis=0)   # (B, T, E)
    D = params["w_hh"].shape[1]
    w_ih, w_hh = params["w_ih"], params["w_hh"]
    b_ih, b_hh = params["b_ih"][0], params["b_hh"][0]

    def step(h, x):
        gi = x @ w_ih.T + b_ih
        gh = h @ w_hh.T + b_hh
        r = jax.nn.sigmoid(gi[:, :D] + gh[:, :D])
        z = jax.nn.sigmoid(gi[:, D:2 * D] + gh[:, D:2 * D])
        n = jnp.tanh(gi[:, 2 * D:] + r * gh[:, 2 * D:])
        h_new = (1.0 - z) * n + z * h
        return h_new, h_new

    B = token_idxs.shape[0]
    h0 = jnp.zeros((B, D), jnp.float32)
    hN, ys = lax.scan(step, h0, jnp.transpose(emb, (1, 0, 2)))
    ys = jnp.transpose(ys, (1, 0, 2))
    mean = jnp.mean(ys, -1, keepdims=True)
    var = jnp.mean((ys - mean) ** 2, -1, keepdims=True)
    out = (ys - mean) * lax.rsqrt(var + LN_EPS) * params["ln_gamma"][0] + params["ln_beta"][0]
    return out, hN[None]


if __name__ == "__main__":
    num_embeddings, embedding_dim, d_model = 16, 32, 32
    B, T = 2, 12   # T=12 with time_chunk=8 exercises multi-chunk carry + ragged tail

    key = jax.random.PRNGKey(0)
    pkey, tkey = jax.random.split(key)
    params = init_params(pkey, num_embeddings, embedding_dim, d_model)
    token_idxs = jax.random.randint(tkey, (B, T), 0, num_embeddings, dtype=jnp.int32)

    ref_out, ref_states = _reference_forward(token_idxs, params)

    # f32 MXU path, multiple time chunks + ragged tail: tight tolerance.
    out32, st32 = predictor_forward(token_idxs, params, states=None,
                                    time_chunk=8, compute_dtype=jnp.float32)
    jax.block_until_ready((out32, st32))
    assert out32.shape == (B, T, d_model) and st32.shape == (1, B, d_model)
    assert jnp.allclose(out32, ref_out, atol=1e-4, rtol=1e-4)
    assert jnp.allclose(st32, ref_states, atol=1e-4, rtol=1e-4)

    # Default bf16 MXU/DMA path (single time chunk): relaxed tolerance.
    out16, st16 = predictor_forward(token_idxs, params, states=None)
    jax.block_until_ready((out16, st16))
    assert out16.shape == (B, T, d_model) and st16.shape == (1, B, d_model)
    assert jnp.allclose(out16, ref_out, atol=5e-2, rtol=5e-2)
    assert jnp.allclose(st16, ref_states, atol=5e-2, rtol=5e-2)

    print("KERNEL_OK")
</pallas_src>

<mosaic_0001>
module attributes {stable_mosaic.version = 11 : i64} {
  func.func @_gru_ln_kernel(%arg0: i32, %arg1: i32, %arg2: memref<8x3x8x128xf32, #tpu.memory_space<vmem>>, %arg3: memref<128x384xf32, #tpu.memory_space<vmem>>, %arg4: memref<1x128xf32, #tpu.memory_space<vmem>>, %arg5: memref<1x128xf32, #tpu.memory_space<vmem>>, %arg6: memref<1x128xf32, #tpu.memory_space<vmem>>, %arg7: memref<8x128xf32, #tpu.memory_space<vmem>>, %arg8: memref<8x8x128xf32, #tpu.memory_space<vmem>>, %arg9: memref<8x128xf32, #tpu.memory_space<vmem>>, %arg10: memref<8x128xf32, #tpu.memory_space<vmem>>) attributes {dimension_semantics = [#tpu.dimension_semantics<parallel>, #tpu.dimension_semantics<arbitrary>], iteration_bounds = array<i64: 1, 2>, scalar_prefetch = 0 : i64, scratch_operands = 1 : i64, tpu.core_type = #tpu.core_type<tc>, window_params = [{transform_indices = @transform_0, window_bounds = array<i64: 8, 3, 8, 128>}, {pipeline_mode = #tpu.pipeline_mode<synchronous>, transform_indices = @transform_1, window_bounds = array<i64: 128, 384>}, {pipeline_mode = #tpu.pipeline_mode<synchronous>, transform_indices = @transform_2, window_bounds = array<i64: 1, 128>}, {pipeline_mode = #tpu.pipeline_mode<synchronous>, transform_indices = @transform_3, window_bounds = array<i64: 1, 128>}, {pipeline_mode = #tpu.pipeline_mode<synchronous>, transform_indices = @transform_4, window_bounds = array<i64: 1, 128>}, {transform_indices = @transform_5, window_bounds = array<i64: 8, 128>}, {transform_indices = @transform_6, window_bounds = array<i64: 8, 8, 128>}, {transform_indices = @transform_7, window_bounds = array<i64: 8, 128>}]} {
    %c0_i32 = arith.constant 0 : i32
    %0 = arith.cmpi eq, %arg1, %c0_i32 : i32
    %1 = arith.extui %0 : i1 to i32
    %c0_i32_0 = arith.constant 0 : i32
    %2 = arith.cmpi ne, %1, %c0_i32_0 : i32
    scf.if %2 {
      %c0_11 = arith.constant 0 : index
      %c0_12 = arith.constant 0 : index
      %19 = vector.load %arg7[%c0_11, %c0_12] : memref<8x128xf32, #tpu.memory_space<vmem>>, vector<8x128xf32>
      %c0_13 = arith.constant 0 : index
      %c0_14 = arith.constant 0 : index
      %20 = vector.load %arg10[%c0_13, %c0_14] : memref<8x128xf32, #tpu.memory_space<vmem>>, vector<8x128xf32>
      tpu.vector_store %arg10[%c0_13, %c0_14], %19 {strides = array<i32>} : memref<8x128xf32, #tpu.memory_space<vmem>>, vector<8x128xf32>,
    } else {
    }
    %c0 = arith.constant 0 : index
    %c0_1 = arith.constant 0 : index
    %3 = vector.load %arg3[%c0, %c0_1] : memref<128x384xf32, #tpu.memory_space<vmem>>, vector<128x384xf32>
    %c0_2 = arith.constant 0 : index
    %c0_3 = arith.constant 0 : index
    %4 = vector.load %arg4[%c0_2, %c0_3] : memref<1x128xf32, #tpu.memory_space<vmem>>, vector<1x128xf32>
    %5 = vector.shape_cast %4 : vector<1x128xf32> to vector<1x128xf32>
    %6 = vector.broadcast %5 : vector<1x128xf32> to vector<8x128xf32>
    %c0_4 = arith.constant 0 : index
    %c0_5 = arith.constant 0 : index
    %7 = vector.load %arg5[%c0_4, %c0_5] : memref<1x128xf32, #tpu.memory_space<vmem>>, vector<1x128xf32>
    %8 = vector.shape_cast %7 : vector<1x128xf32> to vector<1x128xf32>
    %9 = vector.broadcast %8 : vector<1x128xf32> to vector<8x128xf32>
    %c0_6 = arith.constant 0 : index
    %c0_7 = arith.constant 0 : index
    %10 = vector.load %arg6[%c0_6, %c0_7] : memref<1x128xf32, #tpu.memory_space<vmem>>, vector<1x128xf32>
    %11 = vector.shape_cast %10 : vector<1x128xf32> to vector<1x128xf32>
    %12 = vector.broadcast %11 : vector<1x128xf32> to vector<8x128xf32>
    %c1_i32 = arith.constant 1 : i32
    %13 = arith.cmpi ne, %arg1, %c1_i32 : i32
    %14 = arith.extui %13 : i1 to i32
    %c0_i32_8 = arith.constant 0 : i32
    %15 = arith.cmpi ne, %14, %c0_i32_8 : i32
    scf.if %15 {
      %c0_11 = arith.constant 0 : index
      %c0_12 = arith.constant 0 : index
      %19 = vector.load %arg10[%c0_11, %c0_12] : memref<8x128xf32, #tpu.memory_space<vmem>>, vector<8x128xf32>
      %c0_i32_13 = arith.constant 0 : i32
      %cst = arith.constant dense<0.000000e+00> : vector<8x384xf32>
      %20 = tpu.matmul %19, %3, %cst {dimension_numbers = #tpu.dot_dimension_numbers<[1], [0], [0], [1], [0, 0, 1, 1], [], []>} : vector<8x128xf32>, vector<128x384xf32>, vector<8x384xf32> -> vector<8x384xf32>
      %21 = arith.index_cast %c0_i32_13 : i32 to index
      %c0_14 = arith.constant 0 : index
      %c0_15 = arith.constant 0 : index
      %c0_16 = arith.constant 0 : index
      %22 = vector.load %arg2[%21, %c0_14, %c0_15, %c0_16] : memref<8x3x8x128xf32, #tpu.memory_space<vmem>>, vector<1x1x8x128xf32>
      %23 = vector.shape_cast %22 : vector<1x1x8x128xf32> to vector<8x128xf32>
      %24 = arith.index_cast %c0_i32_13 : i32 to index
      %c1 = arith.constant 1 : index
      %c0_17 = arith.constant 0 : index
      %c0_18 = arith.constant 0 : index
      %25 = vector.load %arg2[%24, %c1, %c0_17, %c0_18] : memref<8x3x8x128xf32, #tpu.memory_space<vmem>>, vector<1x1x8x128xf32>
      %26 = vector.shape_cast %25 : vector<1x1x8x128xf32> to vector<8x128xf32>
      %27 = arith.index_cast %c0_i32_13 : i32 to index
      %c2 = arith.constant 2 : index
      %c0_19 = arith.constant 0 : index
      %c0_20 = arith.constant 0 : index
      %28 = vector.load %arg2[%27, %c2, %c0_19, %c0_20] : memref<8x3x8x128xf32, #tpu.memory_space<vmem>>, vector<1x1x8x128xf32>
      %29 = vector.shape_cast %28 : vector<1x1x8x128xf32> to vector<8x128xf32>
      %30 = vector.extract_strided_slice %20 {offsets = [0, 0], sizes = [8, 128], strides = [1, 1]} : vector<8x384xf32> to vector<8x128xf32>
      %31 = arith.addf %23, %30 : vector<8x128xf32>
      %32 = arith.negf %31 : vector<8x128xf32>
      %33 = math.exp %32 : vector<8x128xf32>
      %cst_21 = arith.constant 1.000000e+00 : f32
      %34 = vector.broadcast %cst_21 : f32 to vector<8x128xf32>
      %35 = arith.addf %34, %33 : vector<8x128xf32>
      %36 = arith.divf %34, %35 : vector<8x128xf32>
      %37 = vector.extract_strided_slice %20 {offsets = [0, 128], sizes = [8, 128], strides = [1, 1]} : vector<8x384xf32> to vector<8x128xf32>
      %38 = arith.addf %26, %37 : vector<8x128xf32>
      %39 = arith.negf %38 : vector<8x128xf32>
      %40 = math.exp %39 : vector<8x128xf32>
      %cst_22 = arith.constant 1.000000e+00 : f32
      %41 = vector.broadcast %cst_22 : f32 to vector<8x128xf32>
      %42 = arith.addf %41, %40 : vector<8x128xf32>
      %43 = arith.divf %41, %42 : vector<8x128xf32>
      %44 = vector.extract_strided_slice %20 {offsets = [0, 256], sizes = [8, 128], strides = [1, 1]} : vector<8x384xf32> to vector<8x128xf32>
      %45 = arith.addf %44, %6 : vector<8x128xf32>
      %46 = arith.mulf %36, %45 : vector<8x128xf32>
      %47 = arith.addf %29, %46 : vector<8x128xf32>
      %48 = math.tanh %47 : vector<8x128xf32>
      %cst_23 = arith.constant 1.000000e+00 : f32
      %49 = vector.broadcast %cst_23 : f32 to vector<8x128xf32>
      %50 = arith.subf %49, %43 : vector<8x128xf32>
      %51 = arith.mulf %50, %48 : vector<8x128xf32>
      %52 = arith.mulf %43, %19 : vector<8x128xf32>
      %53 = arith.addf %51, %52 : vector<8x128xf32>
      %cst_24 = arith.constant dense<0.000000e+00> : vector<8xf32>
      %54 = vector.multi_reduction <add>, %53, %cst_24 [1] : vector<8x128xf32> to vector<8xf32>
      %55 = vector.shape_cast %54 : vector<8xf32> to vector<8x1xf32>
      %cst_25 = arith.constant 3.125000e-02 : f32
      %56 = vector.broadcast %cst_25 : f32 to vector<8x1xf32>
      %57 = arith.mulf %55, %56 : vector<8x1xf32>
      %58 = arith.mulf %53, %53 : vector<8x128xf32>
      %cst_26 = arith.constant dense<0.000000e+00> : vector<8xf32>
      %59 = vector.multi_reduction <add>, %58, %cst_26 [1] : vector<8x128xf32> to vector<8xf32>
      %60 = vector.shape_cast %59 : vector<8xf32> to vector<8x1xf32>
      %cst_27 = arith.constant 3.125000e-02 : f32
      %61 = vector.broadcast %cst_27 : f32 to vector<8x1xf32>
      %62 = arith.mulf %60, %61 : vector<8x1xf32>
      %63 = arith.mulf %57, %57 : vector<8x1xf32>
      %64 = arith.subf %62, %63 : vector<8x1xf32>
      %cst_28 = arith.constant 0.000000e+00 : f32
      %65 = vector.broadcast %cst_28 : f32 to vector<8x1xf32>
      %66 = arith.maximumf %64, %65 : vector<8x1xf32>
      %67 = vector.broadcast %57 : vector<8x1xf32> to vector<8x128xf32>
      %68 = arith.subf %53, %67 : vector<8x128xf32>
      %cst_29 = arith.constant 9.99999974E-6 : f32
      %69 = vector.broadcast %cst_29 : f32 to vector<8x1xf32>
      %70 = arith.addf %66, %69 : vector<8x1xf32>
      %71 = math.rsqrt %70 : vector<8x1xf32>
      %72 = vector.broadcast %71 : vector<8x1xf32> to vector<8x128xf32>
      %73 = arith.mulf %68, %72 : vector<8x128xf32>
      %74 = arith.mulf %73, %9 : vector<8x128xf32>
      %75 = arith.addf %74, %12 : vector<8x128xf32>
      %76 = arith.index_cast %c0_i32_13 : i32 to index
      %c0_30 = arith.constant 0 : index
      %c0_31 = arith.constant 0 : index
      %77 = vector.load %arg8[%76, %c0_30, %c0_31] : memref<8x8x128xf32, #tpu.memory_space<vmem>>, vector<1x8x128xf32>
      %78 = vector.shape_cast %77 : vector<1x8x128xf32> to vector<8x128xf32>
      %79 = vector.shape_cast %75 : vector<8x128xf32> to vector<1x8x128xf32>
      tpu.vector_store %arg8[%76, %c0_30, %c0_31], %79 {strides = array<i32>} : memref<8x8x128xf32, #tpu.memory_space<vmem>>, vector<1x8x128xf32>,
      %c1_i32_32 = arith.constant 1 : i32
      %cst_33 = arith.constant dense<0.000000e+00> : vector<8x384xf32>
      %80 = tpu.matmul %53, %3, %cst_33 {dimension_numbers = #tpu.dot_dimension_numbers<[1], [0], [0], [1], [0, 0, 1, 1], [], []>} : vector<8x128xf32>, vector<128x384xf32>, vector<8x384xf32> -> vector<8x384xf32>
      %81 = arith.index_cast %c1_i32_32 : i32 to index
      %c0_34 = arith.constant 0 : index
      %c0_35 = arith.constant 0 : index
      %c0_36 = arith.constant 0 : index
      %82 = vector.load %arg2[%81, %c0_34, %c0_35, %c0_36] : memref<8x3x8x128xf32, #tpu.memory_space<vmem>>, vector<1x1x8x128xf32>
      %83 = vector.shape_cast %82 : vector<1x1x8x128xf32> to vector<8x128xf32>
      %84 = arith.index_cast %c1_i32_32 : i32 to index
      %c1_37 = arith.constant 1 : index
      %c0_38 = arith.constant 0 : index
      %c0_39 = arith.constant 0 : index
      %85 = vector.load %arg2[%84, %c1_37, %c0_38, %c0_39] : memref<8x3x8x128xf32, #tpu.memory_space<vmem>>, vector<1x1x8x128xf32>
      %86 = vector.shape_cast %85 : vector<1x1x8x128xf32> to vector<8x128xf32>
      %87 = arith.index_cast %c1_i32_32 : i32 to index
      %c2_40 = arith.constant 2 : index
      %c0_41 = arith.constant 0 : index
      %c0_42 = arith.constant 0 : index
      %88 = vector.load %arg2[%87, %c2_40, %c0_41, %c0_42] : memref<8x3x8x128xf32, #tpu.memory_space<vmem>>, vector<1x1x8x128xf32>
      %89 = vector.shape_cast %88 : vector<1x1x8x128xf32> to vector<8x128xf32>
      %90 = vector.extract_strided_slice %80 {offsets = [0, 0], sizes = [8, 128], strides = [1, 1]} : vector<8x384xf32> to vector<8x128xf32>
      %91 = arith.addf %83, %90 : vector<8x128xf32>
      %92 = arith.negf %91 : vector<8x128xf32>
      %93 = math.exp %92 : vector<8x128xf32>
      %cst_43 = arith.constant 1.000000e+00 : f32
      %94 = vector.broadcast %cst_43 : f32 to vector<8x128xf32>
      %95 = arith.addf %94, %93 : vector<8x128xf32>
      %96 = arith.divf %94, %95 : vector<8x128xf32>
      %97 = vector.extract_strided_slice %80 {offsets = [0, 128], sizes = [8, 128], strides = [1, 1]} : vector<8x384xf32> to vector<8x128xf32>
      %98 = arith.addf %86, %97 : vector<8x128xf32>
      %99 = arith.negf %98 : vector<8x128xf32>
      %100 = math.exp %99 : vector<8x128xf32>
      %cst_44 = arith.constant 1.000000e+00 : f32
      %101 = vector.broadcast %cst_44 : f32 to vector<8x128xf32>
      %102 = arith.addf %101, %100 : vector<8x128xf32>
      %103 = arith.divf %101, %102 : vector<8x128xf32>
      %104 = vector.extract_strided_slice %80 {offsets = [0, 256], sizes = [8, 128], strides = [1, 1]} : vector<8x384xf32> to vector<8x128xf32>
      %105 = arith.addf %104, %6 : vector<8x128xf32>
      %106 = arith.mulf %96, %105 : vector<8x128xf32>
      %107 = arith.addf %89, %106 : vector<8x128xf32>
      %108 = math.tanh %107 : vector<8x128xf32>
      %cst_45 = arith.constant 1.000000e+00 : f32
      %109 = vector.broadcast %cst_45 : f32 to vector<8x128xf32>
      %110 = arith.subf %109, %103 : vector<8x128xf32>
      %111 = arith.mulf %110, %108 : vector<8x128xf32>
      %112 = arith.mulf %103, %53 : vector<8x128xf32>
      %113 = arith.addf %111, %112 : vector<8x128xf32>
      %cst_46 = arith.constant dense<0.000000e+00> : vector<8xf32>
      %114 = vector.multi_reduction <add>, %113, %cst_46 [1] : vector<8x128xf32> to vector<8xf32>
      %115 = vector.shape_cast %114 : vector<8xf32> to vector<8x1xf32>
      %cst_47 = arith.constant 3.125000e-02 : f32
      %116 = vector.broadcast %cst_47 : f32 to vector<8x1xf32>
      %117 = arith.mulf %115, %116 : vector<8x1xf32>
      %118 = arith.mulf %113, %113 : vector<8x128xf32>
      %cst_48 = arith.constant dense<0.000000e+00> : vector<8xf32>
      %119 = vector.multi_reduction <add>, %118, %cst_48 [1] : vector<8x128xf32> to vector<8xf32>
      %120 = vector.shape_cast %119 : vector<8xf32> to vector<8x1xf32>
      %cst_49 = arith.constant 3.125000e-02 : f32
      %121 = vector.broadcast %cst_49 : f32 to vector<8x1xf32>
      %122 = arith.mulf %120, %121 : vector<8x1xf32>
      %123 = arith.mulf %117, %117 : vector<8x1xf32>
      %124 = arith.subf %122, %123 : vector<8x1xf32>
      %cst_50 = arith.constant 0.000000e+00 : f32
      %125 = vector.broadcast %cst_50 : f32 to vector<8x1xf32>
      %126 = arith.maximumf %124, %125 : vector<8x1xf32>
      %127 = vector.broadcast %117 : vector<8x1xf32> to vector<8x128xf32>
      %128 = arith.subf %113, %127 : vector<8x128xf32>
      %cst_51 = arith.constant 9.99999974E-6 : f32
      %129 = vector.broadcast %cst_51 : f32 to vector<8x1xf32>
      %130 = arith.addf %126, %129 : vector<8x1xf32>
      %131 = math.rsqrt %130 : vector<8x1xf32>
      %132 = vector.broadcast %131 : vector<8x1xf32> to vector<8x128xf32>
      %133 = arith.mulf %128, %132 : vector<8x128xf32>
      %134 = arith.mulf %133, %9 : vector<8x128xf32>
      %135 = arith.addf %134, %12 : vector<8x128xf32>
      %136 = arith.index_cast %c1_i32_32 : i32 to index
      %c0_52 = arith.constant 0 : index
      %c0_53 = arith.constant 0 : index
      %137 = vector.load %arg8[%136, %c0_52, %c0_53] : memref<8x8x128xf32, #tpu.memory_space<vmem>>, vector<1x8x128xf32>
      %138 = vector.shape_cast %137 : vector<1x8x128xf32> to vector<8x128xf32>
      %139 = vector.shape_cast %135 : vector<8x128xf32> to vector<1x8x128xf32>
      tpu.vector_store %arg8[%136, %c0_52, %c0_53], %139 {strides = array<i32>} : memref<8x8x128xf32, #tpu.memory_space<vmem>>, vector<1x8x128xf32>,
      %c2_i32 = arith.constant 2 : i32
      %cst_54 = arith.constant dense<0.000000e+00> : vector<8x384xf32>
      %140 = tpu.matmul %113, %3, %cst_54 {dimension_numbers = #tpu.dot_dimension_numbers<[1], [0], [0], [1], [0, 0, 1, 1], [], []>} : vector<8x128xf32>, vector<128x384xf32>, vector<8x384xf32> -> vector<8x384xf32>
      %141 = arith.index_cast %c2_i32 : i32 to index
      %c0_55 = arith.constant 0 : index
      %c0_56 = arith.constant 0 : index
      %c0_57 = arith.constant 0 : index
      %142 = vector.load %arg2[%141, %c0_55, %c0_56, %c0_57] : memref<8x3x8x128xf32, #tpu.memory_space<vmem>>, vector<1x1x8x128xf32>
      %143 = vector.shape_cast %142 : vector<1x1x8x128xf32> to vector<8x128xf32>
      %144 = arith.index_cast %c2_i32 : i32 to index
      %c1_58 = arith.constant 1 : index
      %c0_59 = arith.constant 0 : index
      %c0_60 = arith.constant 0 : index
      %145 = vector.load %arg2[%144, %c1_58, %c0_59, %c0_60] : memref<8x3x8x128xf32, #tpu.memory_space<vmem>>, vector<1x1x8x128xf32>
      %146 = vector.shape_cast %145 : vector<1x1x8x128xf32> to vector<8x128xf32>
      %147 = arith.index_cast %c2_i32 : i32 to index
      %c2_61 = arith.constant 2 : index
      %c0_62 = arith.constant 0 : index
      %c0_63 = arith.constant 0 : index
      %148 = vector.load %arg2[%147, %c2_61, %c0_62, %c0_63] : memref<8x3x8x128xf32, #tpu.memory_space<vmem>>, vector<1x1x8x128xf32>
      %149 = vector.shape_cast %148 : vector<1x1x8x128xf32> to vector<8x128xf32>
      %150 = vector.extract_strided_slice %140 {offsets = [0, 0], sizes = [8, 128], strides = [1, 1]} : vector<8x384xf32> to vector<8x128xf32>
      %151 = arith.addf %143, %150 : vector<8x128xf32>
      %152 = arith.negf %151 : vector<8x128xf32>
      %153 = math.exp %152 : vector<8x128xf32>
      %cst_64 = arith.constant 1.000000e+00 : f32
      %154 = vector.broadcast %cst_64 : f32 to vector<8x128xf32>
      %155 = arith.addf %154, %153 : vector<8x128xf32>
      %156 = arith.divf %154, %155 : vector<8x128xf32>
      %157 = vector.extract_strided_slice %140 {offsets = [0, 128], sizes = [8, 128], strides = [1, 1]} : vector<8x384xf32> to vector<8x128xf32>
      %158 = arith.addf %146, %157 : vector<8x128xf32>
      %159 = arith.negf %158 : vector<8x128xf32>
      %160 = math.exp %159 : vector<8x128xf32>
      %cst_65 = arith.constant 1.000000e+00 : f32
      %161 = vector.broadcast %cst_65 : f32 to vector<8x128xf32>
      %162 = arith.addf %161, %160 : vector<8x128xf32>
      %163 = arith.divf %161, %162 : vector<8x128xf32>
      %164 = vector.extract_strided_slice %140 {offsets = [0, 256], sizes = [8, 128], strides = [1, 1]} : vector<8x384xf32> to vector<8x128xf32>
      %165 = arith.addf %164, %6 : vector<8x128xf32>
      %166 = arith.mulf %156, %165 : vector<8x128xf32>
      %167 = arith.addf %149, %166 : vector<8x128xf32>
      %168 = math.tanh %167 : vector<8x128xf32>
      %cst_66 = arith.constant 1.000000e+00 : f32
      %169 = vector.broadcast %cst_66 : f32 to vector<8x128xf32>
      %170 = arith.subf %169, %163 : vector<8x128xf32>
      %171 = arith.mulf %170, %168 : vector<8x128xf32>
      %172 = arith.mulf %163, %113 : vector<8x128xf32>
      %173 = arith.addf %171, %172 : vector<8x128xf32>
      %cst_67 = arith.constant dense<0.000000e+00> : vector<8xf32>
      %174 = vector.multi_reduction <add>, %173, %cst_67 [1] : vector<8x128xf32> to vector<8xf32>
      %175 = vector.shape_cast %174 : vector<8xf32> to vector<8x1xf32>
      %cst_68 = arith.constant 3.125000e-02 : f32
      %176 = vector.broadcast %cst_68 : f32 to vector<8x1xf32>
      %177 = arith.mulf %175, %176 : vector<8x1xf32>
      %178 = arith.mulf %173, %173 : vector<8x128xf32>
      %cst_69 = arith.constant dense<0.000000e+00> : vector<8xf32>
      %179 = vector.multi_reduction <add>, %178, %cst_69 [1] : vector<8x128xf32> to vector<8xf32>
      %180 = vector.shape_cast %179 : vector<8xf32> to vector<8x1xf32>
      %cst_70 = arith.constant 3.125000e-02 : f32
      %181 = vector.broadcast %cst_70 : f32 to vector<8x1xf32>
      %182 = arith.mulf %180, %181 : vector<8x1xf32>
      %183 = arith.mulf %177, %177 : vector<8x1xf32>
      %184 = arith.subf %182, %183 : vector<8x1xf32>
      %cst_71 = arith.constant 0.000000e+00 : f32
      %185 = vector.broadcast %cst_71 : f32 to vector<8x1xf32>
      %186 = arith.maximumf %184, %185 : vector<8x1xf32>
      %187 = vector.broadcast %177 : vector<8x1xf32> to vector<8x128xf32>
      %188 = arith.subf %173, %187 : vector<8x128xf32>
      %cst_72 = arith.constant 9.99999974E-6 : f32
      %189 = vector.broadcast %cst_72 : f32 to vector<8x1xf32>
      %190 = arith.addf %186, %189 : vector<8x1xf32>
      %191 = math.rsqrt %190 : vector<8x1xf32>
      %192 = vector.broadcast %191 : vector<8x1xf32> to vector<8x128xf32>
      %193 = arith.mulf %188, %192 : vector<8x128xf32>
      %194 = arith.mulf %193, %9 : vector<8x128xf32>
      %195 = arith.addf %194, %12 : vector<8x128xf32>
      %196 = arith.index_cast %c2_i32 : i32 to index
      %c0_73 = arith.constant 0 : index
      %c0_74 = arith.constant 0 : index
      %197 = vector.load %arg8[%196, %c0_73, %c0_74] : memref<8x8x128xf32, #tpu.memory_space<vmem>>, vector<1x8x128xf32>
      %198 = vector.shape_cast %197 : vector<1x8x128xf32> to vector<8x128xf32>
      %199 = vector.shape_cast %195 : vector<8x128xf32> to vector<1x8x128xf32>
      tpu.vector_store %arg8[%196, %c0_73, %c0_74], %199 {strides = array<i32>} : memref<8x8x128xf32, #tpu.memory_space<vmem>>, vector<1x8x128xf32>,
      %c3_i32 = arith.constant 3 : i32
      %cst_75 = arith.constant dense<0.000000e+00> : vector<8x384xf32>
      %200 = tpu.matmul %173, %3, %cst_75 {dimension_numbers = #tpu.dot_dimension_numbers<[1], [0], [0], [1], [0, 0, 1, 1], [], []>} : vector<8x128xf32>, vector<128x384xf32>, vector<8x384xf32> -> vector<8x384xf32>
      %201 = arith.index_cast %c3_i32 : i32 to index
      %c0_76 = arith.constant 0 : index
      %c0_77 = arith.constant 0 : index
      %c0_78 = arith.constant 0 : index
      %202 = vector.load %arg2[%201, %c0_76, %c0_77, %c0_78] : memref<8x3x8x128xf32, #tpu.memory_space<vmem>>, vector<1x1x8x128xf32>
      %203 = vector.shape_cast %202 : vector<1x1x8x128xf32> to vector<8x128xf32>
      %204 = arith.index_cast %c3_i32 : i32 to index
      %c1_79 = arith.constant 1 : index
      %c0_80 = arith.constant 0 : index
      %c0_81 = arith.constant 0 : index
      %205 = vector.load %arg2[%204, %c1_79, %c0_80, %c0_81] : memref<8x3x8x128xf32, #tpu.memory_space<vmem>>, vector<1x1x8x128xf32>
      %206 = vector.shape_cast %205 : vector<1x1x8x128xf32> to vector<8x128xf32>
      %207 = arith.index_cast %c3_i32 : i32 to index
      %c2_82 = arith.constant 2 : index
      %c0_83 = arith.constant 0 : index
      %c0_84 = arith.constant 0 : index
      %208 = vector.load %arg2[%207, %c2_82, %c0_83, %c0_84] : memref<8x3x8x128xf32, #tpu.memory_space<vmem>>, vector<1x1x8x128xf32>
      %209 = vector.shape_cast %208 : vector<1x1x8x128xf32> to vector<8x128xf32>
      %210 = vector.extract_strided_slice %200 {offsets = [0, 0], sizes = [8, 128], strides = [1, 1]} : vector<8x384xf32> to vector<8x128xf32>
      %211 = arith.addf %203, %210 : vector<8x128xf32>
      %212 = arith.negf %211 : vector<8x128xf32>
      %213 = math.exp %212 : vector<8x128xf32>
      %cst_85 = arith.constant 1.000000e+00 : f32
      %214 = vector.broadcast %cst_85 : f32 to vector<8x128xf32>
      %215 = arith.addf %214, %213 : vector<8x128xf32>
      %216 = arith.divf %214, %215 : vector<8x128xf32>
      %217 = vector.extract_strided_slice %200 {offsets = [0, 128], sizes = [8, 128], strides = [1, 1]} : vector<8x384xf32> to vector<8x128xf32>
      %218 = arith.addf %206, %217 : vector<8x128xf32>
      %219 = arith.negf %218 : vector<8x128xf32>
      %220 = math.exp %219 : vector<8x128xf32>
      %cst_86 = arith.constant 1.000000e+00 : f32
      %221 = vector.broadcast %cst_86 : f32 to vector<8x128xf32>
      %222 = arith.addf %221, %220 : vector<8x128xf32>
      %223 = arith.divf %221, %222 : vector<8x128xf32>
      %224 = vector.extract_strided_slice %200 {offsets = [0, 256], sizes = [8, 128], strides = [1, 1]} : vector<8x384xf32> to vector<8x128xf32>
      %225 = arith.addf %224, %6 : vector<8x128xf32>
      %226 = arith.mulf %216, %225 : vector<8x128xf32>
      %227 = arith.addf %209, %226 : vector<8x128xf32>
      %228 = math.tanh %227 : vector<8x128xf32>
      %cst_87 = arith.constant 1.000000e+00 : f32
      %229 = vector.broadcast %cst_87 : f32 to vector<8x128xf32>
      %230 = arith.subf %229, %223 : vector<8x128xf32>
      %231 = arith.mulf %230, %228 : vector<8x128xf32>
      %232 = arith.mulf %223, %173 : vector<8x128xf32>
      %233 = arith.addf %231, %232 : vector<8x128xf32>
      %cst_88 = arith.constant dense<0.000000e+00> : vector<8xf32>
      %234 = vector.multi_reduction <add>, %233, %cst_88 [1] : vector<8x128xf32> to vector<8xf32>
      %235 = vector.shape_cast %234 : vector<8xf32> to vector<8x1xf32>
      %cst_89 = arith.constant 3.125000e-02 : f32
      %236 = vector.broadcast %cst_89 : f32 to vector<8x1xf32>
      %237 = arith.mulf %235, %236 : vector<8x1xf32>
      %238 = arith.mulf %233, %233 : vector<8x128xf32>
      %cst_90 = arith.constant dense<0.000000e+00> : vector<8xf32>
      %239 = vector.multi_reduction <add>, %238, %cst_90 [1] : vector<8x128xf32> to vector<8xf32>
      %240 = vector.shape_cast %239 : vector<8xf32> to vector<8x1xf32>
      %cst_91 = arith.constant 3.125000e-02 : f32
      %241 = vector.broadcast %cst_91 : f32 to vector<8x1xf32>
      %242 = arith.mulf %240, %241 : vector<8x1xf32>
      %243 = arith.mulf %237, %237 : vector<8x1xf32>
      %244 = arith.subf %242, %243 : vector<8x1xf32>
      %cst_92 = arith.constant 0.000000e+00 : f32
      %245 = vector.broadcast %cst_92 : f32 to vector<8x1xf32>
      %246 = arith.maximumf %244, %245 : vector<8x1xf32>
      %247 = vector.broadcast %237 : vector<8x1xf32> to vector<8x128xf32>
      %248 = arith.subf %233, %247 : vector<8x128xf32>
      %cst_93 = arith.constant 9.99999974E-6 : f32
      %249 = vector.broadcast %cst_93 : f32 to vector<8x1xf32>
      %250 = arith.addf %246, %249 : vector<8x1xf32>
      %251 = math.rsqrt %250 : vector<8x1xf32>
      %252 = vector.broadcast %251 : vector<8x1xf32> to vector<8x128xf32>
      %253 = arith.mulf %248, %252 : vector<8x128xf32>
      %254 = arith.mulf %253, %9 : vector<8x128xf32>
      %255 = arith.addf %254, %12 : vector<8x128xf32>
      %256 = arith.index_cast %c3_i32 : i32 to index
      %c0_94 = arith.constant 0 : index
      %c0_95 = arith.constant 0 : index
      %257 = vector.load %arg8[%256, %c0_94, %c0_95] : memref<8x8x128xf32, #tpu.memory_space<vmem>>, vector<1x8x128xf32>
      %258 = vector.shape_cast %257 : vector<1x8x128xf32> to vector<8x128xf32>
      %259 = vector.shape_cast %255 : vector<8x128xf32> to vector<1x8x128xf32>
      tpu.vector_store %arg8[%256, %c0_94, %c0_95], %259 {strides = array<i32>} : memref<8x8x128xf32, #tpu.memory_space<vmem>>, vector<1x8x128xf32>,
      %c4_i32 = arith.constant 4 : i32
      %cst_96 = arith.constant dense<0.000000e+00> : vector<8x384xf32>
      %260 = tpu.matmul %233, %3, %cst_96 {dimension_numbers = #tpu.dot_dimension_numbers<[1], [0], [0], [1], [0, 0, 1, 1], [], []>} : vector<8x128xf32>, vector<128x384xf32>, vector<8x384xf32> -> vector<8x384xf32>
      %261 = arith.index_cast %c4_i32 : i32 to index
      %c0_97 = arith.constant 0 : index
      %c0_98 = arith.constant 0 : index
      %c0_99 = arith.constant 0 : index
      %262 = vector.load %arg2[%261, %c0_97, %c0_98, %c0_99] : memref<8x3x8x128xf32, #tpu.memory_space<vmem>>, vector<1x1x8x128xf32>
      %263 = vector.shape_cast %262 : vector<1x1x8x128xf32> to vector<8x128xf32>
      %264 = arith.index_cast %c4_i32 : i32 to index
      %c1_100 = arith.constant 1 : index
      %c0_101 = arith.constant 0 : index
      %c0_102 = arith.constant 0 : index
      %265 = vector.load %arg2[%264, %c1_100, %c0_101, %c0_102] : memref<8x3x8x128xf32, #tpu.memory_space<vmem>>, vector<1x1x8x128xf32>
      %266 = vector.shape_cast %265 : vector<1x1x8x128xf32> to vector<8x128xf32>
      %267 = arith.index_cast %c4_i32 : i32 to index
      %c2_103 = arith.constant 2 : index
      %c0_104 = arith.constant 0 : index
      %c0_105 = arith.constant 0 : index
      %268 = vector.load %arg2[%267, %c2_103, %c0_104, %c0_105] : memref<8x3x8x128xf32, #tpu.memory_space<vmem>>, vector<1x1x8x128xf32>
      %269 = vector.shape_cast %268 : vector<1x1x8x128xf32> to vector<8x128xf32>
      %270 = vector.extract_strided_slice %260 {offsets = [0, 0], sizes = [8, 128], strides = [1, 1]} : vector<8x384xf32> to vector<8x128xf32>
      %271 = arith.addf %263, %270 : vector<8x128xf32>
      %272 = arith.negf %271 : vector<8x128xf32>
      %273 = math.exp %272 : vector<8x128xf32>
      %cst_106 = arith.constant 1.000000e+00 : f32
      %274 = vector.broadcast %cst_106 : f32 to vector<8x128xf32>
      %275 = arith.addf %274, %273 : vector<8x128xf32>
      %276 = arith.divf %274, %275 : vector<8x128xf32>
      %277 = vector.extract_strided_slice %260 {offsets = [0, 128], sizes = [8, 128], strides = [1, 1]} : vector<8x384xf32> to vector<8x128xf32>
      %278 = arith.addf %266, %277 : vector<8x128xf32>
      %279 = arith.negf %278 : vector<8x128xf32>
      %280 = math.exp %279 : vector<8x128xf32>
      %cst_107 = arith.constant 1.000000e+00 : f32
      %281 = vector.broadcast %cst_107 : f32 to vector<8x128xf32>
      %282 = arith.addf %281, %280 : vector<8x128xf32>
      %283 = arith.divf %281, %282 : vector<8x128xf32>
      %284 = vector.extract_strided_slice %260 {offsets = [0, 256], sizes = [8, 128], strides = [1, 1]} : vector<8x384xf32> to vector<8x128xf32>
      %285 = arith.addf %284, %6 : vector<8x128xf32>
      %286 = arith.mulf %276, %285 : vector<8x128xf32>
      %287 = arith.addf %269, %286 : vector<8x128xf32>
      %288 = math.tanh %287 : vector<8x128xf32>
      %cst_108 = arith.constant 1.000000e+00 : f32
      %289 = vector.broadcast %cst_108 : f32 to vector<8x128xf32>
      %290 = arith.subf %289, %283 : vector<8x128xf32>
      %291 = arith.mulf %290, %288 : vector<8x128xf32>
      %292 = arith.mulf %283, %233 : vector<8x128xf32>
      %293 = arith.addf %291, %292 : vector<8x128xf32>
      %cst_109 = arith.constant dense<0.000000e+00> : vector<8xf32>
      %294 = vector.multi_reduction <add>, %293, %cst_109 [1] : vector<8x128xf32> to vector<8xf32>
      %295 = vector.shape_cast %294 : vector<8xf32> to vector<8x1xf32>
      %cst_110 = arith.constant 3.125000e-02 : f32
      %296 = vector.broadcast %cst_110 : f32 to vector<8x1xf32>
      %297 = arith.mulf %295, %296 : vector<8x1xf32>
      %298 = arith.mulf %293, %293 : vector<8x128xf32>
      %cst_111 = arith.constant dense<0.000000e+00> : vector<8xf32>
      %299 = vector.multi_reduction <add>, %298, %cst_111 [1] : vector<8x128xf32> to vector<8xf32>
      %300 = vector.shape_cast %299 : vector<8xf32> to vector<8x1xf32>
      %cst_112 = arith.constant 3.125000e-02 : f32
      %301 = vector.broadcast %cst_112 : f32 to vector<8x1xf32>
      %302 = arith.mulf %300, %301 : vector<8x1xf32>
      %303 = arith.mulf %297, %297 : vector<8x1xf32>
      %304 = arith.subf %302, %303 : vector<8x1xf32>
      %cst_113 = arith.constant 0.000000e+00 : f32
      %305 = vector.broadcast %cst_113 : f32 to vector<8x1xf32>
      %306 = arith.maximumf %304, %305 : vector<8x1xf32>
      %307 = vector.broadcast %297 : vector<8x1xf32> to vector<8x128xf32>
      %308 = arith.subf %293, %307 : vector<8x128xf32>
      %cst_114 = arith.constant 9.99999974E-6 : f32
      %309 = vector.broadcast %cst_114 : f32 to vector<8x1xf32>
      %310 = arith.addf %306, %309 : vector<8x1xf32>
      %311 = math.rsqrt %310 : vector<8x1xf32>
      %312 = vector.broadcast %311 : vector<8x1xf32> to vector<8x128xf32>
      %313 = arith.mulf %308, %312 : vector<8x128xf32>
      %314 = arith.mulf %313, %9 : vector<8x128xf32>
      %315 = arith.addf %314, %12 : vector<8x128xf32>
      %316 = arith.index_cast %c4_i32 : i32 to index
      %c0_115 = arith.constant 0 : index
      %c0_116 = arith.constant 0 : index
      %317 = vector.load %arg8[%316, %c0_115, %c0_116] : memref<8x8x128xf32, #tpu.memory_space<vmem>>, vector<1x8x128xf32>
      %318 = vector.shape_cast %317 : vector<1x8x128xf32> to vector<8x128xf32>
      %319 = vector.shape_cast %315 : vector<8x128xf32> to vector<1x8x128xf32>
      tpu.vector_store %arg8[%316, %c0_115, %c0_116], %319 {strides = array<i32>} : memref<8x8x128xf32, #tpu.memory_space<vmem>>, vector<1x8x128xf32>,
      %c5_i32 = arith.constant 5 : i32
      %cst_117 = arith.constant dense<0.000000e+00> : vector<8x384xf32>
      %320 = tpu.matmul %293, %3, %cst_117 {dimension_numbers = #tpu.dot_dimension_numbers<[1], [0], [0], [1], [0, 0, 1, 1], [], []>} : vector<8x128xf32>, vector<128x384xf32>, vector<8x384xf32> -> vector<8x384xf32>
      %321 = arith.index_cast %c5_i32 : i32 to index
      %c0_118 = arith.constant 0 : index
      %c0_119 = arith.constant 0 : index
      %c0_120 = arith.constant 0 : index
      %322 = vector.load %arg2[%321, %c0_118, %c0_119, %c0_120] : memref<8x3x8x128xf32, #tpu.memory_space<vmem>>, vector<1x1x8x128xf32>
      %323 = vector.shape_cast %322 : vector<1x1x8x128xf32> to vector<8x128xf32>
      %324 = arith.index_cast %c5_i32 : i32 to index
      %c1_121 = arith.constant 1 : index
      %c0_122 = arith.constant 0 : index
      %c0_123 = arith.constant 0 : index
      %325 = vector.load %arg2[%324, %c1_121, %c0_122, %c0_123] : memref<8x3x8x128xf32, #tpu.memory_space<vmem>>, vector<1x1x8x128xf32>
      %326 = vector.shape_cast %325 : vector<1x1x8x128xf32> to vector<8x128xf32>
      %327 = arith.index_cast %c5_i32 : i32 to index
      %c2_124 = arith.constant 2 : index
      %c0_125 = arith.constant 0 : index
      %c0_126 = arith.constant 0 : index
      %328 = vector.load %arg2[%327, %c2_124, %c0_125, %c0_126] : memref<8x3x8x128xf32, #tpu.memory_space<vmem>>, vector<1x1x8x128xf32>
      %329 = vector.shape_cast %328 : vector<1x1x8x128xf32> to vector<8x128xf32>
      %330 = vector.extract_strided_slice %320 {offsets = [0, 0], sizes = [8, 128], strides = [1, 1]} : vector<8x384xf32> to vector<8x128xf32>
      %331 = arith.addf %323, %330 : vector<8x128xf32>
      %332 = arith.negf %331 : vector<8x128xf32>
      %333 = math.exp %332 : vector<8x128xf32>
      %cst_127 = arith.constant 1.000000e+00 : f32
      %334 = vector.broadcast %cst_127 : f32 to vector<8x128xf32>
      %335 = arith.addf %334, %333 : vector<8x128xf32>
      %336 = arith.divf %334, %335 : vector<8x128xf32>
      %337 = vector.extract_strided_slice %320 {offsets = [0, 128], sizes = [8, 128], strides = [1, 1]} : vector<8x384xf32> to vector<8x128xf32>
      %338 = arith.addf %326, %337 : vector<8x128xf32>
      %339 = arith.negf %338 : vector<8x128xf32>
      %340 = math.exp %339 : vector<8x128xf32>
      %cst_128 = arith.constant 1.000000e+00 : f32
      %341 = vector.broadcast %cst_128 : f32 to vector<8x128xf32>
      %342 = arith.addf %341, %340 : vector<8x128xf32>
      %343 = arith.divf %341, %342 : vector<8x128xf32>
      %344 = vector.extract_strided_slice %320 {offsets = [0, 256], sizes = [8, 128], strides = [1, 1]} : vector<8x384xf32> to vector<8x128xf32>
      %345 = arith.addf %344, %6 : vector<8x128xf32>
      %346 = arith.mulf %336, %345 : vector<8x128xf32>
      %347 = arith.addf %329, %346 : vector<8x128xf32>
      %348 = math.tanh %347 : vector<8x128xf32>
      %cst_129 = arith.constant 1.000000e+00 : f32
      %349 = vector.broadcast %cst_129 : f32 to vector<8x128xf32>
      %350 = arith.subf %349, %343 : vector<8x128xf32>
      %351 = arith.mulf %350, %348 : vector<8x128xf32>
      %352 = arith.mulf %343, %293 : vector<8x128xf32>
      %353 = arith.addf %351, %352 : vector<8x128xf32>
      %cst_130 = arith.constant dense<0.000000e+00> : vector<8xf32>
      %354 = vector.multi_reduction <add>, %353, %cst_130 [1] : vector<8x128xf32> to vector<8xf32>
      %355 = vector.shape_cast %354 : vector<8xf32> to vector<8x1xf32>
      %cst_131 = arith.constant 3.125000e-02 : f32
      %356 = vector.broadcast %cst_131 : f32 to vector<8x1xf32>
      %357 = arith.mulf %355, %356 : vector<8x1xf32>
      %358 = arith.mulf %353, %353 : vector<8x128xf32>
      %cst_132 = arith.constant dense<0.000000e+00> : vector<8xf32>
      %359 = vector.multi_reduction <add>, %358, %cst_132 [1] : vector<8x128xf32> to vector<8xf32>
      %360 = vector.shape_cast %359 : vector<8xf32> to vector<8x1xf32>
      %cst_133 = arith.constant 3.125000e-02 : f32
      %361 = vector.broadcast %cst_133 : f32 to vector<8x1xf32>
      %362 = arith.mulf %360, %361 : vector<8x1xf32>
      %363 = arith.mulf %357, %357 : vector<8x1xf32>
      %364 = arith.subf %362, %363 : vector<8x1xf32>
      %cst_134 = arith.constant 0.000000e+00 : f32
      %365 = vector.broadcast %cst_134 : f32 to vector<8x1xf32>
      %366 = arith.maximumf %364, %365 : vector<8x1xf32>
      %367 = vector.broadcast %357 : vector<8x1xf32> to vector<8x128xf32>
      %368 = arith.subf %353, %367 : vector<8x128xf32>
      %cst_135 = arith.constant 9.99999974E-6 : f32
      %369 = vector.broadcast %cst_135 : f32 to vector<8x1xf32>
      %370 = arith.addf %366, %369 : vector<8x1xf32>
      %371 = math.rsqrt %370 : vector<8x1xf32>
      %372 = vector.broadcast %371 : vector<8x1xf32> to vector<8x128xf32>
      %373 = arith.mulf %368, %372 : vector<8x128xf32>
      %374 = arith.mulf %373, %9 : vector<8x128xf32>
      %375 = arith.addf %374, %12 : vector<8x128xf32>
      %376 = arith.index_cast %c5_i32 : i32 to index
      %c0_136 = arith.constant 0 : index
      %c0_137 = arith.constant 0 : index
      %377 = vector.load %arg8[%376, %c0_136, %c0_137] : memref<8x8x128xf32, #tpu.memory_space<vmem>>, vector<1x8x128xf32>
      %378 = vector.shape_cast %377 : vector<1x8x128xf32> to vector<8x128xf32>
      %379 = vector.shape_cast %375 : vector<8x128xf32> to vector<1x8x128xf32>
      tpu.vector_store %arg8[%376, %c0_136, %c0_137], %379 {strides = array<i32>} : memref<8x8x128xf32, #tpu.memory_space<vmem>>, vector<1x8x128xf32>,
      %c6_i32 = arith.constant 6 : i32
      %cst_138 = arith.constant dense<0.000000e+00> : vector<8x384xf32>
      %380 = tpu.matmul %353, %3, %cst_138 {dimension_numbers = #tpu.dot_dimension_numbers<[1], [0], [0], [1], [0, 0, 1, 1], [], []>} : vector<8x128xf32>, vector<128x384xf32>, vector<8x384xf32> -> vector<8x384xf32>
      %381 = arith.index_cast %c6_i32 : i32 to index
      %c0_139 = arith.constant 0 : index
      %c0_140 = arith.constant 0 : index
      %c0_141 = arith.constant 0 : index
      %382 = vector.load %arg2[%381, %c0_139, %c0_140, %c0_141] : memref<8x3x8x128xf32, #tpu.memory_space<vmem>>, vector<1x1x8x128xf32>
      %383 = vector.shape_cast %382 : vector<1x1x8x128xf32> to vector<8x128xf32>
      %384 = arith.index_cast %c6_i32 : i32 to index
      %c1_142 = arith.constant 1 : index
      %c0_143 = arith.constant 0 : index
      %c0_144 = arith.constant 0 : index
      %385 = vector.load %arg2[%384, %c1_142, %c0_143, %c0_144] : memref<8x3x8x128xf32, #tpu.memory_space<vmem>>, vector<1x1x8x128xf32>
      %386 = vector.shape_cast %385 : vector<1x1x8x128xf32> to vector<8x128xf32>
      %387 = arith.index_cast %c6_i32 : i32 to index
      %c2_145 = arith.constant 2 : index
      %c0_146 = arith.constant 0 : index
      %c0_147 = arith.constant 0 : index
      %388 = vector.load %arg2[%387, %c2_145, %c0_146, %c0_147] : memref<8x3x8x128xf32, #tpu.memory_space<vmem>>, vector<1x1x8x128xf32>
      %389 = vector.shape_cast %388 : vector<1x1x8x128xf32> to vector<8x128xf32>
      %390 = vector.extract_strided_slice %380 {offsets = [0, 0], sizes = [8, 128], strides = [1, 1]} : vector<8x384xf32> to vector<8x128xf32>
      %391 = arith.addf %383, %390 : vector<8x128xf32>
      %392 = arith.negf %391 : vector<8x128xf32>
      %393 = math.exp %392 : vector<8x128xf32>
      %cst_148 = arith.constant 1.000000e+00 : f32
      %394 = vector.broadcast %cst_148 : f32 to vector<8x128xf32>
      %395 = arith.addf %394, %393 : vector<8x128xf32>
      %396 = arith.divf %394, %395 : vector<8x128xf32>
      %397 = vector.extract_strided_slice %380 {offsets = [0, 128], sizes = [8, 128], strides = [1, 1]} : vector<8x384xf32> to vector<8x128xf32>
      %398 = arith.addf %386, %397 : vector<8x128xf32>
      %399 = arith.negf %398 : vector<8x128xf32>
      %400 = math.exp %399 : vector<8x128xf32>
      %cst_149 = arith.constant 1.000000e+00 : f32
      %401 = vector.broadcast %cst_149 : f32 to vector<8x128xf32>
      %402 = arith.addf %401, %400 : vector<8x128xf32>
      %403 = arith.divf %401, %402 : vector<8x128xf32>
      %404 = vector.extract_strided_slice %380 {offsets = [0, 256], sizes = [8, 128], strides = [1, 1]} : vector<8x384xf32> to vector<8x128xf32>
      %405 = arith.addf %404, %6 : vector<8x128xf32>
      %406 = arith.mulf %396, %405 : vector<8x128xf32>
      %407 = arith.addf %389, %406 : vector<8x128xf32>
      %408 = math.tanh %407 : vector<8x128xf32>
      %cst_150 = arith.constant 1.000000e+00 : f32
      %409 = vector.broadcast %cst_150 : f32 to vector<8x128xf32>
      %410 = arith.subf %409, %403 : vector<8x128xf32>
      %411 = arith.mulf %410, %408 : vector<8x128xf32>
      %412 = arith.mulf %403, %353 : vector<8x128xf32>
      %413 = arith.addf %411, %412 : vector<8x128xf32>
      %cst_151 = arith.constant dense<0.000000e+00> : vector<8xf32>
      %414 = vector.multi_reduction <add>, %413, %cst_151 [1] : vector<8x128xf32> to vector<8xf32>
      %415 = vector.shape_cast %414 : vector<8xf32> to vector<8x1xf32>
      %cst_152 = arith.constant 3.125000e-02 : f32
      %416 = vector.broadcast %cst_152 : f32 to vector<8x1xf32>
      %417 = arith.mulf %415, %416 : vector<8x1xf32>
      %418 = arith.mulf %413, %413 : vector<8x128xf32>
      %cst_153 = arith.constant dense<0.000000e+00> : vector<8xf32>
      %419 = vector.multi_reduction <add>, %418, %cst_153 [1] : vector<8x128xf32> to vector<8xf32>
      %420 = vector.shape_cast %419 : vector<8xf32> to vector<8x1xf32>
      %cst_154 = arith.constant 3.125000e-02 : f32
      %421 = vector.broadcast %cst_154 : f32 to vector<8x1xf32>
      %422 = arith.mulf %420, %421 : vector<8x1xf32>
      %423 = arith.mulf %417, %417 : vector<8x1xf32>
      %424 = arith.subf %422, %423 : vector<8x1xf32>
      %cst_155 = arith.constant 0.000000e+00 : f32
      %425 = vector.broadcast %cst_155 : f32 to vector<8x1xf32>
      %426 = arith.maximumf %424, %425 : vector<8x1xf32>
      %427 = vector.broadcast %417 : vector<8x1xf32> to vector<8x128xf32>
      %428 = arith.subf %413, %427 : vector<8x128xf32>
      %cst_156 = arith.constant 9.99999974E-6 : f32
      %429 = vector.broadcast %cst_156 : f32 to vector<8x1xf32>
      %430 = arith.addf %426, %429 : vector<8x1xf32>
      %431 = math.rsqrt %430 : vector<8x1xf32>
      %432 = vector.broadcast %431 : vector<8x1xf32> to vector<8x128xf32>
      %433 = arith.mulf %428, %432 : vector<8x128xf32>
      %434 = arith.mulf %433, %9 : vector<8x128xf32>
      %435 = arith.addf %434, %12 : vector<8x128xf32>
      %436 = arith.index_cast %c6_i32 : i32 to index
      %c0_157 = arith.constant 0 : index
      %c0_158 = arith.constant 0 : index
      %437 = vector.load %arg8[%436, %c0_157, %c0_158] : memref<8x8x128xf32, #tpu.memory_space<vmem>>, vector<1x8x128xf32>
      %438 = vector.shape_cast %437 : vector<1x8x128xf32> to vector<8x128xf32>
      %439 = vector.shape_cast %435 : vector<8x128xf32> to vector<1x8x128xf32>
      tpu.vector_store %arg8[%436, %c0_157, %c0_158], %439 {strides = array<i32>} : memref<8x8x128xf32, #tpu.memory_space<vmem>>, vector<1x8x128xf32>,
      %c7_i32 = arith.constant 7 : i32
      %cst_159 = arith.constant dense<0.000000e+00> : vector<8x384xf32>
      %440 = tpu.matmul %413, %3, %cst_159 {dimension_numbers = #tpu.dot_dimension_numbers<[1], [0], [0], [1], [0, 0, 1, 1], [], []>} : vector<8x128xf32>, vector<128x384xf32>, vector<8x384xf32> -> vector<8x384xf32>
      %441 = arith.index_cast %c7_i32 : i32 to index
      %c0_160 = arith.constant 0 : index
      %c0_161 = arith.constant 0 : index
      %c0_162 = arith.constant 0 : index
      %442 = vector.load %arg2[%441, %c0_160, %c0_161, %c0_162] : memref<8x3x8x128xf32, #tpu.memory_space<vmem>>, vector<1x1x8x128xf32>
      %443 = vector.shape_cast %442 : vector<1x1x8x128xf32> to vector<8x128xf32>
      %444 = arith.index_cast %c7_i32 : i32 to index
      %c1_163 = arith.constant 1 : index
      %c0_164 = arith.constant 0 : index
      %c0_165 = arith.constant 0 : index
      %445 = vector.load %arg2[%444, %c1_163, %c0_164, %c0_165] : memref<8x3x8x128xf32, #tpu.memory_space<vmem>>, vector<1x1x8x128xf32>
      %446 = vector.shape_cast %445 : vector<1x1x8x128xf32> to vector<8x128xf32>
      %447 = arith.index_cast %c7_i32 : i32 to index
      %c2_166 = arith.constant 2 : index
      %c0_167 = arith.constant 0 : index
      %c0_168 = arith.constant 0 : index
      %448 = vector.load %arg2[%447, %c2_166, %c0_167, %c0_168] : memref<8x3x8x128xf32, #tpu.memory_space<vmem>>, vector<1x1x8x128xf32>
      %449 = vector.shape_cast %448 : vector<1x1x8x128xf32> to vector<8x128xf32>
      %450 = vector.extract_strided_slice %440 {offsets = [0, 0], sizes = [8, 128], strides = [1, 1]} : vector<8x384xf32> to vector<8x128xf32>
      %451 = arith.addf %443, %450 : vector<8x128xf32>
      %452 = arith.negf %451 : vector<8x128xf32>
      %453 = math.exp %452 : vector<8x128xf32>
      %cst_169 = arith.constant 1.000000e+00 : f32
      %454 = vector.broadcast %cst_169 : f32 to vector<8x128xf32>
      %455 = arith.addf %454, %453 : vector<8x128xf32>
      %456 = arith.divf %454, %455 : vector<8x128xf32>
      %457 = vector.extract_strided_slice %440 {offsets = [0, 128], sizes = [8, 128], strides = [1, 1]} : vector<8x384xf32> to vector<8x128xf32>
      %458 = arith.addf %446, %457 : vector<8x128xf32>
      %459 = arith.negf %458 : vector<8x128xf32>
      %460 = math.exp %459 : vector<8x128xf32>
      %cst_170 = arith.constant 1.000000e+00 : f32
      %461 = vector.broadcast %cst_170 : f32 to vector<8x128xf32>
      %462 = arith.addf %461, %460 : vector<8x128xf32>
      %463 = arith.divf %461, %462 : vector<8x128xf32>
      %464 = vector.extract_strided_slice %440 {offsets = [0, 256], sizes = [8, 128], strides = [1, 1]} : vector<8x384xf32> to vector<8x128xf32>
      %465 = arith.addf %464, %6 : vector<8x128xf32>
      %466 = arith.mulf %456, %465 : vector<8x128xf32>
      %467 = arith.addf %449, %466 : vector<8x128xf32>
      %468 = math.tanh %467 : vector<8x128xf32>
      %cst_171 = arith.constant 1.000000e+00 : f32
      %469 = vector.broadcast %cst_171 : f32 to vector<8x128xf32>
      %470 = arith.subf %469, %463 : vector<8x128xf32>
      %471 = arith.mulf %470, %468 : vector<8x128xf32>
      %472 = arith.mulf %463, %413 : vector<8x128xf32>
      %473 = arith.addf %471, %472 : vector<8x128xf32>
      %cst_172 = arith.constant dense<0.000000e+00> : vector<8xf32>
      %474 = vector.multi_reduction <add>, %473, %cst_172 [1] : vector<8x128xf32> to vector<8xf32>
      %475 = vector.shape_cast %474 : vector<8xf32> to vector<8x1xf32>
      %cst_173 = arith.constant 3.125000e-02 : f32
      %476 = vector.broadcast %cst_173 : f32 to vector<8x1xf32>
      %477 = arith.mulf %475, %476 : vector<8x1xf32>
      %478 = arith.mulf %473, %473 : vector<8x128xf32>
      %cst_174 = arith.constant dense<0.000000e+00> : vector<8xf32>
      %479 = vector.multi_reduction <add>, %478, %cst_174 [1] : vector<8x128xf32> to vector<8xf32>
      %480 = vector.shape_cast %479 : vector<8xf32> to vector<8x1xf32>
      %cst_175 = arith.constant 3.125000e-02 : f32
      %481 = vector.broadcast %cst_175 : f32 to vector<8x1xf32>
      %482 = arith.mulf %480, %481 : vector<8x1xf32>
      %483 = arith.mulf %477, %477 : vector<8x1xf32>
      %484 = arith.subf %482, %483 : vector<8x1xf32>
      %cst_176 = arith.constant 0.000000e+00 : f32
      %485 = vector.broadcast %cst_176 : f32 to vector<8x1xf32>
      %486 = arith.maximumf %484, %485 : vector<8x1xf32>
      %487 = vector.broadcast %477 : vector<8x1xf32> to vector<8x128xf32>
      %488 = arith.subf %473, %487 : vector<8x128xf32>
      %cst_177 = arith.constant 9.99999974E-6 : f32
      %489 = vector.broadcast %cst_177 : f32 to vector<8x1xf32>
      %490 = arith.addf %486, %489 : vector<8x1xf32>
      %491 = math.rsqrt %490 : vector<8x1xf32>
      %492 = vector.broadcast %491 : vector<8x1xf32> to vector<8x128xf32>
      %493 = arith.mulf %488, %492 : vector<8x128xf32>
      %494 = arith.mulf %493, %9 : vector<8x128xf32>
      %495 = arith.addf %494, %12 : vector<8x128xf32>
      %496 = arith.index_cast %c7_i32 : i32 to index
      %c0_178 = arith.constant 0 : index
      %c0_179 = arith.constant 0 : index
      %497 = vector.load %arg8[%496, %c0_178, %c0_179] : memref<8x8x128xf32, #tpu.memory_space<vmem>>, vector<1x8x128xf32>
      %498 = vector.shape_cast %497 : vector<1x8x128xf32> to vector<8x128xf32>
      %499 = vector.shape_cast %495 : vector<8x128xf32> to vector<1x8x128xf32>
      tpu.vector_store %arg8[%496, %c0_178, %c0_179], %499 {strides = array<i32>} : memref<8x8x128xf32, #tpu.memory_space<vmem>>, vector<1x8x128xf32>,
      %c8_i32 = arith.constant 8 : i32
      %c0_180 = arith.constant 0 : index
      %c0_181 = arith.constant 0 : index
      %500 = vector.load %arg10[%c0_180, %c0_181] : memref<8x128xf32, #tpu.memory_space<vmem>>, vector<8x128xf32>
      tpu.vector_store %arg10[%c0_180, %c0_181], %473 {strides = array<i32>} : memref<8x128xf32, #tpu.memory_space<vmem>>, vector<8x128xf32>,
    } else {
    }
    %c1_i32_9 = arith.constant 1 : i32
    %16 = arith.cmpi eq, %arg1, %c1_i32_9 : i32
    %17 = arith.extui %16 : i1 to i32
    %c0_i32_10 = arith.constant 0 : i32
    %18 = arith.cmpi ne, %17, %c0_i32_10 : i32
    scf.if %18 {
      %c0_11 = arith.constant 0 : index
      %c0_12 = arith.constant 0 : index
      %19 = vector.load %arg10[%c0_11, %c0_12] : memref<8x128xf32, #tpu.memory_space<vmem>>, vector<8x128xf32>
      %c0_i32_13 = arith.constant 0 : i32
      %cst = arith.constant dense<0.000000e+00> : vector<8x384xf32>
      %20 = tpu.matmul %19, %3, %cst {dimension_numbers = #tpu.dot_dimension_numbers<[1], [0], [0], [1], [0, 0, 1, 1], [], []>} : vector<8x128xf32>, vector<128x384xf32>, vector<8x384xf32> -> vector<8x384xf32>
      %21 = arith.index_cast %c0_i32_13 : i32 to index
      %c0_14 = arith.constant 0 : index
      %c0_15 = arith.constant 0 : index
      %c0_16 = arith.constant 0 : index
      %22 = vector.load %arg2[%21, %c0_14, %c0_15, %c0_16] : memref<8x3x8x128xf32, #tpu.memory_space<vmem>>, vector<1x1x8x128xf32>
      %23 = vector.shape_cast %22 : vector<1x1x8x128xf32> to vector<8x128xf32>
      %24 = arith.index_cast %c0_i32_13 : i32 to index
      %c1 = arith.constant 1 : index
      %c0_17 = arith.constant 0 : index
      %c0_18 = arith.constant 0 : index
      %25 = vector.load %arg2[%24, %c1, %c0_17, %c0_18] : memref<8x3x8x128xf32, #tpu.memory_space<vmem>>, vector<1x1x8x128xf32>
      %26 = vector.shape_cast %25 : vector<1x1x8x128xf32> to vector<8x128xf32>
      %27 = arith.index_cast %c0_i32_13 : i32 to index
      %c2 = arith.constant 2 : index
      %c0_19 = arith.constant 0 : index
      %c0_20 = arith.constant 0 : index
      %28 = vector.load %arg2[%27, %c2, %c0_19, %c0_20] : memref<8x3x8x128xf32, #tpu.memory_space<vmem>>, vector<1x1x8x128xf32>
      %29 = vector.shape_cast %28 : vector<1x1x8x128xf32> to vector<8x128xf32>
      %30 = vector.extract_strided_slice %20 {offsets = [0, 0], sizes = [8, 128], strides = [1, 1]} : vector<8x384xf32> to vector<8x128xf32>
      %31 = arith.addf %23, %30 : vector<8x128xf32>
      %32 = arith.negf %31 : vector<8x128xf32>
      %33 = math.exp %32 : vector<8x128xf32>
      %cst_21 = arith.constant 1.000000e+00 : f32
      %34 = vector.broadcast %cst_21 : f32 to vector<8x128xf32>
      %35 = arith.addf %34, %33 : vector<8x128xf32>
      %36 = arith.divf %34, %35 : vector<8x128xf32>
      %37 = vector.extract_strided_slice %20 {offsets = [0, 128], sizes = [8, 128], strides = [1, 1]} : vector<8x384xf32> to vector<8x128xf32>
      %38 = arith.addf %26, %37 : vector<8x128xf32>
      %39 = arith.negf %38 : vector<8x128xf32>
      %40 = math.exp %39 : vector<8x128xf32>
      %cst_22 = arith.constant 1.000000e+00 : f32
      %41 = vector.broadcast %cst_22 : f32 to vector<8x128xf32>
      %42 = arith.addf %41, %40 : vector<8x128xf32>
      %43 = arith.divf %41, %42 : vector<8x128xf32>
      %44 = vector.extract_strided_slice %20 {offsets = [0, 256], sizes = [8, 128], strides = [1, 1]} : vector<8x384xf32> to vector<8x128xf32>
      %45 = arith.addf %44, %6 : vector<8x128xf32>
      %46 = arith.mulf %36, %45 : vector<8x128xf32>
      %47 = arith.addf %29, %46 : vector<8x128xf32>
      %48 = math.tanh %47 : vector<8x128xf32>
      %cst_23 = arith.constant 1.000000e+00 : f32
      %49 = vector.broadcast %cst_23 : f32 to vector<8x128xf32>
      %50 = arith.subf %49, %43 : vector<8x128xf32>
      %51 = arith.mulf %50, %48 : vector<8x128xf32>
      %52 = arith.mulf %43, %19 : vector<8x128xf32>
      %53 = arith.addf %51, %52 : vector<8x128xf32>
      %cst_24 = arith.constant dense<0.000000e+00> : vector<8xf32>
      %54 = vector.multi_reduction <add>, %53, %cst_24 [1] : vector<8x128xf32> to vector<8xf32>
      %55 = vector.shape_cast %54 : vector<8xf32> to vector<8x1xf32>
      %cst_25 = arith.constant 3.125000e-02 : f32
      %56 = vector.broadcast %cst_25 : f32 to vector<8x1xf32>
      %57 = arith.mulf %55, %56 : vector<8x1xf32>
      %58 = arith.mulf %53, %53 : vector<8x128xf32>
      %cst_26 = arith.constant dense<0.000000e+00> : vector<8xf32>
      %59 = vector.multi_reduction <add>, %58, %cst_26 [1] : vector<8x128xf32> to vector<8xf32>
      %60 = vector.shape_cast %59 : vector<8xf32> to vector<8x1xf32>
      %cst_27 = arith.constant 3.125000e-02 : f32
      %61 = vector.broadcast %cst_27 : f32 to vector<8x1xf32>
      %62 = arith.mulf %60, %61 : vector<8x1xf32>
      %63 = arith.mulf %57, %57 : vector<8x1xf32>
      %64 = arith.subf %62, %63 : vector<8x1xf32>
      %cst_28 = arith.constant 0.000000e+00 : f32
      %65 = vector.broadcast %cst_28 : f32 to vector<8x1xf32>
      %66 = arith.maximumf %64, %65 : vector<8x1xf32>
      %67 = vector.broadcast %57 : vector<8x1xf32> to vector<8x128xf32>
      %68 = arith.subf %53, %67 : vector<8x128xf32>
      %cst_29 = arith.constant 9.99999974E-6 : f32
      %69 = vector.broadcast %cst_29 : f32 to vector<8x1xf32>
      %70 = arith.addf %66, %69 : vector<8x1xf32>
      %71 = math.rsqrt %70 : vector<8x1xf32>
      %72 = vector.broadcast %71 : vector<8x1xf32> to vector<8x128xf32>
      %73 = arith.mulf %68, %72 : vector<8x128xf32>
      %74 = arith.mulf %73, %9 : vector<8x128xf32>
      %75 = arith.addf %74, %12 : vector<8x128xf32>
      %76 = arith.index_cast %c0_i32_13 : i32 to index
      %c0_30 = arith.constant 0 : index
      %c0_31 = arith.constant 0 : index
      %77 = vector.load %arg8[%76, %c0_30, %c0_31] : memref<8x8x128xf32, #tpu.memory_space<vmem>>, vector<1x8x128xf32>
      %78 = vector.shape_cast %77 : vector<1x8x128xf32> to vector<8x128xf32>
      %79 = vector.shape_cast %75 : vector<8x128xf32> to vector<1x8x128xf32>
      tpu.vector_store %arg8[%76, %c0_30, %c0_31], %79 {strides = array<i32>} : memref<8x8x128xf32, #tpu.memory_space<vmem>>, vector<1x8x128xf32>,
      %c1_i32_32 = arith.constant 1 : i32
      %cst_33 = arith.constant dense<0.000000e+00> : vector<8x384xf32>
      %80 = tpu.matmul %53, %3, %cst_33 {dimension_numbers = #tpu.dot_dimension_numbers<[1], [0], [0], [1], [0, 0, 1, 1], [], []>} : vector<8x128xf32>, vector<128x384xf32>, vector<8x384xf32> -> vector<8x384xf32>
      %81 = arith.index_cast %c1_i32_32 : i32 to index
      %c0_34 = arith.constant 0 : index
      %c0_35 = arith.constant 0 : index
      %c0_36 = arith.constant 0 : index
      %82 = vector.load %arg2[%81, %c0_34, %c0_35, %c0_36] : memref<8x3x8x128xf32, #tpu.memory_space<vmem>>, vector<1x1x8x128xf32>
      %83 = vector.shape_cast %82 : vector<1x1x8x128xf32> to vector<8x128xf32>
      %84 = arith.index_cast %c1_i32_32 : i32 to index
      %c1_37 = arith.constant 1 : index
      %c0_38 = arith.constant 0 : index
      %c0_39 = arith.constant 0 : index
      %85 = vector.load %arg2[%84, %c1_37, %c0_38, %c0_39] : memref<8x3x8x128xf32, #tpu.memory_space<vmem>>, vector<1x1x8x128xf32>
      %86 = vector.shape_cast %85 : vector<1x1x8x128xf32> to vector<8x128xf32>
      %87 = arith.index_cast %c1_i32_32 : i32 to index
      %c2_40 = arith.constant 2 : index
      %c0_41 = arith.constant 0 : index
      %c0_42 = arith.constant 0 : index
      %88 = vector.load %arg2[%87, %c2_40, %c0_41, %c0_42] : memref<8x3x8x128xf32, #tpu.memory_space<vmem>>, vector<1x1x8x128xf32>
      %89 = vector.shape_cast %88 : vector<1x1x8x128xf32> to vector<8x128xf32>
      %90 = vector.extract_strided_slice %80 {offsets = [0, 0], sizes = [8, 128], strides = [1, 1]} : vector<8x384xf32> to vector<8x128xf32>
      %91 = arith.addf %83, %90 : vector<8x128xf32>
      %92 = arith.negf %91 : vector<8x128xf32>
      %93 = math.exp %92 : vector<8x128xf32>
      %cst_43 = arith.constant 1.000000e+00 : f32
      %94 = vector.broadcast %cst_43 : f32 to vector<8x128xf32>
      %95 = arith.addf %94, %93 : vector<8x128xf32>
      %96 = arith.divf %94, %95 : vector<8x128xf32>
      %97 = vector.extract_strided_slice %80 {offsets = [0, 128], sizes = [8, 128], strides = [1, 1]} : vector<8x384xf32> to vector<8x128xf32>
      %98 = arith.addf %86, %97 : vector<8x128xf32>
      %99 = arith.negf %98 : vector<8x128xf32>
      %100 = math.exp %99 : vector<8x128xf32>
      %cst_44 = arith.constant 1.000000e+00 : f32
      %101 = vector.broadcast %cst_44 : f32 to vector<8x128xf32>
      %102 = arith.addf %101, %100 : vector<8x128xf32>
      %103 = arith.divf %101, %102 : vector<8x128xf32>
      %104 = vector.extract_strided_slice %80 {offsets = [0, 256], sizes = [8, 128], strides = [1, 1]} : vector<8x384xf32> to vector<8x128xf32>
      %105 = arith.addf %104, %6 : vector<8x128xf32>
      %106 = arith.mulf %96, %105 : vector<8x128xf32>
      %107 = arith.addf %89, %106 : vector<8x128xf32>
      %108 = math.tanh %107 : vector<8x128xf32>
      %cst_45 = arith.constant 1.000000e+00 : f32
      %109 = vector.broadcast %cst_45 : f32 to vector<8x128xf32>
      %110 = arith.subf %109, %103 : vector<8x128xf32>
      %111 = arith.mulf %110, %108 : vector<8x128xf32>
      %112 = arith.mulf %103, %53 : vector<8x128xf32>
      %113 = arith.addf %111, %112 : vector<8x128xf32>
      %cst_46 = arith.constant dense<0.000000e+00> : vector<8xf32>
      %114 = vector.multi_reduction <add>, %113, %cst_46 [1] : vector<8x128xf32> to vector<8xf32>
      %115 = vector.shape_cast %114 : vector<8xf32> to vector<8x1xf32>
      %cst_47 = arith.constant 3.125000e-02 : f32
      %116 = vector.broadcast %cst_47 : f32 to vector<8x1xf32>
      %117 = arith.mulf %115, %116 : vector<8x1xf32>
      %118 = arith.mulf %113, %113 : vector<8x128xf32>
      %cst_48 = arith.constant dense<0.000000e+00> : vector<8xf32>
      %119 = vector.multi_reduction <add>, %118, %cst_48 [1] : vector<8x128xf32> to vector<8xf32>
      %120 = vector.shape_cast %119 : vector<8xf32> to vector<8x1xf32>
      %cst_49 = arith.constant 3.125000e-02 : f32
      %121 = vector.broadcast %cst_49 : f32 to vector<8x1xf32>
      %122 = arith.mulf %120, %121 : vector<8x1xf32>
      %123 = arith.mulf %117, %117 : vector<8x1xf32>
      %124 = arith.subf %122, %123 : vector<8x1xf32>
      %cst_50 = arith.constant 0.000000e+00 : f32
      %125 = vector.broadcast %cst_50 : f32 to vector<8x1xf32>
      %126 = arith.maximumf %124, %125 : vector<8x1xf32>
      %127 = vector.broadcast %117 : vector<8x1xf32> to vector<8x128xf32>
      %128 = arith.subf %113, %127 : vector<8x128xf32>
      %cst_51 = arith.constant 9.99999974E-6 : f32
      %129 = vector.broadcast %cst_51 : f32 to vector<8x1xf32>
      %130 = arith.addf %126, %129 : vector<8x1xf32>
      %131 = math.rsqrt %130 : vector<8x1xf32>
      %132 = vector.broadcast %131 : vector<8x1xf32> to vector<8x128xf32>
      %133 = arith.mulf %128, %132 : vector<8x128xf32>
      %134 = arith.mulf %133, %9 : vector<8x128xf32>
      %135 = arith.addf %134, %12 : vector<8x128xf32>
      %136 = arith.index_cast %c1_i32_32 : i32 to index
      %c0_52 = arith.constant 0 : index
      %c0_53 = arith.constant 0 : index
      %137 = vector.load %arg8[%136, %c0_52, %c0_53] : memref<8x8x128xf32, #tpu.memory_space<vmem>>, vector<1x8x128xf32>
      %138 = vector.shape_cast %137 : vector<1x8x128xf32> to vector<8x128xf32>
      %139 = vector.shape_cast %135 : vector<8x128xf32> to vector<1x8x128xf32>
      tpu.vector_store %arg8[%136, %c0_52, %c0_53], %139 {strides = array<i32>} : memref<8x8x128xf32, #tpu.memory_space<vmem>>, vector<1x8x128xf32>,
      %c2_i32 = arith.constant 2 : i32
      %cst_54 = arith.constant dense<0.000000e+00> : vector<8x384xf32>
      %140 = tpu.matmul %113, %3, %cst_54 {dimension_numbers = #tpu.dot_dimension_numbers<[1], [0], [0], [1], [0, 0, 1, 1], [], []>} : vector<8x128xf32>, vector<128x384xf32>, vector<8x384xf32> -> vector<8x384xf32>
      %141 = arith.index_cast %c2_i32 : i32 to index
      %c0_55 = arith.constant 0 : index
      %c0_56 = arith.constant 0 : index
      %c0_57 = arith.constant 0 : index
      %142 = vector.load %arg2[%141, %c0_55, %c0_56, %c0_57] : memref<8x3x8x128xf32, #tpu.memory_space<vmem>>, vector<1x1x8x128xf32>
      %143 = vector.shape_cast %142 : vector<1x1x8x128xf32> to vector<8x128xf32>
      %144 = arith.index_cast %c2_i32 : i32 to index
      %c1_58 = arith.constant 1 : index
      %c0_59 = arith.constant 0 : index
      %c0_60 = arith.constant 0 : index
      %145 = vector.load %arg2[%144, %c1_58, %c0_59, %c0_60] : memref<8x3x8x128xf32, #tpu.memory_space<vmem>>, vector<1x1x8x128xf32>
      %146 = vector.shape_cast %145 : vector<1x1x8x128xf32> to vector<8x128xf32>
      %147 = arith.index_cast %c2_i32 : i32 to index
      %c2_61 = arith.constant 2 : index
      %c0_62 = arith.constant 0 : index
      %c0_63 = arith.constant 0 : index
      %148 = vector.load %arg2[%147, %c2_61, %c0_62, %c0_63] : memref<8x3x8x128xf32, #tpu.memory_space<vmem>>, vector<1x1x8x128xf32>
      %149 = vector.shape_cast %148 : vector<1x1x8x128xf32> to vector<8x128xf32>
      %150 = vector.extract_strided_slice %140 {offsets = [0, 0], sizes = [8, 128], strides = [1, 1]} : vector<8x384xf32> to vector<8x128xf32>
      %151 = arith.addf %143, %150 : vector<8x128xf32>
      %152 = arith.negf %151 : vector<8x128xf32>
      %153 = math.exp %152 : vector<8x128xf32>
      %cst_64 = arith.constant 1.000000e+00 : f32
      %154 = vector.broadcast %cst_64 : f32 to vector<8x128xf32>
      %155 = arith.addf %154, %153 : vector<8x128xf32>
      %156 = arith.divf %154, %155 : vector<8x128xf32>
      %157 = vector.extract_strided_slice %140 {offsets = [0, 128], sizes = [8, 128], strides = [1, 1]} : vector<8x384xf32> to vector<8x128xf32>
      %158 = arith.addf %146, %157 : vector<8x128xf32>
      %159 = arith.negf %158 : vector<8x128xf32>
      %160 = math.exp %159 : vector<8x128xf32>
      %cst_65 = arith.constant 1.000000e+00 : f32
      %161 = vector.broadcast %cst_65 : f32 to vector<8x128xf32>
      %162 = arith.addf %161, %160 : vector<8x128xf32>
      %163 = arith.divf %161, %162 : vector<8x128xf32>
      %164 = vector.extract_strided_slice %140 {offsets = [0, 256], sizes = [8, 128], strides = [1, 1]} : vector<8x384xf32> to vector<8x128xf32>
      %165 = arith.addf %164, %6 : vector<8x128xf32>
      %166 = arith.mulf %156, %165 : vector<8x128xf32>
      %167 = arith.addf %149, %166 : vector<8x128xf32>
      %168 = math.tanh %167 : vector<8x128xf32>
      %cst_66 = arith.constant 1.000000e+00 : f32
      %169 = vector.broadcast %cst_66 : f32 to vector<8x128xf32>
      %170 = arith.subf %169, %163 : vector<8x128xf32>
      %171 = arith.mulf %170, %168 : vector<8x128xf32>
      %172 = arith.mulf %163, %113 : vector<8x128xf32>
      %173 = arith.addf %171, %172 : vector<8x128xf32>
      %cst_67 = arith.constant dense<0.000000e+00> : vector<8xf32>
      %174 = vector.multi_reduction <add>, %173, %cst_67 [1] : vector<8x128xf32> to vector<8xf32>
      %175 = vector.shape_cast %174 : vector<8xf32> to vector<8x1xf32>
      %cst_68 = arith.constant 3.125000e-02 : f32
      %176 = vector.broadcast %cst_68 : f32 to vector<8x1xf32>
      %177 = arith.mulf %175, %176 : vector<8x1xf32>
      %178 = arith.mulf %173, %173 : vector<8x128xf32>
      %cst_69 = arith.constant dense<0.000000e+00> : vector<8xf32>
      %179 = vector.multi_reduction <add>, %178, %cst_69 [1] : vector<8x128xf32> to vector<8xf32>
      %180 = vector.shape_cast %179 : vector<8xf32> to vector<8x1xf32>
      %cst_70 = arith.constant 3.125000e-02 : f32
      %181 = vector.broadcast %cst_70 : f32 to vector<8x1xf32>
      %182 = arith.mulf %180, %181 : vector<8x1xf32>
      %183 = arith.mulf %177, %177 : vector<8x1xf32>
      %184 = arith.subf %182, %183 : vector<8x1xf32>
      %cst_71 = arith.constant 0.000000e+00 : f32
      %185 = vector.broadcast %cst_71 : f32 to vector<8x1xf32>
      %186 = arith.maximumf %184, %185 : vector<8x1xf32>
      %187 = vector.broadcast %177 : vector<8x1xf32> to vector<8x128xf32>
      %188 = arith.subf %173, %187 : vector<8x128xf32>
      %cst_72 = arith.constant 9.99999974E-6 : f32
      %189 = vector.broadcast %cst_72 : f32 to vector<8x1xf32>
      %190 = arith.addf %186, %189 : vector<8x1xf32>
      %191 = math.rsqrt %190 : vector<8x1xf32>
      %192 = vector.broadcast %191 : vector<8x1xf32> to vector<8x128xf32>
      %193 = arith.mulf %188, %192 : vector<8x128xf32>
      %194 = arith.mulf %193, %9 : vector<8x128xf32>
      %195 = arith.addf %194, %12 : vector<8x128xf32>
      %196 = arith.index_cast %c2_i32 : i32 to index
      %c0_73 = arith.constant 0 : index
      %c0_74 = arith.constant 0 : index
      %197 = vector.load %arg8[%196, %c0_73, %c0_74] : memref<8x8x128xf32, #tpu.memory_space<vmem>>, vector<1x8x128xf32>
      %198 = vector.shape_cast %197 : vector<1x8x128xf32> to vector<8x128xf32>
      %199 = vector.shape_cast %195 : vector<8x128xf32> to vector<1x8x128xf32>
      tpu.vector_store %arg8[%196, %c0_73, %c0_74], %199 {strides = array<i32>} : memref<8x8x128xf32, #tpu.memory_space<vmem>>, vector<1x8x128xf32>,
      %c3_i32 = arith.constant 3 : i32
      %cst_75 = arith.constant dense<0.000000e+00> : vector<8x384xf32>
      %200 = tpu.matmul %173, %3, %cst_75 {dimension_numbers = #tpu.dot_dimension_numbers<[1], [0], [0], [1], [0, 0, 1, 1], [], []>} : vector<8x128xf32>, vector<128x384xf32>, vector<8x384xf32> -> vector<8x384xf32>
      %201 = arith.index_cast %c3_i32 : i32 to index
      %c0_76 = arith.constant 0 : index
      %c0_77 = arith.constant 0 : index
      %c0_78 = arith.constant 0 : index
      %202 = vector.load %arg2[%201, %c0_76, %c0_77, %c0_78] : memref<8x3x8x128xf32, #tpu.memory_space<vmem>>, vector<1x1x8x128xf32>
      %203 = vector.shape_cast %202 : vector<1x1x8x128xf32> to vector<8x128xf32>
      %204 = arith.index_cast %c3_i32 : i32 to index
      %c1_79 = arith.constant 1 : index
      %c0_80 = arith.constant 0 : index
      %c0_81 = arith.constant 0 : index
      %205 = vector.load %arg2[%204, %c1_79, %c0_80, %c0_81] : memref<8x3x8x128xf32, #tpu.memory_space<vmem>>, vector<1x1x8x128xf32>
      %206 = vector.shape_cast %205 : vector<1x1x8x128xf32> to vector<8x128xf32>
      %207 = arith.index_cast %c3_i32 : i32 to index
      %c2_82 = arith.constant 2 : index
      %c0_83 = arith.constant 0 : index
      %c0_84 = arith.constant 0 : index
      %208 = vector.load %arg2[%207, %c2_82, %c0_83, %c0_84] : memref<8x3x8x128xf32, #tpu.memory_space<vmem>>, vector<1x1x8x128xf32>
      %209 = vector.shape_cast %208 : vector<1x1x8x128xf32> to vector<8x128xf32>
      %210 = vector.extract_strided_slice %200 {offsets = [0, 0], sizes = [8, 128], strides = [1, 1]} : vector<8x384xf32> to vector<8x128xf32>
      %211 = arith.addf %203, %210 : vector<8x128xf32>
      %212 = arith.negf %211 : vector<8x128xf32>
      %213 = math.exp %212 : vector<8x128xf32>
      %cst_85 = arith.constant 1.000000e+00 : f32
      %214 = vector.broadcast %cst_85 : f32 to vector<8x128xf32>
      %215 = arith.addf %214, %213 : vector<8x128xf32>
      %216 = arith.divf %214, %215 : vector<8x128xf32>
      %217 = vector.extract_strided_slice %200 {offsets = [0, 128], sizes = [8, 128], strides = [1, 1]} : vector<8x384xf32> to vector<8x128xf32>
      %218 = arith.addf %206, %217 : vector<8x128xf32>
      %219 = arith.negf %218 : vector<8x128xf32>
      %220 = math.exp %219 : vector<8x128xf32>
      %cst_86 = arith.constant 1.000000e+00 : f32
      %221 = vector.broadcast %cst_86 : f32 to vector<8x128xf32>
      %222 = arith.addf %221, %220 : vector<8x128xf32>
      %223 = arith.divf %221, %222 : vector<8x128xf32>
      %224 = vector.extract_strided_slice %200 {offsets = [0, 256], sizes = [8, 128], strides = [1, 1]} : vector<8x384xf32> to vector<8x128xf32>
      %225 = arith.addf %224, %6 : vector<8x128xf32>
      %226 = arith.mulf %216, %225 : vector<8x128xf32>
      %227 = arith.addf %209, %226 : vector<8x128xf32>
      %228 = math.tanh %227 : vector<8x128xf32>
      %cst_87 = arith.constant 1.000000e+00 : f32
      %229 = vector.broadcast %cst_87 : f32 to vector<8x128xf32>
      %230 = arith.subf %229, %223 : vector<8x128xf32>
      %231 = arith.mulf %230, %228 : vector<8x128xf32>
      %232 = arith.mulf %223, %173 : vector<8x128xf32>
      %233 = arith.addf %231, %232 : vector<8x128xf32>
      %cst_88 = arith.constant dense<0.000000e+00> : vector<8xf32>
      %234 = vector.multi_reduction <add>, %233, %cst_88 [1] : vector<8x128xf32> to vector<8xf32>
      %235 = vector.shape_cast %234 : vector<8xf32> to vector<8x1xf32>
      %cst_89 = arith.constant 3.125000e-02 : f32
      %236 = vector.broadcast %cst_89 : f32 to vector<8x1xf32>
      %237 = arith.mulf %235, %236 : vector<8x1xf32>
      %238 = arith.mulf %233, %233 : vector<8x128xf32>
      %cst_90 = arith.constant dense<0.000000e+00> : vector<8xf32>
      %239 = vector.multi_reduction <add>, %238, %cst_90 [1] : vector<8x128xf32> to vector<8xf32>
      %240 = vector.shape_cast %239 : vector<8xf32> to vector<8x1xf32>
      %cst_91 = arith.constant 3.125000e-02 : f32
      %241 = vector.broadcast %cst_91 : f32 to vector<8x1xf32>
      %242 = arith.mulf %240, %241 : vector<8x1xf32>
      %243 = arith.mulf %237, %237 : vector<8x1xf32>
      %244 = arith.subf %242, %243 : vector<8x1xf32>
      %cst_92 = arith.constant 0.000000e+00 : f32
      %245 = vector.broadcast %cst_92 : f32 to vector<8x1xf32>
      %246 = arith.maximumf %244, %245 : vector<8x1xf32>
      %247 = vector.broadcast %237 : vector<8x1xf32> to vector<8x128xf32>
      %248 = arith.subf %233, %247 : vector<8x128xf32>
      %cst_93 = arith.constant 9.99999974E-6 : f32
      %249 = vector.broadcast %cst_93 : f32 to vector<8x1xf32>
      %250 = arith.addf %246, %249 : vector<8x1xf32>
      %251 = math.rsqrt %250 : vector<8x1xf32>
      %252 = vector.broadcast %251 : vector<8x1xf32> to vector<8x128xf32>
      %253 = arith.mulf %248, %252 : vector<8x128xf32>
      %254 = arith.mulf %253, %9 : vector<8x128xf32>
      %255 = arith.addf %254, %12 : vector<8x128xf32>
      %256 = arith.index_cast %c3_i32 : i32 to index
      %c0_94 = arith.constant 0 : index
      %c0_95 = arith.constant 0 : index
      %257 = vector.load %arg8[%256, %c0_94, %c0_95] : memref<8x8x128xf32, #tpu.memory_space<vmem>>, vector<1x8x128xf32>
      %258 = vector.shape_cast %257 : vector<1x8x128xf32> to vector<8x128xf32>
      %259 = vector.shape_cast %255 : vector<8x128xf32> to vector<1x8x128xf32>
      tpu.vector_store %arg8[%256, %c0_94, %c0_95], %259 {strides = array<i32>} : memref<8x8x128xf32, #tpu.memory_space<vmem>>, vector<1x8x128xf32>,
      %c4_i32 = arith.constant 4 : i32
      %c0_96 = arith.constant 0 : index
      %c0_97 = arith.constant 0 : index
      %260 = vector.load %arg10[%c0_96, %c0_97] : memref<8x128xf32, #tpu.memory_space<vmem>>, vector<8x128xf32>
      tpu.vector_store %arg10[%c0_96, %c0_97], %233 {strides = array<i32>} : memref<8x128xf32, #tpu.memory_space<vmem>>, vector<8x128xf32>,
      %c0_98 = arith.constant 0 : index
      %c0_99 = arith.constant 0 : index
      %261 = vector.load %arg9[%c0_98, %c0_99] : memref<8x128xf32, #tpu.memory_space<vmem>>, vector<8x128xf32>
      tpu.vector_store %arg9[%c0_98, %c0_99], %233 {strides = array<i32>} : memref<8x128xf32, #tpu.memory_space<vmem>>, vector<8x128xf32>,
    } else {
    }
    return
  }
  func.func @transform_0(%arg0: i32, %arg1: i32) -> (i32, i32, i32, i32) {
    %c0_i32 = arith.constant 0 : i32
    %c0_i32_0 = arith.constant 0 : i32
    %c0_i32_1 = arith.constant 0 : i32
    return %arg1, %c0_i32, %arg0, %c0_i32_0 : i32, i32, i32, i32
  }
  func.func @transform_1(%arg0: i32, %arg1: i32) -> (i32, i32) {
    %c0_i32 = arith.constant 0 : i32
    %c0_i32_0 = arith.constant 0 : i32
    %c0_i32_1 = arith.constant 0 : i32
    return %c0_i32, %c0_i32_0 : i32, i32
  }
  func.func @transform_2(%arg0: i32, %arg1: i32) -> (i32, i32) {
    %c0_i32 = arith.constant 0 : i32
    %c0_i32_0 = arith.constant 0 : i32
    %c0_i32_1 = arith.constant 0 : i32
    return %c0_i32, %c0_i32_0 : i32, i32
  }
  func.func @transform_3(%arg0: i32, %arg1: i32) -> (i32, i32) {
    %c0_i32 = arith.constant 0 : i32
    %c0_i32_0 = arith.constant 0 : i32
    %c0_i32_1 = arith.constant 0 : i32
    return %c0_i32, %c0_i32_0 : i32, i32
  }
  func.func @transform_4(%arg0: i32, %arg1: i32) -> (i32, i32) {
    %c0_i32 = arith.constant 0 : i32
    %c0_i32_0 = arith.constant 0 : i32
    %c0_i32_1 = arith.constant 0 : i32
    return %c0_i32, %c0_i32_0 : i32, i32
  }
  func.func @transform_5(%arg0: i32, %arg1: i32) -> (i32, i32) {
    %c0_i32 = arith.constant 0 : i32
    %c0_i32_0 = arith.constant 0 : i32
    return %arg0, %c0_i32 : i32, i32
  }
  func.func @transform_6(%arg0: i32, %arg1: i32) -> (i32, i32, i32) {
    %c0_i32 = arith.constant 0 : i32
    %c0_i32_0 = arith.constant 0 : i32
    return %arg1, %arg0, %c0_i32 : i32, i32, i32
  }
  func.func @transform_7(%arg0: i32, %arg1: i32) -> (i32, i32) {
    %c0_i32 = arith.constant 0 : i32
    %c0_i32_0 = arith.constant 0 : i32
    return %arg0, %c0_i32 : i32, i32
  }
}

module attributes {stable_mosaic.version = 11 : i64} {
  func.func @_gru_ln_kernel(%arg0: i32, %arg1: i32, %arg2: memref<8x3x8x128xf32, #tpu.memory_space<vmem>>, %arg3: memref<128x384xf32, #tpu.memory_space<vmem>>, %arg4: memref<1x128xf32, #tpu.memory_space<vmem>>, %arg5: memref<1x128xf32, #tpu.memory_space<vmem>>, %arg6: memref<1x128xf32, #tpu.memory_space<vmem>>, %arg7: memref<8x128xf32, #tpu.memory_space<vmem>>, %arg8: memref<8x8x128xf32, #tpu.memory_space<vmem>>, %arg9: memref<8x128xf32, #tpu.memory_space<vmem>>, %arg10: memref<8x128xf32, #tpu.memory_space<vmem>>) attributes {dimension_semantics = [#tpu.dimension_semantics<parallel>, #tpu.dimension_semantics<arbitrary>], iteration_bounds = array<i64: 1, 2>, scalar_prefetch = 0 : i64, scratch_operands = 1 : i64, tpu.core_type = #tpu.core_type<tc>, window_params = [{transform_indices = @transform_0, window_bounds = array<i64: 8, 3, 8, 128>}, {pipeline_mode = #tpu.pipeline_mode<synchronous>, transform_indices = @transform_1, window_bounds = array<i64: 128, 384>}, {pipeline_mode = #tpu.pipeline_mode<synchronous>, transform_indices = @transform_2, window_bounds = array<i64: 1, 128>}, {pipeline_mode = #tpu.pipeline_mode<synchronous>, transform_indices = @transform_3, window_bounds = array<i64: 1, 128>}, {pipeline_mode = #tpu.pipeline_mode<synchronous>, transform_indices = @transform_4, window_bounds = array<i64: 1, 128>}, {transform_indices = @transform_5, window_bounds = array<i64: 8, 128>}, {transform_indices = @transform_6, window_bounds = array<i64: 8, 8, 128>}, {transform_indices = @transform_7, window_bounds = array<i64: 8, 128>}]} {
    %c0_i32 = arith.constant 0 : i32
    %0 = arith.cmpi eq, %arg1, %c0_i32 : i32
    %1 = arith.extui %0 : i1 to i32
    %c0_i32_0 = arith.constant 0 : i32
    %2 = arith.cmpi ne, %1, %c0_i32_0 : i32
    scf.if %2 {
      %c0_11 = arith.constant 0 : index
      %c0_12 = arith.constant 0 : index
      %19 = vector.load %arg7[%c0_11, %c0_12] : memref<8x128xf32, #tpu.memory_space<vmem>>, vector<8x128xf32>
      %c0_13 = arith.constant 0 : index
      %c0_14 = arith.constant 0 : index
      %20 = vector.load %arg10[%c0_13, %c0_14] : memref<8x128xf32, #tpu.memory_space<vmem>>, vector<8x128xf32>
      tpu.vector_store %arg10[%c0_13, %c0_14], %19 {strides = array<i32>} : memref<8x128xf32, #tpu.memory_space<vmem>>, vector<8x128xf32>,
    } else {
    }
    %c0 = arith.constant 0 : index
    %c0_1 = arith.constant 0 : index
    %3 = vector.load %arg3[%c0, %c0_1] : memref<128x384xf32, #tpu.memory_space<vmem>>, vector<128x384xf32>
    %c0_2 = arith.constant 0 : index
    %c0_3 = arith.constant 0 : index
    %4 = vector.load %arg4[%c0_2, %c0_3] : memref<1x128xf32, #tpu.memory_space<vmem>>, vector<1x128xf32>
    %5 = vector.shape_cast %4 : vector<1x128xf32> to vector<1x128xf32>
    %6 = vector.broadcast %5 : vector<1x128xf32> to vector<8x128xf32>
    %c0_4 = arith.constant 0 : index
    %c0_5 = arith.constant 0 : index
    %7 = vector.load %arg5[%c0_4, %c0_5] : memref<1x128xf32, #tpu.memory_space<vmem>>, vector<1x128xf32>
    %8 = vector.shape_cast %7 : vector<1x128xf32> to vector<1x128xf32>
    %9 = vector.broadcast %8 : vector<1x128xf32> to vector<8x128xf32>
    %c0_6 = arith.constant 0 : index
    %c0_7 = arith.constant 0 : index
    %10 = vector.load %arg6[%c0_6, %c0_7] : memref<1x128xf32, #tpu.memory_space<vmem>>, vector<1x128xf32>
    %11 = vector.shape_cast %10 : vector<1x128xf32> to vector<1x128xf32>
    %12 = vector.broadcast %11 : vector<1x128xf32> to vector<8x128xf32>
    %c1_i32 = arith.constant 1 : i32
    %13 = arith.cmpi ne, %arg1, %c1_i32 : i32
    %14 = arith.extui %13 : i1 to i32
    %c0_i32_8 = arith.constant 0 : i32
    %15 = arith.cmpi ne, %14, %c0_i32_8 : i32
    scf.if %15 {
      %c0_11 = arith.constant 0 : index
      %c0_12 = arith.constant 0 : index
      %19 = vector.load %arg10[%c0_11, %c0_12] : memref<8x128xf32, #tpu.memory_space<vmem>>, vector<8x128xf32>
      %c0_i32_13 = arith.constant 0 : i32
      %cst = arith.constant dense<0.000000e+00> : vector<8x384xf32>
      %20 = tpu.matmul %19, %3, %cst {dimension_numbers = #tpu.dot_dimension_numbers<[1], [0], [0], [1], [0, 0, 1, 1], [], []>} : vector<8x128xf32>, vector<128x384xf32>, vector<8x384xf32> -> vector<8x384xf32>
      %21 = arith.index_cast %c0_i32_13 : i32 to index
      %c0_14 = arith.constant 0 : index
      %c0_15 = arith.constant 0 : index
      %c0_16 = arith.constant 0 : index
      %22 = vector.load %arg2[%21, %c0_14, %c0_15, %c0_16] : memref<8x3x8x128xf32, #tpu.memory_space<vmem>>, vector<1x1x8x128xf32>
      %23 = vector.shape_cast %22 : vector<1x1x8x128xf32> to vector<8x128xf32>
      %24 = arith.index_cast %c0_i32_13 : i32 to index
      %c1 = arith.constant 1 : index
      %c0_17 = arith.constant 0 : index
      %c0_18 = arith.constant 0 : index
      %25 = vector.load %arg2[%24, %c1, %c0_17, %c0_18] : memref<8x3x8x128xf32, #tpu.memory_space<vmem>>, vector<1x1x8x128xf32>
      %26 = vector.shape_cast %25 : vector<1x1x8x128xf32> to vector<8x128xf32>
      %27 = arith.index_cast %c0_i32_13 : i32 to index
      %c2 = arith.constant 2 : index
      %c0_19 = arith.constant 0 : index
      %c0_20 = arith.constant 0 : index
      %28 = vector.load %arg2[%27, %c2, %c0_19, %c0_20] : memref<8x3x8x128xf32, #tpu.memory_space<vmem>>, vector<1x1x8x128xf32>
      %29 = vector.shape_cast %28 : vector<1x1x8x128xf32> to vector<8x128xf32>
      %30 = vector.extract_strided_slice %20 {offsets = [0, 0], sizes = [8, 128], strides = [1, 1]} : vector<8x384xf32> to vector<8x128xf32>
      %31 = arith.addf %23, %30 : vector<8x128xf32>
      %32 = arith.negf %31 : vector<8x128xf32>
      %33 = math.exp %32 : vector<8x128xf32>
      %cst_21 = arith.constant 1.000000e+00 : f32
      %34 = vector.broadcast %cst_21 : f32 to vector<8x128xf32>
      %35 = arith.addf %34, %33 : vector<8x128xf32>
      %36 = arith.divf %34, %35 : vector<8x128xf32>
      %37 = vector.extract_strided_slice %20 {offsets = [0, 128], sizes = [8, 128], strides = [1, 1]} : vector<8x384xf32> to vector<8x128xf32>
      %38 = arith.addf %26, %37 : vector<8x128xf32>
      %39 = arith.negf %38 : vector<8x128xf32>
      %40 = math.exp %39 : vector<8x128xf32>
      %cst_22 = arith.constant 1.000000e+00 : f32
      %41 = vector.broadcast %cst_22 : f32 to vector<8x128xf32>
      %42 = arith.addf %41, %40 : vector<8x128xf32>
      %43 = arith.divf %41, %42 : vector<8x128xf32>
      %44 = vector.extract_strided_slice %20 {offsets = [0, 256], sizes = [8, 128], strides = [1, 1]} : vector<8x384xf32> to vector<8x128xf32>
      %45 = arith.addf %44, %6 : vector<8x128xf32>
      %46 = arith.mulf %36, %45 : vector<8x128xf32>
      %47 = arith.addf %29, %46 : vector<8x128xf32>
      %48 = math.tanh %47 : vector<8x128xf32>
      %cst_23 = arith.constant 1.000000e+00 : f32
      %49 = vector.broadcast %cst_23 : f32 to vector<8x128xf32>
      %50 = arith.subf %49, %43 : vector<8x128xf32>
      %51 = arith.mulf %50, %48 : vector<8x128xf32>
      %52 = arith.mulf %43, %19 : vector<8x128xf32>
      %53 = arith.addf %51, %52 : vector<8x128xf32>
      %cst_24 = arith.constant dense<0.000000e+00> : vector<8xf32>
      %54 = vector.multi_reduction <add>, %53, %cst_24 [1] : vector<8x128xf32> to vector<8xf32>
      %55 = vector.shape_cast %54 : vector<8xf32> to vector<8x1xf32>
      %cst_25 = arith.constant 3.125000e-02 : f32
      %56 = vector.broadcast %cst_25 : f32 to vector<8x1xf32>
      %57 = arith.mulf %55, %56 : vector<8x1xf32>
      %58 = arith.mulf %53, %53 : vector<8x128xf32>
      %cst_26 = arith.constant dense<0.000000e+00> : vector<8xf32>
      %59 = vector.multi_reduction <add>, %58, %cst_26 [1] : vector<8x128xf32> to vector<8xf32>
      %60 = vector.shape_cast %59 : vector<8xf32> to vector<8x1xf32>
      %cst_27 = arith.constant 3.125000e-02 : f32
      %61 = vector.broadcast %cst_27 : f32 to vector<8x1xf32>
      %62 = arith.mulf %60, %61 : vector<8x1xf32>
      %63 = arith.mulf %57, %57 : vector<8x1xf32>
      %64 = arith.subf %62, %63 : vector<8x1xf32>
      %cst_28 = arith.constant 0.000000e+00 : f32
      %65 = vector.broadcast %cst_28 : f32 to vector<8x1xf32>
      %66 = arith.maximumf %64, %65 : vector<8x1xf32>
      %67 = vector.broadcast %57 : vector<8x1xf32> to vector<8x128xf32>
      %68 = arith.subf %53, %67 : vector<8x128xf32>
      %cst_29 = arith.constant 9.99999974E-6 : f32
      %69 = vector.broadcast %cst_29 : f32 to vector<8x1xf32>
      %70 = arith.addf %66, %69 : vector<8x1xf32>
      %71 = math.rsqrt %70 : vector<8x1xf32>
      %72 = vector.broadcast %71 : vector<8x1xf32> to vector<8x128xf32>
      %73 = arith.mulf %68, %72 : vector<8x128xf32>
      %74 = arith.mulf %73, %9 : vector<8x128xf32>
      %75 = arith.addf %74, %12 : vector<8x128xf32>
      %76 = arith.index_cast %c0_i32_13 : i32 to index
      %c0_30 = arith.constant 0 : index
      %c0_31 = arith.constant 0 : index
      %77 = vector.load %arg8[%76, %c0_30, %c0_31] : memref<8x8x128xf32, #tpu.memory_space<vmem>>, vector<1x8x128xf32>
      %78 = vector.shape_cast %77 : vector<1x8x128xf32> to vector<8x128xf32>
      %79 = vector.shape_cast %75 : vector<8x128xf32> to vector<1x8x128xf32>
      tpu.vector_store %arg8[%76, %c0_30, %c0_31], %79 {strides = array<i32>} : memref<8x8x128xf32, #tpu.memory_space<vmem>>, vector<1x8x128xf32>,
      %c1_i32_32 = arith.constant 1 : i32
      %cst_33 = arith.constant dense<0.000000e+00> : vector<8x384xf32>
      %80 = tpu.matmul %53, %3, %cst_33 {dimension_numbers = #tpu.dot_dimension_numbers<[1], [0], [0], [1], [0, 0, 1, 1], [], []>} : vector<8x128xf32>, vector<128x384xf32>, vector<8x384xf32> -> vector<8x384xf32>
      %81 = arith.index_cast %c1_i32_32 : i32 to index
      %c0_34 = arith.constant 0 : index
      %c0_35 = arith.constant 0 : index
      %c0_36 = arith.constant 0 : index
      %82 = vector.load %arg2[%81, %c0_34, %c0_35, %c0_36] : memref<8x3x8x128xf32, #tpu.memory_space<vmem>>, vector<1x1x8x128xf32>
      %83 = vector.shape_cast %82 : vector<1x1x8x128xf32> to vector<8x128xf32>
      %84 = arith.index_cast %c1_i32_32 : i32 to index
      %c1_37 = arith.constant 1 : index
      %c0_38 = arith.constant 0 : index
      %c0_39 = arith.constant 0 : index
      %85 = vector.load %arg2[%84, %c1_37, %c0_38, %c0_39] : memref<8x3x8x128xf32, #tpu.memory_space<vmem>>, vector<1x1x8x128xf32>
      %86 = vector.shape_cast %85 : vector<1x1x8x128xf32> to vector<8x128xf32>
      %87 = arith.index_cast %c1_i32_32 : i32 to index
      %c2_40 = arith.constant 2 : index
      %c0_41 = arith.constant 0 : index
      %c0_42 = arith.constant 0 : index
      %88 = vector.load %arg2[%87, %c2_40, %c0_41, %c0_42] : memref<8x3x8x128xf32, #tpu.memory_space<vmem>>, vector<1x1x8x128xf32>
      %89 = vector.shape_cast %88 : vector<1x1x8x128xf32> to vector<8x128xf32>
      %90 = vector.extract_strided_slice %80 {offsets = [0, 0], sizes = [8, 128], strides = [1, 1]} : vector<8x384xf32> to vector<8x128xf32>
      %91 = arith.addf %83, %90 : vector<8x128xf32>
      %92 = arith.negf %91 : vector<8x128xf32>
      %93 = math.exp %92 : vector<8x128xf32>
      %cst_43 = arith.constant 1.000000e+00 : f32
      %94 = vector.broadcast %cst_43 : f32 to vector<8x128xf32>
      %95 = arith.addf %94, %93 : vector<8x128xf32>
      %96 = arith.divf %94, %95 : vector<8x128xf32>
      %97 = vector.extract_strided_slice %80 {offsets = [0, 128], sizes = [8, 128], strides = [1, 1]} : vector<8x384xf32> to vector<8x128xf32>
      %98 = arith.addf %86, %97 : vector<8x128xf32>
      %99 = arith.negf %98 : vector<8x128xf32>
      %100 = math.exp %99 : vector<8x128xf32>
      %cst_44 = arith.constant 1.000000e+00 : f32
      %101 = vector.broadcast %cst_44 : f32 to vector<8x128xf32>
      %102 = arith.addf %101, %100 : vector<8x128xf32>
      %103 = arith.divf %101, %102 : vector<8x128xf32>
      %104 = vector.extract_strided_slice %80 {offsets = [0, 256], sizes = [8, 128], strides = [1, 1]} : vector<8x384xf32> to vector<8x128xf32>
      %105 = arith.addf %104, %6 : vector<8x128xf32>
      %106 = arith.mulf %96, %105 : vector<8x128xf32>
      %107 = arith.addf %89, %106 : vector<8x128xf32>
      %108 = math.tanh %107 : vector<8x128xf32>
      %cst_45 = arith.constant 1.000000e+00 : f32
      %109 = vector.broadcast %cst_45 : f32 to vector<8x128xf32>
      %110 = arith.subf %109, %103 : vector<8x128xf32>
      %111 = arith.mulf %110, %108 : vector<8x128xf32>
      %112 = arith.mulf %103, %53 : vector<8x128xf32>
      %113 = arith.addf %111, %112 : vector<8x128xf32>
      %cst_46 = arith.constant dense<0.000000e+00> : vector<8xf32>
      %114 = vector.multi_reduction <add>, %113, %cst_46 [1] : vector<8x128xf32> to vector<8xf32>
      %115 = vector.shape_cast %114 : vector<8xf32> to vector<8x1xf32>
      %cst_47 = arith.constant 3.125000e-02 : f32
      %116 = vector.broadcast %cst_47 : f32 to vector<8x1xf32>
      %117 = arith.mulf %115, %116 : vector<8x1xf32>
      %118 = arith.mulf %113, %113 : vector<8x128xf32>
      %cst_48 = arith.constant dense<0.000000e+00> : vector<8xf32>
      %119 = vector.multi_reduction <add>, %118, %cst_48 [1] : vector<8x128xf32> to vector<8xf32>
      %120 = vector.shape_cast %119 : vector<8xf32> to vector<8x1xf32>
      %cst_49 = arith.constant 3.125000e-02 : f32
      %121 = vector.broadcast %cst_49 : f32 to vector<8x1xf32>
      %122 = arith.mulf %120, %121 : vector<8x1xf32>
      %123 = arith.mulf %117, %117 : vector<8x1xf32>
      %124 = arith.subf %122, %123 : vector<8x1xf32>
      %cst_50 = arith.constant 0.000000e+00 : f32
      %125 = vector.broadcast %cst_50 : f32 to vector<8x1xf32>
      %126 = arith.maximumf %124, %125 : vector<8x1xf32>
      %127 = vector.broadcast %117 : vector<8x1xf32> to vector<8x128xf32>
      %128 = arith.subf %113, %127 : vector<8x128xf32>
      %cst_51 = arith.constant 9.99999974E-6 : f32
      %129 = vector.broadcast %cst_51 : f32 to vector<8x1xf32>
      %130 = arith.addf %126, %129 : vector<8x1xf32>
      %131 = math.rsqrt %130 : vector<8x1xf32>
      %132 = vector.broadcast %131 : vector<8x1xf32> to vector<8x128xf32>
      %133 = arith.mulf %128, %132 : vector<8x128xf32>
      %134 = arith.mulf %133, %9 : vector<8x128xf32>
      %135 = arith.addf %134, %12 : vector<8x128xf32>
      %136 = arith.index_cast %c1_i32_32 : i32 to index
      %c0_52 = arith.constant 0 : index
      %c0_53 = arith.constant 0 : index
      %137 = vector.load %arg8[%136, %c0_52, %c0_53] : memref<8x8x128xf32, #tpu.memory_space<vmem>>, vector<1x8x128xf32>
      %138 = vector.shape_cast %137 : vector<1x8x128xf32> to vector<8x128xf32>
      %139 = vector.shape_cast %135 : vector<8x128xf32> to vector<1x8x128xf32>
      tpu.vector_store %arg8[%136, %c0_52, %c0_53], %139 {strides = array<i32>} : memref<8x8x128xf32, #tpu.memory_space<vmem>>, vector<1x8x128xf32>,
      %c2_i32 = arith.constant 2 : i32
      %cst_54 = arith.constant dense<0.000000e+00> : vector<8x384xf32>
      %140 = tpu.matmul %113, %3, %cst_54 {dimension_numbers = #tpu.dot_dimension_numbers<[1], [0], [0], [1], [0, 0, 1, 1], [], []>} : vector<8x128xf32>, vector<128x384xf32>, vector<8x384xf32> -> vector<8x384xf32>
      %141 = arith.index_cast %c2_i32 : i32 to index
      %c0_55 = arith.constant 0 : index
      %c0_56 = arith.constant 0 : index
      %c0_57 = arith.constant 0 : index
      %142 = vector.load %arg2[%141, %c0_55, %c0_56, %c0_57] : memref<8x3x8x128xf32, #tpu.memory_space<vmem>>, vector<1x1x8x128xf32>
      %143 = vector.shape_cast %142 : vector<1x1x8x128xf32> to vector<8x128xf32>
      %144 = arith.index_cast %c2_i32 : i32 to index
      %c1_58 = arith.constant 1 : index
      %c0_59 = arith.constant 0 : index
      %c0_60 = arith.constant 0 : index
      %145 = vector.load %arg2[%144, %c1_58, %c0_59, %c0_60] : memref<8x3x8x128xf32, #tpu.memory_space<vmem>>, vector<1x1x8x128xf32>
      %146 = vector.shape_cast %145 : vector<1x1x8x128xf32> to vector<8x128xf32>
      %147 = arith.index_cast %c2_i32 : i32 to index
      %c2_61 = arith.constant 2 : index
      %c0_62 = arith.constant 0 : index
      %c0_63 = arith.constant 0 : index
      %148 = vector.load %arg2[%147, %c2_61, %c0_62, %c0_63] : memref<8x3x8x128xf32, #tpu.memory_space<vmem>>, vector<1x1x8x128xf32>
      %149 = vector.shape_cast %148 : vector<1x1x8x128xf32> to vector<8x128xf32>
      %150 = vector.extract_strided_slice %140 {offsets = [0, 0], sizes = [8, 128], strides = [1, 1]} : vector<8x384xf32> to vector<8x128xf32>
      %151 = arith.addf %143, %150 : vector<8x128xf32>
      %152 = arith.negf %151 : vector<8x128xf32>
      %153 = math.exp %152 : vector<8x128xf32>
      %cst_64 = arith.constant 1.000000e+00 : f32
      %154 = vector.broadcast %cst_64 : f32 to vector<8x128xf32>
      %155 = arith.addf %154, %153 : vector<8x128xf32>
      %156 = arith.divf %154, %155 : vector<8x128xf32>
      %157 = vector.extract_strided_slice %140 {offsets = [0, 128], sizes = [8, 128], strides = [1, 1]} : vector<8x384xf32> to vector<8x128xf32>
      %158 = arith.addf %146, %157 : vector<8x128xf32>
      %159 = arith.negf %158 : vector<8x128xf32>
      %160 = math.exp %159 : vector<8x128xf32>
      %cst_65 = arith.constant 1.000000e+00 : f32
      %161 = vector.broadcast %cst_65 : f32 to vector<8x128xf32>
      %162 = arith.addf %161, %160 : vector<8x128xf32>
      %163 = arith.divf %161, %162 : vector<8x128xf32>
      %164 = vector.extract_strided_slice %140 {offsets = [0, 256], sizes = [8, 128], strides = [1, 1]} : vector<8x384xf32> to vector<8x128xf32>
      %165 = arith.addf %164, %6 : vector<8x128xf32>
      %166 = arith.mulf %156, %165 : vector<8x128xf32>
      %167 = arith.addf %149, %166 : vector<8x128xf32>
      %168 = math.tanh %167 : vector<8x128xf32>
      %cst_66 = arith.constant 1.000000e+00 : f32
      %169 = vector.broadcast %cst_66 : f32 to vector<8x128xf32>
      %170 = arith.subf %169, %163 : vector<8x128xf32>
      %171 = arith.mulf %170, %168 : vector<8x128xf32>
      %172 = arith.mulf %163, %113 : vector<8x128xf32>
      %173 = arith.addf %171, %172 : vector<8x128xf32>
      %cst_67 = arith.constant dense<0.000000e+00> : vector<8xf32>
      %174 = vector.multi_reduction <add>, %173, %cst_67 [1] : vector<8x128xf32> to vector<8xf32>
      %175 = vector.shape_cast %174 : vector<8xf32> to vector<8x1xf32>
      %cst_68 = arith.constant 3.125000e-02 : f32
      %176 = vector.broadcast %cst_68 : f32 to vector<8x1xf32>
      %177 = arith.mulf %175, %176 : vector<8x1xf32>
      %178 = arith.mulf %173, %173 : vector<8x128xf32>
      %cst_69 = arith.constant dense<0.000000e+00> : vector<8xf32>
      %179 = vector.multi_reduction <add>, %178, %cst_69 [1] : vector<8x128xf32> to vector<8xf32>
      %180 = vector.shape_cast %179 : vector<8xf32> to vector<8x1xf32>
      %cst_70 = arith.constant 3.125000e-02 : f32
      %181 = vector.broadcast %cst_70 : f32 to vector<8x1xf32>
      %182 = arith.mulf %180, %181 : vector<8x1xf32>
      %183 = arith.mulf %177, %177 : vector<8x1xf32>
      %184 = arith.subf %182, %183 : vector<8x1xf32>
      %cst_71 = arith.constant 0.000000e+00 : f32
      %185 = vector.broadcast %cst_71 : f32 to vector<8x1xf32>
      %186 = arith.maximumf %184, %185 : vector<8x1xf32>
      %187 = vector.broadcast %177 : vector<8x1xf32> to vector<8x128xf32>
      %188 = arith.subf %173, %187 : vector<8x128xf32>
      %cst_72 = arith.constant 9.99999974E-6 : f32
      %189 = vector.broadcast %cst_72 : f32 to vector<8x1xf32>
      %190 = arith.addf %186, %189 : vector<8x1xf32>
      %191 = math.rsqrt %190 : vector<8x1xf32>
      %192 = vector.broadcast %191 : vector<8x1xf32> to vector<8x128xf32>
      %193 = arith.mulf %188, %192 : vector<8x128xf32>
      %194 = arith.mulf %193, %9 : vector<8x128xf32>
      %195 = arith.addf %194, %12 : vector<8x128xf32>
      %196 = arith.index_cast %c2_i32 : i32 to index
      %c0_73 = arith.constant 0 : index
      %c0_74 = arith.constant 0 : index
      %197 = vector.load %arg8[%196, %c0_73, %c0_74] : memref<8x8x128xf32, #tpu.memory_space<vmem>>, vector<1x8x128xf32>
      %198 = vector.shape_cast %197 : vector<1x8x128xf32> to vector<8x128xf32>
      %199 = vector.shape_cast %195 : vector<8x128xf32> to vector<1x8x128xf32>
      tpu.vector_store %arg8[%196, %c0_73, %c0_74], %199 {strides = array<i32>} : memref<8x8x128xf32, #tpu.memory_space<vmem>>, vector<1x8x128xf32>,
      %c3_i32 = arith.constant 3 : i32
      %cst_75 = arith.constant dense<0.000000e+00> : vector<8x384xf32>
      %200 = tpu.matmul %173, %3, %cst_75 {dimension_numbers = #tpu.dot_dimension_numbers<[1], [0], [0], [1], [0, 0, 1, 1], [], []>} : vector<8x128xf32>, vector<128x384xf32>, vector<8x384xf32> -> vector<8x384xf32>
      %201 = arith.index_cast %c3_i32 : i32 to index
      %c0_76 = arith.constant 0 : index
      %c0_77 = arith.constant 0 : index
      %c0_78 = arith.constant 0 : index
      %202 = vector.load %arg2[%201, %c0_76, %c0_77, %c0_78] : memref<8x3x8x128xf32, #tpu.memory_space<vmem>>, vector<1x1x8x128xf32>
      %203 = vector.shape_cast %202 : vector<1x1x8x128xf32> to vector<8x128xf32>
      %204 = arith.index_cast %c3_i32 : i32 to index
      %c1_79 = arith.constant 1 : index
      %c0_80 = arith.constant 0 : index
      %c0_81 = arith.constant 0 : index
      %205 = vector.load %arg2[%204, %c1_79, %c0_80, %c0_81] : memref<8x3x8x128xf32, #tpu.memory_space<vmem>>, vector<1x1x8x128xf32>
      %206 = vector.shape_cast %205 : vector<1x1x8x128xf32> to vector<8x128xf32>
      %207 = arith.index_cast %c3_i32 : i32 to index
      %c2_82 = arith.constant 2 : index
      %c0_83 = arith.constant 0 : index
      %c0_84 = arith.constant 0 : index
      %208 = vector.load %arg2[%207, %c2_82, %c0_83, %c0_84] : memref<8x3x8x128xf32, #tpu.memory_space<vmem>>, vector<1x1x8x128xf32>
      %209 = vector.shape_cast %208 : vector<1x1x8x128xf32> to vector<8x128xf32>
      %210 = vector.extract_strided_slice %200 {offsets = [0, 0], sizes = [8, 128], strides = [1, 1]} : vector<8x384xf32> to vector<8x128xf32>
      %211 = arith.addf %203, %210 : vector<8x128xf32>
      %212 = arith.negf %211 : vector<8x128xf32>
      %213 = math.exp %212 : vector<8x128xf32>
      %cst_85 = arith.constant 1.000000e+00 : f32
      %214 = vector.broadcast %cst_85 : f32 to vector<8x128xf32>
      %215 = arith.addf %214, %213 : vector<8x128xf32>
      %216 = arith.divf %214, %215 : vector<8x128xf32>
      %217 = vector.extract_strided_slice %200 {offsets = [0, 128], sizes = [8, 128], strides = [1, 1]} : vector<8x384xf32> to vector<8x128xf32>
      %218 = arith.addf %206, %217 : vector<8x128xf32>
      %219 = arith.negf %218 : vector<8x128xf32>
      %220 = math.exp %219 : vector<8x128xf32>
      %cst_86 = arith.constant 1.000000e+00 : f32
      %221 = vector.broadcast %cst_86 : f32 to vector<8x128xf32>
      %222 = arith.addf %221, %220 : vector<8x128xf32>
      %223 = arith.divf %221, %222 : vector<8x128xf32>
      %224 = vector.extract_strided_slice %200 {offsets = [0, 256], sizes = [8, 128], strides = [1, 1]} : vector<8x384xf32> to vector<8x128xf32>
      %225 = arith.addf %224, %6 : vector<8x128xf32>
      %226 = arith.mulf %216, %225 : vector<8x128xf32>
      %227 = arith.addf %209, %226 : vector<8x128xf32>
      %228 = math.tanh %227 : vector<8x128xf32>
      %cst_87 = arith.constant 1.000000e+00 : f32
      %229 = vector.broadcast %cst_87 : f32 to vector<8x128xf32>
      %230 = arith.subf %229, %223 : vector<8x128xf32>
      %231 = arith.mulf %230, %228 : vector<8x128xf32>
      %232 = arith.mulf %223, %173 : vector<8x128xf32>
      %233 = arith.addf %231, %232 : vector<8x128xf32>
      %cst_88 = arith.constant dense<0.000000e+00> : vector<8xf32>
      %234 = vector.multi_reduction <add>, %233, %cst_88 [1] : vector<8x128xf32> to vector<8xf32>
      %235 = vector.shape_cast %234 : vector<8xf32> to vector<8x1xf32>
      %cst_89 = arith.constant 3.125000e-02 : f32
      %236 = vector.broadcast %cst_89 : f32 to vector<8x1xf32>
      %237 = arith.mulf %235, %236 : vector<8x1xf32>
      %238 = arith.mulf %233, %233 : vector<8x128xf32>
      %cst_90 = arith.constant dense<0.000000e+00> : vector<8xf32>
      %239 = vector.multi_reduction <add>, %238, %cst_90 [1] : vector<8x128xf32> to vector<8xf32>
      %240 = vector.shape_cast %239 : vector<8xf32> to vector<8x1xf32>
      %cst_91 = arith.constant 3.125000e-02 : f32
      %241 = vector.broadcast %cst_91 : f32 to vector<8x1xf32>
      %242 = arith.mulf %240, %241 : vector<8x1xf32>
      %243 = arith.mulf %237, %237 : vector<8x1xf32>
      %244 = arith.subf %242, %243 : vector<8x1xf32>
      %cst_92 = arith.constant 0.000000e+00 : f32
      %245 = vector.broadcast %cst_92 : f32 to vector<8x1xf32>
      %246 = arith.maximumf %244, %245 : vector<8x1xf32>
      %247 = vector.broadcast %237 : vector<8x1xf32> to vector<8x128xf32>
      %248 = arith.subf %233, %247 : vector<8x128xf32>
      %cst_93 = arith.constant 9.99999974E-6 : f32
      %249 = vector.broadcast %cst_93 : f32 to vector<8x1xf32>
      %250 = arith.addf %246, %249 : vector<8x1xf32>
      %251 = math.rsqrt %250 : vector<8x1xf32>
      %252 = vector.broadcast %251 : vector<8x1xf32> to vector<8x128xf32>
      %253 = arith.mulf %248, %252 : vector<8x128xf32>
      %254 = arith.mulf %253, %9 : vector<8x128xf32>
      %255 = arith.addf %254, %12 : vector<8x128xf32>
      %256 = arith.index_cast %c3_i32 : i32 to index
      %c0_94 = arith.constant 0 : index
      %c0_95 = arith.constant 0 : index
      %257 = vector.load %arg8[%256, %c0_94, %c0_95] : memref<8x8x128xf32, #tpu.memory_space<vmem>>, vector<1x8x128xf32>
      %258 = vector.shape_cast %257 : vector<1x8x128xf32> to vector<8x128xf32>
      %259 = vector.shape_cast %255 : vector<8x128xf32> to vector<1x8x128xf32>
      tpu.vector_store %arg8[%256, %c0_94, %c0_95], %259 {strides = array<i32>} : memref<8x8x128xf32, #tpu.memory_space<vmem>>, vector<1x8x128xf32>,
      %c4_i32 = arith.constant 4 : i32
      %cst_96 = arith.constant dense<0.000000e+00> : vector<8x384xf32>
      %260 = tpu.matmul %233, %3, %cst_96 {dimension_numbers = #tpu.dot_dimension_numbers<[1], [0], [0], [1], [0, 0, 1, 1], [], []>} : vector<8x128xf32>, vector<128x384xf32>, vector<8x384xf32> -> vector<8x384xf32>
      %261 = arith.index_cast %c4_i32 : i32 to index
      %c0_97 = arith.constant 0 : index
      %c0_98 = arith.constant 0 : index
      %c0_99 = arith.constant 0 : index
      %262 = vector.load %arg2[%261, %c0_97, %c0_98, %c0_99] : memref<8x3x8x128xf32, #tpu.memory_space<vmem>>, vector<1x1x8x128xf32>
      %263 = vector.shape_cast %262 : vector<1x1x8x128xf32> to vector<8x128xf32>
      %264 = arith.index_cast %c4_i32 : i32 to index
      %c1_100 = arith.constant 1 : index
      %c0_101 = arith.constant 0 : index
      %c0_102 = arith.constant 0 : index
      %265 = vector.load %arg2[%264, %c1_100, %c0_101, %c0_102] : memref<8x3x8x128xf32, #tpu.memory_space<vmem>>, vector<1x1x8x128xf32>
      %266 = vector.shape_cast %265 : vector<1x1x8x128xf32> to vector<8x128xf32>
      %267 = arith.index_cast %c4_i32 : i32 to index
      %c2_103 = arith.constant 2 : index
      %c0_104 = arith.constant 0 : index
      %c0_105 = arith.constant 0 : index
      %268 = vector.load %arg2[%267, %c2_103, %c0_104, %c0_105] : memref<8x3x8x128xf32, #tpu.memory_space<vmem>>, vector<1x1x8x128xf32>
      %269 = vector.shape_cast %268 : vector<1x1x8x128xf32> to vector<8x128xf32>
      %270 = vector.extract_strided_slice %260 {offsets = [0, 0], sizes = [8, 128], strides = [1, 1]} : vector<8x384xf32> to vector<8x128xf32>
      %271 = arith.addf %263, %270 : vector<8x128xf32>
      %272 = arith.negf %271 : vector<8x128xf32>
      %273 = math.exp %272 : vector<8x128xf32>
      %cst_106 = arith.constant 1.000000e+00 : f32
      %274 = vector.broadcast %cst_106 : f32 to vector<8x128xf32>
      %275 = arith.addf %274, %273 : vector<8x128xf32>
      %276 = arith.divf %274, %275 : vector<8x128xf32>
      %277 = vector.extract_strided_slice %260 {offsets = [0, 128], sizes = [8, 128], strides = [1, 1]} : vector<8x384xf32> to vector<8x128xf32>
      %278 = arith.addf %266, %277 : vector<8x128xf32>
      %279 = arith.negf %278 : vector<8x128xf32>
      %280 = math.exp %279 : vector<8x128xf32>
      %cst_107 = arith.constant 1.000000e+00 : f32
      %281 = vector.broadcast %cst_107 : f32 to vector<8x128xf32>
      %282 = arith.addf %281, %280 : vector<8x128xf32>
      %283 = arith.divf %281, %282 : vector<8x128xf32>
      %284 = vector.extract_strided_slice %260 {offsets = [0, 256], sizes = [8, 128], strides = [1, 1]} : vector<8x384xf32> to vector<8x128xf32>
      %285 = arith.addf %284, %6 : vector<8x128xf32>
      %286 = arith.mulf %276, %285 : vector<8x128xf32>
      %287 = arith.addf %269, %286 : vector<8x128xf32>
      %288 = math.tanh %287 : vector<8x128xf32>
      %cst_108 = arith.constant 1.000000e+00 : f32
      %289 = vector.broadcast %cst_108 : f32 to vector<8x128xf32>
      %290 = arith.subf %289, %283 : vector<8x128xf32>
      %291 = arith.mulf %290, %288 : vector<8x128xf32>
      %292 = arith.mulf %283, %233 : vector<8x128xf32>
      %293 = arith.addf %291, %292 : vector<8x128xf32>
      %cst_109 = arith.constant dense<0.000000e+00> : vector<8xf32>
      %294 = vector.multi_reduction <add>, %293, %cst_109 [1] : vector<8x128xf32> to vector<8xf32>
      %295 = vector.shape_cast %294 : vector<8xf32> to vector<8x1xf32>
      %cst_110 = arith.constant 3.125000e-02 : f32
      %296 = vector.broadcast %cst_110 : f32 to vector<8x1xf32>
      %297 = arith.mulf %295, %296 : vector<8x1xf32>
      %298 = arith.mulf %293, %293 : vector<8x128xf32>
      %cst_111 = arith.constant dense<0.000000e+00> : vector<8xf32>
      %299 = vector.multi_reduction <add>, %298, %cst_111 [1] : vector<8x128xf32> to vector<8xf32>
      %300 = vector.shape_cast %299 : vector<8xf32> to vector<8x1xf32>
      %cst_112 = arith.constant 3.125000e-02 : f32
      %301 = vector.broadcast %cst_112 : f32 to vector<8x1xf32>
      %302 = arith.mulf %300, %301 : vector<8x1xf32>
      %303 = arith.mulf %297, %297 : vector<8x1xf32>
      %304 = arith.subf %302, %303 : vector<8x1xf32>
      %cst_113 = arith.constant 0.000000e+00 : f32
      %305 = vector.broadcast %cst_113 : f32 to vector<8x1xf32>
      %306 = arith.maximumf %304, %305 : vector<8x1xf32>
      %307 = vector.broadcast %297 : vector<8x1xf32> to vector<8x128xf32>
      %308 = arith.subf %293, %307 : vector<8x128xf32>
      %cst_114 = arith.constant 9.99999974E-6 : f32
      %309 = vector.broadcast %cst_114 : f32 to vector<8x1xf32>
      %310 = arith.addf %306, %309 : vector<8x1xf32>
      %311 = math.rsqrt %310 : vector<8x1xf32>
      %312 = vector.broadcast %311 : vector<8x1xf32> to vector<8x128xf32>
      %313 = arith.mulf %308, %312 : vector<8x128xf32>
      %314 = arith.mulf %313, %9 : vector<8x128xf32>
      %315 = arith.addf %314, %12 : vector<8x128xf32>
      %316 = arith.index_cast %c4_i32 : i32 to index
      %c0_115 = arith.constant 0 : index
      %c0_116 = arith.constant 0 : index
      %317 = vector.load %arg8[%316, %c0_115, %c0_116] : memref<8x8x128xf32, #tpu.memory_space<vmem>>, vector<1x8x128xf32>
      %318 = vector.shape_cast %317 : vector<1x8x128xf32> to vector<8x128xf32>
      %319 = vector.shape_cast %315 : vector<8x128xf32> to vector<1x8x128xf32>
      tpu.vector_store %arg8[%316, %c0_115, %c0_116], %319 {strides = array<i32>} : memref<8x8x128xf32, #tpu.memory_space<vmem>>, vector<1x8x128xf32>,
      %c5_i32 = arith.constant 5 : i32
      %cst_117 = arith.constant dense<0.000000e+00> : vector<8x384xf32>
      %320 = tpu.matmul %293, %3, %cst_117 {dimension_numbers = #tpu.dot_dimension_numbers<[1], [0], [0], [1], [0, 0, 1, 1], [], []>} : vector<8x128xf32>, vector<128x384xf32>, vector<8x384xf32> -> vector<8x384xf32>
      %321 = arith.index_cast %c5_i32 : i32 to index
      %c0_118 = arith.constant 0 : index
      %c0_119 = arith.constant 0 : index
      %c0_120 = arith.constant 0 : index
      %322 = vector.load %arg2[%321, %c0_118, %c0_119, %c0_120] : memref<8x3x8x128xf32, #tpu.memory_space<vmem>>, vector<1x1x8x128xf32>
      %323 = vector.shape_cast %322 : vector<1x1x8x128xf32> to vector<8x128xf32>
      %324 = arith.index_cast %c5_i32 : i32 to index
      %c1_121 = arith.constant 1 : index
      %c0_122 = arith.constant 0 : index
      %c0_123 = arith.constant 0 : index
      %325 = vector.load %arg2[%324, %c1_121, %c0_122, %c0_123] : memref<8x3x8x128xf32, #tpu.memory_space<vmem>>, vector<1x1x8x128xf32>
      %326 = vector.shape_cast %325 : vector<1x1x8x128xf32> to vector<8x128xf32>
      %327 = arith.index_cast %c5_i32 : i32 to index
      %c2_124 = arith.constant 2 : index
      %c0_125 = arith.constant 0 : index
      %c0_126 = arith.constant 0 : index
      %328 = vector.load %arg2[%327, %c2_124, %c0_125, %c0_126] : memref<8x3x8x128xf32, #tpu.memory_space<vmem>>, vector<1x1x8x128xf32>
      %329 = vector.shape_cast %328 : vector<1x1x8x128xf32> to vector<8x128xf32>
      %330 = vector.extract_strided_slice %320 {offsets = [0, 0], sizes = [8, 128], strides = [1, 1]} : vector<8x384xf32> to vector<8x128xf32>
      %331 = arith.addf %323, %330 : vector<8x128xf32>
      %332 = arith.negf %331 : vector<8x128xf32>
      %333 = math.exp %332 : vector<8x128xf32>
      %cst_127 = arith.constant 1.000000e+00 : f32
      %334 = vector.broadcast %cst_127 : f32 to vector<8x128xf32>
      %335 = arith.addf %334, %333 : vector<8x128xf32>
      %336 = arith.divf %334, %335 : vector<8x128xf32>
      %337 = vector.extract_strided_slice %320 {offsets = [0, 128], sizes = [8, 128], strides = [1, 1]} : vector<8x384xf32> to vector<8x128xf32>
      %338 = arith.addf %326, %337 : vector<8x128xf32>
      %339 = arith.negf %338 : vector<8x128xf32>
      %340 = math.exp %339 : vector<8x128xf32>
      %cst_128 = arith.constant 1.000000e+00 : f32
      %341 = vector.broadcast %cst_128 : f32 to vector<8x128xf32>
      %342 = arith.addf %341, %340 : vector<8x128xf32>
      %343 = arith.divf %341, %342 : vector<8x128xf32>
      %344 = vector.extract_strided_slice %320 {offsets = [0, 256], sizes = [8, 128], strides = [1, 1]} : vector<8x384xf32> to vector<8x128xf32>
      %345 = arith.addf %344, %6 : vector<8x128xf32>
      %346 = arith.mulf %336, %345 : vector<8x128xf32>
      %347 = arith.addf %329, %346 : vector<8x128xf32>
      %348 = math.tanh %347 : vector<8x128xf32>
      %cst_129 = arith.constant 1.000000e+00 : f32
      %349 = vector.broadcast %cst_129 : f32 to vector<8x128xf32>
      %350 = arith.subf %349, %343 : vector<8x128xf32>
      %351 = arith.mulf %350, %348 : vector<8x128xf32>
      %352 = arith.mulf %343, %293 : vector<8x128xf32>
      %353 = arith.addf %351, %352 : vector<8x128xf32>
      %cst_130 = arith.constant dense<0.000000e+00> : vector<8xf32>
      %354 = vector.multi_reduction <add>, %353, %cst_130 [1] : vector<8x128xf32> to vector<8xf32>
      %355 = vector.shape_cast %354 : vector<8xf32> to vector<8x1xf32>
      %cst_131 = arith.constant 3.125000e-02 : f32
      %356 = vector.broadcast %cst_131 : f32 to vector<8x1xf32>
      %357 = arith.mulf %355, %356 : vector<8x1xf32>
      %358 = arith.mulf %353, %353 : vector<8x128xf32>
      %cst_132 = arith.constant dense<0.000000e+00> : vector<8xf32>
      %359 = vector.multi_reduction <add>, %358, %cst_132 [1] : vector<8x128xf32> to vector<8xf32>
      %360 = vector.shape_cast %359 : vector<8xf32> to vector<8x1xf32>
      %cst_133 = arith.constant 3.125000e-02 : f32
      %361 = vector.broadcast %cst_133 : f32 to vector<8x1xf32>
      %362 = arith.mulf %360, %361 : vector<8x1xf32>
      %363 = arith.mulf %357, %357 : vector<8x1xf32>
      %364 = arith.subf %362, %363 : vector<8x1xf32>
      %cst_134 = arith.constant 0.000000e+00 : f32
      %365 = vector.broadcast %cst_134 : f32 to vector<8x1xf32>
      %366 = arith.maximumf %364, %365 : vector<8x1xf32>
      %367 = vector.broadcast %357 : vector<8x1xf32> to vector<8x128xf32>
      %368 = arith.subf %353, %367 : vector<8x128xf32>
      %cst_135 = arith.constant 9.99999974E-6 : f32
      %369 = vector.broadcast %cst_135 : f32 to vector<8x1xf32>
      %370 = arith.addf %366, %369 : vector<8x1xf32>
      %371 = math.rsqrt %370 : vector<8x1xf32>
      %372 = vector.broadcast %371 : vector<8x1xf32> to vector<8x128xf32>
      %373 = arith.mulf %368, %372 : vector<8x128xf32>
      %374 = arith.mulf %373, %9 : vector<8x128xf32>
      %375 = arith.addf %374, %12 : vector<8x128xf32>
      %376 = arith.index_cast %c5_i32 : i32 to index
      %c0_136 = arith.constant 0 : index
      %c0_137 = arith.constant 0 : index
      %377 = vector.load %arg8[%376, %c0_136, %c0_137] : memref<8x8x128xf32, #tpu.memory_space<vmem>>, vector<1x8x128xf32>
      %378 = vector.shape_cast %377 : vector<1x8x128xf32> to vector<8x128xf32>
      %379 = vector.shape_cast %375 : vector<8x128xf32> to vector<1x8x128xf32>
      tpu.vector_store %arg8[%376, %c0_136, %c0_137], %379 {strides = array<i32>} : memref<8x8x128xf32, #tpu.memory_space<vmem>>, vector<1x8x128xf32>,
      %c6_i32 = arith.constant 6 : i32
      %cst_138 = arith.constant dense<0.000000e+00> : vector<8x384xf32>
      %380 = tpu.matmul %353, %3, %cst_138 {dimension_numbers = #tpu.dot_dimension_numbers<[1], [0], [0], [1], [0, 0, 1, 1], [], []>} : vector<8x128xf32>, vector<128x384xf32>, vector<8x384xf32> -> vector<8x384xf32>
      %381 = arith.index_cast %c6_i32 : i32 to index
      %c0_139 = arith.constant 0 : index
      %c0_140 = arith.constant 0 : index
      %c0_141 = arith.constant 0 : index
      %382 = vector.load %arg2[%381, %c0_139, %c0_140, %c0_141] : memref<8x3x8x128xf32, #tpu.memory_space<vmem>>, vector<1x1x8x128xf32>
      %383 = vector.shape_cast %382 : vector<1x1x8x128xf32> to vector<8x128xf32>
      %384 = arith.index_cast %c6_i32 : i32 to index
      %c1_142 = arith.constant 1 : index
      %c0_143 = arith.constant 0 : index
      %c0_144 = arith.constant 0 : index
      %385 = vector.load %arg2[%384, %c1_142, %c0_143, %c0_144] : memref<8x3x8x128xf32, #tpu.memory_space<vmem>>, vector<1x1x8x128xf32>
      %386 = vector.shape_cast %385 : vector<1x1x8x128xf32> to vector<8x128xf32>
      %387 = arith.index_cast %c6_i32 : i32 to index
      %c2_145 = arith.constant 2 : index
      %c0_146 = arith.constant 0 : index
      %c0_147 = arith.constant 0 : index
      %388 = vector.load %arg2[%387, %c2_145, %c0_146, %c0_147] : memref<8x3x8x128xf32, #tpu.memory_space<vmem>>, vector<1x1x8x128xf32>
      %389 = vector.shape_cast %388 : vector<1x1x8x128xf32> to vector<8x128xf32>
      %390 = vector.extract_strided_slice %380 {offsets = [0, 0], sizes = [8, 128], strides = [1, 1]} : vector<8x384xf32> to vector<8x128xf32>
      %391 = arith.addf %383, %390 : vector<8x128xf32>
      %392 = arith.negf %391 : vector<8x128xf32>
      %393 = math.exp %392 : vector<8x128xf32>
      %cst_148 = arith.constant 1.000000e+00 : f32
      %394 = vector.broadcast %cst_148 : f32 to vector<8x128xf32>
      %395 = arith.addf %394, %393 : vector<8x128xf32>
      %396 = arith.divf %394, %395 : vector<8x128xf32>
      %397 = vector.extract_strided_slice %380 {offsets = [0, 128], sizes = [8, 128], strides = [1, 1]} : vector<8x384xf32> to vector<8x128xf32>
      %398 = arith.addf %386, %397 : vector<8x128xf32>
      %399 = arith.negf %398 : vector<8x128xf32>
      %400 = math.exp %399 : vector<8x128xf32>
      %cst_149 = arith.constant 1.000000e+00 : f32
      %401 = vector.broadcast %cst_149 : f32 to vector<8x128xf32>
      %402 = arith.addf %401, %400 : vector<8x128xf32>
      %403 = arith.divf %401, %402 : vector<8x128xf32>
      %404 = vector.extract_strided_slice %380 {offsets = [0, 256], sizes = [8, 128], strides = [1, 1]} : vector<8x384xf32> to vector<8x128xf32>
      %405 = arith.addf %404, %6 : vector<8x128xf32>
      %406 = arith.mulf %396, %405 : vector<8x128xf32>
      %407 = arith.addf %389, %406 : vector<8x128xf32>
      %408 = math.tanh %407 : vector<8x128xf32>
      %cst_150 = arith.constant 1.000000e+00 : f32
      %409 = vector.broadcast %cst_150 : f32 to vector<8x128xf32>
      %410 = arith.subf %409, %403 : vector<8x128xf32>
      %411 = arith.mulf %410, %408 : vector<8x128xf32>
      %412 = arith.mulf %403, %353 : vector<8x128xf32>
      %413 = arith.addf %411, %412 : vector<8x128xf32>
      %cst_151 = arith.constant dense<0.000000e+00> : vector<8xf32>
      %414 = vector.multi_reduction <add>, %413, %cst_151 [1] : vector<8x128xf32> to vector<8xf32>
      %415 = vector.shape_cast %414 : vector<8xf32> to vector<8x1xf32>
      %cst_152 = arith.constant 3.125000e-02 : f32
      %416 = vector.broadcast %cst_152 : f32 to vector<8x1xf32>
      %417 = arith.mulf %415, %416 : vector<8x1xf32>
      %418 = arith.mulf %413, %413 : vector<8x128xf32>
      %cst_153 = arith.constant dense<0.000000e+00> : vector<8xf32>
      %419 = vector.multi_reduction <add>, %418, %cst_153 [1] : vector<8x128xf32> to vector<8xf32>
      %420 = vector.shape_cast %419 : vector<8xf32> to vector<8x1xf32>
      %cst_154 = arith.constant 3.125000e-02 : f32
      %421 = vector.broadcast %cst_154 : f32 to vector<8x1xf32>
      %422 = arith.mulf %420, %421 : vector<8x1xf32>
      %423 = arith.mulf %417, %417 : vector<8x1xf32>
      %424 = arith.subf %422, %423 : vector<8x1xf32>
      %cst_155 = arith.constant 0.000000e+00 : f32
      %425 = vector.broadcast %cst_155 : f32 to vector<8x1xf32>
      %426 = arith.maximumf %424, %425 : vector<8x1xf32>
      %427 = vector.broadcast %417 : vector<8x1xf32> to vector<8x128xf32>
      %428 = arith.subf %413, %427 : vector<8x128xf32>
      %cst_156 = arith.constant 9.99999974E-6 : f32
      %429 = vector.broadcast %cst_156 : f32 to vector<8x1xf32>
      %430 = arith.addf %426, %429 : vector<8x1xf32>
      %431 = math.rsqrt %430 : vector<8x1xf32>
      %432 = vector.broadcast %431 : vector<8x1xf32> to vector<8x128xf32>
      %433 = arith.mulf %428, %432 : vector<8x128xf32>
      %434 = arith.mulf %433, %9 : vector<8x128xf32>
      %435 = arith.addf %434, %12 : vector<8x128xf32>
      %436 = arith.index_cast %c6_i32 : i32 to index
      %c0_157 = arith.constant 0 : index
      %c0_158 = arith.constant 0 : index
      %437 = vector.load %arg8[%436, %c0_157, %c0_158] : memref<8x8x128xf32, #tpu.memory_space<vmem>>, vector<1x8x128xf32>
      %438 = vector.shape_cast %437 : vector<1x8x128xf32> to vector<8x128xf32>
      %439 = vector.shape_cast %435 : vector<8x128xf32> to vector<1x8x128xf32>
      tpu.vector_store %arg8[%436, %c0_157, %c0_158], %439 {strides = array<i32>} : memref<8x8x128xf32, #tpu.memory_space<vmem>>, vector<1x8x128xf32>,
      %c7_i32 = arith.constant 7 : i32
      %cst_159 = arith.constant dense<0.000000e+00> : vector<8x384xf32>
      %440 = tpu.matmul %413, %3, %cst_159 {dimension_numbers = #tpu.dot_dimension_numbers<[1], [0], [0], [1], [0, 0, 1, 1], [], []>} : vector<8x128xf32>, vector<128x384xf32>, vector<8x384xf32> -> vector<8x384xf32>
      %441 = arith.index_cast %c7_i32 : i32 to index
      %c0_160 = arith.constant 0 : index
      %c0_161 = arith.constant 0 : index
      %c0_162 = arith.constant 0 : index
      %442 = vector.load %arg2[%441, %c0_160, %c0_161, %c0_162] : memref<8x3x8x128xf32, #tpu.memory_space<vmem>>, vector<1x1x8x128xf32>
      %443 = vector.shape_cast %442 : vector<1x1x8x128xf32> to vector<8x128xf32>
      %444 = arith.index_cast %c7_i32 : i32 to index
      %c1_163 = arith.constant 1 : index
      %c0_164 = arith.constant 0 : index
      %c0_165 = arith.constant 0 : index
      %445 = vector.load %arg2[%444, %c1_163, %c0_164, %c0_165] : memref<8x3x8x128xf32, #tpu.memory_space<vmem>>, vector<1x1x8x128xf32>
      %446 = vector.shape_cast %445 : vector<1x1x8x128xf32> to vector<8x128xf32>
      %447 = arith.index_cast %c7_i32 : i32 to index
      %c2_166 = arith.constant 2 : index
      %c0_167 = arith.constant 0 : index
      %c0_168 = arith.constant 0 : index
      %448 = vector.load %arg2[%447, %c2_166, %c0_167, %c0_168] : memref<8x3x8x128xf32, #tpu.memory_space<vmem>>, vector<1x1x8x128xf32>
      %449 = vector.shape_cast %448 : vector<1x1x8x128xf32> to vector<8x128xf32>
      %450 = vector.extract_strided_slice %440 {offsets = [0, 0], sizes = [8, 128], strides = [1, 1]} : vector<8x384xf32> to vector<8x128xf32>
      %451 = arith.addf %443, %450 : vector<8x128xf32>
      %452 = arith.negf %451 : vector<8x128xf32>
      %453 = math.exp %452 : vector<8x128xf32>
      %cst_169 = arith.constant 1.000000e+00 : f32
      %454 = vector.broadcast %cst_169 : f32 to vector<8x128xf32>
      %455 = arith.addf %454, %453 : vector<8x128xf32>
      %456 = arith.divf %454, %455 : vector<8x128xf32>
      %457 = vector.extract_strided_slice %440 {offsets = [0, 128], sizes = [8, 128], strides = [1, 1]} : vector<8x384xf32> to vector<8x128xf32>
      %458 = arith.addf %446, %457 : vector<8x128xf32>
      %459 = arith.negf %458 : vector<8x128xf32>
      %460 = math.exp %459 : vector<8x128xf32>
      %cst_170 = arith.constant 1.000000e+00 : f32
      %461 = vector.broadcast %cst_170 : f32 to vector<8x128xf32>
      %462 = arith.addf %461, %460 : vector<8x128xf32>
      %463 = arith.divf %461, %462 : vector<8x128xf32>
      %464 = vector.extract_strided_slice %440 {offsets = [0, 256], sizes = [8, 128], strides = [1, 1]} : vector<8x384xf32> to vector<8x128xf32>
      %465 = arith.addf %464, %6 : vector<8x128xf32>
      %466 = arith.mulf %456, %465 : vector<8x128xf32>
      %467 = arith.addf %449, %466 : vector<8x128xf32>
      %468 = math.tanh %467 : vector<8x128xf32>
      %cst_171 = arith.constant 1.000000e+00 : f32
      %469 = vector.broadcast %cst_171 : f32 to vector<8x128xf32>
      %470 = arith.subf %469, %463 : vector<8x128xf32>
      %471 = arith.mulf %470, %468 : vector<8x128xf32>
      %472 = arith.mulf %463, %413 : vector<8x128xf32>
      %473 = arith.addf %471, %472 : vector<8x128xf32>
      %cst_172 = arith.constant dense<0.000000e+00> : vector<8xf32>
      %474 = vector.multi_reduction <add>, %473, %cst_172 [1] : vector<8x128xf32> to vector<8xf32>
      %475 = vector.shape_cast %474 : vector<8xf32> to vector<8x1xf32>
      %cst_173 = arith.constant 3.125000e-02 : f32
      %476 = vector.broadcast %cst_173 : f32 to vector<8x1xf32>
      %477 = arith.mulf %475, %476 : vector<8x1xf32>
      %478 = arith.mulf %473, %473 : vector<8x128xf32>
      %cst_174 = arith.constant dense<0.000000e+00> : vector<8xf32>
      %479 = vector.multi_reduction <add>, %478, %cst_174 [1] : vector<8x128xf32> to vector<8xf32>
      %480 = vector.shape_cast %479 : vector<8xf32> to vector<8x1xf32>
      %cst_175 = arith.constant 3.125000e-02 : f32
      %481 = vector.broadcast %cst_175 : f32 to vector<8x1xf32>
      %482 = arith.mulf %480, %481 : vector<8x1xf32>
      %483 = arith.mulf %477, %477 : vector<8x1xf32>
      %484 = arith.subf %482, %483 : vector<8x1xf32>
      %cst_176 = arith.constant 0.000000e+00 : f32
      %485 = vector.broadcast %cst_176 : f32 to vector<8x1xf32>
      %486 = arith.maximumf %484, %485 : vector<8x1xf32>
      %487 = vector.broadcast %477 : vector<8x1xf32> to vector<8x128xf32>
      %488 = arith.subf %473, %487 : vector<8x128xf32>
      %cst_177 = arith.constant 9.99999974E-6 : f32
      %489 = vector.broadcast %cst_177 : f32 to vector<8x1xf32>
      %490 = arith.addf %486, %489 : vector<8x1xf32>
      %491 = math.rsqrt %490 : vector<8x1xf32>
      %492 = vector.broadcast %491 : vector<8x1xf32> to vector<8x128xf32>
      %493 = arith.mulf %488, %492 : vector<8x128xf32>
      %494 = arith.mulf %493, %9 : vector<8x128xf32>
      %495 = arith.addf %494, %12 : vector<8x128xf32>
      %496 = arith.index_cast %c7_i32 : i32 to index
      %c0_178 = arith.constant 0 : index
      %c0_179 = arith.constant 0 : index
      %497 = vector.load %arg8[%496, %c0_178, %c0_179] : memref<8x8x128xf32, #tpu.memory_space<vmem>>, vector<1x8x128xf32>
      %498 = vector.shape_cast %497 : vector<1x8x128xf32> to vector<8x128xf32>
      %499 = vector.shape_cast %495 : vector<8x128xf32> to vector<1x8x128xf32>
      tpu.vector_store %arg8[%496, %c0_178, %c0_179], %499 {strides = array<i32>} : memref<8x8x128xf32, #tpu.memory_space<vmem>>, vector<1x8x128xf32>,
      %c8_i32 = arith.constant 8 : i32
      %c0_180 = arith.constant 0 : index
      %c0_181 = arith.constant 0 : index
      %500 = vector.load %arg10[%c0_180, %c0_181] : memref<8x128xf32, #tpu.memory_space<vmem>>, vector<8x128xf32>
      tpu.vector_store %arg10[%c0_180, %c0_181], %473 {strides = array<i32>} : memref<8x128xf32, #tpu.memory_space<vmem>>, vector<8x128xf32>,
    } else {
    }
    %c1_i32_9 = arith.constant 1 : i32
    %16 = arith.cmpi eq, %arg1, %c1_i32_9 : i32
    %17 = arith.extui %16 : i1 to i32
    %c0_i32_10 = arith.constant 0 : i32
    %18 = arith.cmpi ne, %17, %c0_i32_10 : i32
    scf.if %18 {
      %c0_11 = arith.constant 0 : index
      %c0_12 = arith.constant 0 : index
      %19 = vector.load %arg10[%c0_11, %c0_12] : memref<8x128xf32, #tpu.memory_space<vmem>>, vector<8x128xf32>
      %c0_i32_13 = arith.constant 0 : i32
      %cst = arith.constant dense<0.000000e+00> : vector<8x384xf32>
      %20 = tpu.matmul %19, %3, %cst {dimension_numbers = #tpu.dot_dimension_numbers<[1], [0], [0], [1], [0, 0, 1, 1], [], []>} : vector<8x128xf32>, vector<128x384xf32>, vector<8x384xf32> -> vector<8x384xf32>
      %21 = arith.index_cast %c0_i32_13 : i32 to index
      %c0_14 = arith.constant 0 : index
      %c0_15 = arith.constant 0 : index
      %c0_16 = arith.constant 0 : index
      %22 = vector.load %arg2[%21, %c0_14, %c0_15, %c0_16] : memref<8x3x8x128xf32, #tpu.memory_space<vmem>>, vector<1x1x8x128xf32>
      %23 = vector.shape_cast %22 : vector<1x1x8x128xf32> to vector<8x128xf32>
      %24 = arith.index_cast %c0_i32_13 : i32 to index
      %c1 = arith.constant 1 : index
      %c0_17 = arith.constant 0 : index
      %c0_18 = arith.constant 0 : index
      %25 = vector.load %arg2[%24, %c1, %c0_17, %c0_18] : memref<8x3x8x128xf32, #tpu.memory_space<vmem>>, vector<1x1x8x128xf32>
      %26 = vector.shape_cast %25 : vector<1x1x8x128xf32> to vector<8x128xf32>
      %27 = arith.index_cast %c0_i32_13 : i32 to index
      %c2 = arith.constant 2 : index
      %c0_19 = arith.constant 0 : index
      %c0_20 = arith.constant 0 : index
      %28 = vector.load %arg2[%27, %c2, %c0_19, %c0_20] : memref<8x3x8x128xf32, #tpu.memory_space<vmem>>, vector<1x1x8x128xf32>
      %29 = vector.shape_cast %28 : vector<1x1x8x128xf32> to vector<8x128xf32>
      %30 = vector.extract_strided_slice %20 {offsets = [0, 0], sizes = [8, 128], strides = [1, 1]} : vector<8x384xf32> to vector<8x128xf32>
      %31 = arith.addf %23, %30 : vector<8x128xf32>
      %32 = arith.negf %31 : vector<8x128xf32>
      %33 = math.exp %32 : vector<8x128xf32>
      %cst_21 = arith.constant 1.000000e+00 : f32
      %34 = vector.broadcast %cst_21 : f32 to vector<8x128xf32>
      %35 = arith.addf %34, %33 : vector<8x128xf32>
      %36 = arith.divf %34, %35 : vector<8x128xf32>
      %37 = vector.extract_strided_slice %20 {offsets = [0, 128], sizes = [8, 128], strides = [1, 1]} : vector<8x384xf32> to vector<8x128xf32>
      %38 = arith.addf %26, %37 : vector<8x128xf32>
      %39 = arith.negf %38 : vector<8x128xf32>
      %40 = math.exp %39 : vector<8x128xf32>
      %cst_22 = arith.constant 1.000000e+00 : f32
      %41 = vector.broadcast %cst_22 : f32 to vector<8x128xf32>
      %42 = arith.addf %41, %40 : vector<8x128xf32>
      %43 = arith.divf %41, %42 : vector<8x128xf32>
      %44 = vector.extract_strided_slice %20 {offsets = [0, 256], sizes = [8, 128], strides = [1, 1]} : vector<8x384xf32> to vector<8x128xf32>
      %45 = arith.addf %44, %6 : vector<8x128xf32>
      %46 = arith.mulf %36, %45 : vector<8x128xf32>
      %47 = arith.addf %29, %46 : vector<8x128xf32>
      %48 = math.tanh %47 : vector<8x128xf32>
      %cst_23 = arith.constant 1.000000e+00 : f32
      %49 = vector.broadcast %cst_23 : f32 to vector<8x128xf32>
      %50 = arith.subf %49, %43 : vector<8x128xf32>
      %51 = arith.mulf %50, %48 : vector<8x128xf32>
      %52 = arith.mulf %43, %19 : vector<8x128xf32>
      %53 = arith.addf %51, %52 : vector<8x128xf32>
      %cst_24 = arith.constant dense<0.000000e+00> : vector<8xf32>
      %54 = vector.multi_reduction <add>, %53, %cst_24 [1] : vector<8x128xf32> to vector<8xf32>
      %55 = vector.shape_cast %54 : vector<8xf32> to vector<8x1xf32>
      %cst_25 = arith.constant 3.125000e-02 : f32
      %56 = vector.broadcast %cst_25 : f32 to vector<8x1xf32>
      %57 = arith.mulf %55, %56 : vector<8x1xf32>
      %58 = arith.mulf %53, %53 : vector<8x128xf32>
      %cst_26 = arith.constant dense<0.000000e+00> : vector<8xf32>
      %59 = vector.multi_reduction <add>, %58, %cst_26 [1] : vector<8x128xf32> to vector<8xf32>
      %60 = vector.shape_cast %59 : vector<8xf32> to vector<8x1xf32>
      %cst_27 = arith.constant 3.125000e-02 : f32
      %61 = vector.broadcast %cst_27 : f32 to vector<8x1xf32>
      %62 = arith.mulf %60, %61 : vector<8x1xf32>
      %63 = arith.mulf %57, %57 : vector<8x1xf32>
      %64 = arith.subf %62, %63 : vector<8x1xf32>
      %cst_28 = arith.constant 0.000000e+00 : f32
      %65 = vector.broadcast %cst_28 : f32 to vector<8x1xf32>
      %66 = arith.maximumf %64, %65 : vector<8x1xf32>
      %67 = vector.broadcast %57 : vector<8x1xf32> to vector<8x128xf32>
      %68 = arith.subf %53, %67 : vector<8x128xf32>
      %cst_29 = arith.constant 9.99999974E-6 : f32
      %69 = vector.broadcast %cst_29 : f32 to vector<8x1xf32>
      %70 = arith.addf %66, %69 : vector<8x1xf32>
      %71 = math.rsqrt %70 : vector<8x1xf32>
      %72 = vector.broadcast %71 : vector<8x1xf32> to vector<8x128xf32>
      %73 = arith.mulf %68, %72 : vector<8x128xf32>
      %74 = arith.mulf %73, %9 : vector<8x128xf32>
      %75 = arith.addf %74, %12 : vector<8x128xf32>
      %76 = arith.index_cast %c0_i32_13 : i32 to index
      %c0_30 = arith.constant 0 : index
      %c0_31 = arith.constant 0 : index
      %77 = vector.load %arg8[%76, %c0_30, %c0_31] : memref<8x8x128xf32, #tpu.memory_space<vmem>>, vector<1x8x128xf32>
      %78 = vector.shape_cast %77 : vector<1x8x128xf32> to vector<8x128xf32>
      %79 = vector.shape_cast %75 : vector<8x128xf32> to vector<1x8x128xf32>
      tpu.vector_store %arg8[%76, %c0_30, %c0_31], %79 {strides = array<i32>} : memref<8x8x128xf32, #tpu.memory_space<vmem>>, vector<1x8x128xf32>,
      %c1_i32_32 = arith.constant 1 : i32
      %cst_33 = arith.constant dense<0.000000e+00> : vector<8x384xf32>
      %80 = tpu.matmul %53, %3, %cst_33 {dimension_numbers = #tpu.dot_dimension_numbers<[1], [0], [0], [1], [0, 0, 1, 1], [], []>} : vector<8x128xf32>, vector<128x384xf32>, vector<8x384xf32> -> vector<8x384xf32>
      %81 = arith.index_cast %c1_i32_32 : i32 to index
      %c0_34 = arith.constant 0 : index
      %c0_35 = arith.constant 0 : index
      %c0_36 = arith.constant 0 : index
      %82 = vector.load %arg2[%81, %c0_34, %c0_35, %c0_36] : memref<8x3x8x128xf32, #tpu.memory_space<vmem>>, vector<1x1x8x128xf32>
      %83 = vector.shape_cast %82 : vector<1x1x8x128xf32> to vector<8x128xf32>
      %84 = arith.index_cast %c1_i32_32 : i32 to index
      %c1_37 = arith.constant 1 : index
      %c0_38 = arith.constant 0 : index
      %c0_39 = arith.constant 0 : index
      %85 = vector.load %arg2[%84, %c1_37, %c0_38, %c0_39] : memref<8x3x8x128xf32, #tpu.memory_space<vmem>>, vector<1x1x8x128xf32>
      %86 = vector.shape_cast %85 : vector<1x1x8x128xf32> to vector<8x128xf32>
      %87 = arith.index_cast %c1_i32_32 : i32 to index
      %c2_40 = arith.constant 2 : index
      %c0_41 = arith.constant 0 : index
      %c0_42 = arith.constant 0 : index
      %88 = vector.load %arg2[%87, %c2_40, %c0_41, %c0_42] : memref<8x3x8x128xf32, #tpu.memory_space<vmem>>, vector<1x1x8x128xf32>
      %89 = vector.shape_cast %88 : vector<1x1x8x128xf32> to vector<8x128xf32>
      %90 = vector.extract_strided_slice %80 {offsets = [0, 0], sizes = [8, 128], strides = [1, 1]} : vector<8x384xf32> to vector<8x128xf32>
      %91 = arith.addf %83, %90 : vector<8x128xf32>
      %92 = arith.negf %91 : vector<8x128xf32>
      %93 = math.exp %92 : vector<8x128xf32>
      %cst_43 = arith.constant 1.000000e+00 : f32
      %94 = vector.broadcast %cst_43 : f32 to vector<8x128xf32>
      %95 = arith.addf %94, %93 : vector<8x128xf32>
      %96 = arith.divf %94, %95 : vector<8x128xf32>
      %97 = vector.extract_strided_slice %80 {offsets = [0, 128], sizes = [8, 128], strides = [1, 1]} : vector<8x384xf32> to vector<8x128xf32>
      %98 = arith.addf %86, %97 : vector<8x128xf32>
      %99 = arith.negf %98 : vector<8x128xf32>
      %100 = math.exp %99 : vector<8x128xf32>
      %cst_44 = arith.constant 1.000000e+00 : f32
      %101 = vector.broadcast %cst_44 : f32 to vector<8x128xf32>
      %102 = arith.addf %101, %100 : vector<8x128xf32>
      %103 = arith.divf %101, %102 : vector<8x128xf32>
      %104 = vector.extract_strided_slice %80 {offsets = [0, 256], sizes = [8, 128], strides = [1, 1]} : vector<8x384xf32> to vector<8x128xf32>
      %105 = arith.addf %104, %6 : vector<8x128xf32>
      %106 = arith.mulf %96, %105 : vector<8x128xf32>
      %107 = arith.addf %89, %106 : vector<8x128xf32>
      %108 = math.tanh %107 : vector<8x128xf32>
      %cst_45 = arith.constant 1.000000e+00 : f32
      %109 = vector.broadcast %cst_45 : f32 to vector<8x128xf32>
      %110 = arith.subf %109, %103 : vector<8x128xf32>
      %111 = arith.mulf %110, %108 : vector<8x128xf32>
      %112 = arith.mulf %103, %53 : vector<8x128xf32>
      %113 = arith.addf %111, %112 : vector<8x128xf32>
      %cst_46 = arith.constant dense<0.000000e+00> : vector<8xf32>
      %114 = vector.multi_reduction <add>, %113, %cst_46 [1] : vector<8x128xf32> to vector<8xf32>
      %115 = vector.shape_cast %114 : vector<8xf32> to vector<8x1xf32>
      %cst_47 = arith.constant 3.125000e-02 : f32
      %116 = vector.broadcast %cst_47 : f32 to vector<8x1xf32>
      %117 = arith.mulf %115, %116 : vector<8x1xf32>
      %118 = arith.mulf %113, %113 : vector<8x128xf32>
      %cst_48 = arith.constant dense<0.000000e+00> : vector<8xf32>
      %119 = vector.multi_reduction <add>, %118, %cst_48 [1] : vector<8x128xf32> to vector<8xf32>
      %120 = vector.shape_cast %119 : vector<8xf32> to vector<8x1xf32>
      %cst_49 = arith.constant 3.125000e-02 : f32
      %121 = vector.broadcast %cst_49 : f32 to vector<8x1xf32>
      %122 = arith.mulf %120, %121 : vector<8x1xf32>
      %123 = arith.mulf %117, %117 : vector<8x1xf32>
      %124 = arith.subf %122, %123 : vector<8x1xf32>
      %cst_50 = arith.constant 0.000000e+00 : f32
      %125 = vector.broadcast %cst_50 : f32 to vector<8x1xf32>
      %126 = arith.maximumf %124, %125 : vector<8x1xf32>
      %127 = vector.broadcast %117 : vector<8x1xf32> to vector<8x128xf32>
      %128 = arith.subf %113, %127 : vector<8x128xf32>
      %cst_51 = arith.constant 9.99999974E-6 : f32
      %129 = vector.broadcast %cst_51 : f32 to vector<8x1xf32>
      %130 = arith.addf %126, %129 : vector<8x1xf32>
      %131 = math.rsqrt %130 : vector<8x1xf32>
      %132 = vector.broadcast %131 : vector<8x1xf32> to vector<8x128xf32>
      %133 = arith.mulf %128, %132 : vector<8x128xf32>
      %134 = arith.mulf %133, %9 : vector<8x128xf32>
      %135 = arith.addf %134, %12 : vector<8x128xf32>
      %136 = arith.index_cast %c1_i32_32 : i32 to index
      %c0_52 = arith.constant 0 : index
      %c0_53 = arith.constant 0 : index
      %137 = vector.load %arg8[%136, %c0_52, %c0_53] : memref<8x8x128xf32, #tpu.memory_space<vmem>>, vector<1x8x128xf32>
      %138 = vector.shape_cast %137 : vector<1x8x128xf32> to vector<8x128xf32>
      %139 = vector.shape_cast %135 : vector<8x128xf32> to vector<1x8x128xf32>
      tpu.vector_store %arg8[%136, %c0_52, %c0_53], %139 {strides = array<i32>} : memref<8x8x128xf32, #tpu.memory_space<vmem>>, vector<1x8x128xf32>,
      %c2_i32 = arith.constant 2 : i32
      %cst_54 = arith.constant dense<0.000000e+00> : vector<8x384xf32>
      %140 = tpu.matmul %113, %3, %cst_54 {dimension_numbers = #tpu.dot_dimension_numbers<[1], [0], [0], [1], [0, 0, 1, 1], [], []>} : vector<8x128xf32>, vector<128x384xf32>, vector<8x384xf32> -> vector<8x384xf32>
      %141 = arith.index_cast %c2_i32 : i32 to index
      %c0_55 = arith.constant 0 : index
      %c0_56 = arith.constant 0 : index
      %c0_57 = arith.constant 0 : index
      %142 = vector.load %arg2[%141, %c0_55, %c0_56, %c0_57] : memref<8x3x8x128xf32, #tpu.memory_space<vmem>>, vector<1x1x8x128xf32>
      %143 = vector.shape_cast %142 : vector<1x1x8x128xf32> to vector<8x128xf32>
      %144 = arith.index_cast %c2_i32 : i32 to index
      %c1_58 = arith.constant 1 : index
      %c0_59 = arith.constant 0 : index
      %c0_60 = arith.constant 0 : index
      %145 = vector.load %arg2[%144, %c1_58, %c0_59, %c0_60] : memref<8x3x8x128xf32, #tpu.memory_space<vmem>>, vector<1x1x8x128xf32>
      %146 = vector.shape_cast %145 : vector<1x1x8x128xf32> to vector<8x128xf32>
      %147 = arith.index_cast %c2_i32 : i32 to index
      %c2_61 = arith.constant 2 : index
      %c0_62 = arith.constant 0 : index
      %c0_63 = arith.constant 0 : index
      %148 = vector.load %arg2[%147, %c2_61, %c0_62, %c0_63] : memref<8x3x8x128xf32, #tpu.memory_space<vmem>>, vector<1x1x8x128xf32>
      %149 = vector.shape_cast %148 : vector<1x1x8x128xf32> to vector<8x128xf32>
      %150 = vector.extract_strided_slice %140 {offsets = [0, 0], sizes = [8, 128], strides = [1, 1]} : vector<8x384xf32> to vector<8x128xf32>
      %151 = arith.addf %143, %150 : vector<8x128xf32>
      %152 = arith.negf %151 : vector<8x128xf32>
      %153 = math.exp %152 : vector<8x128xf32>
      %cst_64 = arith.constant 1.000000e+00 : f32
      %154 = vector.broadcast %cst_64 : f32 to vector<8x128xf32>
      %155 = arith.addf %154, %153 : vector<8x128xf32>
      %156 = arith.divf %154, %155 : vector<8x128xf32>
      %157 = vector.extract_strided_slice %140 {offsets = [0, 128], sizes = [8, 128], strides = [1, 1]} : vector<8x384xf32> to vector<8x128xf32>
      %158 = arith.addf %146, %157 : vector<8x128xf32>
      %159 = arith.negf %158 : vector<8x128xf32>
      %160 = math.exp %159 : vector<8x128xf32>
      %cst_65 = arith.constant 1.000000e+00 : f32
      %161 = vector.broadcast %cst_65 : f32 to vector<8x128xf32>
      %162 = arith.addf %161, %160 : vector<8x128xf32>
      %163 = arith.divf %161, %162 : vector<8x128xf32>
      %164 = vector.extract_strided_slice %140 {offsets = [0, 256], sizes = [8, 128], strides = [1, 1]} : vector<8x384xf32> to vector<8x128xf32>
      %165 = arith.addf %164, %6 : vector<8x128xf32>
      %166 = arith.mulf %156, %165 : vector<8x128xf32>
      %167 = arith.addf %149, %166 : vector<8x128xf32>
      %168 = math.tanh %167 : vector<8x128xf32>
      %cst_66 = arith.constant 1.000000e+00 : f32
      %169 = vector.broadcast %cst_66 : f32 to vector<8x128xf32>
      %170 = arith.subf %169, %163 : vector<8x128xf32>
      %171 = arith.mulf %170, %168 : vector<8x128xf32>
      %172 = arith.mulf %163, %113 : vector<8x128xf32>
      %173 = arith.addf %171, %172 : vector<8x128xf32>
      %cst_67 = arith.constant dense<0.000000e+00> : vector<8xf32>
      %174 = vector.multi_reduction <add>, %173, %cst_67 [1] : vector<8x128xf32> to vector<8xf32>
      %175 = vector.shape_cast %174 : vector<8xf32> to vector<8x1xf32>
      %cst_68 = arith.constant 3.125000e-02 : f32
      %176 = vector.broadcast %cst_68 : f32 to vector<8x1xf32>
      %177 = arith.mulf %175, %176 : vector<8x1xf32>
      %178 = arith.mulf %173, %173 : vector<8x128xf32>
      %cst_69 = arith.constant dense<0.000000e+00> : vector<8xf32>
      %179 = vector.multi_reduction <add>, %178, %cst_69 [1] : vector<8x128xf32> to vector<8xf32>
      %180 = vector.shape_cast %179 : vector<8xf32> to vector<8x1xf32>
      %cst_70 = arith.constant 3.125000e-02 : f32
      %181 = vector.broadcast %cst_70 : f32 to vector<8x1xf32>
      %182 = arith.mulf %180, %181 : vector<8x1xf32>
      %183 = arith.mulf %177, %177 : vector<8x1xf32>
      %184 = arith.subf %182, %183 : vector<8x1xf32>
      %cst_71 = arith.constant 0.000000e+00 : f32
      %185 = vector.broadcast %cst_71 : f32 to vector<8x1xf32>
      %186 = arith.maximumf %184, %185 : vector<8x1xf32>
      %187 = vector.broadcast %177 : vector<8x1xf32> to vector<8x128xf32>
      %188 = arith.subf %173, %187 : vector<8x128xf32>
      %cst_72 = arith.constant 9.99999974E-6 : f32
      %189 = vector.broadcast %cst_72 : f32 to vector<8x1xf32>
      %190 = arith.addf %186, %189 : vector<8x1xf32>
      %191 = math.rsqrt %190 : vector<8x1xf32>
      %192 = vector.broadcast %191 : vector<8x1xf32> to vector<8x128xf32>
      %193 = arith.mulf %188, %192 : vector<8x128xf32>
      %194 = arith.mulf %193, %9 : vector<8x128xf32>
      %195 = arith.addf %194, %12 : vector<8x128xf32>
      %196 = arith.index_cast %c2_i32 : i32 to index
      %c0_73 = arith.constant 0 : index
      %c0_74 = arith.constant 0 : index
      %197 = vector.load %arg8[%196, %c0_73, %c0_74] : memref<8x8x128xf32, #tpu.memory_space<vmem>>, vector<1x8x128xf32>
      %198 = vector.shape_cast %197 : vector<1x8x128xf32> to vector<8x128xf32>
      %199 = vector.shape_cast %195 : vector<8x128xf32> to vector<1x8x128xf32>
      tpu.vector_store %arg8[%196, %c0_73, %c0_74], %199 {strides = array<i32>} : memref<8x8x128xf32, #tpu.memory_space<vmem>>, vector<1x8x128xf32>,
      %c3_i32 = arith.constant 3 : i32
      %cst_75 = arith.constant dense<0.000000e+00> : vector<8x384xf32>
      %200 = tpu.matmul %173, %3, %cst_75 {dimension_numbers = #tpu.dot_dimension_numbers<[1], [0], [0], [1], [0, 0, 1, 1], [], []>} : vector<8x128xf32>, vector<128x384xf32>, vector<8x384xf32> -> vector<8x384xf32>
      %201 = arith.index_cast %c3_i32 : i32 to index
      %c0_76 = arith.constant 0 : index
      %c0_77 = arith.constant 0 : index
      %c0_78 = arith.constant 0 : index
      %202 = vector.load %arg2[%201, %c0_76, %c0_77, %c0_78] : memref<8x3x8x128xf32, #tpu.memory_space<vmem>>, vector<1x1x8x128xf32>
      %203 = vector.shape_cast %202 : vector<1x1x8x128xf32> to vector<8x128xf32>
      %204 = arith.index_cast %c3_i32 : i32 to index
      %c1_79 = arith.constant 1 : index
      %c0_80 = arith.constant 0 : index
      %c0_81 = arith.constant 0 : index
      %205 = vector.load %arg2[%204, %c1_79, %c0_80, %c0_81] : memref<8x3x8x128xf32, #tpu.memory_space<vmem>>, vector<1x1x8x128xf32>
      %206 = vector.shape_cast %205 : vector<1x1x8x128xf32> to vector<8x128xf32>
      %207 = arith.index_cast %c3_i32 : i32 to index
      %c2_82 = arith.constant 2 : index
      %c0_83 = arith.constant 0 : index
      %c0_84 = arith.constant 0 : index
      %208 = vector.load %arg2[%207, %c2_82, %c0_83, %c0_84] : memref<8x3x8x128xf32, #tpu.memory_space<vmem>>, vector<1x1x8x128xf32>
      %209 = vector.shape_cast %208 : vector<1x1x8x128xf32> to vector<8x128xf32>
      %210 = vector.extract_strided_slice %200 {offsets = [0, 0], sizes = [8, 128], strides = [1, 1]} : vector<8x384xf32> to vector<8x128xf32>
      %211 = arith.addf %203, %210 : vector<8x128xf32>
      %212 = arith.negf %211 : vector<8x128xf32>
      %213 = math.exp %212 : vector<8x128xf32>
      %cst_85 = arith.constant 1.000000e+00 : f32
      %214 = vector.broadcast %cst_85 : f32 to vector<8x128xf32>
      %215 = arith.addf %214, %213 : vector<8x128xf32>
      %216 = arith.divf %214, %215 : vector<8x128xf32>
      %217 = vector.extract_strided_slice %200 {offsets = [0, 128], sizes = [8, 128], strides = [1, 1]} : vector<8x384xf32> to vector<8x128xf32>
      %218 = arith.addf %206, %217 : vector<8x128xf32>
      %219 = arith.negf %218 : vector<8x128xf32>
      %220 = math.exp %219 : vector<8x128xf32>
      %cst_86 = arith.constant 1.000000e+00 : f32
      %221 = vector.broadcast %cst_86 : f32 to vector<8x128xf32>
      %222 = arith.addf %221, %220 : vector<8x128xf32>
      %223 = arith.divf %221, %222 : vector<8x128xf32>
      %224 = vector.extract_strided_slice %200 {offsets = [0, 256], sizes = [8, 128], strides = [1, 1]} : vector<8x384xf32> to vector<8x128xf32>
      %225 = arith.addf %224, %6 : vector<8x128xf32>
      %226 = arith.mulf %216, %225 : vector<8x128xf32>
      %227 = arith.addf %209, %226 : vector<8x128xf32>
      %228 = math.tanh %227 : vector<8x128xf32>
      %cst_87 = arith.constant 1.000000e+00 : f32
      %229 = vector.broadcast %cst_87 : f32 to vector<8x128xf32>
      %230 = arith.subf %229, %223 : vector<8x128xf32>
      %231 = arith.mulf %230, %228 : vector<8x128xf32>
      %232 = arith.mulf %223, %173 : vector<8x128xf32>
      %233 = arith.addf %231, %232 : vector<8x128xf32>
      %cst_88 = arith.constant dense<0.000000e+00> : vector<8xf32>
      %234 = vector.multi_reduction <add>, %233, %cst_88 [1] : vector<8x128xf32> to vector<8xf32>
      %235 = vector.shape_cast %234 : vector<8xf32> to vector<8x1xf32>
      %cst_89 = arith.constant 3.125000e-02 : f32
      %236 = vector.broadcast %cst_89 : f32 to vector<8x1xf32>
      %237 = arith.mulf %235, %236 : vector<8x1xf32>
      %238 = arith.mulf %233, %233 : vector<8x128xf32>
      %cst_90 = arith.constant dense<0.000000e+00> : vector<8xf32>
      %239 = vector.multi_reduction <add>, %238, %cst_90 [1] : vector<8x128xf32> to vector<8xf32>
      %240 = vector.shape_cast %239 : vector<8xf32> to vector<8x1xf32>
      %cst_91 = arith.constant 3.125000e-02 : f32
      %241 = vector.broadcast %cst_91 : f32 to vector<8x1xf32>
      %242 = arith.mulf %240, %241 : vector<8x1xf32>
      %243 = arith.mulf %237, %237 : vector<8x1xf32>
      %244 = arith.subf %242, %243 : vector<8x1xf32>
      %cst_92 = arith.constant 0.000000e+00 : f32
      %245 = vector.broadcast %cst_92 : f32 to vector<8x1xf32>
      %246 = arith.maximumf %244, %245 : vector<8x1xf32>
      %247 = vector.broadcast %237 : vector<8x1xf32> to vector<8x128xf32>
      %248 = arith.subf %233, %247 : vector<8x128xf32>
      %cst_93 = arith.constant 9.99999974E-6 : f32
      %249 = vector.broadcast %cst_93 : f32 to vector<8x1xf32>
      %250 = arith.addf %246, %249 : vector<8x1xf32>
      %251 = math.rsqrt %250 : vector<8x1xf32>
      %252 = vector.broadcast %251 : vector<8x1xf32> to vector<8x128xf32>
      %253 = arith.mulf %248, %252 : vector<8x128xf32>
      %254 = arith.mulf %253, %9 : vector<8x128xf32>
      %255 = arith.addf %254, %12 : vector<8x128xf32>
      %256 = arith.index_cast %c3_i32 : i32 to index
      %c0_94 = arith.constant 0 : index
      %c0_95 = arith.constant 0 : index
      %257 = vector.load %arg8[%256, %c0_94, %c0_95] : memref<8x8x128xf32, #tpu.memory_space<vmem>>, vector<1x8x128xf32>
      %258 = vector.shape_cast %257 : vector<1x8x128xf32> to vector<8x128xf32>
      %259 = vector.shape_cast %255 : vector<8x128xf32> to vector<1x8x128xf32>
      tpu.vector_store %arg8[%256, %c0_94, %c0_95], %259 {strides = array<i32>} : memref<8x8x128xf32, #tpu.memory_space<vmem>>, vector<1x8x128xf32>,
      %c4_i32 = arith.constant 4 : i32
      %c0_96 = arith.constant 0 : index
      %c0_97 = arith.constant 0 : index
      %260 = vector.load %arg10[%c0_96, %c0_97] : memref<8x128xf32, #tpu.memory_space<vmem>>, vector<8x128xf32>
      tpu.vector_store %arg10[%c0_96, %c0_97], %233 {strides = array<i32>} : memref<8x128xf32, #tpu.memory_space<vmem>>, vector<8x128xf32>,
      %c0_98 = arith.constant 0 : index
      %c0_99 = arith.constant 0 : index
      %261 = vector.load %arg9[%c0_98, %c0_99] : memref<8x128xf32, #tpu.memory_space<vmem>>, vector<8x128xf32>
      tpu.vector_store %arg9[%c0_98, %c0_99], %233 {strides = array<i32>} : memref<8x128xf32, #tpu.memory_space<vmem>>, vector<8x128xf32>,
    } else {
    }
    return
  }
  func.func @transform_0(%arg0: i32, %arg1: i32) -> (i32, i32, i32, i32) {
    %c0_i32 = arith.constant 0 : i32
    %c0_i32_0 = arith.constant 0 : i32
    %c0_i32_1 = arith.constant 0 : i32
    return %arg1, %c0_i32, %arg0, %c0_i32_0 : i32, i32, i32, i32
  }
  func.func @transform_1(%arg0: i32, %arg1: i32) -> (i32, i32) {
    %c0_i32 = arith.constant 0 : i32
    %c0_i32_0 = arith.constant 0 : i32
    %c0_i32_1 = arith.constant 0 : i32
    return %c0_i32, %c0_i32_0 : i32, i32
  }
  func.func @transform_2(%arg0: i32, %arg1: i32) -> (i32, i32) {
    %c0_i32 = arith.constant 0 : i32
    %c0_i32_0 = arith.constant 0 : i32
    %c0_i32_1 = arith.constant 0 : i32
    return %c0_i32, %c0_i32_0 : i32, i32
  }
  func.func @transform_3(%arg0: i32, %arg1: i32) -> (i32, i32) {
    %c0_i32 = arith.constant 0 : i32
    %c0_i32_0 = arith.constant 0 : i32
    %c0_i32_1 = arith.constant 0 : i32
    return %c0_i32, %c0_i32_0 : i32, i32
  }
  func.func @transform_4(%arg0: i32, %arg1: i32) -> (i32, i32) {
    %c0_i32 = arith.constant 0 : i32
    %c0_i32_0 = arith.constant 0 : i32
    %c0_i32_1 = arith.constant 0 : i32
    return %c0_i32, %c0_i32_0 : i32, i32
  }
  func.func @transform_5(%arg0: i32, %arg1: i32) -> (i32, i32) {
    %c0_i32 = arith.constant 0 : i32
    %c0_i32_0 = arith.constant 0 : i32
    return %arg0, %c0_i32 : i32, i32
  }
  func.func @transform_6(%arg0: i32, %arg1: i32) -> (i32, i32, i32) {
    %c0_i32 = arith.constant 0 : i32
    %c0_i32_0 = arith.constant 0 : i32
    return %arg1, %arg0, %c0_i32 : i32, i32, i32
  }
  func.func @transform_7(%arg0: i32, %arg1: i32) -> (i32, i32) {
    %c0_i32 = arith.constant 0 : i32
    %c0_i32_0 = arith.constant 0 : i32
    return %arg0, %c0_i32 : i32, i32
  }
}

</mosaic_0001>

<bundles_post_ra>
// kernel: tpu_custom_call.1
= control target key start
LH: loop header
LB: loop body
LE: loop exit
PB: predicated region body
PF: predicated region fallthrough
CT: control target
= control target key end

     0   :  { %s5829_s0 = inlined_call_operand.hbm [shape: f32[16,3,8,128], index: 0, kind: input, shape index: {}]   ;;  %s5830_s1 = inlined_call_operand.hbm [shape: f32[128,384], index: 1, kind: input, shape index: {}]   ;;  %s5831_s2 = inlined_call_operand.vmem [shape: f32[1,128], index: 2, kind: input, shape index: {}]   ;;  %s5832_s3 = inlined_call_operand.vmem [shape: f32[1,128], index: 3, kind: input, shape index: {}]   ;;  %s5833_s4 = inlined_call_operand.vmem [shape: f32[1,128], index: 4, kind: input, shape index: {}]   ;;  %s5834_s5 = inlined_call_operand.vmem [shape: f32[8,128], index: 5, kind: input, shape index: {}]   ;;  %s5835_s6 = inlined_call_operand.hbm [shape: f32[16,8,128], index: 6, kind: output, shape index: {0}]   ;;  %s5836_s7 = inlined_call_operand.hbm [shape: f32[8,128], index: 7, kind: output, shape index: {1}]  }
   0x1   :  { %5879 = sst [smem:[#allocation48_spill]] %s5830_s1 }
   0x2   :  { %13 = vsyncpa [#allocation4], 0 }
   0x3   :  { %15 = vsyncpa [#allocation4 + $0x1], 0 }
   0x4   :  { %16 = vsyncpa [#allocation7], 0 }
   0x5   :  { %17 = vsyncpa [#allocation5], 0 }
   0x6   :  { %19 = vsyncpa [#allocation5 + $0x1], 0 }
   0x7   :  { %20 = vsyncpa [#allocation10], 0  ;;  %s4693_s24 = smov 0   ;;  %s4695_s25 = smov 0  }
   0x8   :  { %s4697_s26 = smov 0   ;;  %s4699_s27 = smov 0  }
   0x9   :  { %s4701_s28 = smov 0   ;;  %s4703_s29 = smov 0  }
   0xa LB: > { %s2832_s30 = sadd.s32 4294967295, %s4635_s29   ;;  %s2833_s8 = sadd.s32 4294967294, %s4635_s29   ;;  %s4635_s29 = sphi %s4703_s29, %s26_s29   ;;  %s4631_s28 = sphi %s4701_s28, %s5968_s28   ;;  %s4627_s27 = sphi %s4699_s27, %s5967_s27   ;;  %s4623_s26 = sphi %s4697_s26, %s5966_s26   ;;  %s4619_s25 = sphi %s4695_s25, %s5965_s25   ;;  %s4615_s24 = sphi %s4693_s24, %s5964_s24  }
   0xb   : > { %p60_p0 = scmp.ne.s32.totalorder %s4619_s25, %s4615_s24  ;;  %p4727_p1 = scmp.eq.s32.totalorder %s2832_s30, 0 }
   0xc   : > { %p4731_p2 = scmp.eq.s32.totalorder %s2832_s30, 1  ;;  %p202_p3 = scmp.eq.s32.totalorder %s2833_s8, 1 }
   0xd   : > { %s5880_s9 = scalar_select %p4727_p1, 1, 0 }
   0xe   : > { %s5881_s10 = scalar_select %p4731_p2, 1, 0 }
   0xf   : > { %p4737_p4 = por %p4727_p1, %p60_p0  ;;  %p2834_p5 = scmp.ge.s32.totalorder %s4635_s29, 1 }
  0x10   : > { %p4742_p6 = por %p202_p3, %p60_p0  ;;  %p235_p7 = scmp.lt.s32.totalorder %s4635_s29, 3 }
  0x11   : > { %s5882_s11 = scalar_select %p4737_p4, 1, 0 }
  0x12   : > { %s5883_s12 = scalar_select %p4742_p6, 1, 0 }
  0x13   : > { %p4747_p8 = pnand %p2834_p5, %p235_p7  ;;  %s4637_s14 = smov [#allocation6]  }
  0x14   : > { %5884 = sst [smem:[#allocation15_spill]] %s5883_s12  ;;  %s247_s15 = sshll.u32 %s4637_s14, 4  ;;  %s248_s15 = int_to_ptr.vmem [resolvable:$true] %s247_s15 }
  0x15   : > { %s5885_s13 = scalar_select %p4747_p8, 1, 0 }
  0x16   : > { %p4237_p9 = pneg %p4747_p8  ;;  %s35_s17 = sadd.s32 1, %s4631_s28 }
  0x17   : > { %s5887_s1 = sld [smem:[#allocation48_spill]] }
  0x18   : > { %p4756_p11 = pnand %p4237_p9, %p4727_p1 }
  0x1a   : > { %p4463_p13 = pneg %p4756_p11 }
  0x1d   : > { %s4461_s20 = scalar_lea.hbm %s5887_s1, 6144 }
  0x1e   : > { %p4462_p12 = scmp.ne.s32.totalorder %s5887_s1, %s4461_s20  ;;  %p4468_p5 = scmp.lt.u32.totalorder %s4461_s20, %s5887_s1 }
  0x20   : > { %p4464_p0 = pnand %p4463_p13, %p4462_p12 }
  0x22   : > { %p4465_p3 = pneg %p4464_p0 }
  0x24   : > { %p4470_p7 = pnand %p4468_p5, %p4465_p3 }
  0x26   : > { %4473 = shalt.err (!%p4470_p7)
}
  0x27   : > { %s4474_s8 = scalar_lea.vmem %s248_s15, 6144  ;;  %p4482_p1 = scmp.lt.s32.totalorder %s248_s15, %s248_s15 }
  0x28   : > { %p4475_p9 = scmp.ne.s32.totalorder %s248_s15, %s4474_s8  ;;  %p4483_p4 = scmp.lt.s32.totalorder %s4474_s8, %s4474_s8 }
  0x2a   : > { %p4477_p10 = pnand %p4475_p9, %p4463_p13  ;;  %p4484_p8 = por %p4483_p4, %p4482_p1 }
  0x2c   : > { %p4478_p6 = pneg %p4477_p10 }
  0x2e   : > { %p4485_p2 = pnand %p4484_p8, %p4478_p6 }
  0x30   : > { %4488 = shalt.err (!%p4485_p2)
}
  0x31   : > { %s4638_s14 = smov 384   ;;  %s4639_s18 = smov 24  }
  0x32   : > { %4240 = dma.hbm_to_vmem [thread:$0]  (!%p4756_p11), %s5887_s1, 6144, %s248_s15, [#allocation7], %s4638_s14, %s4638_s14, %s4639_s18  }
  0x33   : > { %p36_p1 = scmp.ge.s32.totalorder %s35_s17, 2  ;;  %s47_s21 = sadd.s32 1, %s4623_s26 }
  0x34   : > { %p54_p2 = scmp.ne.s32.totalorder %s4623_s26, %s4619_s25  ;;  %p55_p4 = scmp.eq.s32.totalorder %s4635_s29, 0 }
  0x35   : > { %s5970_s17 = smov (%p36_p1, %s35_s17), 0  ;;  %p5888_p8 = scmp.ne.s32.totalorder %s5881_s10, 0 }
  0x36   : > { %p56_p6 = por %p55_p4, %p54_p2  ;;  %s42_s23 = ssub.s32 %s4631_s28, %s5970_s17 }
  0x37   : > { %p4785_p10 = por %p5888_p8, %p54_p2  ;;  %p4250_p12 = scmp.lt.s32.totalorder %s4635_s29, 2 }
  0x38   : > { %p45_p13 = scmp.eq.s32.totalorder %s42_s23, 0  ;;  %s277_s16 = sand.u32 1, %s4623_s26  }
  0x39   : > { %s4222_s30 = smul.u32 192, %s277_s16  ;;  %p4797_p11 = pnand %p4250_p12, %p56_p6 }
  0x3a   : > { %s4794_s8 = scalar_select %p45_p13, %s4623_s26, %s47_s21  }
  0x3b   : > { %s4223_s15 = smul.u32 3072, %s4631_s28  ;;  %s281_s14 = scalar_lea.vmem [#allocation3], %s4222_s30 }
  0x3c   : > { %s290_s18 = sshll.u32 %s281_s14, 4  ;;  %s4808_s21 = scalar_lea.sflag [#allocation4], %s277_s16  ;;  %s4806_s18 = int_to_ptr.vmem [resolvable:$true] %s290_s18 }
  0x3d   : > { %s4804_s12 = scalar_lea.hbm %s5829_s0, %s4223_s15  ;;  %p4491_p3 = pneg %p4797_p11 }
  0x3e   : > { %s4489_s23 = scalar_lea.hbm %s4804_s12, 3072  ;;  %s4494_s15 = scalar_lea.hbm %s5829_s0, 6144 }
  0x3f   : > { %p4490_p0 = scmp.ne.s32.totalorder %s4804_s12, %s4489_s23  ;;  %p4495_p9 = scmp.lt.u32.totalorder %s4804_s12, %s5829_s0 }
  0x40   : > { %p4496_p1 = scmp.lt.u32.totalorder %s4494_s15, %s4489_s23  ;;  %p4498_p4 = scmp.lt.u32.totalorder %s4489_s23, %s4804_s12 }
  0x41   : > { %p4492_p5 = pnand %p4491_p3, %p4490_p0 }
  0x42   : > { %p4497_p2 = por %p4496_p1, %p4495_p9 }
  0x43   : > { %p4493_p7 = pneg %p4492_p5 }
  0x44   : > { %p4499_p6 = por %p4498_p4, %p4497_p2 }
  0x46   : > { %p4500_p8 = pnand %p4499_p6, %p4493_p7 }
  0x48   : > { %4503 = shalt.err (!%p4500_p8)
}
  0x49   : > { %s4504_s16 = scalar_lea.vmem %s4806_s18, 3072  ;;  %s4640_s1 = smov [#allocation3]  }
  0x4a   : > { %p4505_p12 = scmp.ne.s32.totalorder %s4806_s18, %s4504_s16  ;;  %s4509_s30 = sshll.u32 %s4640_s1, 4  ;;  %s4510_s30 = int_to_ptr.vmem [resolvable:$false] %s4509_s30 }
  0x4b   : > { %s4511_s14 = scalar_lea.vmem %s4510_s30, 6144  ;;  %p4512_p5 = scmp.lt.s32.totalorder %s4806_s18, %s4510_s30 }
  0x4c   : > { %p4507_p13 = pnand %p4505_p12, %p4491_p3  ;;  %p4513_p9 = scmp.lt.s32.totalorder %s4511_s14, %s4504_s16 }
  0x4e   : > { %p4508_p0 = pneg %p4507_p13  ;;  %p4514_p1 = por %p4513_p9, %p4512_p5 }
  0x50   : > { %p4515_p2 = pnand %p4514_p1, %p4508_p0 }
  0x52   : > { %4518 = shalt.err (!%p4515_p2)
}
  0x53   : > { %s4641_s23 = smov 128   ;;  %s4642_s15 = smov 8  }
  0x54   : > { %4244 = dma.hbm_to_vmem [thread:$0]  (!%p4797_p11), %s4804_s12, 3072, %s4806_s18, %s4808_s21, %s4641_s23, %s4641_s23, %s4642_s15  }
  0x55   : > { %p5891_p3 = scmp.ne.s32.totalorder %s5885_s13, 0 }
  0x57   : > { %302 = sbr.rel (%p5891_p3) target bundleno = 3684 (0xe64), region = 44 }
  0x5e   : > { %s4839_s20 = sand.u32 1, %s4619_s25   ;;  %p5892_p7 = scmp.ne.s32.totalorder %s5882_s11, 0 }
  0x5f   : > { %s4224_s16 = smul.u32 192, %s4839_s20  ;;  %s305_s1 = scalar_lea.sflag [#allocation4], %s4839_s20 }
  0x61   : > { %s4843_s30 = scalar_lea.vmem [#allocation3], %s4224_s16 }
  0x62   : > { %4598 = dma.done.wait (%p5892_p7), %s305_s1, 3072  }
  0x63   : > { %4600 = vsyncadd (%p5892_p7), %s305_s1, 4294964224  ;;  %p5893_p11 = scmp.ne.s32.totalorder %s5880_s9, 0 }
  0x65   : > { %4602 = dma.done.wait (%p5893_p11), [#allocation7], 6144  }
  0x66   : > { %4604 = vsyncadd (%p5893_p11), [#allocation7], 4294961152  ;;  %s2843_s12 = sshll.u32 %s4839_s20, 6  ;;  %p2844_p4 = scmp.ne.s32.totalorder %s4627_s27, 0 }
  0x67   : > { %s4854_s13 = scalar_lea.vmem [#allocation8], %s2843_s12  ;;  %v357_v0 = vld [vmem:[%s5834_s5] sm:$0xff] (!%p2844_p4) }
  0x68   : > { %356 = sbr.rel (%p2844_p4) target bundleno = 111 (0x6f), region = 56  ;;  %358 = vst [vmem:[#allocation2] sm:$0xff] (!%p2844_p4), %v357_v0 }
  0x6f PF: > { %v4860_v1 = vld [vmem:[#allocation6] sm:$0xff]  ;;  %v4862_v2 = vld [vmem:[#allocation6 + $0x8] sm:$0xff]  ;;  %v4864_v3 = vld [vmem:[#allocation6 + $0x10] sm:$0xff]  ;;  %p2848_p6 = scmp.eq.s32.totalorder %s4627_s27, 1 }
  0x70   : > { %v4866_v4 = vld [vmem:[#allocation6 + $0x18] sm:$0xff]  ;;  %v4868_v5 = vld [vmem:[#allocation6 + $0x20] sm:$0xff]  ;;  %v4870_v6 = vld [vmem:[#allocation6 + $0x28] sm:$0xff]  ;;  %v5873_v58 = vmov (!%p2848_p6), 0.0|0.0   ;;  %v5843_v60 = vmov (!%p2848_p6), 0.0   ;;  %vm4645_vm0 = vmmov (!%p2848_p6), 0  }
  0x71   : > { %v4872_v7 = vld [vmem:[#allocation6 + $0x30] sm:$0xff]  ;;  %v4874_v8 = vld [vmem:[#allocation6 + $0x38] sm:$0xff]  ;;  %v4876_v9 = vld [vmem:[#allocation6 + $0x40] sm:$0xff]  ;;  %v4974_v52 = vpack.c.bf16 (!%p2848_p6), %v4868_v5, %v4862_v2  ;;  %v4978_v53 = vpack.c.bf16 (!%p2848_p6), %v4866_v4, %v4860_v1  ;;  %v4992_v56 = vpack.c.bf16 (!%p2848_p6), %v4870_v6, %v4864_v3  ;;  %3582 = vmatprep.subr.bf16.mxu1 (!%p2848_p6), %v5873_v58  ;;  %497 = vmatprep.mubr.f32.mxu0 (!%p2848_p6), %v5843_v60 }
  0x72   : > { %v4878_v10 = vld [vmem:[#allocation6 + $0x48] sm:$0xff]  ;;  %v4880_v11 = vld [vmem:[#allocation6 + $0x50] sm:$0xff]  ;;  %v4882_v12 = vld [vmem:[#allocation6 + $0x58] sm:$0xff]  ;;  %3162 = vmatprep.mubr.msk.f32.mxu1 (!%p2848_p6), %vm4645_vm0, %v5843_v60 }
  0x73   : > { %v4884_v13 = vld [vmem:[#allocation6 + $0x60] sm:$0xff]  ;;  %v4886_v14 = vld [vmem:[#allocation6 + $0x68] sm:$0xff]  ;;  %v4888_v15 = vld [vmem:[#allocation6 + $0x70] sm:$0xff]  ;;  %v4982_v54 = vpack.c.bf16 (!%p2848_p6), %v4880_v11, %v4874_v8  ;;  %3551 = vmatprep.subr.bf16.mxu0 (!%p2848_p6), %v4974_v52  ;;  %v4988_v55 = vpack.c.bf16 (!%p2848_p6), %v4878_v10, %v4872_v7  ;;  %3584 = vmatpush3.bf16.msra.mxu1 (!%p2848_p6), %v4992_v56  ;;  %v5003_v59 = vpack.c.bf16 (!%p2848_p6), %v4882_v12, %v4876_v9 }
  0x74   : > { %5894 = vst [vmem:[#allocation16_spill] sm:$0xff] %v4888_v15  ;;  %v4890_v16 = vld [vmem:[#allocation6 + $0x78] sm:$0xff]  ;;  %v4892_v17 = vld [vmem:[#allocation6 + $0x80] sm:$0xff]  ;;  %v4894_v18 = vld [vmem:[#allocation6 + $0x88] sm:$0xff]  ;;  %3553 = vmatpush1.bf16.msra.mxu0 (!%p2848_p6), %v4978_v53  ;;  %3585 = vmatprep.subr.bf16.mxu1 (!%p2848_p6), %v5873_v58 }
  0x75   : > { %5895 = vst [vmem:[#allocation17_spill] sm:$0xff] %v4894_v18  ;;  %v4896_v19 = vld [vmem:[#allocation6 + $0x90] sm:$0xff]  ;;  %v4898_v20 = vld [vmem:[#allocation6 + $0x98] sm:$0xff]  ;;  %v4900_v21 = vld [vmem:[#allocation6 + $0xa0] sm:$0xff]  ;;  %3555 = vmatprep.subr.bf16.mxu0 (!%p2848_p6), %v4982_v54  ;;  %v4997_v57 = vpack.c.bf16 (!%p2848_p6), %v4892_v17, %v4886_v14  ;;  %v5012_v61 = vpack.c.bf16 (!%p2848_p6), %v4890_v16, %v4884_v13  ;;  %v5022_v63 = vpack.c.bf16 (!%p2848_p6), %v4894_v18, %v4888_v15 }
  0x76   : > { %5896 = vst [vmem:[#allocation18_spill] sm:$0xff] %v4896_v19  ;;  %5897 = vst [vmem:[#allocation19_spill] sm:$0xff] %v4898_v20  ;;  %v4902_v22 = vld [vmem:[#allocation6 + $0xa8] sm:$0xff]  ;;  %v4904_v23 = vld [vmem:[#allocation6 + $0xb0] sm:$0xff] }
  0x77   : > { %5898 = vst [vmem:[#allocation20_spill] sm:$0xff] %v4900_v21  ;;  %5899 = vst [vmem:[#allocation21_spill] sm:$0xff] %v4902_v22  ;;  %v4906_v24 = vld [vmem:[#allocation6 + $0xb8] sm:$0xff]  ;;  %v4908_v25 = vld [vmem:[#allocation6 + $0xc0] sm:$0xff]  ;;  %v5017_v62 = vpack.c.bf16 (!%p2848_p6), %v4904_v23, %v4898_v20  ;;  %3587 = vmatpush3.bf16.msra.mxu1 (!%p2848_p6), %v5003_v59  ;;  %v5028_v0 = vpack.c.bf16 (!%p2848_p6), %v4902_v22, %v4896_v19 }
  0x78   : > { %5900 = vst [vmem:[#allocation22_spill] sm:$0xff] %v4904_v23  ;;  %5901 = vst [vmem:[#allocation23_spill] sm:$0xff] %v4906_v24  ;;  %v4910_v26 = vld [vmem:[#allocation6 + $0xc8] sm:$0xff]  ;;  %v4912_v27 = vld [vmem:[#allocation6 + $0xd0] sm:$0xff]  ;;  %3557 = vmatpush1.bf16.msra.mxu0 (!%p2848_p6), %v4988_v55  ;;  %3588 = vmatprep.subr.bf16.mxu1 (!%p2848_p6), %v5873_v58  ;;  %v5038_v18 = vpack.c.bf16 (!%p2848_p6), %v4906_v24, %v4900_v21 }
  0x79   : > { %5902 = vst [vmem:[#allocation24_spill] sm:$0xff] %v4908_v25  ;;  %5903 = vst [vmem:[#allocation25_spill] sm:$0xff] %v4910_v26  ;;  %v4914_v28 = vld [vmem:[#allocation6 + $0xd8] sm:$0xff]  ;;  %v4916_v29 = vld [vmem:[#allocation6 + $0xe0] sm:$0xff]  ;;  %3559 = vmatprep.subr.bf16.mxu0 (!%p2848_p6), %v4997_v57 }
  0x7a   : > { %5904 = vst [vmem:[#allocation26_spill] sm:$0xff] %v4912_v27  ;;  %5905 = vst [vmem:[#allocation27_spill] sm:$0xff] %v4914_v28  ;;  %v4918_v30 = vld [vmem:[#allocation6 + $0xe8] sm:$0xff]  ;;  %v4920_v31 = vld [vmem:[#allocation6 + $0xf0] sm:$0xff]  ;;  %v5033_v60 = vpack.c.bf16 (!%p2848_p6), %v4916_v29, %v4910_v26  ;;  %v5044_v22 = vpack.c.bf16 (!%p2848_p6), %v4914_v28, %v4908_v25 }
  0x7b   : > { %5906 = vst [vmem:[#allocation28_spill] sm:$0xff] %v4916_v29  ;;  %5907 = vst [vmem:[#allocation29_spill] sm:$0xff] %v4918_v30  ;;  %v4922_v32 = vld [vmem:[#allocation6 + $0xf8] sm:$0xff]  ;;  %v4924_v33 = vld [vmem:[#allocation6 + $0x100] sm:$0xff]  ;;  %3590 = vmatpush3.bf16.msra.mxu1 (!%p2848_p6), %v5022_v63  ;;  %v5054_v24 = vpack.c.bf16 (!%p2848_p6), %v4918_v30, %v4912_v27 }
  0x7c   : > { %5908 = vst [vmem:[#allocation30_spill] sm:$0xff] %v4920_v31  ;;  %5909 = vst [vmem:[#allocation31_spill] sm:$0xff] %v4922_v32  ;;  %v4926_v34 = vld [vmem:[#allocation6 + $0x108] sm:$0xff]  ;;  %v4928_v35 = vld [vmem:[#allocation6 + $0x110] sm:$0xff]  ;;  %3561 = vmatpush1.bf16.msra.mxu0 (!%p2848_p6), %v5012_v61  ;;  %3591 = vmatprep.subr.bf16.mxu1 (!%p2848_p6), %v5873_v58 }
  0x7d   : > { %5910 = vst [vmem:[#allocation32_spill] sm:$0xff] %v4924_v33  ;;  %5911 = vst [vmem:[#allocation33_spill] sm:$0xff] %v4926_v34  ;;  %v4930_v36 = vld [vmem:[#allocation6 + $0x118] sm:$0xff]  ;;  %v4932_v37 = vld [vmem:[#allocation6 + $0x120] sm:$0xff]  ;;  %3563 = vmatprep.subr.bf16.mxu0 (!%p2848_p6), %v5017_v62  ;;  %v5049_v29 = vpack.c.bf16 (!%p2848_p6), %v4928_v35, %v4922_v32  ;;  %v5060_v28 = vpack.c.bf16 (!%p2848_p6), %v4926_v34, %v4920_v31 }
  0x7e   : > { %5912 = vst [vmem:[#allocation34_spill] sm:$0xff] %v4928_v35  ;;  %5913 = vst [vmem:[#allocation35_spill] sm:$0xff] %v4930_v36  ;;  %v4934_v38 = vld [vmem:[#allocation6 + $0x128] sm:$0xff]  ;;  %v4936_v39 = vld [vmem:[#allocation6 + $0x130] sm:$0xff]  ;;  %v5070_v30 = vpack.c.bf16 (!%p2848_p6), %v4930_v36, %v4924_v33 }
  0x7f   : > { %5914 = vst [vmem:[#allocation36_spill] sm:$0xff] %v4932_v37  ;;  %5915 = vst [vmem:[#allocation37_spill] sm:$0xff] %v4934_v38  ;;  %v4938_v40 = vld [vmem:[#allocation6 + $0x138] sm:$0xff]  ;;  %v4940_v41 = vld [vmem:[#allocation6 + $0x140] sm:$0xff]  ;;  %3593 = vmatpush3.bf16.msra.mxu1 (!%p2848_p6), %v5038_v18 }
  0x80   : > { %5916 = vst [vmem:[#allocation38_spill] sm:$0xff] %v4936_v39  ;;  %5917 = vst [vmem:[#allocation39_spill] sm:$0xff] %v4938_v40  ;;  %v4942_v42 = vld [vmem:[#allocation6 + $0x148] sm:$0xff]  ;;  %v4944_v43 = vld [vmem:[#allocation6 + $0x150] sm:$0xff]  ;;  %431 = sbr.rel (%p2848_p6) target bundleno = 2391 (0x957), region = 60  ;;  %3565 = vmatpush1.bf16.msra.mxu0 (!%p2848_p6), %v5028_v0  ;;  %3594 = vmatprep.subr.bf16.mxu1 (!%p2848_p6), %v5873_v58  ;;  %v5065_v35 = vpack.c.bf16 (!%p2848_p6), %v4940_v41, %v4934_v38  ;;  %v5076_v34 = vpack.c.bf16 (!%p2848_p6), %v4938_v40, %v4932_v37 }
  0x81   : > { %5918 = vst [vmem:[#allocation40_spill] sm:$0xff] %v4940_v41  ;;  %5919 = vst [vmem:[#allocation41_spill] sm:$0xff] %v4942_v42  ;;  %v4946_v44 = vld [vmem:[#allocation6 + $0x158] sm:$0xff]  ;;  %v4948_v45 = vld [vmem:[#allocation6 + $0x160] sm:$0xff]  ;;  %3567 = vmatprep.subr.bf16.mxu0 (!%p2848_p6), %v5033_v60  ;;  %v5086_v36 = vpack.c.bf16 (!%p2848_p6), %v4942_v42, %v4936_v39 }
  0x82   : > { %5920 = vst [vmem:[#allocation42_spill] sm:$0xff] %v4944_v43  ;;  %5921 = vst [vmem:[#allocation43_spill] sm:$0xff] %v4946_v44  ;;  %v4950_v46 = vld [vmem:[#allocation6 + $0x168] sm:$0xff]  ;;  %v4952_v47 = vld [vmem:[#allocation6 + $0x170] sm:$0xff] }
  0x83   : > { %5922 = vst [vmem:[#allocation44_spill] sm:$0xff] %v4948_v45  ;;  %5923 = vst [vmem:[#allocation45_spill] sm:$0xff] %v4950_v46  ;;  %v4954_v48 = vld [vmem:[#allocation6 + $0x178] sm:$0xff]  ;;  %3596 = vmatpush3.bf16.msra.mxu1 (!%p2848_p6), %v5054_v24  ;;  %v5081_v41 = vpack.c.bf16 (!%p2848_p6), %v4952_v47, %v4946_v44  ;;  %v5092_v40 = vpack.c.bf16 (!%p2848_p6), %v4950_v46, %v4944_v43  ;;  %v5926_v46 = vmov (!%p2848_p6), 0.0   ;;  %v2849_v44 = vld [vmem:[%s4843_s30 + $0x8] sm:$0xff] (!%p2848_p6) }
  0x84   : > { %5924 = vst [vmem:[#allocation46_spill] sm:$0xff] %v4952_v47  ;;  %5925 = vst [vmem:[#allocation47_spill] sm:$0xff] %v4954_v48  ;;  %v4959_v49 = vld [vmem:[%s5831_s2] ss:$0 sm:$0xff]  ;;  %3569 = vmatpush1.bf16.msra.mxu0 (!%p2848_p6), %v5044_v22  ;;  %3597 = vmatprep.subr.bf16.mxu1 (!%p2848_p6), %v5873_v58  ;;  %v5098_v47 = vpack.c.bf16 (!%p2848_p6), %v4954_v48, %v4948_v45  ;;  %v574_v48 = vld [vmem:[%s4843_s30] sm:$0xff] (!%p2848_p6) }
  0x85   : > { %v4964_v50 = vld [vmem:[%s5832_s3] ss:$0 sm:$0xff]  ;;  %3571 = vmatprep.subr.bf16.mxu0 (!%p2848_p6), %v5049_v29  ;;  %v2850_v15 = vld [vmem:[%s4843_s30 + $0x10] sm:$0xff] (!%p2848_p6) }
  0x86   : > { %v4969_v51 = vld [vmem:[%s5833_s4] ss:$0 sm:$0xff] }
  0x87   : > { %3599 = vmatpush3.bf16.msra.mxu1 %v5070_v30  ;;  %v5102_v42 = vld [vmem:[#allocation2] sm:$0xff] }
  0x88   : > { %3573 = vmatpush1.bf16.msra.mxu0 %v5060_v28  ;;  %3600 = vmatprep.subr.bf16.mxu1 %v5873_v58 }
  0x89   : > { %3575 = vmatprep.subr.bf16.mxu0 %v5065_v35 }
  0x8b   : > { %3602 = vmatpush3.bf16.msra.mxu1 %v5086_v36 }
  0x8c   : > { %3577 = vmatpush1.bf16.msra.mxu0 %v5076_v34  ;;  %3603 = vmatprep.subr.bf16.mxu1 %v5873_v58 }
  0x8d   : > { %3579 = vmatprep.subr.bf16.mxu0 %v5081_v41 }
  0x8f   : > { %3605 = vmatpush3.bf16.msra.mxu1 %v5098_v47 }
  0x90   : > { %3581 = vmatpush1.bf16.msra.mxu0 %v5092_v40  ;;  %3638 = vmatprep.subr.bf16.mxu1 %v5873_v58 }
  0x91   : > { %3607 = vmatprep.subr.bf16.mxu0 %v4974_v52 }
  0x92   : > { %3163 = vmatmul.mubr.f32.vlgmr.msra.gmra.mrb[0].mxu1 %v5102_v42 }
  0x93   : > { %498 = vmatmul.mubr.f32.vlgmr.msra.gmra.mrb[0].mxu0 %v5102_v42  ;;  %3640 = vmatpush3.bf16.msra.mxu1 %v4992_v56 }
  0x94   : > { %3609 = vmatpush1.bf16.msra.mxu0 %v4978_v53  ;;  %682 = vmatprep.mubr.f32.mxu0 %v5926_v46 }
  0x95   : > { %3611 = vmatprep.subr.bf16.mxu0 %v4982_v54  ;;  %3197 = vmatprep.mubr.msk.f32.mxu1 %vm4645_vm0, %v5926_v46 }
  0x96   : > { %3641 = vmatprep.subr.bf16.mxu1 %v5873_v58 }
  0x97   : > { %3643 = vmatpush3.bf16.msra.mxu1 %v5003_v59 }
  0x98   : > { %3613 = vmatpush1.bf16.msra.mxu0 %v4988_v55  ;;  %3644 = vmatprep.subr.bf16.mxu1 %v5873_v58 }
  0x99   : > { %3615 = vmatprep.subr.bf16.mxu0 %v4997_v57 }
  0x9b   : > { %3646 = vmatpush3.bf16.msra.mxu1 %v5022_v63 }
  0x9c   : > { %3617 = vmatpush1.bf16.msra.mxu0 %v5012_v61  ;;  %3647 = vmatprep.subr.bf16.mxu1 %v5873_v58 }
  0x9d   : > { %3619 = vmatprep.subr.bf16.mxu0 %v5017_v62 }
  0x9f   : > { %3649 = vmatpush3.bf16.msra.mxu1 %v5038_v18 }
  0xa0   : > { %3621 = vmatpush1.bf16.msra.mxu0 %v5028_v0  ;;  %3650 = vmatprep.subr.bf16.mxu1 %v5873_v58 }
  0xa1   : > { %3623 = vmatprep.subr.bf16.mxu0 %v5033_v60 }
  0xa3   : > { %3652 = vmatpush3.bf16.msra.mxu1 %v5054_v24 }
  0xa4   : > { %3625 = vmatpush1.bf16.msra.mxu0 %v5044_v22  ;;  %3653 = vmatprep.subr.bf16.mxu1 %v5873_v58 }
  0xa5   : > { %3627 = vmatprep.subr.bf16.mxu0 %v5049_v29 }
  0xa7   : > { %3655 = vmatpush3.bf16.msra.mxu1 %v5070_v30 }
  0xa8   : > { %3629 = vmatpush1.bf16.msra.mxu0 %v5060_v28  ;;  %3656 = vmatprep.subr.bf16.mxu1 %v5873_v58 }
  0xa9   : > { %3631 = vmatprep.subr.bf16.mxu0 %v5065_v35 }
  0xab   : > { %3658 = vmatpush3.bf16.msra.mxu1 %v5086_v36 }
  0xac   : > { %3633 = vmatpush1.bf16.msra.mxu0 %v5076_v34  ;;  %3659 = vmatprep.subr.bf16.mxu1 %v5873_v58 }
  0xad   : > { %3635 = vmatprep.subr.bf16.mxu0 %v5081_v41 }
  0xaf   : > { %3661 = vmatpush3.bf16.msra.mxu1 %v5098_v47 }
  0xb0   : > { %3637 = vmatpush1.bf16.msra.mxu0 %v5092_v40  ;;  %3694 = vmatprep.subr.bf16.mxu1 %v5873_v58 }
  0xb1   : > { %3663 = vmatprep.subr.bf16.mxu0 %v4974_v52 }
 0x165   : > { %v570_v37 = vpop.f32.mrb[0].mxu1 }
 0x166   : > { %v499_v45 = vpop.f32.mrb[0].mxu0  ;;  %v3164_v38 = vpop.f32.mrb[1].mxu1  ;;  %v593_v58 = vadd.f32 %v4959_v49, %v570_v37 }
 0x167   : > { %v579_v43 = vadd.f32 %v574_v48, %v499_v45  ;;  %v501_v39 = vpop.f32.mrb[1].mxu0 }
 0x168   : > { %v586_v31 = vadd.f32 %v2849_v44, %v501_v39 }
 0x169   : > { %v2851_v33 = vmul.f32 -1.442695, %v579_v43 }
 0x16a   : > { %v2852_v27 = vmul.f32 -1.442695, %v586_v31 }
 0x16b   : > { %4317 = vpow2.f32 %v2851_v33 }
 0x16c   : > { %4319 = vpow2.f32 %v2852_v27 }
 0x175   : > { %v4318_v32 = vpop.eup %4317 }
 0x176   : > { %v583_v25 = vadd.f32 1.0, %v4318_v32  ;;  %v4320_v21 = vpop.eup %4319 }
 0x177   : > { %v590_v26 = vadd.f32 1.0, %v4320_v21 }
 0x178   : > { %4321 = vrcp.f32 %v583_v25 }
 0x179   : > { %4323 = vrcp.f32 %v590_v26 }
 0x182   : > { %v4322_v19 = vpop.eup %4321 }
 0x183   : > { %v594_v45 = vmul.f32 %v4322_v19, %v593_v58  ;;  %v4324_v23 = vpop.eup %4323  ;;  %v5927_v19 = vmov 0.0|0.0  }
 0x184   : > { %v597_v43 = vsub.f32 1.0, %v4324_v23  ;;  %v599_v33 = vmul.f32 %v4324_v23, %v5102_v42 }
 0x185   : > { %v595_v48 = vadd.f32 %v2850_v15, %v594_v45 }
 0x187   : > { %4325 = vtanh.f32 %v595_v48 }
 0x191   : > { %v4326_v38 = vpop.eup %4325 }
 0x192   : > { %v598_v31 = vmul.f32 %v4326_v38, %v597_v43  ;;  %v2853_v38 = vld [vmem:[%s4843_s30 + $0x18] sm:$0xff] }
 0x194   : > { %v5149_v27 = vadd.f32 %v599_v33, %v598_v31 }
 0x196   : > { %601 = vadd.xlane.f32.xlu0 %v5149_v27  ;;  %683 = vmatmul.mubr.f32.vlgmr.msra.gmra.mrb[2].mxu0 %v5149_v27  ;;  %v604_v15 = vmul.f32 %v5149_v27, %v5149_v27 }
 0x197   : > { %3198 = vmatmul.mubr.f32.vlgmr.msra.gmra.mrb[2].mxu1 %v5149_v27  ;;  %3665 = vmatpush1.bf16.msra.mxu0 %v4978_v53 }
 0x198   : > { %3696 = vmatpush3.bf16.msra.mxu1 %v4992_v56  ;;  %3667 = vmatprep.subr.bf16.mxu0 %v4982_v54 }
 0x199   : > { %3697 = vmatprep.subr.bf16.mxu1 %v5927_v19  ;;  %869 = vmatprep.mubr.f32.mxu0 %v5926_v46 }
 0x19a   : > { %605 = vadd.xlane.f32.xlu0 %v604_v15  ;;  %3232 = vmatprep.mubr.msk.f32.mxu1 %vm4645_vm0, %v5926_v46 }
 0x19b   : > { %3669 = vmatpush1.bf16.msra.mxu0 %v4988_v55 }
 0x19c   : > { %3699 = vmatpush3.bf16.msra.mxu1 %v5003_v59  ;;  %3671 = vmatprep.subr.bf16.mxu0 %v4997_v57 }
 0x19d   : > { %3700 = vmatprep.subr.bf16.mxu1 %v5927_v19 }
 0x19f   : > { %3673 = vmatpush1.bf16.msra.mxu0 %v5012_v61 }
 0x1a0   : > { %3702 = vmatpush3.bf16.msra.mxu1 %v5022_v63  ;;  %3675 = vmatprep.subr.bf16.mxu0 %v5017_v62 }
 0x1a1   : > { %3703 = vmatprep.subr.bf16.mxu1 %v5927_v19 }
 0x1a3   : > { %3677 = vmatpush1.bf16.msra.mxu0 %v5028_v0 }
 0x1a4   : > { %3705 = vmatpush3.bf16.msra.mxu1 %v5038_v18  ;;  %3679 = vmatprep.subr.bf16.mxu0 %v5033_v60 }
 0x1a5   : > { %3706 = vmatprep.subr.bf16.mxu1 %v5927_v19 }
 0x1a7   : > { %3681 = vmatpush1.bf16.msra.mxu0 %v5044_v22 }
 0x1a8   : > { %3708 = vmatpush3.bf16.msra.mxu1 %v5054_v24  ;;  %3683 = vmatprep.subr.bf16.mxu0 %v5049_v29 }
 0x1a9   : > { %3709 = vmatprep.subr.bf16.mxu1 %v5927_v19 }
 0x1ab   : > { %3685 = vmatpush1.bf16.msra.mxu0 %v5060_v28 }
 0x1ac   : > { %3711 = vmatpush3.bf16.msra.mxu1 %v5070_v30  ;;  %3687 = vmatprep.subr.bf16.mxu0 %v5065_v35 }
 0x1ad   : > { %3712 = vmatprep.subr.bf16.mxu1 %v5927_v19 }
 0x1af   : > { %3689 = vmatpush1.bf16.msra.mxu0 %v5076_v34 }
 0x1b0   : > { %3714 = vmatpush3.bf16.msra.mxu1 %v5086_v36  ;;  %3691 = vmatprep.subr.bf16.mxu0 %v5081_v41 }
 0x1b1   : > { %3715 = vmatprep.subr.bf16.mxu1 %v5927_v19 }
 0x1b3   : > { %3693 = vmatpush1.bf16.msra.mxu0 %v5092_v40 }
 0x1b4   : > { %3717 = vmatpush3.bf16.msra.mxu1 %v5098_v47  ;;  %3719 = vmatprep.subr.bf16.mxu0 %v4974_v52 }
 0x1b5   : > { %3750 = vmatprep.subr.bf16.mxu1 %v5927_v19 }
 0x223   : > { %v602_v21 = vpop.xlane.xlu0 %601 }
 0x224   : > { %v603_v23 = vmul.f32 0.03125, %v602_v21 }
 0x226   : > { %v608_v26 = vmul.f32 %v603_v23, %v603_v23  ;;  %v611_v44 = vsub.f32 %v5149_v27, %v603_v23 }
 0x227   : > { %v606_v25 = vpop.xlane.xlu0 %605 }
 0x228   : > { %v607_v32 = vmul.f32 0.03125, %v606_v25  ;;  %v2854_v25 = vld [vmem:[%s4843_s30 + $0x20] sm:$0xff] }
 0x22a   : > { %v609_v37 = vsub.f32 %v607_v32, %v608_v26 }
 0x22c   : > { %v610_v39 = vmax.f32 %v609_v37, 0.0 }
 0x22e   : > { %v612_v42 = vadd.f32 1e-05, %v610_v39 }
 0x230   : > { %4327 = vrsqrt.f32 %v612_v42 }
 0x23a   : > { %v4328_v58 = vpop.eup %4327 }
 0x23b   : > { %v614_v45 = vmul.f32 %v4328_v58, %v611_v44 }
 0x23d   : > { %v615_v48 = vmul.f32 %v4964_v50, %v614_v45 }
 0x23f   : > { %v616_v43 = vadd.f32 %v4969_v51, %v615_v48 }
 0x241   : > { %617 = vst [vmem:[%s4854_s13] sm:$0xff] %v616_v43  ;;  %v2855_v43 = vld [vmem:[%s4843_s30 + $0x28] sm:$0xff] }
 0x269   : > { %v684_v33 = vpop.f32.mrb[2].mxu0 }
 0x26a   : > { %v765_v31 = vadd.f32 %v2853_v38, %v684_v33  ;;  %v755_v15 = vpop.f32.mrb[2].mxu1  ;;  %v686_v21 = vpop.f32.mrb[3].mxu0 }
 0x26b   : > { %v3199_v26 = vpop.f32.mrb[3].mxu1  ;;  %v772_v37 = vadd.f32 %v2854_v25, %v686_v21  ;;  %v779_v45 = vadd.f32 %v4959_v49, %v755_v15 }
 0x26c   : > { %v2856_v32 = vmul.f32 -1.442695, %v765_v31 }
 0x26d   : > { %v2857_v39 = vmul.f32 -1.442695, %v772_v37 }
 0x26e   : > { %4329 = vpow2.f32 %v2856_v32 }
 0x26f   : > { %4331 = vpow2.f32 %v2857_v39 }
 0x278   : > { %v4330_v23 = vpop.eup %4329 }
 0x279   : > { %v769_v42 = vadd.f32 1.0, %v4330_v23  ;;  %v4332_v44 = vpop.eup %4331 }
 0x27a   : > { %v776_v58 = vadd.f32 1.0, %v4332_v44 }
 0x27b   : > { %4333 = vrcp.f32 %v769_v42 }
 0x27c   : > { %4335 = vrcp.f32 %v776_v58 }
 0x285   : > { %v4334_v48 = vpop.eup %4333 }
 0x286   : > { %v780_v38 = vmul.f32 %v4334_v48, %v779_v45  ;;  %v4336_v20 = vpop.eup %4335 }
 0x287   : > { %v783_v26 = vsub.f32 1.0, %v4336_v20  ;;  %v785_v25 = vmul.f32 %v4336_v20, %v5149_v27 }
 0x288   : > { %v781_v33 = vadd.f32 %v2855_v43, %v780_v38 }
 0x28a   : > { %4337 = vtanh.f32 %v781_v33 }
 0x294   : > { %v4338_v31 = vpop.eup %4337 }
 0x295   : > { %v784_v21 = vmul.f32 %v4338_v31, %v783_v26  ;;  %v2859_v26 = vld [vmem:[%s4843_s30 + $0x30] sm:$0xff] }
 0x297   : > { %v5200_v32 = vadd.f32 %v785_v25, %v784_v21 }
 0x299   : > { %870 = vmatmul.mubr.f32.vlgmr.msra.gmra.mrb[4].mxu0 %v5200_v32  ;;  %3233 = vmatmul.mubr.f32.vlgmr.msra.gmra.mrb[4].mxu1 %v5200_v32  ;;  %v790_v15 = vmul.f32 %v5200_v32, %v5200_v32 }
 0x29a   : > { %787 = vadd.xlane.f32.xlu0 %v5200_v32  ;;  %3721 = vmatpush1.bf16.msra.mxu0 %v4978_v53 }
 0x29b   : > { %791 = vadd.xlane.f32.xlu1 %v790_v15  ;;  %3752 = vmatpush3.bf16.msra.mxu1 %v4992_v56 }
 0x29c   : > { %3723 = vmatprep.subr.bf16.mxu0 %v4982_v54  ;;  %3753 = vmatprep.subr.bf16.mxu1 %v5927_v19 }
 0x29d   : > { %1056 = vmatprep.mubr.f32.mxu0 %v5926_v46  ;;  %3267 = vmatprep.mubr.msk.f32.mxu1 %vm4645_vm0, %v5926_v46 }
 0x29e   : > { %3725 = vmatpush1.bf16.msra.mxu0 %v4988_v55 }
 0x29f   : > { %3755 = vmatpush3.bf16.msra.mxu1 %v5003_v59  ;;  %3727 = vmatprep.subr.bf16.mxu0 %v4997_v57 }
 0x2a0   : > { %3756 = vmatprep.subr.bf16.mxu1 %v5927_v19 }
 0x2a2   : > { %3729 = vmatpush1.bf16.msra.mxu0 %v5012_v61 }
 0x2a3   : > { %3758 = vmatpush3.bf16.msra.mxu1 %v5022_v63  ;;  %3731 = vmatprep.subr.bf16.mxu0 %v5017_v62 }
 0x2a4   : > { %3759 = vmatprep.subr.bf16.mxu1 %v5927_v19 }
 0x2a6   : > { %3733 = vmatpush1.bf16.msra.mxu0 %v5028_v0 }
 0x2a7   : > { %3761 = vmatpush3.bf16.msra.mxu1 %v5038_v18  ;;  %3735 = vmatprep.subr.bf16.mxu0 %v5033_v60 }
 0x2a8   : > { %3762 = vmatprep.subr.bf16.mxu1 %v5927_v19 }
 0x2aa   : > { %3737 = vmatpush1.bf16.msra.mxu0 %v5044_v22 }
 0x2ab   : > { %3764 = vmatpush3.bf16.msra.mxu1 %v5054_v24  ;;  %3739 = vmatprep.subr.bf16.mxu0 %v5049_v29 }
 0x2ac   : > { %3765 = vmatprep.subr.bf16.mxu1 %v5927_v19 }
 0x2ae   : > { %3741 = vmatpush1.bf16.msra.mxu0 %v5060_v28 }
 0x2af   : > { %3767 = vmatpush3.bf16.msra.mxu1 %v5070_v30  ;;  %3743 = vmatprep.subr.bf16.mxu0 %v5065_v35 }
 0x2b0   : > { %3768 = vmatprep.subr.bf16.mxu1 %v5927_v19 }
 0x2b2   : > { %3745 = vmatpush1.bf16.msra.mxu0 %v5076_v34 }
 0x2b3   : > { %3770 = vmatpush3.bf16.msra.mxu1 %v5086_v36  ;;  %3747 = vmatprep.subr.bf16.mxu0 %v5081_v41 }
 0x2b4   : > { %3771 = vmatprep.subr.bf16.mxu1 %v5927_v19 }
 0x2b6   : > { %3749 = vmatpush1.bf16.msra.mxu0 %v5092_v40 }
 0x2b7   : > { %3773 = vmatpush3.bf16.msra.mxu1 %v5098_v47  ;;  %3775 = vmatprep.subr.bf16.mxu0 %v4974_v52 }
 0x2b8   : > { %3806 = vmatprep.subr.bf16.mxu1 %v5927_v19 }
 0x327   : > { %v788_v20 = vpop.xlane.xlu0 %787 }
 0x328   : > { %v789_v27 = vmul.f32 0.03125, %v788_v20  ;;  %v792_v37 = vpop.xlane.xlu1 %791  ;;  %v2860_v20 = vld [vmem:[%s4843_s30 + $0x38] sm:$0xff] }
 0x329   : > { %v793_v39 = vmul.f32 0.03125, %v792_v37 }
 0x32a   : > { %v794_v23 = vmul.f32 %v789_v27, %v789_v27  ;;  %v797_v45 = vsub.f32 %v5200_v32, %v789_v27 }
 0x32c   : > { %v795_v42 = vsub.f32 %v793_v39, %v794_v23 }
 0x32e   : > { %v796_v44 = vmax.f32 %v795_v42, 0.0 }
 0x330   : > { %v798_v58 = vadd.f32 1e-05, %v796_v44 }
 0x332   : > { %4339 = vrsqrt.f32 %v798_v58 }
 0x33c   : > { %v4340_v48 = vpop.eup %4339 }
 0x33d   : > { %v800_v43 = vmul.f32 %v4340_v48, %v797_v45 }
 0x33f   : > { %v801_v38 = vmul.f32 %v4964_v50, %v800_v43 }
 0x341   : > { %v802_v33 = vadd.f32 %v4969_v51, %v801_v38  ;;  %v2861_v38 = vld [vmem:[%s4843_s30 + $0x40] sm:$0xff] }
 0x343   : > { %2858 = vst [vmem:[%s4854_s13 + $0x8] sm:$0xff] %v802_v33 }
 0x36c   : > { %v871_v31 = vpop.f32.mrb[4].mxu0  ;;  %v942_v21 = vpop.f32.mrb[4].mxu1 }
 0x36d   : > { %v952_v25 = vadd.f32 %v2859_v26, %v871_v31  ;;  %v873_v15 = vpop.f32.mrb[5].mxu0  ;;  %v3234_v37 = vpop.f32.mrb[5].mxu1  ;;  %v966_v48 = vadd.f32 %v4959_v49, %v942_v21 }
 0x36e   : > { %v959_v23 = vadd.f32 %v2860_v20, %v873_v15 }
 0x36f   : > { %v2862_v39 = vmul.f32 -1.442695, %v952_v25 }
 0x370   : > { %v2863_v42 = vmul.f32 -1.442695, %v959_v23 }
 0x371   : > { %4341 = vpow2.f32 %v2862_v39 }
 0x372   : > { %4343 = vpow2.f32 %v2863_v42 }
 0x37b   : > { %v4342_v27 = vpop.eup %4341 }
 0x37c   : > { %v956_v44 = vadd.f32 1.0, %v4342_v27  ;;  %v4344_v58 = vpop.eup %4343 }
 0x37d   : > { %v963_v45 = vadd.f32 1.0, %v4344_v58 }
 0x37e   : > { %4345 = vrcp.f32 %v956_v44 }
 0x37f   : > { %4347 = vrcp.f32 %v963_v45 }
 0x388   : > { %v4346_v43 = vpop.eup %4345 }
 0x389   : > { %v967_v33 = vmul.f32 %v4346_v43, %v966_v48  ;;  %v4348_v31 = vpop.eup %4347 }
 0x38a   : > { %v970_v37 = vsub.f32 1.0, %v4348_v31  ;;  %v972_v20 = vmul.f32 %v4348_v31, %v5200_v32 }
 0x38b   : > { %v968_v26 = vadd.f32 %v2861_v38, %v967_v33 }
 0x38d   : > { %4349 = vtanh.f32 %v968_v26 }
 0x397   : > { %v4350_v25 = vpop.eup %4349 }
 0x398   : > { %v971_v15 = vmul.f32 %v4350_v25, %v970_v37  ;;  %v2865_v37 = vld [vmem:[%s4843_s30 + $0x48] sm:$0xff] }
 0x39a   : > { %v5251_v39 = vadd.f32 %v972_v20, %v971_v15 }
 0x39c   : > { %1057 = vmatmul.mubr.f32.vlgmr.msra.gmra.mrb[6].mxu0 %v5251_v39  ;;  %3268 = vmatmul.mubr.f32.vlgmr.msra.gmra.mrb[6].mxu1 %v5251_v39  ;;  %v977_v21 = vmul.f32 %v5251_v39, %v5251_v39 }
 0x39d   : > { %974 = vadd.xlane.f32.xlu1 %v5251_v39  ;;  %3777 = vmatpush1.bf16.msra.mxu0 %v4978_v53 }
 0x39e   : > { %978 = vadd.xlane.f32.xlu0 %v977_v21  ;;  %3808 = vmatpush3.bf16.msra.mxu1 %v4992_v56 }
 0x39f   : > { %3779 = vmatprep.subr.bf16.mxu0 %v4982_v54  ;;  %3809 = vmatprep.subr.bf16.mxu1 %v5927_v19 }
 0x3a0   : > { %1243 = vmatprep.mubr.f32.mxu0 %v5926_v46  ;;  %3302 = vmatprep.mubr.msk.f32.mxu1 %vm4645_vm0, %v5926_v46 }
 0x3a1   : > { %3781 = vmatpush1.bf16.msra.mxu0 %v4988_v55 }
 0x3a2   : > { %3811 = vmatpush3.bf16.msra.mxu1 %v5003_v59  ;;  %3783 = vmatprep.subr.bf16.mxu0 %v4997_v57 }
 0x3a3   : > { %3812 = vmatprep.subr.bf16.mxu1 %v5927_v19 }
 0x3a5   : > { %3785 = vmatpush1.bf16.msra.mxu0 %v5012_v61 }
 0x3a6   : > { %3814 = vmatpush3.bf16.msra.mxu1 %v5022_v63  ;;  %3787 = vmatprep.subr.bf16.mxu0 %v5017_v62 }
 0x3a7   : > { %3815 = vmatprep.subr.bf16.mxu1 %v5927_v19 }
 0x3a9   : > { %3789 = vmatpush1.bf16.msra.mxu0 %v5028_v0 }
 0x3aa   : > { %3817 = vmatpush3.bf16.msra.mxu1 %v5038_v18  ;;  %3791 = vmatprep.subr.bf16.mxu0 %v5033_v60 }
 0x3ab   : > { %3818 = vmatprep.subr.bf16.mxu1 %v5927_v19 }
 0x3ad   : > { %3793 = vmatpush1.bf16.msra.mxu0 %v5044_v22 }
 0x3ae   : > { %3820 = vmatpush3.bf16.msra.mxu1 %v5054_v24  ;;  %3795 = vmatprep.subr.bf16.mxu0 %v5049_v29 }
 0x3af   : > { %3821 = vmatprep.subr.bf16.mxu1 %v5927_v19 }
 0x3b1   : > { %3797 = vmatpush1.bf16.msra.mxu0 %v5060_v28 }
 0x3b2   : > { %3823 = vmatpush3.bf16.msra.mxu1 %v5070_v30  ;;  %3799 = vmatprep.subr.bf16.mxu0 %v5065_v35 }
 0x3b3   : > { %3824 = vmatprep.subr.bf16.mxu1 %v5927_v19 }
 0x3b5   : > { %3801 = vmatpush1.bf16.msra.mxu0 %v5076_v34 }
 0x3b6   : > { %3826 = vmatpush3.bf16.msra.mxu1 %v5086_v36  ;;  %3803 = vmatprep.subr.bf16.mxu0 %v5081_v41 }
 0x3b7   : > { %3827 = vmatprep.subr.bf16.mxu1 %v5927_v19 }
 0x3b9   : > { %3805 = vmatpush1.bf16.msra.mxu0 %v5092_v40 }
 0x3ba   : > { %3829 = vmatpush3.bf16.msra.mxu1 %v5098_v47  ;;  %3831 = vmatprep.subr.bf16.mxu0 %v4974_v52 }
 0x3bb   : > { %3862 = vmatprep.subr.bf16.mxu1 %v5927_v19 }
 0x42a   : > { %v975_v32 = vpop.xlane.xlu1 %974 }
 0x42b   : > { %v976_v23 = vmul.f32 0.03125, %v975_v32  ;;  %v979_v42 = vpop.xlane.xlu0 %978  ;;  %v2866_v32 = vld [vmem:[%s4843_s30 + $0x50] sm:$0xff] }
 0x42c   : > { %v980_v27 = vmul.f32 0.03125, %v979_v42 }
 0x42d   : > { %v981_v44 = vmul.f32 %v976_v23, %v976_v23  ;;  %v984_v43 = vsub.f32 %v5251_v39, %v976_v23 }
 0x42f   : > { %v982_v58 = vsub.f32 %v980_v27, %v981_v44 }
 0x431   : > { %v983_v45 = vmax.f32 %v982_v58, 0.0 }
 0x433   : > { %v985_v48 = vadd.f32 1e-05, %v983_v45 }
 0x435   : > { %4351 = vrsqrt.f32 %v985_v48 }
 0x43f   : > { %v4352_v38 = vpop.eup %4351 }
 0x440   : > { %v987_v33 = vmul.f32 %v4352_v38, %v984_v43 }
 0x442   : > { %v988_v26 = vmul.f32 %v4964_v50, %v987_v33 }
 0x444   : > { %v989_v31 = vadd.f32 %v4969_v51, %v988_v26  ;;  %v2867_v26 = vld [vmem:[%s4843_s30 + $0x58] sm:$0xff] }
 0x446   : > { %2864 = vst [vmem:[%s4854_s13 + $0x10] sm:$0xff] %v989_v31 }
 0x46f   : > { %v1058_v25 = vpop.f32.mrb[6].mxu0  ;;  %v1129_v15 = vpop.f32.mrb[6].mxu1 }
 0x470   : > { %v1139_v20 = vadd.f32 %v2865_v37, %v1058_v25  ;;  %v1060_v21 = vpop.f32.mrb[7].mxu0  ;;  %v3269_v42 = vpop.f32.mrb[7].mxu1  ;;  %v1153_v38 = vadd.f32 %v4959_v49, %v1129_v15 }
 0x471   : > { %v1146_v44 = vadd.f32 %v2866_v32, %v1060_v21 }
 0x472   : > { %v2868_v27 = vmul.f32 -1.442695, %v1139_v20 }
 0x473   : > { %v2869_v58 = vmul.f32 -1.442695, %v1146_v44 }
 0x474   : > { %4353 = vpow2.f32 %v2868_v27 }
 0x475   : > { %4355 = vpow2.f32 %v2869_v58 }
 0x47e   : > { %v4354_v23 = vpop.eup %4353 }
 0x47f   : > { %v1143_v45 = vadd.f32 1.0, %v4354_v23  ;;  %v4356_v48 = vpop.eup %4355 }
 0x480   : > { %v1150_v43 = vadd.f32 1.0, %v4356_v48 }
 0x481   : > { %4357 = vrcp.f32 %v1143_v45 }
 0x482   : > { %4359 = vrcp.f32 %v1150_v43 }
 0x48b   : > { %v4358_v33 = vpop.eup %4357 }
 0x48c   : > { %v1154_v31 = vmul.f32 %v4358_v33, %v1153_v38  ;;  %v4360_v25 = vpop.eup %4359 }
 0x48d   : > { %v1157_v42 = vsub.f32 1.0, %v4360_v25  ;;  %v1159_v32 = vmul.f32 %v4360_v25, %v5251_v39 }
 0x48e   : > { %v1155_v37 = vadd.f32 %v2867_v26, %v1154_v31 }
 0x490   : > { %4361 = vtanh.f32 %v1155_v37 }
 0x49a   : > { %v4362_v20 = vpop.eup %4361 }
 0x49b   : > { %v1158_v21 = vmul.f32 %v4362_v20, %v1157_v42  ;;  %v2871_v42 = vld [vmem:[%s4843_s30 + $0x60] sm:$0xff] }
 0x49d   : > { %v5302_v27 = vadd.f32 %v1159_v32, %v1158_v21 }
 0x49f   : > { %1244 = vmatmul.mubr.f32.vlgmr.msra.gmra.mrb[8].mxu0 %v5302_v27  ;;  %3303 = vmatmul.mubr.f32.vlgmr.msra.gmra.mrb[8].mxu1 %v5302_v27  ;;  %v1164_v15 = vmul.f32 %v5302_v27, %v5302_v27 }
 0x4a0   : > { %1161 = vadd.xlane.f32.xlu1 %v5302_v27  ;;  %3833 = vmatpush1.bf16.msra.mxu0 %v4978_v53 }
 0x4a1   : > { %3864 = vmatpush3.bf16.msra.mxu1 %v4992_v56  ;;  %3835 = vmatprep.subr.bf16.mxu0 %v4982_v54 }
 0x4a2   : > { %3865 = vmatprep.subr.bf16.mxu1 %v5927_v19  ;;  %1430 = vmatprep.mubr.f32.mxu0 %v5926_v46 }
 0x4a3   : > { %3337 = vmatprep.mubr.msk.f32.mxu1 %vm4645_vm0, %v5926_v46 }
 0x4a4   : > { %1165 = vadd.xlane.f32.xlu1 %v1164_v15  ;;  %3837 = vmatpush1.bf16.msra.mxu0 %v4988_v55 }
 0x4a5   : > { %3867 = vmatpush3.bf16.msra.mxu1 %v5003_v59  ;;  %3839 = vmatprep.subr.bf16.mxu0 %v4997_v57 }
 0x4a6   : > { %3868 = vmatprep.subr.bf16.mxu1 %v5927_v19 }
 0x4a8   : > { %3841 = vmatpush1.bf16.msra.mxu0 %v5012_v61 }
 0x4a9   : > { %3870 = vmatpush3.bf16.msra.mxu1 %v5022_v63  ;;  %3843 = vmatprep.subr.bf16.mxu0 %v5017_v62 }
 0x4aa   : > { %3871 = vmatprep.subr.bf16.mxu1 %v5927_v19 }
 0x4ac   : > { %3845 = vmatpush1.bf16.msra.mxu0 %v5028_v0 }
 0x4ad   : > { %3873 = vmatpush3.bf16.msra.mxu1 %v5038_v18  ;;  %3847 = vmatprep.subr.bf16.mxu0 %v5033_v60 }
 0x4ae   : > { %3874 = vmatprep.subr.bf16.mxu1 %v5927_v19 }
 0x4b0   : > { %3849 = vmatpush1.bf16.msra.mxu0 %v5044_v22 }
 0x4b1   : > { %3876 = vmatpush3.bf16.msra.mxu1 %v5054_v24  ;;  %3851 = vmatprep.subr.bf16.mxu0 %v5049_v29 }
 0x4b2   : > { %3877 = vmatprep.subr.bf16.mxu1 %v5927_v19 }
 0x4b4   : > { %3853 = vmatpush1.bf16.msra.mxu0 %v5060_v28 }
 0x4b5   : > { %3879 = vmatpush3.bf16.msra.mxu1 %v5070_v30  ;;  %3855 = vmatprep.subr.bf16.mxu0 %v5065_v35 }
 0x4b6   : > { %3880 = vmatprep.subr.bf16.mxu1 %v5927_v19 }
 0x4b8   : > { %3857 = vmatpush1.bf16.msra.mxu0 %v5076_v34 }
 0x4b9   : > { %3882 = vmatpush3.bf16.msra.mxu1 %v5086_v36  ;;  %3859 = vmatprep.subr.bf16.mxu0 %v5081_v41 }
 0x4ba   : > { %3883 = vmatprep.subr.bf16.mxu1 %v5927_v19 }
 0x4bc   : > { %3861 = vmatpush1.bf16.msra.mxu0 %v5092_v40 }
 0x4bd   : > { %3885 = vmatpush3.bf16.msra.mxu1 %v5098_v47  ;;  %3887 = vmatprep.subr.bf16.mxu0 %v4974_v52 }
 0x4be   : > { %3918 = vmatprep.subr.bf16.mxu1 %v5927_v19 }
 0x52d   : > { %v1162_v39 = vpop.xlane.xlu1 %1161 }
 0x52e   : > { %v1163_v44 = vmul.f32 0.03125, %v1162_v39  ;;  %v2872_v39 = vld [vmem:[%s4843_s30 + $0x68] sm:$0xff] }
 0x530   : > { %v1168_v23 = vmul.f32 %v1163_v44, %v1163_v44  ;;  %v1171_v33 = vsub.f32 %v5302_v27, %v1163_v44 }
 0x531   : > { %v1166_v58 = vpop.xlane.xlu1 %1165 }
 0x532   : > { %v1167_v45 = vmul.f32 0.03125, %v1166_v58 }
 0x534   : > { %v1169_v48 = vsub.f32 %v1167_v45, %v1168_v23 }
 0x536   : > { %v1170_v43 = vmax.f32 %v1169_v48, 0.0 }
 0x538   : > { %v1172_v38 = vadd.f32 1e-05, %v1170_v43 }
 0x53a   : > { %4363 = vrsqrt.f32 %v1172_v38 }
 0x544   : > { %v4364_v26 = vpop.eup %4363 }
 0x545   : > { %v1174_v31 = vmul.f32 %v4364_v26, %v1171_v33 }
 0x547   : > { %v1175_v37 = vmul.f32 %v4964_v50, %v1174_v31 }
 0x549   : > { %v1176_v25 = vadd.f32 %v4969_v51, %v1175_v37  ;;  %v2873_v37 = vld [vmem:[%s4843_s30 + $0x70] sm:$0xff] }
 0x54b   : > { %2870 = vst [vmem:[%s4854_s13 + $0x18] sm:$0xff] %v1176_v25 }
 0x572   : > { %v1245_v20 = vpop.f32.mrb[8].mxu0  ;;  %v1316_v21 = vpop.f32.mrb[8].mxu1 }
 0x573   : > { %v1326_v32 = vadd.f32 %v2871_v42, %v1245_v20  ;;  %v1247_v15 = vpop.f32.mrb[9].mxu0  ;;  %v3304_v58 = vpop.f32.mrb[9].mxu1  ;;  %v1340_v26 = vadd.f32 %v4959_v49, %v1316_v21 }
 0x574   : > { %v1333_v45 = vadd.f32 %v2872_v39, %v1247_v15 }
 0x575   : > { %v2874_v23 = vmul.f32 -1.442695, %v1326_v32 }
 0x576   : > { %v2875_v48 = vmul.f32 -1.442695, %v1333_v45 }
 0x577   : > { %4365 = vpow2.f32 %v2874_v23 }
 0x578   : > { %4367 = vpow2.f32 %v2875_v48 }
 0x581   : > { %v4366_v44 = vpop.eup %4365 }
 0x582   : > { %v1330_v43 = vadd.f32 1.0, %v4366_v44  ;;  %v4368_v38 = vpop.eup %4367 }
 0x583   : > { %v1337_v33 = vadd.f32 1.0, %v4368_v38 }
 0x584   : > { %4369 = vrcp.f32 %v1330_v43 }
 0x585   : > { %4371 = vrcp.f32 %v1337_v33 }
 0x58e   : > { %v4370_v31 = vpop.eup %4369 }
 0x58f   : > { %v1341_v25 = vmul.f32 %v4370_v31, %v1340_v26  ;;  %v4372_v20 = vpop.eup %4371 }
 0x590   : > { %v1344_v58 = vsub.f32 1.0, %v4372_v20  ;;  %v1346_v39 = vmul.f32 %v4372_v20, %v5302_v27  ;;  %v2877_v20 = vld [vmem:[%s4843_s30 + $0x78] sm:$0xff] }
 0x591   : > { %v1342_v42 = vadd.f32 %v2873_v37, %v1341_v25 }
 0x593   : > { %4373 = vtanh.f32 %v1342_v42 }
 0x59d   : > { %v4374_v32 = vpop.eup %4373 }
 0x59e   : > { %v1345_v15 = vmul.f32 %v4374_v32, %v1344_v58 }
 0x5a0   : > { %v5353_v23 = vadd.f32 %v1346_v39, %v1345_v15 }
 0x5a2   : > { %1431 = vmatmul.mubr.f32.vlgmr.msra.gmra.mrb[10].mxu0 %v5353_v23  ;;  %3338 = vmatmul.mubr.f32.vlgmr.msra.gmra.mrb[10].mxu1 %v5353_v23  ;;  %v1351_v21 = vmul.f32 %v5353_v23, %v5353_v23 }
 0x5a3   : > { %1348 = vadd.xlane.f32.xlu0 %v5353_v23  ;;  %3889 = vmatpush1.bf16.msra.mxu0 %v4978_v53 }
 0x5a4   : > { %3920 = vmatpush3.bf16.msra.mxu1 %v4992_v56  ;;  %3891 = vmatprep.subr.bf16.mxu0 %v4982_v54 }
 0x5a5   : > { %3921 = vmatprep.subr.bf16.mxu1 %v5927_v19  ;;  %1617 = vmatprep.mubr.f32.mxu0 %v5926_v46 }
 0x5a6   : > { %3372 = vmatprep.mubr.msk.f32.mxu1 %vm4645_vm0, %v5926_v46 }
 0x5a7   : > { %1352 = vadd.xlane.f32.xlu0 %v1351_v21  ;;  %3893 = vmatpush1.bf16.msra.mxu0 %v4988_v55  ;;  %v2878_v21 = vld [vmem:[%s4843_s30 + $0x80] sm:$0xff] }
 0x5a8   : > { %3923 = vmatpush3.bf16.msra.mxu1 %v5003_v59  ;;  %3895 = vmatprep.subr.bf16.mxu0 %v4997_v57 }
 0x5a9   : > { %3924 = vmatprep.subr.bf16.mxu1 %v5927_v19 }
 0x5ab   : > { %3897 = vmatpush1.bf16.msra.mxu0 %v5012_v61 }
 0x5ac   : > { %3926 = vmatpush3.bf16.msra.mxu1 %v5022_v63  ;;  %3899 = vmatprep.subr.bf16.mxu0 %v5017_v62 }
 0x5ad   : > { %3927 = vmatprep.subr.bf16.mxu1 %v5927_v19 }
 0x5af   : > { %3901 = vmatpush1.bf16.msra.mxu0 %v5028_v0 }
 0x5b0   : > { %3929 = vmatpush3.bf16.msra.mxu1 %v5038_v18  ;;  %3903 = vmatprep.subr.bf16.mxu0 %v5033_v60 }
 0x5b1   : > { %3930 = vmatprep.subr.bf16.mxu1 %v5927_v19 }
 0x5b3   : > { %3905 = vmatpush1.bf16.msra.mxu0 %v5044_v22 }
 0x5b4   : > { %3932 = vmatpush3.bf16.msra.mxu1 %v5054_v24  ;;  %3907 = vmatprep.subr.bf16.mxu0 %v5049_v29 }
 0x5b5   : > { %3933 = vmatprep.subr.bf16.mxu1 %v5927_v19 }
 0x5b7   : > { %3909 = vmatpush1.bf16.msra.mxu0 %v5060_v28 }
 0x5b8   : > { %3935 = vmatpush3.bf16.msra.mxu1 %v5070_v30  ;;  %3911 = vmatprep.subr.bf16.mxu0 %v5065_v35 }
 0x5b9   : > { %3936 = vmatprep.subr.bf16.mxu1 %v5927_v19 }
 0x5bb   : > { %3913 = vmatpush1.bf16.msra.mxu0 %v5076_v34 }
 0x5bc   : > { %3938 = vmatpush3.bf16.msra.mxu1 %v5086_v36  ;;  %3915 = vmatprep.subr.bf16.mxu0 %v5081_v41 }
 0x5bd   : > { %3939 = vmatprep.subr.bf16.mxu1 %v5927_v19 }
 0x5bf   : > { %3917 = vmatpush1.bf16.msra.mxu0 %v5092_v40 }
 0x5c0   : > { %3941 = vmatpush3.bf16.msra.mxu1 %v5098_v47  ;;  %3943 = vmatprep.subr.bf16.mxu0 %v4974_v52 }
 0x5c1   : > { %3974 = vmatprep.subr.bf16.mxu1 %v5927_v19 }
 0x630   : > { %v1349_v27 = vpop.xlane.xlu0 %1348 }
 0x631   : > { %v1350_v45 = vmul.f32 0.03125, %v1349_v27 }
 0x633   : > { %v1355_v44 = vmul.f32 %v1350_v45, %v1350_v45  ;;  %v1358_v31 = vsub.f32 %v5353_v23, %v1350_v45 }
 0x634   : > { %v1353_v48 = vpop.xlane.xlu0 %1352 }
 0x635   : > { %v1354_v43 = vmul.f32 0.03125, %v1353_v48 }
 0x637   : > { %v1356_v38 = vsub.f32 %v1354_v43, %v1355_v44 }
 0x639   : > { %v1357_v33 = vmax.f32 %v1356_v38, 0.0 }
 0x63b   : > { %v1359_v26 = vadd.f32 1e-05, %v1357_v33 }
 0x63d   : > { %4375 = vrsqrt.f32 %v1359_v26 }
 0x647   : > { %v4376_v37 = vpop.eup %4375 }
 0x648   : > { %v1361_v25 = vmul.f32 %v4376_v37, %v1358_v31 }
 0x64a   : > { %v1362_v52 = vmul.f32 %v4964_v50, %v1361_v25  ;;  %v2879_v25 = vld [vmem:[%s4843_s30 + $0x88] sm:$0xff] }
 0x64c   : > { %v1363_v42 = vadd.f32 %v4969_v51, %v1362_v52 }
 0x64e   : > { %2876 = vst [vmem:[%s4854_s13 + $0x20] sm:$0xff] %v1363_v42 }
 0x675   : > { %v1432_v58 = vpop.f32.mrb[10].mxu0  ;;  %v1503_v32 = vpop.f32.mrb[10].mxu1 }
 0x676   : > { %v1513_v15 = vadd.f32 %v2877_v20, %v1432_v58  ;;  %v1434_v39 = vpop.f32.mrb[11].mxu0  ;;  %v3339_v27 = vpop.f32.mrb[11].mxu1  ;;  %v1527_v31 = vadd.f32 %v4959_v49, %v1503_v32 }
 0x677   : > { %v1520_v44 = vadd.f32 %v2878_v21, %v1434_v39 }
 0x678   : > { %v2880_v48 = vmul.f32 -1.442695, %v1513_v15 }
 0x679   : > { %v2881_v43 = vmul.f32 -1.442695, %v1520_v44 }
 0x67a   : > { %4377 = vpow2.f32 %v2880_v48 }
 0x67b   : > { %4379 = vpow2.f32 %v2881_v43 }
 0x684   : > { %v4378_v45 = vpop.eup %4377 }
 0x685   : > { %v1517_v38 = vadd.f32 1.0, %v4378_v45  ;;  %v4380_v33 = vpop.eup %4379  ;;  %v2885_v45 = vld [vmem:[%s4843_s30 + $0xa0] sm:$0xff] }
 0x686   : > { %v1524_v26 = vadd.f32 1.0, %v4380_v33 }
 0x687   : > { %4381 = vrcp.f32 %v1517_v38 }
 0x688   : > { %4383 = vrcp.f32 %v1524_v26 }
 0x691   : > { %v4382_v37 = vpop.eup %4381 }
 0x692   : > { %v1528_v52 = vmul.f32 %v4382_v37, %v1527_v31  ;;  %v4384_v20 = vpop.eup %4383 }
 0x693   : > { %v1531_v58 = vsub.f32 1.0, %v4384_v20  ;;  %v1533_v21 = vmul.f32 %v4384_v20, %v5353_v23 }
 0x694   : > { %v1529_v42 = vadd.f32 %v2879_v25, %v1528_v52 }
 0x696   : > { %4385 = vtanh.f32 %v1529_v42 }
 0x6a0   : > { %v4386_v15 = vpop.eup %4385 }
 0x6a1   : > { %v1532_v39 = vmul.f32 %v4386_v15, %v1531_v58 }
 0x6a3   : > { %v5404_v27 = vadd.f32 %v1533_v21, %v1532_v39 }
 0x6a5   : > { %1618 = vmatmul.mubr.f32.vlgmr.msra.gmra.mrb[12].mxu0 %v5404_v27  ;;  %3373 = vmatmul.mubr.f32.vlgmr.msra.gmra.mrb[12].mxu1 %v5404_v27  ;;  %v1538_v32 = vmul.f32 %v5404_v27, %v5404_v27 }
 0x6a6   : > { %1535 = vadd.xlane.f32.xlu1 %v5404_v27  ;;  %3945 = vmatpush1.bf16.msra.mxu0 %v4978_v53 }
 0x6a7   : > { %3976 = vmatpush3.bf16.msra.mxu1 %v4992_v56  ;;  %3947 = vmatprep.subr.bf16.mxu0 %v4982_v54 }
 0x6a8   : > { %3977 = vmatprep.subr.bf16.mxu1 %v5927_v19  ;;  %1804 = vmatprep.mubr.f32.mxu0 %v5926_v46 }
 0x6a9   : > { %3407 = vmatprep.mubr.msk.f32.mxu1 %vm4645_vm0, %v5926_v46 }
 0x6aa   : > { %1539 = vadd.xlane.f32.xlu1 %v1538_v32  ;;  %3949 = vmatpush1.bf16.msra.mxu0 %v4988_v55 }
 0x6ab   : > { %3979 = vmatpush3.bf16.msra.mxu1 %v5003_v59  ;;  %3951 = vmatprep.subr.bf16.mxu0 %v4997_v57  ;;  %v2884_v59 = vld [vmem:[%s4843_s30 + $0x98] sm:$0xff] }
 0x6ac   : > { %3980 = vmatprep.subr.bf16.mxu1 %v5927_v19 }
 0x6ae   : > { %3953 = vmatpush1.bf16.msra.mxu0 %v5012_v61 }
 0x6af   : > { %3982 = vmatpush3.bf16.msra.mxu1 %v5022_v63  ;;  %3955 = vmatprep.subr.bf16.mxu0 %v5017_v62 }
 0x6b0   : > { %3983 = vmatprep.subr.bf16.mxu1 %v5927_v19 }
 0x6b2   : > { %3957 = vmatpush1.bf16.msra.mxu0 %v5028_v0 }
 0x6b3   : > { %3985 = vmatpush3.bf16.msra.mxu1 %v5038_v18  ;;  %3959 = vmatprep.subr.bf16.mxu0 %v5033_v60 }
 0x6b4   : > { %3986 = vmatprep.subr.bf16.mxu1 %v5927_v19 }
 0x6b6   : > { %3961 = vmatpush1.bf16.msra.mxu0 %v5044_v22 }
 0x6b7   : > { %3988 = vmatpush3.bf16.msra.mxu1 %v5054_v24  ;;  %3963 = vmatprep.subr.bf16.mxu0 %v5049_v29 }
 0x6b8   : > { %3989 = vmatprep.subr.bf16.mxu1 %v5927_v19 }
 0x6ba   : > { %3965 = vmatpush1.bf16.msra.mxu0 %v5060_v28 }
 0x6bb   : > { %3991 = vmatpush3.bf16.msra.mxu1 %v5070_v30  ;;  %3967 = vmatprep.subr.bf16.mxu0 %v5065_v35 }
 0x6bc   : > { %3992 = vmatprep.subr.bf16.mxu1 %v5927_v19 }
 0x6be   : > { %3969 = vmatpush1.bf16.msra.mxu0 %v5076_v34 }
 0x6bf   : > { %3994 = vmatpush3.bf16.msra.mxu1 %v5086_v36  ;;  %3971 = vmatprep.subr.bf16.mxu0 %v5081_v41 }
 0x6c0   : > { %3995 = vmatprep.subr.bf16.mxu1 %v5927_v19 }
 0x6c2   : > { %3973 = vmatpush1.bf16.msra.mxu0 %v5092_v40 }
 0x6c3   : > { %3997 = vmatpush3.bf16.msra.mxu1 %v5098_v47  ;;  %v2883_v47 = vld [vmem:[%s4843_s30 + $0x90] sm:$0xff] }
 0x733   : > { %v1536_v18 = vpop.xlane.xlu1 %1535 }
 0x734   : > { %v1537_v22 = vmul.f32 0.03125, %v1536_v18 }
 0x736   : > { %v1542_v28 = vmul.f32 %v1537_v22, %v1537_v22  ;;  %v1545_v36 = vsub.f32 %v5404_v27, %v1537_v22 }
 0x737   : > { %v1540_v24 = vpop.xlane.xlu1 %1539 }
 0x738   : > { %v1541_v29 = vmul.f32 0.03125, %v1540_v24 }
 0x73a   : > { %v1543_v30 = vsub.f32 %v1541_v29, %v1542_v28 }
 0x73c   : > { %v1544_v34 = vmax.f32 %v1543_v30, 0.0 }
 0x73e   : > { %v1546_v35 = vadd.f32 1e-05, %v1544_v34 }
 0x740   : > { %4387 = vrsqrt.f32 %v1546_v35  ;;  %v2889_v35 = vld [vmem:[%s4843_s30 + $0xa8] sm:$0xff] }
 0x74a   : > { %v4388_v41 = vpop.eup %4387 }
 0x74b   : > { %v1548_v46 = vmul.f32 %v4388_v41, %v1545_v36 }
 0x74d   : > { %v1549_v40 = vmul.f32 %v4964_v50, %v1548_v46 }
 0x74f   : > { %v1550_v53 = vadd.f32 %v4969_v51, %v1549_v40 }
 0x751   : > { %2882 = vst [vmem:[%s4854_s13 + $0x28] sm:$0xff] %v1550_v53  ;;  %v2890_v53 = vld [vmem:[%s4843_s30 + $0xb0] sm:$0xff] }
 0x778   : > { %v1619_v54 = vpop.f32.mrb[12].mxu0  ;;  %v1690_v55 = vpop.f32.mrb[12].mxu1 }
 0x779   : > { %v1700_v56 = vadd.f32 %v2883_v47, %v1619_v54  ;;  %v1621_v57 = vpop.f32.mrb[13].mxu0  ;;  %v3374_v60 = vpop.f32.mrb[13].mxu1  ;;  %v1714_v44 = vadd.f32 %v4959_v49, %v1690_v55 }
 0x77a   : > { %v1707_v62 = vadd.f32 %v2884_v59, %v1621_v57 }
 0x77b   : > { %v2886_v61 = vmul.f32 -1.442695, %v1700_v56 }
 0x77c   : > { %v2887_v63 = vmul.f32 -1.442695, %v1707_v62 }
 0x77d   : > { %4389 = vpow2.f32 %v2886_v61 }
 0x77e   : > { %4391 = vpow2.f32 %v2887_v63 }
 0x787   : > { %v4390_v0 = vpop.eup %4389 }
 0x788   : > { %v1704_v19 = vadd.f32 1.0, %v4390_v0  ;;  %v4392_v23 = vpop.eup %4391  ;;  %v2891_v0 = vld [vmem:[%s4843_s30 + $0xb8] sm:$0xff] }
 0x789   : > { %v1711_v48 = vadd.f32 1.0, %v4392_v23 }
 0x78a   : > { %4393 = vrcp.f32 %v1704_v19 }
 0x78b   : > { %4395 = vrcp.f32 %v1711_v48 }
 0x794   : > { %v4394_v43 = vpop.eup %4393 }
 0x795   : > { %v1715_v38 = vmul.f32 %v4394_v43, %v1714_v44  ;;  %v4396_v26 = vpop.eup %4395 }
 0x796   : > { %v1718_v31 = vsub.f32 1.0, %v4396_v26  ;;  %v1720_v52 = vmul.f32 %v4396_v26, %v5404_v27 }
 0x797   : > { %v1716_v33 = vadd.f32 %v2885_v45, %v1715_v38 }
 0x799   : > { %4397 = vtanh.f32 %v1716_v33 }
 0x7a3   : > { %v4398_v37 = vpop.eup %4397 }
 0x7a4   : > { %v1719_v25 = vmul.f32 %v4398_v37, %v1718_v31 }
 0x7a6   : > { %v1721_v42 = vadd.f32 %v1720_v52, %v1719_v25 }
 0x7a8   : > { %1805 = vmatmul.mubr.f32.vlgmr.msra.gmra.mrb[14].mxu0 %v1721_v42  ;;  %3408 = vmatmul.mubr.f32.vlgmr.msra.gmra.mrb[14].mxu1 %v1721_v42  ;;  %v1725_v20 = vmul.f32 %v1721_v42, %v1721_v42 }
 0x7a9   : > { %1722 = vadd.xlane.f32.xlu0 %v1721_v42 }
 0x7ad   : > { %1726 = vadd.xlane.f32.xlu0 %v1725_v20 }
 0x836   : > { %v1723_v58 = vpop.xlane.xlu0 %1722 }
 0x837   : > { %v1724_v15 = vmul.f32 0.03125, %v1723_v58 }
 0x839   : > { %v1729_v21 = vmul.f32 %v1724_v15, %v1724_v15  ;;  %v1732_v28 = vsub.f32 %v1721_v42, %v1724_v15 }
 0x83a   : > { %v1727_v39 = vpop.xlane.xlu0 %1726 }
 0x83b   : > { %v1728_v32 = vmul.f32 0.03125, %v1727_v39 }
 0x83d   : > { %v1730_v18 = vsub.f32 %v1728_v32, %v1729_v21 }
 0x83f   : > { %v1731_v22 = vmax.f32 %v1730_v18, 0.0 }
 0x841   : > { %v1733_v24 = vadd.f32 1e-05, %v1731_v22 }
 0x843   : > { %4399 = vrsqrt.f32 %v1733_v24 }
 0x84d   : > { %v4400_v27 = vpop.eup %4399 }
 0x84e   : > { %v1735_v29 = vmul.f32 %v4400_v27, %v1732_v28 }
 0x850   : > { %v1736_v30 = vmul.f32 %v4964_v50, %v1735_v29 }
 0x852   : > { %v1737_v34 = vadd.f32 %v4969_v51, %v1736_v30 }
 0x854   : > { %2888 = vst [vmem:[%s4854_s13 + $0x30] sm:$0xff] %v1737_v34 }
 0x87b   : > { %v1806_v36 = vpop.f32.mrb[14].mxu0  ;;  %v1877_v41 = vpop.f32.mrb[14].mxu1 }
 0x87c   : > { %v1887_v46 = vadd.f32 %v2889_v35, %v1806_v36  ;;  %v1808_v40 = vpop.f32.mrb[15].mxu0  ;;  %v3409_v47 = vpop.f32.mrb[15].mxu1  ;;  %v1901_v62 = vadd.f32 %v4959_v49, %v1877_v41 }
 0x87d   : > { %v1894_v55 = vadd.f32 %v2890_v53, %v1808_v40 }
 0x87e   : > { %v2892_v54 = vmul.f32 -1.442695, %v1887_v46 }
 0x87f   : > { %v2893_v56 = vmul.f32 -1.442695, %v1894_v55 }
 0x880   : > { %4401 = vpow2.f32 %v2892_v54 }
 0x881   : > { %4403 = vpow2.f32 %v2893_v56 }
 0x88a   : > { %v4402_v57 = vpop.eup %4401 }
 0x88b   : > { %v1891_v59 = vadd.f32 1.0, %v4402_v57  ;;  %v4404_v60 = vpop.eup %4403 }
 0x88c   : > { %v1898_v61 = vadd.f32 1.0, %v4404_v60 }
 0x88d   : > { %4405 = vrcp.f32 %v1891_v59 }
 0x88e   : > { %4407 = vrcp.f32 %v1898_v61 }
 0x897   : > { %v4406_v63 = vpop.eup %4405 }
 0x898   : > { %v1902_v19 = vmul.f32 %v4406_v63, %v1901_v62  ;;  %v4408_v48 = vpop.eup %4407 }
 0x899   : > { %v1905_v44 = vsub.f32 1.0, %v4408_v48  ;;  %v1907_v38 = vmul.f32 %v4408_v48, %v1721_v42 }
 0x89a   : > { %v1903_v23 = vadd.f32 %v2891_v0, %v1902_v19 }
 0x89c   : > { %4409 = vtanh.f32 %v1903_v23 }
 0x8a6   : > { %v4410_v43 = vpop.eup %4409 }
 0x8a7   : > { %v1906_v45 = vmul.f32 %v4410_v43, %v1905_v44 }
 0x8a9   : > { %v1908_v33 = vadd.f32 %v1907_v38, %v1906_v45 }
 0x8ab   : > { %1927 = vst [vmem:[#allocation2] sm:$0xff] %v1908_v33  ;;  %1909 = vadd.xlane.f32.xlu1 %v1908_v33  ;;  %v1912_v26 = vmul.f32 %v1908_v33, %v1908_v33 }
 0x8af   : > { %1913 = vadd.xlane.f32.xlu1 %v1912_v26 }
 0x938   : > { %v1910_v31 = vpop.xlane.xlu1 %1909 }
 0x939   : > { %v1911_v37 = vmul.f32 0.03125, %v1910_v31 }
 0x93b   : > { %v1916_v52 = vmul.f32 %v1911_v37, %v1911_v37  ;;  %v1919_v21 = vsub.f32 %v1908_v33, %v1911_v37 }
 0x93c   : > { %v1914_v25 = vpop.xlane.xlu1 %1913 }
 0x93d   : > { %v1915_v20 = vmul.f32 0.03125, %v1914_v25 }
 0x93f   : > { %v1917_v58 = vsub.f32 %v1915_v20, %v1916_v52 }
 0x941   : > { %v1918_v15 = vmax.f32 %v1917_v58, 0.0 }
 0x943   : > { %v1920_v39 = vadd.f32 1e-05, %v1918_v15 }
 0x945   : > { %4411 = vrsqrt.f32 %v1920_v39 }
 0x94f   : > { %v4412_v32 = vpop.eup %4411 }
 0x950   : > { %v1922_v18 = vmul.f32 %v4412_v32, %v1919_v21 }
 0x952   : > { %v1923_v42 = vmul.f32 %v4964_v50, %v1922_v18 }
 0x954   : > { %v1924_v22 = vadd.f32 %v4969_v51, %v1923_v42 }
 0x956   : > { %2894 = vst [vmem:[%s4854_s13 + $0x38] sm:$0xff] %v1924_v22 }
 0x957 PF: > { %p2895_p8 = scmp.ne.s32.totalorder %s4627_s27, 1 }
 0x958   : > { %v5466_v24 = vpack.c.bf16 (!%p2895_p8), %v4868_v5, %v4862_v2  ;;  %v5470_v28 = vpack.c.bf16 (!%p2895_p8), %v4866_v4, %v4860_v1  ;;  %v5474_v27 = vpack.c.bf16 (!%p2895_p8), %v4880_v11, %v4874_v8  ;;  %v5480_v29 = vpack.c.bf16 (!%p2895_p8), %v4878_v10, %v4872_v7  ;;  %v5929_v8 = vld [vmem:[#allocation22_spill] sm:$0xff] (!%p2895_p8)  ;;  %v5930_v10 = vld [vmem:[#allocation16_spill] sm:$0xff] (!%p2895_p8)  ;;  %v5931_v11 = vld [vmem:[#allocation17_spill] sm:$0xff] (!%p2895_p8) }
 0x959   : > { %1931 = sbr.rel (%p2895_p8) target bundleno = 3634 (0xe32), region = 64  ;;  %v5484_v2 = vpack.c.bf16 (!%p2895_p8), %v4870_v6, %v4864_v3  ;;  %v5489_v1 = vpack.c.bf16 (!%p2895_p8), %v4892_v17, %v4886_v14  ;;  %v4646_v4 = vmov (!%p2895_p8), 0.0|0.0   ;;  %v5495_v5 = vpack.c.bf16 (!%p2895_p8), %v4882_v12, %v4876_v9  ;;  %v5928_v6 = vld [vmem:[#allocation19_spill] sm:$0xff] (!%p2895_p8)  ;;  %v5932_v14 = vld [vmem:[#allocation18_spill] sm:$0xff] (!%p2895_p8)  ;;  %v5933_v17 = vld [vmem:[#allocation21_spill] sm:$0xff] (!%p2895_p8) }
 0x95a   : > { %3999 = vmatprep.subr.bf16.mxu0 (!%p2895_p8), %v5466_v24  ;;  %4030 = vmatprep.subr.bf16.mxu1 (!%p2895_p8), %v4646_v4  ;;  %v4647_v7 = vmov (!%p2895_p8), 0.0   ;;  %vm4648_vm1 = vmmov (!%p2895_p8), 0   ;;  %v5504_v3 = vpack.c.bf16 (!%p2895_p8), %v4890_v16, %v4884_v13  ;;  %v5509_v9 = vpack.c.bf16 (!%p2895_p8), %v5929_v8, %v5928_v6  ;;  %v5934_v16 = vld [vmem:[#allocation25_spill] sm:$0xff] (!%p2895_p8)  ;;  %v5935_v30 = vld [vmem:[#allocation28_spill] sm:$0xff] (!%p2895_p8)  ;;  %v5937_v36 = vld [vmem:[#allocation23_spill] sm:$0xff] (!%p2895_p8) }
 0x95b   : > { %4001 = vmatpush1.bf16.msra.mxu0 (!%p2895_p8), %v5470_v28  ;;  %4032 = vmatpush3.bf16.msra.mxu1 (!%p2895_p8), %v5484_v2  ;;  %v5514_v12 = vpack.c.bf16 (!%p2895_p8), %v5931_v11, %v5930_v10  ;;  %v5520_v13 = vpack.c.bf16 (!%p2895_p8), %v5933_v17, %v5932_v14  ;;  %v5525_v34 = vpack.c.bf16 (!%p2895_p8), %v5935_v30, %v5934_v16  ;;  %v5936_v35 = vld [vmem:[#allocation20_spill] sm:$0xff] (!%p2895_p8)  ;;  %v5939_v40 = vld [vmem:[#allocation27_spill] sm:$0xff] (!%p2895_p8)  ;;  %v5941_v54 = vld [vmem:[#allocation34_spill] sm:$0xff] (!%p2895_p8) }
 0x95c   : > { %4003 = vmatprep.subr.bf16.mxu0 (!%p2895_p8), %v5474_v27  ;;  %1997 = vmatprep.mubr.f32.mxu0 (!%p2895_p8), %v4647_v7  ;;  %v5530_v41 = vpack.c.bf16 (!%p2895_p8), %v5937_v36, %v5936_v35  ;;  %v5938_v46 = vld [vmem:[#allocation24_spill] sm:$0xff] (!%p2895_p8)  ;;  %v5940_v47 = vld [vmem:[#allocation31_spill] sm:$0xff] (!%p2895_p8)  ;;  %v5942_v56 = vld [vmem:[#allocation26_spill] sm:$0xff] (!%p2895_p8) }
 0x95d   : > { %4033 = vmatprep.subr.bf16.mxu1 (!%p2895_p8), %v4646_v4  ;;  %3442 = vmatprep.mubr.msk.f32.mxu1 (!%p2895_p8), %vm4648_vm1, %v4647_v7  ;;  %v5536_v53 = vpack.c.bf16 (!%p2895_p8), %v5939_v40, %v5938_v46  ;;  %v5541_v55 = vpack.c.bf16 (!%p2895_p8), %v5941_v54, %v5940_v47  ;;  %v5943_v57 = vld [vmem:[#allocation29_spill] sm:$0xff] (!%p2895_p8)  ;;  %v5944_v60 = vld [vmem:[#allocation30_spill] sm:$0xff] (!%p2895_p8)  ;;  %v5947_v0 = vld [vmem:[#allocation40_spill] sm:$0xff] (!%p2895_p8) }
 0x95e   : > { %v5546_v59 = vpack.c.bf16 (!%p2895_p8), %v5943_v57, %v5942_v56  ;;  %v5945_v61 = vld [vmem:[#allocation33_spill] sm:$0xff] (!%p2895_p8)  ;;  %v5948_v23 = vld [vmem:[#allocation32_spill] sm:$0xff] (!%p2895_p8)  ;;  %v5949_v48 = vld [vmem:[#allocation35_spill] sm:$0xff] (!%p2895_p8) }
 0x95f   : > { %4005 = vmatpush1.bf16.msra.mxu0 (!%p2895_p8), %v5480_v29  ;;  %4035 = vmatpush3.bf16.msra.mxu1 (!%p2895_p8), %v5495_v5  ;;  %v5552_v62 = vpack.c.bf16 (!%p2895_p8), %v5945_v61, %v5944_v60  ;;  %v5946_v63 = vld [vmem:[#allocation37_spill] sm:$0xff] (!%p2895_p8)  ;;  %v5562_v44 = vpack.c.bf16 (!%p2895_p8), %v5949_v48, %v5948_v23  ;;  %v5950_v43 = vld [vmem:[#allocation36_spill] sm:$0xff] (!%p2895_p8)  ;;  %v5951_v45 = vld [vmem:[#allocation39_spill] sm:$0xff] (!%p2895_p8) }
 0x960   : > { %4007 = vmatprep.subr.bf16.mxu0 %v5489_v1  ;;  %4036 = vmatprep.subr.bf16.mxu1 %v4646_v4  ;;  %v5557_v19 = vpack.c.bf16 %v5947_v0, %v5946_v63  ;;  %v5568_v38 = vpack.c.bf16 %v5951_v45, %v5950_v43  ;;  %v5952_v33 = vld [vmem:[#allocation43_spill] sm:$0xff]  ;;  %v5953_v26 = vld [vmem:[#allocation46_spill] sm:$0xff]  ;;  %v5955_v25 = vld [vmem:[#allocation41_spill] sm:$0xff] }
 0x961   : > { %v5573_v31 = vpack.c.bf16 %v5953_v26, %v5952_v33  ;;  %v5954_v37 = vld [vmem:[#allocation38_spill] sm:$0xff]  ;;  %v5957_v58 = vld [vmem:[#allocation45_spill] sm:$0xff]  ;;  %v5958_v39 = vld [vmem:[#allocation44_spill] sm:$0xff] }
 0x962   : > { %v5578_v52 = vpack.c.bf16 %v5955_v25, %v5954_v37  ;;  %v5956_v20 = vld [vmem:[#allocation42_spill] sm:$0xff]  ;;  %v5959_v21 = vld [vmem:[#allocation47_spill] sm:$0xff]  ;;  %v2896_v10 = vld [vmem:[%s4843_s30 + $0x8] sm:$0xff] }
 0x963   : > { %4009 = vmatpush1.bf16.msra.mxu0 %v5504_v3  ;;  %4038 = vmatpush3.bf16.msra.mxu1 %v5514_v12  ;;  %v5584_v15 = vpack.c.bf16 %v5957_v58, %v5956_v20  ;;  %v5590_v32 = vpack.c.bf16 %v5959_v21, %v5958_v39  ;;  %v5594_v18 = vld [vmem:[#allocation2] sm:$0xff]  ;;  %v2074_v42 = vld [vmem:[%s4843_s30] sm:$0xff]  ;;  %v2897_v56 = vld [vmem:[%s4843_s30 + $0x10] sm:$0xff] }
 0x964   : > { %4011 = vmatprep.subr.bf16.mxu0 %v5509_v9  ;;  %4039 = vmatprep.subr.bf16.mxu1 %v4646_v4 }
 0x967   : > { %4013 = vmatpush1.bf16.msra.mxu0 %v5520_v13  ;;  %4041 = vmatpush3.bf16.msra.mxu1 %v5530_v41 }
 0x968   : > { %4015 = vmatprep.subr.bf16.mxu0 %v5525_v34  ;;  %4042 = vmatprep.subr.bf16.mxu1 %v4646_v4 }
 0x96b   : > { %4017 = vmatpush1.bf16.msra.mxu0 %v5536_v53  ;;  %4044 = vmatpush3.bf16.msra.mxu1 %v5546_v59 }
 0x96c   : > { %4019 = vmatprep.subr.bf16.mxu0 %v5541_v55  ;;  %4045 = vmatprep.subr.bf16.mxu1 %v4646_v4 }
 0x96f   : > { %4021 = vmatpush1.bf16.msra.mxu0 %v5552_v62  ;;  %4047 = vmatpush3.bf16.msra.mxu1 %v5562_v44 }
 0x970   : > { %4023 = vmatprep.subr.bf16.mxu0 %v5557_v19  ;;  %4048 = vmatprep.subr.bf16.mxu1 %v4646_v4 }
 0x973   : > { %4025 = vmatpush1.bf16.msra.mxu0 %v5568_v38  ;;  %4050 = vmatpush3.bf16.msra.mxu1 %v5578_v52 }
 0x974   : > { %4027 = vmatprep.subr.bf16.mxu0 %v5573_v31  ;;  %4051 = vmatprep.subr.bf16.mxu1 %v4646_v4 }
 0x977   : > { %4029 = vmatpush1.bf16.msra.mxu0 %v5584_v15  ;;  %4053 = vmatpush3.bf16.msra.mxu1 %v5590_v32 }
 0x978   : > { %4055 = vmatprep.subr.bf16.mxu0 %v5466_v24  ;;  %4086 = vmatprep.subr.bf16.mxu1 %v4646_v4 }
 0x97a   : > { %1998 = vmatmul.mubr.f32.vlgmr.msra.gmra.mrb[0].mxu0 %v5594_v18  ;;  %3443 = vmatmul.mubr.f32.vlgmr.msra.gmra.mrb[0].mxu1 %v5594_v18 }
 0x97b   : > { %4057 = vmatpush1.bf16.msra.mxu0 %v5470_v28  ;;  %2182 = vmatprep.mubr.f32.mxu0 %v4647_v7 }
 0x97c   : > { %4059 = vmatprep.subr.bf16.mxu0 %v5474_v27  ;;  %4088 = vmatpush3.bf16.msra.mxu1 %v5484_v2 }
 0x97d   : > { %3477 = vmatprep.mubr.msk.f32.mxu1 %vm4648_vm1, %v4647_v7  ;;  %4089 = vmatprep.subr.bf16.mxu1 %v4646_v4 }
 0x97f   : > { %4061 = vmatpush1.bf16.msra.mxu0 %v5480_v29 }
 0x980   : > { %4063 = vmatprep.subr.bf16.mxu0 %v5489_v1  ;;  %4091 = vmatpush3.bf16.msra.mxu1 %v5495_v5 }
 0x981   : > { %4092 = vmatprep.subr.bf16.mxu1 %v4646_v4 }
 0x983   : > { %4065 = vmatpush1.bf16.msra.mxu0 %v5504_v3 }
 0x984   : > { %4067 = vmatprep.subr.bf16.mxu0 %v5509_v9  ;;  %4094 = vmatpush3.bf16.msra.mxu1 %v5514_v12 }
 0x985   : > { %4095 = vmatprep.subr.bf16.mxu1 %v4646_v4 }
 0x987   : > { %4069 = vmatpush1.bf16.msra.mxu0 %v5520_v13 }
 0x988   : > { %4071 = vmatprep.subr.bf16.mxu0 %v5525_v34  ;;  %4097 = vmatpush3.bf16.msra.mxu1 %v5530_v41 }
 0x989   : > { %4098 = vmatprep.subr.bf16.mxu1 %v4646_v4 }
 0x98b   : > { %4073 = vmatpush1.bf16.msra.mxu0 %v5536_v53 }
 0x98c   : > { %4075 = vmatprep.subr.bf16.mxu0 %v5541_v55  ;;  %4100 = vmatpush3.bf16.msra.mxu1 %v5546_v59 }
 0x98d   : > { %4101 = vmatprep.subr.bf16.mxu1 %v4646_v4 }
 0x98f   : > { %4077 = vmatpush1.bf16.msra.mxu0 %v5552_v62 }
 0x990   : > { %4079 = vmatprep.subr.bf16.mxu0 %v5557_v19  ;;  %4103 = vmatpush3.bf16.msra.mxu1 %v5562_v44 }
 0x991   : > { %4104 = vmatprep.subr.bf16.mxu1 %v4646_v4 }
 0x993   : > { %4081 = vmatpush1.bf16.msra.mxu0 %v5568_v38 }
 0x994   : > { %4083 = vmatprep.subr.bf16.mxu0 %v5573_v31  ;;  %4106 = vmatpush3.bf16.msra.mxu1 %v5578_v52 }
 0x995   : > { %4107 = vmatprep.subr.bf16.mxu1 %v4646_v4 }
 0x997   : > { %4085 = vmatpush1.bf16.msra.mxu0 %v5584_v15 }
 0x998   : > { %4111 = vmatprep.subr.bf16.mxu0 %v5466_v24  ;;  %4109 = vmatpush3.bf16.msra.mxu1 %v5590_v32 }
 0x999   : > { %4142 = vmatprep.subr.bf16.mxu1 %v4646_v4 }
 0xa4d   : > { %v1999_v22 = vpop.f32.mrb[0].mxu0  ;;  %v2070_v11 = vpop.f32.mrb[0].mxu1 }
 0xa4e   : > { %v2079_v6 = vadd.f32 %v2074_v42, %v1999_v22  ;;  %v2001_v8 = vpop.f32.mrb[1].mxu0  ;;  %v3444_v17 = vpop.f32.mrb[1].mxu1  ;;  %v2093_v47 = vadd.f32 %v4959_v49, %v2070_v11 }
 0xa4f   : > { %v2086_v16 = vadd.f32 %v2896_v10, %v2001_v8  ;;  %v2900_v8 = vld [vmem:[%s4843_s30 + $0x18] sm:$0xff] }
 0xa50   : > { %v2898_v14 = vmul.f32 -1.442695, %v2079_v6 }
 0xa51   : > { %v2899_v30 = vmul.f32 -1.442695, %v2086_v16  ;;  %v2901_v16 = vld [vmem:[%s4843_s30 + $0x20] sm:$0xff] }
 0xa52   : > { %4413 = vpow2.f32 %v2898_v14 }
 0xa53   : > { %4415 = vpow2.f32 %v2899_v30 }
 0xa5c   : > { %v4414_v35 = vpop.eup %4413 }
 0xa5d   : > { %v2083_v36 = vadd.f32 1.0, %v4414_v35  ;;  %v4416_v46 = vpop.eup %4415 }
 0xa5e   : > { %v2090_v40 = vadd.f32 1.0, %v4416_v46 }
 0xa5f   : > { %4417 = vrcp.f32 %v2083_v36 }
 0xa60   : > { %4419 = vrcp.f32 %v2090_v40 }
 0xa69   : > { %v4418_v54 = vpop.eup %4417 }
 0xa6a   : > { %v2094_v57 = vmul.f32 %v4418_v54, %v2093_v47  ;;  %v4420_v61 = vpop.eup %4419 }
 0xa6b   : > { %v2097_v63 = vsub.f32 1.0, %v4420_v61  ;;  %v2099_v23 = vmul.f32 %v4420_v61, %v5594_v18  ;;  %v2902_v61 = vld [vmem:[%s4843_s30 + $0x28] sm:$0xff] }
 0xa6c   : > { %v2095_v60 = vadd.f32 %v2897_v56, %v2094_v57 }
 0xa6e   : > { %4421 = vtanh.f32 %v2095_v60 }
 0xa78   : > { %v4422_v0 = vpop.eup %4421 }
 0xa79   : > { %v2098_v48 = vmul.f32 %v4422_v0, %v2097_v63 }
 0xa7b   : > { %v5641_v43 = vadd.f32 %v2099_v23, %v2098_v48 }
 0xa7d   : > { %2101 = vadd.xlane.f32.xlu0 %v5641_v43  ;;  %2183 = vmatmul.mubr.f32.vlgmr.msra.gmra.mrb[2].mxu0 %v5641_v43  ;;  %v2104_v45 = vmul.f32 %v5641_v43, %v5641_v43 }
 0xa7e   : > { %3478 = vmatmul.mubr.f32.vlgmr.msra.gmra.mrb[2].mxu1 %v5641_v43  ;;  %4113 = vmatpush1.bf16.msra.mxu0 %v5470_v28 }
 0xa7f   : > { %4144 = vmatpush3.bf16.msra.mxu1 %v5484_v2  ;;  %4115 = vmatprep.subr.bf16.mxu0 %v5474_v27 }
 0xa80   : > { %4145 = vmatprep.subr.bf16.mxu1 %v4646_v4  ;;  %2369 = vmatprep.mubr.f32.mxu0 %v4647_v7 }
 0xa81   : > { %2105 = vadd.xlane.f32.xlu0 %v2104_v45  ;;  %3512 = vmatprep.mubr.msk.f32.mxu1 %vm4648_vm1, %v4647_v7 }
 0xa82   : > { %4117 = vmatpush1.bf16.msra.mxu0 %v5480_v29 }
 0xa83   : > { %4147 = vmatpush3.bf16.msra.mxu1 %v5495_v5  ;;  %4119 = vmatprep.subr.bf16.mxu0 %v5489_v1 }
 0xa84   : > { %4148 = vmatprep.subr.bf16.mxu1 %v4646_v4 }
 0xa86   : > { %4121 = vmatpush1.bf16.msra.mxu0 %v5504_v3 }
 0xa87   : > { %4150 = vmatpush3.bf16.msra.mxu1 %v5514_v12  ;;  %4123 = vmatprep.subr.bf16.mxu0 %v5509_v9 }
 0xa88   : > { %4151 = vmatprep.subr.bf16.mxu1 %v4646_v4 }
 0xa8a   : > { %4125 = vmatpush1.bf16.msra.mxu0 %v5520_v13 }
 0xa8b   : > { %4153 = vmatpush3.bf16.msra.mxu1 %v5530_v41  ;;  %4127 = vmatprep.subr.bf16.mxu0 %v5525_v34 }
 0xa8c   : > { %4154 = vmatprep.subr.bf16.mxu1 %v4646_v4 }
 0xa8e   : > { %4129 = vmatpush1.bf16.msra.mxu0 %v5536_v53 }
 0xa8f   : > { %4156 = vmatpush3.bf16.msra.mxu1 %v5546_v59  ;;  %4131 = vmatprep.subr.bf16.mxu0 %v5541_v55 }
 0xa90   : > { %4157 = vmatprep.subr.bf16.mxu1 %v4646_v4 }
 0xa92   : > { %4133 = vmatpush1.bf16.msra.mxu0 %v5552_v62 }
 0xa93   : > { %4159 = vmatpush3.bf16.msra.mxu1 %v5562_v44  ;;  %4135 = vmatprep.subr.bf16.mxu0 %v5557_v19 }
 0xa94   : > { %4160 = vmatprep.subr.bf16.mxu1 %v4646_v4 }
 0xa96   : > { %4137 = vmatpush1.bf16.msra.mxu0 %v5568_v38 }
 0xa97   : > { %4162 = vmatpush3.bf16.msra.mxu1 %v5578_v52  ;;  %4139 = vmatprep.subr.bf16.mxu0 %v5573_v31 }
 0xa98   : > { %4163 = vmatprep.subr.bf16.mxu1 %v4646_v4 }
 0xa9a   : > { %4141 = vmatpush1.bf16.msra.mxu0 %v5584_v15 }
 0xa9b   : > { %4165 = vmatpush3.bf16.msra.mxu1 %v5590_v32  ;;  %4167 = vmatprep.subr.bf16.mxu0 %v5466_v24 }
 0xa9c   : > { %4198 = vmatprep.subr.bf16.mxu1 %v4646_v4 }
 0xb0a   : > { %v2102_v33 = vpop.xlane.xlu0 %2101 }
 0xb0b   : > { %v2103_v26 = vmul.f32 0.03125, %v2102_v33 }
 0xb0d   : > { %v2108_v25 = vmul.f32 %v2103_v26, %v2103_v26  ;;  %v2111_v18 = vsub.f32 %v5641_v43, %v2103_v26 }
 0xb0e   : > { %v2106_v37 = vpop.xlane.xlu0 %2105 }
 0xb0f   : > { %v2107_v20 = vmul.f32 0.03125, %v2106_v37 }
 0xb11   : > { %v2109_v58 = vsub.f32 %v2107_v20, %v2108_v25 }
 0xb13   : > { %v2110_v39 = vmax.f32 %v2109_v58, 0.0 }
 0xb15   : > { %v2112_v21 = vadd.f32 1e-05, %v2110_v39 }
 0xb17   : > { %4423 = vrsqrt.f32 %v2112_v21  ;;  %v2908_v21 = vld [vmem:[%s4843_s30 + $0x40] sm:$0xff] }
 0xb21   : > { %v4424_v42 = vpop.eup %4423 }
 0xb22   : > { %v2114_v22 = vmul.f32 %v4424_v42, %v2111_v18 }
 0xb24   : > { %v2115_v24 = vmul.f32 %v4964_v50, %v2114_v22 }
 0xb26   : > { %v2116_v6 = vadd.f32 %v4969_v51, %v2115_v24 }
 0xb28   : > { %2117 = vst [vmem:[%s4854_s13] sm:$0xff] %v2116_v6 }
 0xb50   : > { %v2184_v10 = vpop.f32.mrb[2].mxu0 }
 0xb51   : > { %v2265_v11 = vadd.f32 %v2900_v8, %v2184_v10  ;;  %v2255_v14 = vpop.f32.mrb[2].mxu1  ;;  %v2186_v17 = vpop.f32.mrb[3].mxu0 }
 0xb52   : > { %v3479_v30 = vpop.f32.mrb[3].mxu1  ;;  %v2272_v36 = vadd.f32 %v2901_v16, %v2186_v17  ;;  %v2279_v57 = vadd.f32 %v4959_v49, %v2255_v14 }
 0xb53   : > { %v2903_v35 = vmul.f32 -1.442695, %v2265_v11 }
 0xb54   : > { %v2904_v46 = vmul.f32 -1.442695, %v2272_v36 }
 0xb55   : > { %4425 = vpow2.f32 %v2903_v35 }
 0xb56   : > { %4427 = vpow2.f32 %v2904_v46 }
 0xb5f   : > { %v4426_v40 = vpop.eup %4425 }
 0xb60   : > { %v2269_v47 = vadd.f32 1.0, %v4426_v40  ;;  %v4428_v54 = vpop.eup %4427 }
 0xb61   : > { %v2276_v56 = vadd.f32 1.0, %v4428_v54 }
 0xb62   : > { %4429 = vrcp.f32 %v2269_v47 }
 0xb63   : > { %4431 = vrcp.f32 %v2276_v56 }
 0xb6c   : > { %v4430_v60 = vpop.eup %4429 }
 0xb6d   : > { %v2280_v63 = vmul.f32 %v4430_v60, %v2279_v57  ;;  %v4432_v23 = vpop.eup %4431 }
 0xb6e   : > { %v2283_v48 = vsub.f32 1.0, %v4432_v23  ;;  %v2285_v26 = vmul.f32 %v4432_v23, %v5641_v43 }
 0xb6f   : > { %v2281_v0 = vadd.f32 %v2902_v61, %v2280_v63  ;;  %v2912_v63 = vld [vmem:[%s4843_s30 + $0x48] sm:$0xff] }
 0xb71   : > { %4433 = vtanh.f32 %v2281_v0 }
 0xb7b   : > { %v4434_v45 = vpop.eup %4433 }
 0xb7c   : > { %v2284_v33 = vmul.f32 %v4434_v45, %v2283_v48 }
 0xb7e   : > { %v5692_v37 = vadd.f32 %v2285_v26, %v2284_v33  ;;  %v2913_v33 = vld [vmem:[%s4843_s30 + $0x50] sm:$0xff] }
 0xb80   : > { %2370 = vmatmul.mubr.f32.vlgmr.msra.gmra.mrb[4].mxu0 %v5692_v37  ;;  %3513 = vmatmul.mubr.f32.vlgmr.msra.gmra.mrb[4].mxu1 %v5692_v37  ;;  %v2290_v25 = vmul.f32 %v5692_v37, %v5692_v37 }
 0xb81   : > { %2287 = vadd.xlane.f32.xlu0 %v5692_v37  ;;  %4169 = vmatpush1.bf16.msra.mxu0 %v5470_v28 }
 0xb82   : > { %2291 = vadd.xlane.f32.xlu1 %v2290_v25  ;;  %4200 = vmatpush3.bf16.msra.mxu1 %v5484_v2 }
 0xb83   : > { %4171 = vmatprep.subr.bf16.mxu0 %v5474_v27  ;;  %4201 = vmatprep.subr.bf16.mxu1 %v4646_v4 }
 0xb84   : > { %2556 = vmatprep.mubr.f32.mxu0 %v4647_v7  ;;  %3547 = vmatprep.mubr.msk.f32.mxu1 %vm4648_vm1, %v4647_v7 }
 0xb85   : > { %4173 = vmatpush1.bf16.msra.mxu0 %v5480_v29 }
 0xb86   : > { %4203 = vmatpush3.bf16.msra.mxu1 %v5495_v5  ;;  %4175 = vmatprep.subr.bf16.mxu0 %v5489_v1 }
 0xb87   : > { %4204 = vmatprep.subr.bf16.mxu1 %v4646_v4 }
 0xb89   : > { %4177 = vmatpush1.bf16.msra.mxu0 %v5504_v3 }
 0xb8a   : > { %4206 = vmatpush3.bf16.msra.mxu1 %v5514_v12  ;;  %4179 = vmatprep.subr.bf16.mxu0 %v5509_v9 }
 0xb8b   : > { %4207 = vmatprep.subr.bf16.mxu1 %v4646_v4 }
 0xb8d   : > { %4181 = vmatpush1.bf16.msra.mxu0 %v5520_v13 }
 0xb8e   : > { %4209 = vmatpush3.bf16.msra.mxu1 %v5530_v41  ;;  %4183 = vmatprep.subr.bf16.mxu0 %v5525_v34  ;;  %v2906_v41 = vld [vmem:[%s4843_s30 + $0x30] sm:$0xff] }
 0xb8f   : > { %4210 = vmatprep.subr.bf16.mxu1 %v4646_v4 }
 0xb91   : > { %4185 = vmatpush1.bf16.msra.mxu0 %v5536_v53 }
 0xb92   : > { %4212 = vmatpush3.bf16.msra.mxu1 %v5546_v59  ;;  %4187 = vmatprep.subr.bf16.mxu0 %v5541_v55 }
 0xb93   : > { %4213 = vmatprep.subr.bf16.mxu1 %v4646_v4 }
 0xb95   : > { %4189 = vmatpush1.bf16.msra.mxu0 %v5552_v62 }
 0xb96   : > { %4215 = vmatpush3.bf16.msra.mxu1 %v5562_v44  ;;  %4191 = vmatprep.subr.bf16.mxu0 %v5557_v19  ;;  %v2907_v19 = vld [vmem:[%s4843_s30 + $0x38] sm:$0xff] }
 0xb97   : > { %4216 = vmatprep.subr.bf16.mxu1 %v4646_v4 }
 0xb99   : > { %4193 = vmatpush1.bf16.msra.mxu0 %v5568_v38 }
 0xb9a   : > { %4218 = vmatpush3.bf16.msra.mxu1 %v5578_v52  ;;  %4195 = vmatprep.subr.bf16.mxu0 %v5573_v31 }
 0xb9b   : > { %4219 = vmatprep.subr.bf16.mxu1 %v4646_v4 }
 0xb9d   : > { %4197 = vmatpush1.bf16.msra.mxu0 %v5584_v15 }
 0xb9e   : > { %4221 = vmatpush3.bf16.msra.mxu1 %v5590_v32 }
 0xc0e   : > { %v2288_v28 = vpop.xlane.xlu0 %2287 }
 0xc0f   : > { %v2289_v27 = vmul.f32 0.03125, %v2288_v28  ;;  %v2292_v29 = vpop.xlane.xlu1 %2291 }
 0xc10   : > { %v2293_v2 = vmul.f32 0.03125, %v2292_v29 }
 0xc11   : > { %v2294_v1 = vmul.f32 %v2289_v27, %v2289_v27  ;;  %v2297_v9 = vsub.f32 %v5692_v37, %v2289_v27 }
 0xc13   : > { %v2295_v5 = vsub.f32 %v2293_v2, %v2294_v1 }
 0xc15   : > { %v2296_v7 = vmax.f32 %v2295_v5, 0.0 }
 0xc17   : > { %v2298_v3 = vadd.f32 1e-05, %v2296_v7 }
 0xc19   : > { %4435 = vrsqrt.f32 %v2298_v3  ;;  %v2914_v3 = vld [vmem:[%s4843_s30 + $0x58] sm:$0xff] }
 0xc23   : > { %v4436_v12 = vpop.eup %4435 }
 0xc24   : > { %v2300_v4 = vmul.f32 %v4436_v12, %v2297_v9 }
 0xc26   : > { %v2301_v13 = vmul.f32 %v4964_v50, %v2300_v4 }
 0xc28   : > { %v2302_v34 = vadd.f32 %v4969_v51, %v2301_v13 }
 0xc2a   : > { %2905 = vst [vmem:[%s4854_s13 + $0x8] sm:$0xff] %v2302_v34 }
 0xc53   : > { %v2371_v53 = vpop.f32.mrb[4].mxu0  ;;  %v2442_v55 = vpop.f32.mrb[4].mxu1 }
 0xc54   : > { %v2452_v59 = vadd.f32 %v2906_v41, %v2371_v53  ;;  %v2373_v62 = vpop.f32.mrb[5].mxu0  ;;  %v3514_v44 = vpop.f32.mrb[5].mxu1  ;;  %v2466_v58 = vadd.f32 %v4959_v49, %v2442_v55 }
 0xc55   : > { %v2459_v31 = vadd.f32 %v2907_v19, %v2373_v62 }
 0xc56   : > { %v2909_v38 = vmul.f32 -1.442695, %v2452_v59 }
 0xc57   : > { %v2910_v52 = vmul.f32 -1.442695, %v2459_v31 }
 0xc58   : > { %4437 = vpow2.f32 %v2909_v38 }
 0xc59   : > { %4439 = vpow2.f32 %v2910_v52 }
 0xc62   : > { %v4438_v15 = vpop.eup %4437 }
 0xc63   : > { %v2456_v32 = vadd.f32 1.0, %v4438_v15  ;;  %v4440_v43 = vpop.eup %4439 }
 0xc64   : > { %v2463_v20 = vadd.f32 1.0, %v4440_v43 }
 0xc65   : > { %4441 = vrcp.f32 %v2456_v32 }
 0xc66   : > { %4443 = vrcp.f32 %v2463_v20 }
 0xc6f   : > { %v4442_v39 = vpop.eup %4441 }
 0xc70   : > { %v2467_v18 = vmul.f32 %v4442_v39, %v2466_v58  ;;  %v4444_v22 = vpop.eup %4443 }
 0xc71   : > { %v2470_v24 = vsub.f32 1.0, %v4444_v22  ;;  %v2472_v10 = vmul.f32 %v4444_v22, %v5692_v37 }
 0xc72   : > { %v2468_v42 = vadd.f32 %v2908_v21, %v2467_v18 }
 0xc74   : > { %4445 = vtanh.f32 %v2468_v42 }
 0xc7e   : > { %v4446_v6 = vpop.eup %4445 }
 0xc7f   : > { %v2471_v8 = vmul.f32 %v4446_v6, %v2470_v24 }
 0xc81   : > { %v2473_v11 = vadd.f32 %v2472_v10, %v2471_v8 }
 0xc83   : > { %2557 = vmatmul.mubr.f32.vlgmr.msra.gmra.mrb[6].mxu0 %v2473_v11  ;;  %3548 = vmatmul.mubr.f32.vlgmr.msra.gmra.mrb[6].mxu1 %v2473_v11  ;;  %v2477_v14 = vmul.f32 %v2473_v11, %v2473_v11 }
 0xc84   : > { %2474 = vadd.xlane.f32.xlu1 %v2473_v11 }
 0xc85   : > { %2478 = vadd.xlane.f32.xlu0 %v2477_v14 }
 0xd11   : > { %v2475_v17 = vpop.xlane.xlu1 %2474 }
 0xd12   : > { %v2476_v16 = vmul.f32 0.03125, %v2475_v17  ;;  %v2479_v30 = vpop.xlane.xlu0 %2478 }
 0xd13   : > { %v2480_v35 = vmul.f32 0.03125, %v2479_v30 }
 0xd14   : > { %v2481_v36 = vmul.f32 %v2476_v16, %v2476_v16  ;;  %v2484_v54 = vsub.f32 %v2473_v11, %v2476_v16 }
 0xd16   : > { %v2482_v46 = vsub.f32 %v2480_v35, %v2481_v36 }
 0xd18   : > { %v2483_v40 = vmax.f32 %v2482_v46, 0.0 }
 0xd1a   : > { %v2485_v47 = vadd.f32 1e-05, %v2483_v40 }
 0xd1c   : > { %4447 = vrsqrt.f32 %v2485_v47 }
 0xd26   : > { %v4448_v56 = vpop.eup %4447 }
 0xd27   : > { %v2487_v57 = vmul.f32 %v4448_v56, %v2484_v54 }
 0xd29   : > { %v2488_v60 = vmul.f32 %v4964_v50, %v2487_v57 }
 0xd2b   : > { %v2489_v61 = vadd.f32 %v4969_v51, %v2488_v60 }
 0xd2d   : > { %2911 = vst [vmem:[%s4854_s13 + $0x10] sm:$0xff] %v2489_v61 }
 0xd56   : > { %v2558_v0 = vpop.f32.mrb[6].mxu0  ;;  %v2629_v23 = vpop.f32.mrb[6].mxu1 }
 0xd57   : > { %v2639_v48 = vadd.f32 %v2912_v63, %v2558_v0  ;;  %v2560_v45 = vpop.f32.mrb[7].mxu0  ;;  %v3549_v26 = vpop.f32.mrb[7].mxu1  ;;  %v2653_v5 = vadd.f32 %v4959_v49, %v2629_v23 }
 0xd58   : > { %v2646_v25 = vadd.f32 %v2913_v33, %v2560_v45 }
 0xd59   : > { %v2915_v37 = vmul.f32 -1.442695, %v2639_v48 }
 0xd5a   : > { %v2916_v28 = vmul.f32 -1.442695, %v2646_v25 }
 0xd5b   : > { %4449 = vpow2.f32 %v2915_v37 }
 0xd5c   : > { %4451 = vpow2.f32 %v2916_v28 }
 0xd65   : > { %v4450_v27 = vpop.eup %4449 }
 0xd66   : > { %v2643_v29 = vadd.f32 1.0, %v4450_v27  ;;  %v4452_v2 = vpop.eup %4451 }
 0xd67   : > { %v2650_v1 = vadd.f32 1.0, %v4452_v2 }
 0xd68   : > { %4453 = vrcp.f32 %v2643_v29 }
 0xd69   : > { %4455 = vrcp.f32 %v2650_v1 }
 0xd72   : > { %v4454_v7 = vpop.eup %4453 }
 0xd73   : > { %v2654_v9 = vmul.f32 %v4454_v7, %v2653_v5  ;;  %v4456_v4 = vpop.eup %4455 }
 0xd74   : > { %v2657_v13 = vsub.f32 1.0, %v4456_v4  ;;  %v2659_v53 = vmul.f32 %v4456_v4, %v2473_v11 }
 0xd75   : > { %v2655_v12 = vadd.f32 %v2914_v3, %v2654_v9 }
 0xd77   : > { %4457 = vtanh.f32 %v2655_v12 }
 0xd81   : > { %v4458_v34 = vpop.eup %4457 }
 0xd82   : > { %v2658_v41 = vmul.f32 %v4458_v34, %v2657_v13 }
 0xd84   : > { %v2660_v55 = vadd.f32 %v2659_v53, %v2658_v41 }
 0xd86   : > { %2679 = vst [vmem:[#allocation2] sm:$0xff] %v2660_v55  ;;  %2680 = vst [vmem:[#allocation9] sm:$0xff] %v2660_v55  ;;  %2661 = vadd.xlane.f32.xlu1 %v2660_v55  ;;  %v2664_v59 = vmul.f32 %v2660_v55, %v2660_v55 }
 0xd8a   : > { %2665 = vadd.xlane.f32.xlu1 %v2664_v59 }
 0xe13   : > { %v2662_v62 = vpop.xlane.xlu1 %2661 }
 0xe14   : > { %v2663_v49 = vmul.f32 0.03125, %v2662_v62 }
 0xe16   : > { %v2668_v44 = vmul.f32 %v2663_v49, %v2663_v49  ;;  %v2671_v32 = vsub.f32 %v2660_v55, %v2663_v49 }
 0xe17   : > { %v2666_v19 = vpop.xlane.xlu1 %2665 }
 0xe18   : > { %v2667_v38 = vmul.f32 0.03125, %v2666_v19 }
 0xe1a   : > { %v2669_v31 = vsub.f32 %v2667_v38, %v2668_v44 }
 0xe1c   : > { %v2670_v52 = vmax.f32 %v2669_v31, 0.0 }
 0xe1e   : > { %v2672_v15 = vadd.f32 1e-05, %v2670_v52 }
 0xe20   : > { %4459 = vrsqrt.f32 %v2672_v15 }
 0xe2a   : > { %v4460_v43 = vpop.eup %4459 }
 0xe2b   : > { %v2674_v20 = vmul.f32 %v4460_v43, %v2671_v32 }
 0xe2d   : > { %v2675_v58 = vmul.f32 %v4964_v50, %v2674_v20 }
 0xe2f   : > { %v2676_v39 = vadd.f32 %v4969_v51, %v2675_v58 }
 0xe31   : > { %2917 = vst [vmem:[%s4854_s13 + $0x18] sm:$0xff] %v2676_v39 }
 0xe32 PF: > { %s2925_s16 = sshll.u32 %s4627_s27, 10  ;;  %s2696_s18 = sshll.u32 %s4854_s13, 4  ;;  %s5758_s18 = int_to_ptr.vmem [resolvable:$true] %s2696_s18 }
 0xe33   : > { %s5755_s12 = scalar_lea.hbm %s5835_s6, %s2925_s16  ;;  %s2682_s19 = scalar_lea.sflag [#allocation5], %s4839_s20 }
 0xe34   : > { %s4519_s9 = scalar_lea.vmem %s5758_s18, 1024  ;;  %s4649_s11 = smov [#allocation8]  }
 0xe35   : > { %p4520_p12 = scmp.ne.s32.totalorder %s5758_s18, %s4519_s9  ;;  %s4523_s21 = sshll.u32 %s4649_s11, 4  ;;  %s4524_s21 = int_to_ptr.vmem [resolvable:$false] %s4523_s21 }
 0xe36   : > { %s4525_s27 = scalar_lea.vmem %s4524_s21, 2048  ;;  %p4526_p5 = scmp.lt.s32.totalorder %s5758_s18, %s4524_s21 }
 0xe37   : > { %p4521_p13 = pnand %p4520_p12, %p4785_p10  ;;  %p4527_p9 = scmp.lt.s32.totalorder %s4525_s27, %s4519_s9 }
 0xe39   : > { %p4522_p0 = pneg %p4521_p13  ;;  %p4528_p1 = por %p4527_p9, %p4526_p5 }
 0xe3b   : > { %p4529_p2 = pnand %p4528_p1, %p4522_p0 }
 0xe3d   : > { %4532 = shalt.err (!%p4529_p2)
}
 0xe3e   : > { %s4533_s13 = scalar_lea.hbm %s5755_s12, 1024  ;;  %s4537_s15 = scalar_lea.hbm %s5835_s6, 2048 }
 0xe3f   : > { %p4534_p3 = scmp.ne.s32.totalorder %s5755_s12, %s4533_s13  ;;  %p4538_p4 = scmp.lt.u32.totalorder %s5755_s12, %s5835_s6 }
 0xe40   : > { %p4539_p6 = scmp.lt.u32.totalorder %s4537_s15, %s4533_s13  ;;  %p4541_p12 = scmp.lt.u32.totalorder %s4533_s13, %s5755_s12 }
 0xe41   : > { %p4535_p7 = pnand %p4534_p3, %p4785_p10 }
 0xe42   : > { %p4540_p8 = por %p4539_p6, %p4538_p4 }
 0xe43   : > { %p4536_p11 = pneg %p4535_p7 }
 0xe44   : > { %p4542_p13 = por %p4541_p12, %p4540_p8 }
 0xe46   : > { %p4543_p0 = pnand %p4542_p13, %p4536_p11 }
 0xe48   : > { %4546 = shalt.err (!%p4543_p0)
}
 0xe49   : > { %s4650_s30 = smov 128   ;;  %s4651_s9 = smov 8  }
 0xe4a   : > { %4231 = dma.vmem_to_hbm [thread:$0]  (%p4785_p10), %s5758_s18, 1024, %s5755_s12, %s2682_s19, %s4650_s30, %s4650_s30, %s4651_s9  }
 0xe4b   : > { %s4652_s11 = smov [#allocation9]   ;;  %p5960_p9 = scmp.ne.s32.totalorder %s5881_s10, 0 }
 0xe4c   : > { %s2712_s21 = sshll.u32 %s4652_s11, 4  ;;  %s2713_s21 = int_to_ptr.vmem [resolvable:$true] %s2712_s21 }
 0xe4d   : > { %s4547_s27 = scalar_lea.vmem %s2713_s21, 128  ;;  %p4554_p3 = scmp.lt.s32.totalorder %s2713_s21, %s2713_s21 }
 0xe4e   : > { %p4548_p5 = scmp.ne.s32.totalorder %s2713_s21, %s4547_s27  ;;  %p4555_p7 = scmp.lt.s32.totalorder %s4547_s27, %s4547_s27 }
 0xe50   : > { %p4549_p1 = pnand %p4548_p5, %p5960_p9  ;;  %p4556_p11 = por %p4555_p7, %p4554_p3 }
 0xe52   : > { %p4550_p2 = pneg %p4549_p1 }
 0xe54   : > { %p4557_p4 = pnand %p4556_p11, %p4550_p2 }
 0xe56   : > { %4560 = shalt.err (!%p4557_p4)
}
 0xe57   : > { %s4561_s22 = scalar_lea.hbm %s5836_s7, 128 }
 0xe58   : > { %p4562_p10 = scmp.ne.s32.totalorder %s5836_s7, %s4561_s22  ;;  %p4567_p12 = scmp.lt.u32.totalorder %s4561_s22, %s5836_s7 }
 0xe5a   : > { %p4563_p6 = pnand %p4562_p10, %p5960_p9 }
 0xe5c   : > { %p4564_p8 = pneg %p4563_p6 }
 0xe5e   : > { %p4569_p13 = pnand %p4567_p12, %p4564_p8 }
 0xe60   : > { %4572 = shalt.err (!%p4569_p13)
}
 0xe61   : > { %4233 = dma.vmem_to_hbm [thread:$0]  (%p5960_p9), %s2713_s21, 128, %s5836_s7, [#allocation10]  }
 0xe62   : > { %4606 = dma.done.wait (%p5960_p9), [#allocation10], 128  }
 0xe63   : > { %4608 = vsyncadd (%p5960_p9), [#allocation10], 4294967168 }
 0xe64 PF: > { %s5961_s16 = sld [smem:[#allocation15_spill]]  ;;  %s2728_s1 = sand.u32 1, %s4615_s24  }
 0xe65   : > { %p5963_p5 = scmp.ge.s32.totalorder %s4635_s29, 2  ;;  %s2729_s30 = scalar_lea.sflag [#allocation5], %s2728_s1 }
 0xe6a   : > { %p5962_p0 = scmp.ne.s32.totalorder %s5961_s16, 0 }
 0xe6c   : > { %p4246_p1 = pnand %p5963_p5, %p5962_p0 }
 0xe6e   : > { %4610 = dma.done.wait (!%p4246_p1), %s2729_s30, 1024  }
 0xe6f   : > { %4612 = vsyncadd (!%p4246_p1), %s2729_s30, 4294966272  ;;  %s26_s29 = sadd.s32 1, %s4635_s29   ;;  %s5964_s24 = smov %s4619_s25 }
 0xe70   : > { %p23_p2 = scmp.ge.s32.totalorder %s26_s29, 4   ;;  %s5965_s25 = smov %s4623_s26 }
 0xe71   : > { %s5966_s26 = smov %s4794_s8  ;;  %s5967_s27 = smov %s4631_s28 }
 0xe72   : > { %s5968_s28 = smov %s5970_s17  ;;  %25 = sbr.rel (!%p23_p2) target bundleno = 10 (0xa), region = 161 }
 0xe79   :  { %2734 = vsyncpa [#allocation4], 1 }
 0xe7a   :  { %2736 = vsyncpa [#allocation4 + $0x1], 1 }
 0xe7b   :  { %2737 = vsyncpa [#allocation7], 1 }
 0xe7c   :  { %2738 = vsyncpa [#allocation5], 1 }
 0xe7d   :  { %2740 = vsyncpa [#allocation5 + $0x1], 1 }
 0xe7e   :  { %2741 = vsyncpa [#allocation10], 1 }

// kernel: tpu_custom_call.1
= control target key start
LH: loop header
LB: loop body
LE: loop exit
PB: predicated region body
PF: predicated region fallthrough
CT: control target
= control target key end

     0   :  { %s5829_s0 = inlined_call_operand.hbm [shape: f32[16,3,8,128], index: 0, kind: input, shape index: {}]   ;;  %s5830_s1 = inlined_call_operand.hbm [shape: f32[128,384], index: 1, kind: input, shape index: {}]   ;;  %s5831_s2 = inlined_call_operand.vmem [shape: f32[1,128], index: 2, kind: input, shape index: {}]   ;;  %s5832_s3 = inlined_call_operand.vmem [shape: f32[1,128], index: 3, kind: input, shape index: {}]   ;;  %s5833_s4 = inlined_call_operand.vmem [shape: f32[1,128], index: 4, kind: input, shape index: {}]   ;;  %s5834_s5 = inlined_call_operand.vmem [shape: f32[8,128], index: 5, kind: input, shape index: {}]   ;;  %s5835_s6 = inlined_call_operand.hbm [shape: f32[16,8,128], index: 6, kind: output, shape index: {0}]   ;;  %s5836_s7 = inlined_call_operand.hbm [shape: f32[8,128], index: 7, kind: output, shape index: {1}]  }
   0x1   :  { %5879 = sst [smem:[#allocation48_spill]] %s5830_s1 }
   0x2   :  { %13 = vsyncpa [#allocation4], 0 }
   0x3   :  { %15 = vsyncpa [#allocation4 + $0x1], 0 }
   0x4   :  { %16 = vsyncpa [#allocation7], 0 }
   0x5   :  { %17 = vsyncpa [#allocation5], 0 }
   0x6   :  { %19 = vsyncpa [#allocation5 + $0x1], 0 }
   0x7   :  { %20 = vsyncpa [#allocation10], 0  ;;  %s4693_s24 = smov 0   ;;  %s4695_s25 = smov 0  }
   0x8   :  { %s4697_s26 = smov 0   ;;  %s4699_s27 = smov 0  }
   0x9   :  { %s4701_s28 = smov 0   ;;  %s4703_s29 = smov 0  }
   0xa LB: > { %s2832_s30 = sadd.s32 4294967295, %s4635_s29   ;;  %s2833_s8 = sadd.s32 4294967294, %s4635_s29   ;;  %s4635_s29 = sphi %s4703_s29, %s26_s29   ;;  %s4631_s28 = sphi %s4701_s28, %s5968_s28   ;;  %s4627_s27 = sphi %s4699_s27, %s5967_s27   ;;  %s4623_s26 = sphi %s4697_s26, %s5966_s26   ;;  %s4619_s25 = sphi %s4695_s25, %s5965_s25   ;;  %s4615_s24 = sphi %s4693_s24, %s5964_s24  }
   0xb   : > { %p60_p0 = scmp.ne.s32.totalorder %s4619_s25, %s4615_s24  ;;  %p4727_p1 = scmp.eq.s32.totalorder %s2832_s30, 0 }
   0xc   : > { %p4731_p2 = scmp.eq.s32.totalorder %s2832_s30, 1  ;;  %p202_p3 = scmp.eq.s32.totalorder %s2833_s8, 1 }
   0xd   : > { %s5880_s9 = scalar_select %p4727_p1, 1, 0 }
   0xe   : > { %s5881_s10 = scalar_select %p4731_p2, 1, 0 }
   0xf   : > { %p4737_p4 = por %p4727_p1, %p60_p0  ;;  %p2834_p5 = scmp.ge.s32.totalorder %s4635_s29, 1 }
  0x10   : > { %p4742_p6 = por %p202_p3, %p60_p0  ;;  %p235_p7 = scmp.lt.s32.totalorder %s4635_s29, 3 }
  0x11   : > { %s5882_s11 = scalar_select %p4737_p4, 1, 0 }
  0x12   : > { %s5883_s12 = scalar_select %p4742_p6, 1, 0 }
  0x13   : > { %p4747_p8 = pnand %p2834_p5, %p235_p7  ;;  %s4637_s14 = smov [#allocation6]  }
  0x14   : > { %5884 = sst [smem:[#allocation15_spill]] %s5883_s12  ;;  %s247_s15 = sshll.u32 %s4637_s14, 4  ;;  %s248_s15 = int_to_ptr.vmem [resolvable:$true] %s247_s15 }
  0x15   : > { %s5885_s13 = scalar_select %p4747_p8, 1, 0 }
  0x16   : > { %p4237_p9 = pneg %p4747_p8  ;;  %s35_s17 = sadd.s32 1, %s4631_s28 }
  0x17   : > { %s5887_s1 = sld [smem:[#allocation48_spill]] }
  0x18   : > { %p4756_p11 = pnand %p4237_p9, %p4727_p1 }
  0x1a   : > { %p4463_p13 = pneg %p4756_p11 }
  0x1d   : > { %s4461_s20 = scalar_lea.hbm %s5887_s1, 6144 }
  0x1e   : > { %p4462_p12 = scmp.ne.s32.totalorder %s5887_s1, %s4461_s20  ;;  %p4468_p5 = scmp.lt.u32.totalorder %s4461_s20, %s5887_s1 }
  0x20   : > { %p4464_p0 = pnand %p4463_p13, %p4462_p12 }
  0x22   : > { %p4465_p3 = pneg %p4464_p0 }
  0x24   : > { %p4470_p7 = pnand %p4468_p5, %p4465_p3 }
  0x26   : > { %4473 = shalt.err (!%p4470_p7)
}
  0x27   : > { %s4474_s8 = scalar_lea.vmem %s248_s15, 6144  ;;  %p4482_p1 = scmp.lt.s32.totalorder %s248_s15, %s248_s15 }
  0x28   : > { %p4475_p9 = scmp.ne.s32.totalorder %s248_s15, %s4474_s8  ;;  %p4483_p4 = scmp.lt.s32.totalorder %s4474_s8, %s4474_s8 }
  0x2a   : > { %p4477_p10 = pnand %p4475_p9, %p4463_p13  ;;  %p4484_p8 = por %p4483_p4, %p4482_p1 }
  0x2c   : > { %p4478_p6 = pneg %p4477_p10 }
  0x2e   : > { %p4485_p2 = pnand %p4484_p8, %p4478_p6 }
  0x30   : > { %4488 = shalt.err (!%p4485_p2)
}
  0x31   : > { %s4638_s14 = smov 384   ;;  %s4639_s18 = smov 24  }
  0x32   : > { %4240 = dma.hbm_to_vmem [thread:$0]  (!%p4756_p11), %s5887_s1, 6144, %s248_s15, [#allocation7], %s4638_s14, %s4638_s14, %s4639_s18  }
  0x33   : > { %p36_p1 = scmp.ge.s32.totalorder %s35_s17, 2  ;;  %s47_s21 = sadd.s32 1, %s4623_s26 }
  0x34   : > { %p54_p2 = scmp.ne.s32.totalorder %s4623_s26, %s4619_s25  ;;  %p55_p4 = scmp.eq.s32.totalorder %s4635_s29, 0 }
  0x35   : > { %s5970_s17 = smov (%p36_p1, %s35_s17), 0  ;;  %p5888_p8 = scmp.ne.s32.totalorder %s5881_s10, 0 }
  0x36   : > { %p56_p6 = por %p55_p4, %p54_p2  ;;  %s42_s23 = ssub.s32 %s4631_s28, %s5970_s17 }
  0x37   : > { %p4785_p10 = por %p5888_p8, %p54_p2  ;;  %p4250_p12 = scmp.lt.s32.totalorder %s4635_s29, 2 }
  0x38   : > { %p45_p13 = scmp.eq.s32.totalorder %s42_s23, 0  ;;  %s277_s16 = sand.u32 1, %s4623_s26  }
  0x39   : > { %s4222_s30 = smul.u32 192, %s277_s16  ;;  %p4797_p11 = pnand %p4250_p12, %p56_p6 }
  0x3a   : > { %s4794_s8 = scalar_select %p45_p13, %s4623_s26, %s47_s21  }
  0x3b   : > { %s4223_s15 = smul.u32 3072, %s4631_s28  ;;  %s281_s14 = scalar_lea.vmem [#allocation3], %s4222_s30 }
  0x3c   : > { %s290_s18 = sshll.u32 %s281_s14, 4  ;;  %s4808_s21 = scalar_lea.sflag [#allocation4], %s277_s16  ;;  %s4806_s18 = int_to_ptr.vmem [resolvable:$true] %s290_s18 }
  0x3d   : > { %s4804_s12 = scalar_lea.hbm %s5829_s0, %s4223_s15  ;;  %p4491_p3 = pneg %p4797_p11 }
  0x3e   : > { %s4489_s23 = scalar_lea.hbm %s4804_s12, 3072  ;;  %s4494_s15 = scalar_lea.hbm %s5829_s0, 6144 }
  0x3f   : > { %p4490_p0 = scmp.ne.s32.totalorder %s4804_s12, %s4489_s23  ;;  %p4495_p9 = scmp.lt.u32.totalorder %s4804_s12, %s5829_s0 }
  0x40   : > { %p4496_p1 = scmp.lt.u32.totalorder %s4494_s15, %s4489_s23  ;;  %p4498_p4 = scmp.lt.u32.totalorder %s4489_s23, %s4804_s12 }
  0x41   : > { %p4492_p5 = pnand %p4491_p3, %p4490_p0 }
  0x42   : > { %p4497_p2 = por %p4496_p1, %p4495_p9 }
  0x43   : > { %p4493_p7 = pneg %p4492_p5 }
  0x44   : > { %p4499_p6 = por %p4498_p4, %p4497_p2 }
  0x46   : > { %p4500_p8 = pnand %p4499_p6, %p4493_p7 }
  0x48   : > { %4503 = shalt.err (!%p4500_p8)
}
  0x49   : > { %s4504_s16 = scalar_lea.vmem %s4806_s18, 3072  ;;  %s4640_s1 = smov [#allocation3]  }
  0x4a   : > { %p4505_p12 = scmp.ne.s32.totalorder %s4806_s18, %s4504_s16  ;;  %s4509_s30 = sshll.u32 %s4640_s1, 4  ;;  %s4510_s30 = int_to_ptr.vmem [resolvable:$false] %s4509_s30 }
  0x4b   : > { %s4511_s14 = scalar_lea.vmem %s4510_s30, 6144  ;;  %p4512_p5 = scmp.lt.s32.totalorder %s4806_s18, %s4510_s30 }
  0x4c   : > { %p4507_p13 = pnand %p4505_p12, %p4491_p3  ;;  %p4513_p9 = scmp.lt.s32.totalorder %s4511_s14, %s4504_s16 }
  0x4e   : > { %p4508_p0 = pneg %p4507_p13  ;;  %p4514_p1 = por %p4513_p9, %p4512_p5 }
  0x50   : > { %p4515_p2 = pnand %p4514_p1, %p4508_p0 }
  0x52   : > { %4518 = shalt.err (!%p4515_p2)
}
  0x53   : > { %s4641_s23 = smov 128   ;;  %s4642_s15 = smov 8  }
  0x54   : > { %4244 = dma.hbm_to_vmem [thread:$0]  (!%p4797_p11), %s4804_s12, 3072, %s4806_s18, %s4808_s21, %s4641_s23, %s4641_s23, %s4642_s15  }
  0x55   : > { %p5891_p3 = scmp.ne.s32.totalorder %s5885_s13, 0 }
  0x57   : > { %302 = sbr.rel (%p5891_p3) target bundleno = 3684 (0xe64), region = 44 }
  0x5e   : > { %s4839_s20 = sand.u32 1, %s4619_s25   ;;  %p5892_p7 = scmp.ne.s32.totalorder %s5882_s11, 0 }
  0x5f   : > { %s4224_s16 = smul.u32 192, %s4839_s20  ;;  %s305_s1 = scalar_lea.sflag [#allocation4], %s4839_s20 }
  0x61   : > { %s4843_s30 = scalar_lea.vmem [#allocation3], %s4224_s16 }
  0x62   : > { %4598 = dma.done.wait (%p5892_p7), %s305_s1, 3072  }
  0x63   : > { %4600 = vsyncadd (%p5892_p7), %s305_s1, 4294964224  ;;  %p5893_p11 = scmp.ne.s32.totalorder %s5880_s9, 0 }
  0x65   : > { %4602 = dma.done.wait (%p5893_p11), [#allocation7], 6144  }
  0x66   : > { %4604 = vsyncadd (%p5893_p11), [#allocation7], 4294961152  ;;  %s2843_s12 = sshll.u32 %s4839_s20, 6  ;;  %p2844_p4 = scmp.ne.s32.totalorder %s4627_s27, 0 }
  0x67   : > { %s4854_s13 = scalar_lea.vmem [#allocation8], %s2843_s12  ;;  %v357_v0 = vld [vmem:[%s5834_s5] sm:$0xff] (!%p2844_p4) }
  0x68   : > { %356 = sbr.rel (%p2844_p4) target bundleno = 111 (0x6f), region = 56  ;;  %358 = vst [vmem:[#allocation2] sm:$0xff] (!%p2844_p4), %v357_v0 }
  0x6f PF: > { %v4860_v1 = vld [vmem:[#allocation6] sm:$0xff]  ;;  %v4862_v2 = vld [vmem:[#allocation6 + $0x8] sm:$0xff]  ;;  %v4864_v3 = vld [vmem:[#allocation6 + $0x10] sm:$0xff]  ;;  %p2848_p6 = scmp.eq.s32.totalorder %s4627_s27, 1 }
  0x70   : > { %v4866_v4 = vld [vmem:[#allocation6 + $0x18] sm:$0xff]  ;;  %v4868_v5 = vld [vmem:[#allocation6 + $0x20] sm:$0xff]  ;;  %v4870_v6 = vld [vmem:[#allocation6 + $0x28] sm:$0xff]  ;;  %v5873_v58 = vmov (!%p2848_p6), 0.0|0.0   ;;  %v5843_v60 = vmov (!%p2848_p6), 0.0   ;;  %vm4645_vm0 = vmmov (!%p2848_p6), 0  }
  0x71   : > { %v4872_v7 = vld [vmem:[#allocation6 + $0x30] sm:$0xff]  ;;  %v4874_v8 = vld [vmem:[#allocation6 + $0x38] sm:$0xff]  ;;  %v4876_v9 = vld [vmem:[#allocation6 + $0x40] sm:$0xff]  ;;  %v4974_v52 = vpack.c.bf16 (!%p2848_p6), %v4868_v5, %v4862_v2  ;;  %v4978_v53 = vpack.c.bf16 (!%p2848_p6), %v4866_v4, %v4860_v1  ;;  %v4992_v56 = vpack.c.bf16 (!%p2848_p6), %v4870_v6, %v4864_v3  ;;  %3582 = vmatprep.subr.bf16.mxu1 (!%p2848_p6), %v5873_v58  ;;  %497 = vmatprep.mubr.f32.mxu0 (!%p2848_p6), %v5843_v60 }
  0x72   : > { %v4878_v10 = vld [vmem:[#allocation6 + $0x48] sm:$0xff]  ;;  %v4880_v11 = vld [vmem:[#allocation6 + $0x50] sm:$0xff]  ;;  %v4882_v12 = vld [vmem:[#allocation6 + $0x58] sm:$0xff]  ;;  %3162 = vmatprep.mubr.msk.f32.mxu1 (!%p2848_p6), %vm4645_vm0, %v5843_v60 }
  0x73   : > { %v4884_v13 = vld [vmem:[#allocation6 + $0x60] sm:$0xff]  ;;  %v4886_v14 = vld [vmem:[#allocation6 + $0x68] sm:$0xff]  ;;  %v4888_v15 = vld [vmem:[#allocation6 + $0x70] sm:$0xff]  ;;  %v4982_v54 = vpack.c.bf16 (!%p2848_p6), %v4880_v11, %v4874_v8  ;;  %3551 = vmatprep.subr.bf16.mxu0 (!%p2848_p6), %v4974_v52  ;;  %v4988_v55 = vpack.c.bf16 (!%p2848_p6), %v4878_v10, %v4872_v7  ;;  %3584 = vmatpush3.bf16.msra.mxu1 (!%p2848_p6), %v4992_v56  ;;  %v5003_v59 = vpack.c.bf16 (!%p2848_p6), %v4882_v12, %v4876_v9 }
  0x74   : > { %5894 = vst [vmem:[#allocation16_spill] sm:$0xff] %v4888_v15  ;;  %v4890_v16 = vld [vmem:[#allocation6 + $0x78] sm:$0xff]  ;;  %v4892_v17 = vld [vmem:[#allocation6 + $0x80] sm:$0xff]  ;;  %v4894_v18 = vld [vmem:[#allocation6 + $0x88] sm:$0xff]  ;;  %3553 = vmatpush1.bf16.msra.mxu0 (!%p2848_p6), %v4978_v53  ;;  %3585 = vmatprep.subr.bf16.mxu1 (!%p2848_p6), %v5873_v58 }
  0x75   : > { %5895 = vst [vmem:[#allocation17_spill] sm:$0xff] %v4894_v18  ;;  %v4896_v19 = vld [vmem:[#allocation6 + $0x90] sm:$0xff]  ;;  %v4898_v20 = vld [vmem:[#allocation6 + $0x98] sm:$0xff]  ;;  %v4900_v21 = vld [vmem:[#allocation6 + $0xa0] sm:$0xff]  ;;  %3555 = vmatprep.subr.bf16.mxu0 (!%p2848_p6), %v4982_v54  ;;  %v4997_v57 = vpack.c.bf16 (!%p2848_p6), %v4892_v17, %v4886_v14  ;;  %v5012_v61 = vpack.c.bf16 (!%p2848_p6), %v4890_v16, %v4884_v13  ;;  %v5022_v63 = vpack.c.bf16 (!%p2848_p6), %v4894_v18, %v4888_v15 }
  0x76   : > { %5896 = vst [vmem:[#allocation18_spill] sm:$0xff] %v4896_v19  ;;  %5897 = vst [vmem:[#allocation19_spill] sm:$0xff] %v4898_v20  ;;  %v4902_v22 = vld [vmem:[#allocation6 + $0xa8] sm:$0xff]  ;;  %v4904_v23 = vld [vmem:[#allocation6 + $0xb0] sm:$0xff] }
  0x77   : > { %5898 = vst [vmem:[#allocation20_spill] sm:$0xff] %v4900_v21  ;;  %5899 = vst [vmem:[#allocation21_spill] sm:$0xff] %v4902_v22  ;;  %v4906_v24 = vld [vmem:[#allocation6 + $0xb8] sm:$0xff]  ;;  %v4908_v25 = vld [vmem:[#allocation6 + $0xc0] sm:$0xff]  ;;  %v5017_v62 = vpack.c.bf16 (!%p2848_p6), %v4904_v23, %v4898_v20  ;;  %3587 = vmatpush3.bf16.msra.mxu1 (!%p2848_p6), %v5003_v59  ;;  %v5028_v0 = vpack.c.bf16 (!%p2848_p6), %v4902_v22, %v4896_v19 }
  0x78   : > { %5900 = vst [vmem:[#allocation22_spill] sm:$0xff] %v4904_v23  ;;  %5901 = vst [vmem:[#allocation23_spill] sm:$0xff] %v4906_v24  ;;  %v4910_v26 = vld [vmem:[#allocation6 + $0xc8] sm:$0xff]  ;;  %v4912_v27 = vld [vmem:[#allocation6 + $0xd0] sm:$0xff]  ;;  %3557 = vmatpush1.bf16.msra.mxu0 (!%p2848_p6), %v4988_v55  ;;  %3588 = vmatprep.subr.bf16.mxu1 (!%p2848_p6), %v5873_v58  ;;  %v5038_v18 = vpack.c.bf16 (!%p2848_p6), %v4906_v24, %v4900_v21 }
  0x79   : > { %5902 = vst [vmem:[#allocation24_spill] sm:$0xff] %v4908_v25  ;;  %5903 = vst [vmem:[#allocation25_spill] sm:$0xff] %v4910_v26  ;;  %v4914_v28 = vld [vmem:[#allocation6 + $0xd8] sm:$0xff]  ;;  %v4916_v29 = vld [vmem:[#allocation6 + $0xe0] sm:$0xff]  ;;  %3559 = vmatprep.subr.bf16.mxu0 (!%p2848_p6), %v4997_v57 }
  0x7a   : > { %5904 = vst [vmem:[#allocation26_spill] sm:$0xff] %v4912_v27  ;;  %5905 = vst [vmem:[#allocation27_spill] sm:$0xff] %v4914_v28  ;;  %v4918_v30 = vld [vmem:[#allocation6 + $0xe8] sm:$0xff]  ;;  %v4920_v31 = vld [vmem:[#allocation6 + $0xf0] sm:$0xff]  ;;  %v5033_v60 = vpack.c.bf16 (!%p2848_p6), %v4916_v29, %v4910_v26  ;;  %v5044_v22 = vpack.c.bf16 (!%p2848_p6), %v4914_v28, %v4908_v25 }
  0x7b   : > { %5906 = vst [vmem:[#allocation28_spill] sm:$0xff] %v4916_v29  ;;  %5907 = vst [vmem:[#allocation29_spill] sm:$0xff] %v4918_v30  ;;  %v4922_v32 = vld [vmem:[#allocation6 + $0xf8] sm:$0xff]  ;;  %v4924_v33 = vld [vmem:[#allocation6 + $0x100] sm:$0xff]  ;;  %3590 = vmatpush3.bf16.msra.mxu1 (!%p2848_p6), %v5022_v63  ;;  %v5054_v24 = vpack.c.bf16 (!%p2848_p6), %v4918_v30, %v4912_v27 }
  0x7c   : > { %5908 = vst [vmem:[#allocation30_spill] sm:$0xff] %v4920_v31  ;;  %5909 = vst [vmem:[#allocation31_spill] sm:$0xff] %v4922_v32  ;;  %v4926_v34 = vld [vmem:[#allocation6 + $0x108] sm:$0xff]  ;;  %v4928_v35 = vld [vmem:[#allocation6 + $0x110] sm:$0xff]  ;;  %3561 = vmatpush1.bf16.msra.mxu0 (!%p2848_p6), %v5012_v61  ;;  %3591 = vmatprep.subr.bf16.mxu1 (!%p2848_p6), %v5873_v58 }
  0x7d   : > { %5910 = vst [vmem:[#allocation32_spill] sm:$0xff] %v4924_v33  ;;  %5911 = vst [vmem:[#allocation33_spill] sm:$0xff] %v4926_v34  ;;  %v4930_v36 = vld [vmem:[#allocation6 + $0x118] sm:$0xff]  ;;  %v4932_v37 = vld [vmem:[#allocation6 + $0x120] sm:$0xff]  ;;  %3563 = vmatprep.subr.bf16.mxu0 (!%p2848_p6), %v5017_v62  ;;  %v5049_v29 = vpack.c.bf16 (!%p2848_p6), %v4928_v35, %v4922_v32  ;;  %v5060_v28 = vpack.c.bf16 (!%p2848_p6), %v4926_v34, %v4920_v31 }
  0x7e   : > { %5912 = vst [vmem:[#allocation34_spill] sm:$0xff] %v4928_v35  ;;  %5913 = vst [vmem:[#allocation35_spill] sm:$0xff] %v4930_v36  ;;  %v4934_v38 = vld [vmem:[#allocation6 + $0x128] sm:$0xff]  ;;  %v4936_v39 = vld [vmem:[#allocation6 + $0x130] sm:$0xff]  ;;  %v5070_v30 = vpack.c.bf16 (!%p2848_p6), %v4930_v36, %v4924_v33 }
  0x7f   : > { %5914 = vst [vmem:[#allocation36_spill] sm:$0xff] %v4932_v37  ;;  %5915 = vst [vmem:[#allocation37_spill] sm:$0xff] %v4934_v38  ;;  %v4938_v40 = vld [vmem:[#allocation6 + $0x138] sm:$0xff]  ;;  %v4940_v41 = vld [vmem:[#allocation6 + $0x140] sm:$0xff]  ;;  %3593 = vmatpush3.bf16.msra.mxu1 (!%p2848_p6), %v5038_v18 }
  0x80   : > { %5916 = vst [vmem:[#allocation38_spill] sm:$0xff] %v4936_v39  ;;  %5917 = vst [vmem:[#allocation39_spill] sm:$0xff] %v4938_v40  ;;  %v4942_v42 = vld [vmem:[#allocation6 + $0x148] sm:$0xff]  ;;  %v4944_v43 = vld [vmem:[#allocation6 + $0x150] sm:$0xff]  ;;  %431 = sbr.rel (%p2848_p6) target bundleno = 2391 (0x957), region = 60  ;;  %3565 = vmatpush1.bf16.msra.mxu0 (!%p2848_p6), %v5028_v0  ;;  %3594 = vmatprep.subr.bf16.mxu1 (!%p2848_p6), %v5873_v58  ;;  %v5065_v35 = vpack.c.bf16 (!%p2848_p6), %v4940_v41, %v4934_v38  ;;  %v5076_v34 = vpack.c.bf16 (!%p2848_p6), %v4938_v40, %v4932_v37 }
  0x81   : > { %5918 = vst [vmem:[#allocation40_spill] sm:$0xff] %v4940_v41  ;;  %5919 = vst [vmem:[#allocation41_spill] sm:$0xff] %v4942_v42  ;;  %v4946_v44 = vld [vmem:[#allocation6 + $0x158] sm:$0xff]  ;;  %v4948_v45 = vld [vmem:[#allocation6 + $0x160] sm:$0xff]  ;;  %3567 = vmatprep.subr.bf16.mxu0 (!%p2848_p6), %v5033_v60  ;;  %v5086_v36 = vpack.c.bf16 (!%p2848_p6), %v4942_v42, %v4936_v39 }
  0x82   : > { %5920 = vst [vmem:[#allocation42_spill] sm:$0xff] %v4944_v43  ;;  %5921 = vst [vmem:[#allocation43_spill] sm:$0xff] %v4946_v44  ;;  %v4950_v46 = vld [vmem:[#allocation6 + $0x168] sm:$0xff]  ;;  %v4952_v47 = vld [vmem:[#allocation6 + $0x170] sm:$0xff] }
  0x83   : > { %5922 = vst [vmem:[#allocation44_spill] sm:$0xff] %v4948_v45  ;;  %5923 = vst [vmem:[#allocation45_spill] sm:$0xff] %v4950_v46  ;;  %v4954_v48 = vld [vmem:[#allocation6 + $0x178] sm:$0xff]  ;;  %3596 = vmatpush3.bf16.msra.mxu1 (!%p2848_p6), %v5054_v24  ;;  %v5081_v41 = vpack.c.bf16 (!%p2848_p6), %v4952_v47, %v4946_v44  ;;  %v5092_v40 = vpack.c.bf16 (!%p2848_p6), %v4950_v46, %v4944_v43  ;;  %v5926_v46 = vmov (!%p2848_p6), 0.0   ;;  %v2849_v44 = vld [vmem:[%s4843_s30 + $0x8] sm:$0xff] (!%p2848_p6) }
  0x84   : > { %5924 = vst [vmem:[#allocation46_spill] sm:$0xff] %v4952_v47  ;;  %5925 = vst [vmem:[#allocation47_spill] sm:$0xff] %v4954_v48  ;;  %v4959_v49 = vld [vmem:[%s5831_s2] ss:$0 sm:$0xff]  ;;  %3569 = vmatpush1.bf16.msra.mxu0 (!%p2848_p6), %v5044_v22  ;;  %3597 = vmatprep.subr.bf16.mxu1 (!%p2848_p6), %v5873_v58  ;;  %v5098_v47 = vpack.c.bf16 (!%p2848_p6), %v4954_v48, %v4948_v45  ;;  %v574_v48 = vld [vmem:[%s4843_s30] sm:$0xff] (!%p2848_p6) }
  0x85   : > { %v4964_v50 = vld [vmem:[%s5832_s3] ss:$0 sm:$0xff]  ;;  %3571 = vmatprep.subr.bf16.mxu0 (!%p2848_p6), %v5049_v29  ;;  %v2850_v15 = vld [vmem:[%s4843_s30 + $0x10] sm:$0xff] (!%p2848_p6) }
  0x86   : > { %v4969_v51 = vld [vmem:[%s5833_s4] ss:$0 sm:$0xff] }
  0x87   : > { %3599 = vmatpush3.bf16.msra.mxu1 %v5070_v30  ;;  %v5102_v42 = vld [vmem:[#allocation2] sm:$0xff] }
  0x88   : > { %3573 = vmatpush1.bf16.msra.mxu0 %v5060_v28  ;;  %3600 = vmatprep.subr.bf16.mxu1 %v5873_v58 }
  0x89   : > { %3575 = vmatprep.subr.bf16.mxu0 %v5065_v35 }
  0x8b   : > { %3602 = vmatpush3.bf16.msra.mxu1 %v5086_v36 }
  0x8c   : > { %3577 = vmatpush1.bf16.msra.mxu0 %v5076_v34  ;;  %3603 = vmatprep.subr.bf16.mxu1 %v5873_v58 }
  0x8d   : > { %3579 = vmatprep.subr.bf16.mxu0 %v5081_v41 }
  0x8f   : > { %3605 = vmatpush3.bf16.msra.mxu1 %v5098_v47 }
  0x90   : > { %3581 = vmatpush1.bf16.msra.mxu0 %v5092_v40  ;;  %3638 = vmatprep.subr.bf16.mxu1 %v5873_v58 }
  0x91   : > { %3607 = vmatprep.subr.bf16.mxu0 %v4974_v52 }
  0x92   : > { %3163 = vmatmul.mubr.f32.vlgmr.msra.gmra.mrb[0].mxu1 %v5102_v42 }
  0x93   : > { %498 = vmatmul.mubr.f32.vlgmr.msra.gmra.mrb[0].mxu0 %v5102_v42  ;;  %3640 = vmatpush3.bf16.msra.mxu1 %v4992_v56 }
  0x94   : > { %3609 = vmatpush1.bf16.msra.mxu0 %v4978_v53  ;;  %682 = vmatprep.mubr.f32.mxu0 %v5926_v46 }
  0x95   : > { %3611 = vmatprep.subr.bf16.mxu0 %v4982_v54  ;;  %3197 = vmatprep.mubr.msk.f32.mxu1 %vm4645_vm0, %v5926_v46 }
  0x96   : > { %3641 = vmatprep.subr.bf16.mxu1 %v5873_v58 }
  0x97   : > { %3643 = vmatpush3.bf16.msra.mxu1 %v5003_v59 }
  0x98   : > { %3613 = vmatpush1.bf16.msra.mxu0 %v4988_v55  ;;  %3644 = vmatprep.subr.bf16.mxu1 %v5873_v58 }
  0x99   : > { %3615 = vmatprep.subr.bf16.mxu0 %v4997_v57 }
  0x9b   : > { %3646 = vmatpush3.bf16.msra.mxu1 %v5022_v63 }
  0x9c   : > { %3617 = vmatpush1.bf16.msra.mxu0 %v5012_v61  ;;  %3647 = vmatprep.subr.bf16.mxu1 %v5873_v58 }
  0x9d   : > { %3619 = vmatprep.subr.bf16.mxu0 %v5017_v62 }
  0x9f   : > { %3649 = vmatpush3.bf16.msra.mxu1 %v5038_v18 }
  0xa0   : > { %3621 = vmatpush1.bf16.msra.mxu0 %v5028_v0  ;;  %3650 = vmatprep.subr.bf16.mxu1 %v5873_v58 }
  0xa1   : > { %3623 = vmatprep.subr.bf16.mxu0 %v5033_v60 }
  0xa3   : > { %3652 = vmatpush3.bf16.msra.mxu1 %v5054_v24 }
  0xa4   : > { %3625 = vmatpush1.bf16.msra.mxu0 %v5044_v22  ;;  %3653 = vmatprep.subr.bf16.mxu1 %v5873_v58 }
  0xa5   : > { %3627 = vmatprep.subr.bf16.mxu0 %v5049_v29 }
  0xa7   : > { %3655 = vmatpush3.bf16.msra.mxu1 %v5070_v30 }
  0xa8   : > { %3629 = vmatpush1.bf16.msra.mxu0 %v5060_v28  ;;  %3656 = vmatprep.subr.bf16.mxu1 %v5873_v58 }
  0xa9   : > { %3631 = vmatprep.subr.bf16.mxu0 %v5065_v35 }
  0xab   : > { %3658 = vmatpush3.bf16.msra.mxu1 %v5086_v36 }
  0xac   : > { %3633 = vmatpush1.bf16.msra.mxu0 %v5076_v34  ;;  %3659 = vmatprep.subr.bf16.mxu1 %v5873_v58 }
  0xad   : > { %3635 = vmatprep.subr.bf16.mxu0 %v5081_v41 }
  0xaf   : > { %3661 = vmatpush3.bf16.msra.mxu1 %v5098_v47 }
  0xb0   : > { %3637 = vmatpush1.bf16.msra.mxu0 %v5092_v40  ;;  %3694 = vmatprep.subr.bf16.mxu1 %v5873_v58 }
  0xb1   : > { %3663 = vmatprep.subr.bf16.mxu0 %v4974_v52 }
 0x165   : > { %v570_v37 = vpop.f32.mrb[0].mxu1 }
 0x166   : > { %v499_v45 = vpop.f32.mrb[0].mxu0  ;;  %v3164_v38 = vpop.f32.mrb[1].mxu1  ;;  %v593_v58 = vadd.f32 %v4959_v49, %v570_v37 }
 0x167   : > { %v579_v43 = vadd.f32 %v574_v48, %v499_v45  ;;  %v501_v39 = vpop.f32.mrb[1].mxu0 }
 0x168   : > { %v586_v31 = vadd.f32 %v2849_v44, %v501_v39 }
 0x169   : > { %v2851_v33 = vmul.f32 -1.442695, %v579_v43 }
 0x16a   : > { %v2852_v27 = vmul.f32 -1.442695, %v586_v31 }
 0x16b   : > { %4317 = vpow2.f32 %v2851_v33 }
 0x16c   : > { %4319 = vpow2.f32 %v2852_v27 }
 0x175   : > { %v4318_v32 = vpop.eup %4317 }
 0x176   : > { %v583_v25 = vadd.f32 1.0, %v4318_v32  ;;  %v4320_v21 = vpop.eup %4319 }
 0x177   : > { %v590_v26 = vadd.f32 1.0, %v4320_v21 }
 0x178   : > { %4321 = vrcp.f32 %v583_v25 }
 0x179   : > { %4323 = vrcp.f32 %v590_v26 }
 0x182   : > { %v4322_v19 = vpop.eup %4321 }
 0x183   : > { %v594_v45 = vmul.f32 %v4322_v19, %v593_v58  ;;  %v4324_v23 = vpop.eup %4323  ;;  %v5927_v19 = vmov 0.0|0.0  }
 0x184   : > { %v597_v43 = vsub.f32 1.0, %v4324_v23  ;;  %v599_v33 = vmul.f32 %v4324_v23, %v5102_v42 }
 0x185   : > { %v595_v48 = vadd.f32 %v2850_v15, %v594_v45 }
 0x187   : > { %4325 = vtanh.f32 %v595_v48 }
 0x191   : > { %v4326_v38 = vpop.eup %4325 }
 0x192   : > { %v598_v31 = vmul.f32 %v4326_v38, %v597_v43  ;;  %v2853_v38 = vld [vmem:[%s4843_s30 + $0x18] sm:$0xff] }
 0x194   : > { %v5149_v27 = vadd.f32 %v599_v33, %v598_v31 }
 0x196   : > { %601 = vadd.xlane.f32.xlu0 %v5149_v27  ;;  %683 = vmatmul.mubr.f32.vlgmr.msra.gmra.mrb[2].mxu0 %v5149_v27  ;;  %v604_v15 = vmul.f32 %v5149_v27, %v5149_v27 }
 0x197   : > { %3198 = vmatmul.mubr.f32.vlgmr.msra.gmra.mrb[2].mxu1 %v5149_v27  ;;  %3665 = vmatpush1.bf16.msra.mxu0 %v4978_v53 }
 0x198   : > { %3696 = vmatpush3.bf16.msra.mxu1 %v4992_v56  ;;  %3667 = vmatprep.subr.bf16.mxu0 %v4982_v54 }
 0x199   : > { %3697 = vmatprep.subr.bf16.mxu1 %v5927_v19  ;;  %869 = vmatprep.mubr.f32.mxu0 %v5926_v46 }
 0x19a   : > { %605 = vadd.xlane.f32.xlu0 %v604_v15  ;;  %3232 = vmatprep.mubr.msk.f32.mxu1 %vm4645_vm0, %v5926_v46 }
 0x19b   : > { %3669 = vmatpush1.bf16.msra.mxu0 %v4988_v55 }
 0x19c   : > { %3699 = vmatpush3.bf16.msra.mxu1 %v5003_v59  ;;  %3671 = vmatprep.subr.bf16.mxu0 %v4997_v57 }
 0x19d   : > { %3700 = vmatprep.subr.bf16.mxu1 %v5927_v19 }
 0x19f   : > { %3673 = vmatpush1.bf16.msra.mxu0 %v5012_v61 }
 0x1a0   : > { %3702 = vmatpush3.bf16.msra.mxu1 %v5022_v63  ;;  %3675 = vmatprep.subr.bf16.mxu0 %v5017_v62 }
 0x1a1   : > { %3703 = vmatprep.subr.bf16.mxu1 %v5927_v19 }
 0x1a3   : > { %3677 = vmatpush1.bf16.msra.mxu0 %v5028_v0 }
 0x1a4   : > { %3705 = vmatpush3.bf16.msra.mxu1 %v5038_v18  ;;  %3679 = vmatprep.subr.bf16.mxu0 %v5033_v60 }
 0x1a5   : > { %3706 = vmatprep.subr.bf16.mxu1 %v5927_v19 }
 0x1a7   : > { %3681 = vmatpush1.bf16.msra.mxu0 %v5044_v22 }
 0x1a8   : > { %3708 = vmatpush3.bf16.msra.mxu1 %v5054_v24  ;;  %3683 = vmatprep.subr.bf16.mxu0 %v5049_v29 }
 0x1a9   : > { %3709 = vmatprep.subr.bf16.mxu1 %v5927_v19 }
 0x1ab   : > { %3685 = vmatpush1.bf16.msra.mxu0 %v5060_v28 }
 0x1ac   : > { %3711 = vmatpush3.bf16.msra.mxu1 %v5070_v30  ;;  %3687 = vmatprep.subr.bf16.mxu0 %v5065_v35 }
 0x1ad   : > { %3712 = vmatprep.subr.bf16.mxu1 %v5927_v19 }
 0x1af   : > { %3689 = vmatpush1.bf16.msra.mxu0 %v5076_v34 }
 0x1b0   : > { %3714 = vmatpush3.bf16.msra.mxu1 %v5086_v36  ;;  %3691 = vmatprep.subr.bf16.mxu0 %v5081_v41 }
 0x1b1   : > { %3715 = vmatprep.subr.bf16.mxu1 %v5927_v19 }
 0x1b3   : > { %3693 = vmatpush1.bf16.msra.mxu0 %v5092_v40 }
 0x1b4   : > { %3717 = vmatpush3.bf16.msra.mxu1 %v5098_v47  ;;  %3719 = vmatprep.subr.bf16.mxu0 %v4974_v52 }
 0x1b5   : > { %3750 = vmatprep.subr.bf16.mxu1 %v5927_v19 }
 0x223   : > { %v602_v21 = vpop.xlane.xlu0 %601 }
 0x224   : > { %v603_v23 = vmul.f32 0.03125, %v602_v21 }
 0x226   : > { %v608_v26 = vmul.f32 %v603_v23, %v603_v23  ;;  %v611_v44 = vsub.f32 %v5149_v27, %v603_v23 }
 0x227   : > { %v606_v25 = vpop.xlane.xlu0 %605 }
 0x228   : > { %v607_v32 = vmul.f32 0.03125, %v606_v25  ;;  %v2854_v25 = vld [vmem:[%s4843_s30 + $0x20] sm:$0xff] }
 0x22a   : > { %v609_v37 = vsub.f32 %v607_v32, %v608_v26 }
 0x22c   : > { %v610_v39 = vmax.f32 %v609_v37, 0.0 }
 0x22e   : > { %v612_v42 = vadd.f32 1e-05, %v610_v39 }
 0x230   : > { %4327 = vrsqrt.f32 %v612_v42 }
 0x23a   : > { %v4328_v58 = vpop.eup %4327 }
 0x23b   : > { %v614_v45 = vmul.f32 %v4328_v58, %v611_v44 }
 0x23d   : > { %v615_v48 = vmul.f32 %v4964_v50, %v614_v45 }
 0x23f   : > { %v616_v43 = vadd.f32 %v4969_v51, %v615_v48 }
 0x241   : > { %617 = vst [vmem:[%s4854_s13] sm:$0xff] %v616_v43  ;;  %v2855_v43 = vld [vmem:[%s4843_s30 + $0x28] sm:$0xff] }
 0x269   : > { %v684_v33 = vpop.f32.mrb[2].mxu0 }
 0x26a   : > { %v765_v31 = vadd.f32 %v2853_v38, %v684_v33  ;;  %v755_v15 = vpop.f32.mrb[2].mxu1  ;;  %v686_v21 = vpop.f32.mrb[3].mxu0 }
 0x26b   : > { %v3199_v26 = vpop.f32.mrb[3].mxu1  ;;  %v772_v37 = vadd.f32 %v2854_v25, %v686_v21  ;;  %v779_v45 = vadd.f32 %v4959_v49, %v755_v15 }
 0x26c   : > { %v2856_v32 = vmul.f32 -1.442695, %v765_v31 }
 0x26d   : > { %v2857_v39 = vmul.f32 -1.442695, %v772_v37 }
 0x26e   : > { %4329 = vpow2.f32 %v2856_v32 }
 0x26f   : > { %4331 = vpow2.f32 %v2857_v39 }
 0x278   : > { %v4330_v23 = vpop.eup %4329 }
 0x279   : > { %v769_v42 = vadd.f32 1.0, %v4330_v23  ;;  %v4332_v44 = vpop.eup %4331 }
 0x27a   : > { %v776_v58 = vadd.f32 1.0, %v4332_v44 }
 0x27b   : > { %4333 = vrcp.f32 %v769_v42 }
 0x27c   : > { %4335 = vrcp.f32 %v776_v58 }
 0x285   : > { %v4334_v48 = vpop.eup %4333 }
 0x286   : > { %v780_v38 = vmul.f32 %v4334_v48, %v779_v45  ;;  %v4336_v20 = vpop.eup %4335 }
 0x287   : > { %v783_v26 = vsub.f32 1.0, %v4336_v20  ;;  %v785_v25 = vmul.f32 %v4336_v20, %v5149_v27 }
 0x288   : > { %v781_v33 = vadd.f32 %v2855_v43, %v780_v38 }
 0x28a   : > { %4337 = vtanh.f32 %v781_v33 }
 0x294   : > { %v4338_v31 = vpop.eup %4337 }
 0x295   : > { %v784_v21 = vmul.f32 %v4338_v31, %v783_v26  ;;  %v2859_v26 = vld [vmem:[%s4843_s30 + $0x30] sm:$0xff] }
 0x297   : > { %v5200_v32 = vadd.f32 %v785_v25, %v784_v21 }
 0x299   : > { %870 = vmatmul.mubr.f32.vlgmr.msra.gmra.mrb[4].mxu0 %v5200_v32  ;;  %3233 = vmatmul.mubr.f32.vlgmr.msra.gmra.mrb[4].mxu1 %v5200_v32  ;;  %v790_v15 = vmul.f32 %v5200_v32, %v5200_v32 }
 0x29a   : > { %787 = vadd.xlane.f32.xlu0 %v5200_v32  ;;  %3721 = vmatpush1.bf16.msra.mxu0 %v4978_v53 }
 0x29b   : > { %791 = vadd.xlane.f32.xlu1 %v790_v15  ;;  %3752 = vmatpush3.bf16.msra.mxu1 %v4992_v56 }
 0x29c   : > { %3723 = vmatprep.subr.bf16.mxu0 %v4982_v54  ;;  %3753 = vmatprep.subr.bf16.mxu1 %v5927_v19 }
 0x29d   : > { %1056 = vmatprep.mubr.f32.mxu0 %v5926_v46  ;;  %3267 = vmatprep.mubr.msk.f32.mxu1 %vm4645_vm0, %v5926_v46 }
 0x29e   : > { %3725 = vmatpush1.bf16.msra.mxu0 %v4988_v55 }
 0x29f   : > { %3755 = vmatpush3.bf16.msra.mxu1 %v5003_v59  ;;  %3727 = vmatprep.subr.bf16.mxu0 %v4997_v57 }
 0x2a0   : > { %3756 = vmatprep.subr.bf16.mxu1 %v5927_v19 }
 0x2a2   : > { %3729 = vmatpush1.bf16.msra.mxu0 %v5012_v61 }
 0x2a3   : > { %3758 = vmatpush3.bf16.msra.mxu1 %v5022_v63  ;;  %3731 = vmatprep.subr.bf16.mxu0 %v5017_v62 }
 0x2a4   : > { %3759 = vmatprep.subr.bf16.mxu1 %v5927_v19 }
 0x2a6   : > { %3733 = vmatpush1.bf16.msra.mxu0 %v5028_v0 }
 0x2a7   : > { %3761 = vmatpush3.bf16.msra.mxu1 %v5038_v18  ;;  %3735 = vmatprep.subr.bf16.mxu0 %v5033_v60 }
 0x2a8   : > { %3762 = vmatprep.subr.bf16.mxu1 %v5927_v19 }
 0x2aa   : > { %3737 = vmatpush1.bf16.msra.mxu0 %v5044_v22 }
 0x2ab   : > { %3764 = vmatpush3.bf16.msra.mxu1 %v5054_v24  ;;  %3739 = vmatprep.subr.bf16.mxu0 %v5049_v29 }
 0x2ac   : > { %3765 = vmatprep.subr.bf16.mxu1 %v5927_v19 }
 0x2ae   : > { %3741 = vmatpush1.bf16.msra.mxu0 %v5060_v28 }
 0x2af   : > { %3767 = vmatpush3.bf16.msra.mxu1 %v5070_v30  ;;  %3743 = vmatprep.subr.bf16.mxu0 %v5065_v35 }
 0x2b0   : > { %3768 = vmatprep.subr.bf16.mxu1 %v5927_v19 }
 0x2b2   : > { %3745 = vmatpush1.bf16.msra.mxu0 %v5076_v34 }
 0x2b3   : > { %3770 = vmatpush3.bf16.msra.mxu1 %v5086_v36  ;;  %3747 = vmatprep.subr.bf16.mxu0 %v5081_v41 }
 0x2b4   : > { %3771 = vmatprep.subr.bf16.mxu1 %v5927_v19 }
 0x2b6   : > { %3749 = vmatpush1.bf16.msra.mxu0 %v5092_v40 }
 0x2b7   : > { %3773 = vmatpush3.bf16.msra.mxu1 %v5098_v47  ;;  %3775 = vmatprep.subr.bf16.mxu0 %v4974_v52 }
 0x2b8   : > { %3806 = vmatprep.subr.bf16.mxu1 %v5927_v19 }
 0x327   : > { %v788_v20 = vpop.xlane.xlu0 %787 }
 0x328   : > { %v789_v27 = vmul.f32 0.03125, %v788_v20  ;;  %v792_v37 = vpop.xlane.xlu1 %791  ;;  %v2860_v20 = vld [vmem:[%s4843_s30 + $0x38] sm:$0xff] }
 0x329   : > { %v793_v39 = vmul.f32 0.03125, %v792_v37 }
 0x32a   : > { %v794_v23 = vmul.f32 %v789_v27, %v789_v27  ;;  %v797_v45 = vsub.f32 %v5200_v32, %v789_v27 }
 0x32c   : > { %v795_v42 = vsub.f32 %v793_v39, %v794_v23 }
 0x32e   : > { %v796_v44 = vmax.f32 %v795_v42, 0.0 }
 0x330   : > { %v798_v58 = vadd.f32 1e-05, %v796_v44 }
 0x332   : > { %4339 = vrsqrt.f32 %v798_v58 }
 0x33c   : > { %v4340_v48 = vpop.eup %4339 }
 0x33d   : > { %v800_v43 = vmul.f32 %v4340_v48, %v797_v45 }
 0x33f   : > { %v801_v38 = vmul.f32 %v4964_v50, %v800_v43 }
 0x341   : > { %v802_v33 = vadd.f32 %v4969_v51, %v801_v38  ;;  %v2861_v38 = vld [vmem:[%s4843_s30 + $0x40] sm:$0xff] }
 0x343   : > { %2858 = vst [vmem:[%s4854_s13 + $0x8] sm:$0xff] %v802_v33 }
 0x36c   : > { %v871_v31 = vpop.f32.mrb[4].mxu0  ;;  %v942_v21 = vpop.f32.mrb[4].mxu1 }
 0x36d   : > { %v952_v25 = vadd.f32 %v2859_v26, %v871_v31  ;;  %v873_v15 = vpop.f32.mrb[5].mxu0  ;;  %v3234_v37 = vpop.f32.mrb[5].mxu1  ;;  %v966_v48 = vadd.f32 %v4959_v49, %v942_v21 }
 0x36e   : > { %v959_v23 = vadd.f32 %v2860_v20, %v873_v15 }
 0x36f   : > { %v2862_v39 = vmul.f32 -1.442695, %v952_v25 }
 0x370   : > { %v2863_v42 = vmul.f32 -1.442695, %v959_v23 }
 0x371   : > { %4341 = vpow2.f32 %v2862_v39 }
 0x372   : > { %4343 = vpow2.f32 %v2863_v42 }
 0x37b   : > { %v4342_v27 = vpop.eup %4341 }
 0x37c   : > { %v956_v44 = vadd.f32 1.0, %v4342_v27  ;;  %v4344_v58 = vpop.eup %4343 }
 0x37d   : > { %v963_v45 = vadd.f32 1.0, %v4344_v58 }
 0x37e   : > { %4345 = vrcp.f32 %v956_v44 }
 0x37f   : > { %4347 = vrcp.f32 %v963_v45 }
 0x388   : > { %v4346_v43 = vpop.eup %4345 }
 0x389   : > { %v967_v33 = vmul.f32 %v4346_v43, %v966_v48  ;;  %v4348_v31 = vpop.eup %4347 }
 0x38a   : > { %v970_v37 = vsub.f32 1.0, %v4348_v31  ;;  %v972_v20 = vmul.f32 %v4348_v31, %v5200_v32 }
 0x38b   : > { %v968_v26 = vadd.f32 %v2861_v38, %v967_v33 }
 0x38d   : > { %4349 = vtanh.f32 %v968_v26 }
 0x397   : > { %v4350_v25 = vpop.eup %4349 }
 0x398   : > { %v971_v15 = vmul.f32 %v4350_v25, %v970_v37  ;;  %v2865_v37 = vld [vmem:[%s4843_s30 + $0x48] sm:$0xff] }
 0x39a   : > { %v5251_v39 = vadd.f32 %v972_v20, %v971_v15 }
 0x39c   : > { %1057 = vmatmul.mubr.f32.vlgmr.msra.gmra.mrb[6].mxu0 %v5251_v39  ;;  %3268 = vmatmul.mubr.f32.vlgmr.msra.gmra.mrb[6].mxu1 %v5251_v39  ;;  %v977_v21 = vmul.f32 %v5251_v39, %v5251_v39 }
 0x39d   : > { %974 = vadd.xlane.f32.xlu1 %v5251_v39  ;;  %3777 = vmatpush1.bf16.msra.mxu0 %v4978_v53 }
 0x39e   : > { %978 = vadd.xlane.f32.xlu0 %v977_v21  ;;  %3808 = vmatpush3.bf16.msra.mxu1 %v4992_v56 }
 0x39f   : > { %3779 = vmatprep.subr.bf16.mxu0 %v4982_v54  ;;  %3809 = vmatprep.subr.bf16.mxu1 %v5927_v19 }
 0x3a0   : > { %1243 = vmatprep.mubr.f32.mxu0 %v5926_v46  ;;  %3302 = vmatprep.mubr.msk.f32.mxu1 %vm4645_vm0, %v5926_v46 }
 0x3a1   : > { %3781 = vmatpush1.bf16.msra.mxu0 %v4988_v55 }
 0x3a2   : > { %3811 = vmatpush3.bf16.msra.mxu1 %v5003_v59  ;;  %3783 = vmatprep.subr.bf16.mxu0 %v4997_v57 }
 0x3a3   : > { %3812 = vmatprep.subr.bf16.mxu1 %v5927_v19 }
 0x3a5   : > { %3785 = vmatpush1.bf16.msra.mxu0 %v5012_v61 }
 0x3a6   : > { %3814 = vmatpush3.bf16.msra.mxu1 %v5022_v63  ;;  %3787 = vmatprep.subr.bf16.mxu0 %v5017_v62 }
 0x3a7   : > { %3815 = vmatprep.subr.bf16.mxu1 %v5927_v19 }
 0x3a9   : > { %3789 = vmatpush1.bf16.msra.mxu0 %v5028_v0 }
 0x3aa   : > { %3817 = vmatpush3.bf16.msra.mxu1 %v5038_v18  ;;  %3791 = vmatprep.subr.bf16.mxu0 %v5033_v60 }
 0x3ab   : > { %3818 = vmatprep.subr.bf16.mxu1 %v5927_v19 }
 0x3ad   : > { %3793 = vmatpush1.bf16.msra.mxu0 %v5044_v22 }
 0x3ae   : > { %3820 = vmatpush3.bf16.msra.mxu1 %v5054_v24  ;;  %3795 = vmatprep.subr.bf16.mxu0 %v5049_v29 }
 0x3af   : > { %3821 = vmatprep.subr.bf16.mxu1 %v5927_v19 }
 0x3b1   : > { %3797 = vmatpush1.bf16.msra.mxu0 %v5060_v28 }
 0x3b2   : > { %3823 = vmatpush3.bf16.msra.mxu1 %v5070_v30  ;;  %3799 = vmatprep.subr.bf16.mxu0 %v5065_v35 }
 0x3b3   : > { %3824 = vmatprep.subr.bf16.mxu1 %v5927_v19 }
 0x3b5   : > { %3801 = vmatpush1.bf16.msra.mxu0 %v5076_v34 }
 0x3b6   : > { %3826 = vmatpush3.bf16.msra.mxu1 %v5086_v36  ;;  %3803 = vmatprep.subr.bf16.mxu0 %v5081_v41 }
 0x3b7   : > { %3827 = vmatprep.subr.bf16.mxu1 %v5927_v19 }
 0x3b9   : > { %3805 = vmatpush1.bf16.msra.mxu0 %v5092_v40 }
 0x3ba   : > { %3829 = vmatpush3.bf16.msra.mxu1 %v5098_v47  ;;  %3831 = vmatprep.subr.bf16.mxu0 %v4974_v52 }
 0x3bb   : > { %3862 = vmatprep.subr.bf16.mxu1 %v5927_v19 }
 0x42a   : > { %v975_v32 = vpop.xlane.xlu1 %974 }
 0x42b   : > { %v976_v23 = vmul.f32 0.03125, %v975_v32  ;;  %v979_v42 = vpop.xlane.xlu0 %978  ;;  %v2866_v32 = vld [vmem:[%s4843_s30 + $0x50] sm:$0xff] }
 0x42c   : > { %v980_v27 = vmul.f32 0.03125, %v979_v42 }
 0x42d   : > { %v981_v44 = vmul.f32 %v976_v23, %v976_v23  ;;  %v984_v43 = vsub.f32 %v5251_v39, %v976_v23 }
 0x42f   : > { %v982_v58 = vsub.f32 %v980_v27, %v981_v44 }
 0x431   : > { %v983_v45 = vmax.f32 %v982_v58, 0.0 }
 0x433   : > { %v985_v48 = vadd.f32 1e-05, %v983_v45 }
 0x435   : > { %4351 = vrsqrt.f32 %v985_v48 }
 0x43f   : > { %v4352_v38 = vpop.eup %4351 }
 0x440   : > { %v987_v33 = vmul.f32 %v4352_v38, %v984_v43 }
 0x442   : > { %v988_v26 = vmul.f32 %v4964_v50, %v987_v33 }
 0x444   : > { %v989_v31 = vadd.f32 %v4969_v51, %v988_v26  ;;  %v2867_v26 = vld [vmem:[%s4843_s30 + $0x58] sm:$0xff] }
 0x446   : > { %2864 = vst [vmem:[%s4854_s13 + $0x10] sm:$0xff] %v989_v31 }
 0x46f   : > { %v1058_v25 = vpop.f32.mrb[6].mxu0  ;;  %v1129_v15 = vpop.f32.mrb[6].mxu1 }
 0x470   : > { %v1139_v20 = vadd.f32 %v2865_v37, %v1058_v25  ;;  %v1060_v21 = vpop.f32.mrb[7].mxu0  ;;  %v3269_v42 = vpop.f32.mrb[7].mxu1  ;;  %v1153_v38 = vadd.f32 %v4959_v49, %v1129_v15 }
 0x471   : > { %v1146_v44 = vadd.f32 %v2866_v32, %v1060_v21 }
 0x472   : > { %v2868_v27 = vmul.f32 -1.442695, %v1139_v20 }
 0x473   : > { %v2869_v58 = vmul.f32 -1.442695, %v1146_v44 }
 0x474   : > { %4353 = vpow2.f32 %v2868_v27 }
 0x475   : > { %4355 = vpow2.f32 %v2869_v58 }
 0x47e   : > { %v4354_v23 = vpop.eup %4353 }
 0x47f   : > { %v1143_v45 = vadd.f32 1.0, %v4354_v23  ;;  %v4356_v48 = vpop.eup %4355 }
 0x480   : > { %v1150_v43 = vadd.f32 1.0, %v4356_v48 }
 0x481   : > { %4357 = vrcp.f32 %v1143_v45 }
 0x482   : > { %4359 = vrcp.f32 %v1150_v43 }
 0x48b   : > { %v4358_v33 = vpop.eup %4357 }
 0x48c   : > { %v1154_v31 = vmul.f32 %v4358_v33, %v1153_v38  ;;  %v4360_v25 = vpop.eup %4359 }
 0x48d   : > { %v1157_v42 = vsub.f32 1.0, %v4360_v25  ;;  %v1159_v32 = vmul.f32 %v4360_v25, %v5251_v39 }
 0x48e   : > { %v1155_v37 = vadd.f32 %v2867_v26, %v1154_v31 }
 0x490   : > { %4361 = vtanh.f32 %v1155_v37 }
 0x49a   : > { %v4362_v20 = vpop.eup %4361 }
 0x49b   : > { %v1158_v21 = vmul.f32 %v4362_v20, %v1157_v42  ;;  %v2871_v42 = vld [vmem:[%s4843_s30 + $0x60] sm:$0xff] }
 0x49d   : > { %v5302_v27 = vadd.f32 %v1159_v32, %v1158_v21 }
 0x49f   : > { %1244 = vmatmul.mubr.f32.vlgmr.msra.gmra.mrb[8].mxu0 %v5302_v27  ;;  %3303 = vmatmul.mubr.f32.vlgmr.msra.gmra.mrb[8].mxu1 %v5302_v27  ;;  %v1164_v15 = vmul.f32 %v5302_v27, %v5302_v27 }
 0x4a0   : > { %1161 = vadd.xlane.f32.xlu1 %v5302_v27  ;;  %3833 = vmatpush1.bf16.msra.mxu0 %v4978_v53 }
 0x4a1   : > { %3864 = vmatpush3.bf16.msra.mxu1 %v4992_v56  ;;  %3835 = vmatprep.subr.bf16.mxu0 %v4982_v54 }
 0x4a2   : > { %3865 = vmatprep.subr.bf16.mxu1 %v5927_v19  ;;  %1430 = vmatprep.mubr.f32.mxu0 %v5926_v46 }
 0x4a3   : > { %3337 = vmatprep.mubr.msk.f32.mxu1 %vm4645_vm0, %v5926_v46 }
 0x4a4   : > { %1165 = vadd.xlane.f32.xlu1 %v1164_v15  ;;  %3837 = vmatpush1.bf16.msra.mxu0 %v4988_v55 }
 0x4a5   : > { %3867 = vmatpush3.bf16.msra.mxu1 %v5003_v59  ;;  %3839 = vmatprep.subr.bf16.mxu0 %v4997_v57 }
 0x4a6   : > { %3868 = vmatprep.subr.bf16.mxu1 %v5927_v19 }
 0x4a8   : > { %3841 = vmatpush1.bf16.msra.mxu0 %v5012_v61 }
 0x4a9   : > { %3870 = vmatpush3.bf16.msra.mxu1 %v5022_v63  ;;  %3843 = vmatprep.subr.bf16.mxu0 %v5017_v62 }
 0x4aa   : > { %3871 = vmatprep.subr.bf16.mxu1 %v5927_v19 }
 0x4ac   : > { %3845 = vmatpush1.bf16.msra.mxu0 %v5028_v0 }
 0x4ad   : > { %3873 = vmatpush3.bf16.msra.mxu1 %v5038_v18  ;;  %3847 = vmatprep.subr.bf16.mxu0 %v5033_v60 }
 0x4ae   : > { %3874 = vmatprep.subr.bf16.mxu1 %v5927_v19 }
 0x4b0   : > { %3849 = vmatpush1.bf16.msra.mxu0 %v5044_v22 }
 0x4b1   : > { %3876 = vmatpush3.bf16.msra.mxu1 %v5054_v24  ;;  %3851 = vmatprep.subr.bf16.mxu0 %v5049_v29 }
 0x4b2   : > { %3877 = vmatprep.subr.bf16.mxu1 %v5927_v19 }
 0x4b4   : > { %3853 = vmatpush1.bf16.msra.mxu0 %v5060_v28 }
 0x4b5   : > { %3879 = vmatpush3.bf16.msra.mxu1 %v5070_v30  ;;  %3855 = vmatprep.subr.bf16.mxu0 %v5065_v35 }
 0x4b6   : > { %3880 = vmatprep.subr.bf16.mxu1 %v5927_v19 }
 0x4b8   : > { %3857 = vmatpush1.bf16.msra.mxu0 %v5076_v34 }
 0x4b9   : > { %3882 = vmatpush3.bf16.msra.mxu1 %v5086_v36  ;;  %3859 = vmatprep.subr.bf16.mxu0 %v5081_v41 }
 0x4ba   : > { %3883 = vmatprep.subr.bf16.mxu1 %v5927_v19 }
 0x4bc   : > { %3861 = vmatpush1.bf16.msra.mxu0 %v5092_v40 }
 0x4bd   : > { %3885 = vmatpush3.bf16.msra.mxu1 %v5098_v47  ;;  %3887 = vmatprep.subr.bf16.mxu0 %v4974_v52 }
 0x4be   : > { %3918 = vmatprep.subr.bf16.mxu1 %v5927_v19 }
 0x52d   : > { %v1162_v39 = vpop.xlane.xlu1 %1161 }
 0x52e   : > { %v1163_v44 = vmul.f32 0.03125, %v1162_v39  ;;  %v2872_v39 = vld [vmem:[%s4843_s30 + $0x68] sm:$0xff] }
 0x530   : > { %v1168_v23 = vmul.f32 %v1163_v44, %v1163_v44  ;;  %v1171_v33 = vsub.f32 %v5302_v27, %v1163_v44 }
 0x531   : > { %v1166_v58 = vpop.xlane.xlu1 %1165 }
 0x532   : > { %v1167_v45 = vmul.f32 0.03125, %v1166_v58 }
 0x534   : > { %v1169_v48 = vsub.f32 %v1167_v45, %v1168_v23 }
 0x536   : > { %v1170_v43 = vmax.f32 %v1169_v48, 0.0 }
 0x538   : > { %v1172_v38 = vadd.f32 1e-05, %v1170_v43 }
 0x53a   : > { %4363 = vrsqrt.f32 %v1172_v38 }
 0x544   : > { %v4364_v26 = vpop.eup %4363 }
 0x545   : > { %v1174_v31 = vmul.f32 %v4364_v26, %v1171_v33 }
 0x547   : > { %v1175_v37 = vmul.f32 %v4964_v50, %v1174_v31 }
 0x549   : > { %v1176_v25 = vadd.f32 %v4969_v51, %v1175_v37  ;;  %v2873_v37 = vld [vmem:[%s4843_s30 + $0x70] sm:$0xff] }
 0x54b   : > { %2870 = vst [vmem:[%s4854_s13 + $0x18] sm:$0xff] %v1176_v25 }
 0x572   : > { %v1245_v20 = vpop.f32.mrb[8].mxu0  ;;  %v1316_v21 = vpop.f32.mrb[8].mxu1 }
 0x573   : > { %v1326_v32 = vadd.f32 %v2871_v42, %v1245_v20  ;;  %v1247_v15 = vpop.f32.mrb[9].mxu0  ;;  %v3304_v58 = vpop.f32.mrb[9].mxu1  ;;  %v1340_v26 = vadd.f32 %v4959_v49, %v1316_v21 }
 0x574   : > { %v1333_v45 = vadd.f32 %v2872_v39, %v1247_v15 }
 0x575   : > { %v2874_v23 = vmul.f32 -1.442695, %v1326_v32 }
 0x576   : > { %v2875_v48 = vmul.f32 -1.442695, %v1333_v45 }
 0x577   : > { %4365 = vpow2.f32 %v2874_v23 }
 0x578   : > { %4367 = vpow2.f32 %v2875_v48 }
 0x581   : > { %v4366_v44 = vpop.eup %4365 }
 0x582   : > { %v1330_v43 = vadd.f32 1.0, %v4366_v44  ;;  %v4368_v38 = vpop.eup %4367 }
 0x583   : > { %v1337_v33 = vadd.f32 1.0, %v4368_v38 }
 0x584   : > { %4369 = vrcp.f32 %v1330_v43 }
 0x585   : > { %4371 = vrcp.f32 %v1337_v33 }
 0x58e   : > { %v4370_v31 = vpop.eup %4369 }
 0x58f   : > { %v1341_v25 = vmul.f32 %v4370_v31, %v1340_v26  ;;  %v4372_v20 = vpop.eup %4371 }
 0x590   : > { %v1344_v58 = vsub.f32 1.0, %v4372_v20  ;;  %v1346_v39 = vmul.f32 %v4372_v20, %v5302_v27  ;;  %v2877_v20 = vld [vmem:[%s4843_s30 + $0x78] sm:$0xff] }
 0x591   : > { %v1342_v42 = vadd.f32 %v2873_v37, %v1341_v25 }
 0x593   : > { %4373 = vtanh.f32 %v1342_v42 }
 0x59d   : > { %v4374_v32 = vpop.eup %4373 }
 0x59e   : > { %v1345_v15 = vmul.f32 %v4374_v32, %v1344_v58 }
 0x5a0   : > { %v5353_v23 = vadd.f32 %v1346_v39, %v1345_v15 }
 0x5a2   : > { %1431 = vmatmul.mubr.f32.vlgmr.msra.gmra.mrb[10].mxu0 %v5353_v23  ;;  %3338 = vmatmul.mubr.f32.vlgmr.msra.gmra.mrb[10].mxu1 %v5353_v23  ;;  %v1351_v21 = vmul.f32 %v5353_v23, %v5353_v23 }
 0x5a3   : > { %1348 = vadd.xlane.f32.xlu0 %v5353_v23  ;;  %3889 = vmatpush1.bf16.msra.mxu0 %v4978_v53 }
 0x5a4   : > { %3920 = vmatpush3.bf16.msra.mxu1 %v4992_v56  ;;  %3891 = vmatprep.subr.bf16.mxu0 %v4982_v54 }
 0x5a5   : > { %3921 = vmatprep.subr.bf16.mxu1 %v5927_v19  ;;  %1617 = vmatprep.mubr.f32.mxu0 %v5926_v46 }
 0x5a6   : > { %3372 = vmatprep.mubr.msk.f32.mxu1 %vm4645_vm0, %v5926_v46 }
 0x5a7   : > { %1352 = vadd.xlane.f32.xlu0 %v1351_v21  ;;  %3893 = vmatpush1.bf16.msra.mxu0 %v4988_v55  ;;  %v2878_v21 = vld [vmem:[%s4843_s30 + $0x80] sm:$0xff] }
 0x5a8   : > { %3923 = vmatpush3.bf16.msra.mxu1 %v5003_v59  ;;  %3895 = vmatprep.subr.bf16.mxu0 %v4997_v57 }
 0x5a9   : > { %3924 = vmatprep.subr.bf16.mxu1 %v5927_v19 }
 0x5ab   : > { %3897 = vmatpush1.bf16.msra.mxu0 %v5012_v61 }
 0x5ac   : > { %3926 = vmatpush3.bf16.msra.mxu1 %v5022_v63  ;;  %3899 = vmatprep.subr.bf16.mxu0 %v5017_v62 }
 0x5ad   : > { %3927 = vmatprep.subr.bf16.mxu1 %v5927_v19 }
 0x5af   : > { %3901 = vmatpush1.bf16.msra.mxu0 %v5028_v0 }
 0x5b0   : > { %3929 = vmatpush3.bf16.msra.mxu1 %v5038_v18  ;;  %3903 = vmatprep.subr.bf16.mxu0 %v5033_v60 }
 0x5b1   : > { %3930 = vmatprep.subr.bf16.mxu1 %v5927_v19 }
 0x5b3   : > { %3905 = vmatpush1.bf16.msra.mxu0 %v5044_v22 }
 0x5b4   : > { %3932 = vmatpush3.bf16.msra.mxu1 %v5054_v24  ;;  %3907 = vmatprep.subr.bf16.mxu0 %v5049_v29 }
 0x5b5   : > { %3933 = vmatprep.subr.bf16.mxu1 %v5927_v19 }
 0x5b7   : > { %3909 = vmatpush1.bf16.msra.mxu0 %v5060_v28 }
 0x5b8   : > { %3935 = vmatpush3.bf16.msra.mxu1 %v5070_v30  ;;  %3911 = vmatprep.subr.bf16.mxu0 %v5065_v35 }
 0x5b9   : > { %3936 = vmatprep.subr.bf16.mxu1 %v5927_v19 }
 0x5bb   : > { %3913 = vmatpush1.bf16.msra.mxu0 %v5076_v34 }
 0x5bc   : > { %3938 = vmatpush3.bf16.msra.mxu1 %v5086_v36  ;;  %3915 = vmatprep.subr.bf16.mxu0 %v5081_v41 }
 0x5bd   : > { %3939 = vmatprep.subr.bf16.mxu1 %v5927_v19 }
 0x5bf   : > { %3917 = vmatpush1.bf16.msra.mxu0 %v5092_v40 }
 0x5c0   : > { %3941 = vmatpush3.bf16.msra.mxu1 %v5098_v47  ;;  %3943 = vmatprep.subr.bf16.mxu0 %v4974_v52 }
 0x5c1   : > { %3974 = vmatprep.subr.bf16.mxu1 %v5927_v19 }
 0x630   : > { %v1349_v27 = vpop.xlane.xlu0 %1348 }
 0x631   : > { %v1350_v45 = vmul.f32 0.03125, %v1349_v27 }
 0x633   : > { %v1355_v44 = vmul.f32 %v1350_v45, %v1350_v45  ;;  %v1358_v31 = vsub.f32 %v5353_v23, %v1350_v45 }
 0x634   : > { %v1353_v48 = vpop.xlane.xlu0 %1352 }
 0x635   : > { %v1354_v43 = vmul.f32 0.03125, %v1353_v48 }
 0x637   : > { %v1356_v38 = vsub.f32 %v1354_v43, %v1355_v44 }
 0x639   : > { %v1357_v33 = vmax.f32 %v1356_v38, 0.0 }
 0x63b   : > { %v1359_v26 = vadd.f32 1e-05, %v1357_v33 }
 0x63d   : > { %4375 = vrsqrt.f32 %v1359_v26 }
 0x647   : > { %v4376_v37 = vpop.eup %4375 }
 0x648   : > { %v1361_v25 = vmul.f32 %v4376_v37, %v1358_v31 }
 0x64a   : > { %v1362_v52 = vmul.f32 %v4964_v50, %v1361_v25  ;;  %v2879_v25 = vld [vmem:[%s4843_s30 + $0x88] sm:$0xff] }
 0x64c   : > { %v1363_v42 = vadd.f32 %v4969_v51, %v1362_v52 }
 0x64e   : > { %2876 = vst [vmem:[%s4854_s13 + $0x20] sm:$0xff] %v1363_v42 }
 0x675   : > { %v1432_v58 = vpop.f32.mrb[10].mxu0  ;;  %v1503_v32 = vpop.f32.mrb[10].mxu1 }
 0x676   : > { %v1513_v15 = vadd.f32 %v2877_v20, %v1432_v58  ;;  %v1434_v39 = vpop.f32.mrb[11].mxu0  ;;  %v3339_v27 = vpop.f32.mrb[11].mxu1  ;;  %v1527_v31 = vadd.f32 %v4959_v49, %v1503_v32 }
 0x677   : > { %v1520_v44 = vadd.f32 %v2878_v21, %v1434_v39 }
 0x678   : > { %v2880_v48 = vmul.f32 -1.442695, %v1513_v15 }
 0x679   : > { %v2881_v43 = vmul.f32 -1.442695, %v1520_v44 }
 0x67a   : > { %4377 = vpow2.f32 %v2880_v48 }
 0x67b   : > { %4379 = vpow2.f32 %v2881_v43 }
 0x684   : > { %v4378_v45 = vpop.eup %4377 }
 0x685   : > { %v1517_v38 = vadd.f32 1.0, %v4378_v45  ;;  %v4380_v33 = vpop.eup %4379  ;;  %v2885_v45 = vld [vmem:[%s4843_s30 + $0xa0] sm:$0xff] }
 0x686   : > { %v1524_v26 = vadd.f32 1.0, %v4380_v33 }
 0x687   : > { %4381 = vrcp.f32 %v1517_v38 }
 0x688   : > { %4383 = vrcp.f32 %v1524_v26 }
 0x691   : > { %v4382_v37 = vpop.eup %4381 }
 0x692   : > { %v1528_v52 = vmul.f32 %v4382_v37, %v1527_v31  ;;  %v4384_v20 = vpop.eup %4383 }
 0x693   : > { %v1531_v58 = vsub.f32 1.0, %v4384_v20  ;;  %v1533_v21 = vmul.f32 %v4384_v20, %v5353_v23 }
 0x694   : > { %v1529_v42 = vadd.f32 %v2879_v25, %v1528_v52 }
 0x696   : > { %4385 = vtanh.f32 %v1529_v42 }
 0x6a0   : > { %v4386_v15 = vpop.eup %4385 }
 0x6a1   : > { %v1532_v39 = vmul.f32 %v4386_v15, %v1531_v58 }
 0x6a3   : > { %v5404_v27 = vadd.f32 %v1533_v21, %v1532_v39 }
 0x6a5   : > { %1618 = vmatmul.mubr.f32.vlgmr.msra.gmra.mrb[12].mxu0 %v5404_v27  ;;  %3373 = vmatmul.mubr.f32.vlgmr.msra.gmra.mrb[12].mxu1 %v5404_v27  ;;  %v1538_v32 = vmul.f32 %v5404_v27, %v5404_v27 }
 0x6a6   : > { %1535 = vadd.xlane.f32.xlu1 %v5404_v27  ;;  %3945 = vmatpush1.bf16.msra.mxu0 %v4978_v53 }
 0x6a7   : > { %3976 = vmatpush3.bf16.msra.mxu1 %v4992_v56  ;;  %3947 = vmatprep.subr.bf16.mxu0 %v4982_v54 }
 0x6a8   : > { %3977 = vmatprep.subr.bf16.mxu1 %v5927_v19  ;;  %1804 = vmatprep.mubr.f32.mxu0 %v5926_v46 }
 0x6a9   : > { %3407 = vmatprep.mubr.msk.f32.mxu1 %vm4645_vm0, %v5926_v46 }
 0x6aa   : > { %1539 = vadd.xlane.f32.xlu1 %v1538_v32  ;;  %3949 = vmatpush1.bf16.msra.mxu0 %v4988_v55 }
 0x6ab   : > { %3979 = vmatpush3.bf16.msra.mxu1 %v5003_v59  ;;  %3951 = vmatprep.subr.bf16.mxu0 %v4997_v57  ;;  %v2884_v59 = vld [vmem:[%s4843_s30 + $0x98] sm:$0xff] }
 0x6ac   : > { %3980 = vmatprep.subr.bf16.mxu1 %v5927_v19 }
 0x6ae   : > { %3953 = vmatpush1.bf16.msra.mxu0 %v5012_v61 }
 0x6af   : > { %3982 = vmatpush3.bf16.msra.mxu1 %v5022_v63  ;;  %3955 = vmatprep.subr.bf16.mxu0 %v5017_v62 }
 0x6b0   : > { %3983 = vmatprep.subr.bf16.mxu1 %v5927_v19 }
 0x6b2   : > { %3957 = vmatpush1.bf16.msra.mxu0 %v5028_v0 }
 0x6b3   : > { %3985 = vmatpush3.bf16.msra.mxu1 %v5038_v18  ;;  %3959 = vmatprep.subr.bf16.mxu0 %v5033_v60 }
 0x6b4   : > { %3986 = vmatprep.subr.bf16.mxu1 %v5927_v19 }
 0x6b6   : > { %3961 = vmatpush1.bf16.msra.mxu0 %v5044_v22 }
 0x6b7   : > { %3988 = vmatpush3.bf16.msra.mxu1 %v5054_v24  ;;  %3963 = vmatprep.subr.bf16.mxu0 %v5049_v29 }
 0x6b8   : > { %3989 = vmatprep.subr.bf16.mxu1 %v5927_v19 }
 0x6ba   : > { %3965 = vmatpush1.bf16.msra.mxu0 %v5060_v28 }
 0x6bb   : > { %3991 = vmatpush3.bf16.msra.mxu1 %v5070_v30  ;;  %3967 = vmatprep.subr.bf16.mxu0 %v5065_v35 }
 0x6bc   : > { %3992 = vmatprep.subr.bf16.mxu1 %v5927_v19 }
 0x6be   : > { %3969 = vmatpush1.bf16.msra.mxu0 %v5076_v34 }
 0x6bf   : > { %3994 = vmatpush3.bf16.msra.mxu1 %v5086_v36  ;;  %3971 = vmatprep.subr.bf16.mxu0 %v5081_v41 }
 0x6c0   : > { %3995 = vmatprep.subr.bf16.mxu1 %v5927_v19 }
 0x6c2   : > { %3973 = vmatpush1.bf16.msra.mxu0 %v5092_v40 }
 0x6c3   : > { %3997 = vmatpush3.bf16.msra.mxu1 %v5098_v47  ;;  %v2883_v47 = vld [vmem:[%s4843_s30 + $0x90] sm:$0xff] }
 0x733   : > { %v1536_v18 = vpop.xlane.xlu1 %1535 }
 0x734   : > { %v1537_v22 = vmul.f32 0.03125, %v1536_v18 }
 0x736   : > { %v1542_v28 = vmul.f32 %v1537_v22, %v1537_v22  ;;  %v1545_v36 = vsub.f32 %v5404_v27, %v1537_v22 }
 0x737   : > { %v1540_v24 = vpop.xlane.xlu1 %1539 }
 0x738   : > { %v1541_v29 = vmul.f32 0.03125, %v1540_v24 }
 0x73a   : > { %v1543_v30 = vsub.f32 %v1541_v29, %v1542_v28 }
 0x73c   : > { %v1544_v34 = vmax.f32 %v1543_v30, 0.0 }
 0x73e   : > { %v1546_v35 = vadd.f32 1e-05, %v1544_v34 }
 0x740   : > { %4387 = vrsqrt.f32 %v1546_v35  ;;  %v2889_v35 = vld [vmem:[%s4843_s30 + $0xa8] sm:$0xff] }
 0x74a   : > { %v4388_v41 = vpop.eup %4387 }
 0x74b   : > { %v1548_v46 = vmul.f32 %v4388_v41, %v1545_v36 }
 0x74d   : > { %v1549_v40 = vmul.f32 %v4964_v50, %v1548_v46 }
 0x74f   : > { %v1550_v53 = vadd.f32 %v4969_v51, %v1549_v40 }
 0x751   : > { %2882 = vst [vmem:[%s4854_s13 + $0x28] sm:$0xff] %v1550_v53  ;;  %v2890_v53 = vld [vmem:[%s4843_s30 + $0xb0] sm:$0xff] }
 0x778   : > { %v1619_v54 = vpop.f32.mrb[12].mxu0  ;;  %v1690_v55 = vpop.f32.mrb[12].mxu1 }
 0x779   : > { %v1700_v56 = vadd.f32 %v2883_v47, %v1619_v54  ;;  %v1621_v57 = vpop.f32.mrb[13].mxu0  ;;  %v3374_v60 = vpop.f32.mrb[13].mxu1  ;;  %v1714_v44 = vadd.f32 %v4959_v49, %v1690_v55 }
 0x77a   : > { %v1707_v62 = vadd.f32 %v2884_v59, %v1621_v57 }
 0x77b   : > { %v2886_v61 = vmul.f32 -1.442695, %v1700_v56 }
 0x77c   : > { %v2887_v63 = vmul.f32 -1.442695, %v1707_v62 }
 0x77d   : > { %4389 = vpow2.f32 %v2886_v61 }
 0x77e   : > { %4391 = vpow2.f32 %v2887_v63 }
 0x787   : > { %v4390_v0 = vpop.eup %4389 }
 0x788   : > { %v1704_v19 = vadd.f32 1.0, %v4390_v0  ;;  %v4392_v23 = vpop.eup %4391  ;;  %v2891_v0 = vld [vmem:[%s4843_s30 + $0xb8] sm:$0xff] }
 0x789   : > { %v1711_v48 = vadd.f32 1.0, %v4392_v23 }
 0x78a   : > { %4393 = vrcp.f32 %v1704_v19 }
 0x78b   : > { %4395 = vrcp.f32 %v1711_v48 }
 0x794   : > { %v4394_v43 = vpop.eup %4393 }
 0x795   : > { %v1715_v38 = vmul.f32 %v4394_v43, %v1714_v44  ;;  %v4396_v26 = vpop.eup %4395 }
 0x796   : > { %v1718_v31 = vsub.f32 1.0, %v4396_v26  ;;  %v1720_v52 = vmul.f32 %v4396_v26, %v5404_v27 }
 0x797   : > { %v1716_v33 = vadd.f32 %v2885_v45, %v1715_v38 }
 0x799   : > { %4397 = vtanh.f32 %v1716_v33 }
 0x7a3   : > { %v4398_v37 = vpop.eup %4397 }
 0x7a4   : > { %v1719_v25 = vmul.f32 %v4398_v37, %v1718_v31 }
 0x7a6   : > { %v1721_v42 = vadd.f32 %v1720_v52, %v1719_v25 }
 0x7a8   : > { %1805 = vmatmul.mubr.f32.vlgmr.msra.gmra.mrb[14].mxu0 %v1721_v42  ;;  %3408 = vmatmul.mubr.f32.vlgmr.msra.gmra.mrb[14].mxu1 %v1721_v42  ;;  %v1725_v20 = vmul.f32 %v1721_v42, %v1721_v42 }
 0x7a9   : > { %1722 = vadd.xlane.f32.xlu0 %v1721_v42 }
 0x7ad   : > { %1726 = vadd.xlane.f32.xlu0 %v1725_v20 }
 0x836   : > { %v1723_v58 = vpop.xlane.xlu0 %1722 }
 0x837   : > { %v1724_v15 = vmul.f32 0.03125, %v1723_v58 }
 0x839   : > { %v1729_v21 = vmul.f32 %v1724_v15, %v1724_v15  ;;  %v1732_v28 = vsub.f32 %v1721_v42, %v1724_v15 }
 0x83a   : > { %v1727_v39 = vpop.xlane.xlu0 %1726 }
 0x83b   : > { %v1728_v32 = vmul.f32 0.03125, %v1727_v39 }
 0x83d   : > { %v1730_v18 = vsub.f32 %v1728_v32, %v1729_v21 }
 0x83f   : > { %v1731_v22 = vmax.f32 %v1730_v18, 0.0 }
 0x841   : > { %v1733_v24 = vadd.f32 1e-05, %v1731_v22 }
 0x843   : > { %4399 = vrsqrt.f32 %v1733_v24 }
 0x84d   : > { %v4400_v27 = vpop.eup %4399 }
 0x84e   : > { %v1735_v29 = vmul.f32 %v4400_v27, %v1732_v28 }
 0x850   : > { %v1736_v30 = vmul.f32 %v4964_v50, %v1735_v29 }
 0x852   : > { %v1737_v34 = vadd.f32 %v4969_v51, %v1736_v30 }
 0x854   : > { %2888 = vst [vmem:[%s4854_s13 + $0x30] sm:$0xff] %v1737_v34 }
 0x87b   : > { %v1806_v36 = vpop.f32.mrb[14].mxu0  ;;  %v1877_v41 = vpop.f32.mrb[14].mxu1 }
 0x87c   : > { %v1887_v46 = vadd.f32 %v2889_v35, %v1806_v36  ;;  %v1808_v40 = vpop.f32.mrb[15].mxu0  ;;  %v3409_v47 = vpop.f32.mrb[15].mxu1  ;;  %v1901_v62 = vadd.f32 %v4959_v49, %v1877_v41 }
 0x87d   : > { %v1894_v55 = vadd.f32 %v2890_v53, %v1808_v40 }
 0x87e   : > { %v2892_v54 = vmul.f32 -1.442695, %v1887_v46 }
 0x87f   : > { %v2893_v56 = vmul.f32 -1.442695, %v1894_v55 }
 0x880   : > { %4401 = vpow2.f32 %v2892_v54 }
 0x881   : > { %4403 = vpow2.f32 %v2893_v56 }
 0x88a   : > { %v4402_v57 = vpop.eup %4401 }
 0x88b   : > { %v1891_v59 = vadd.f32 1.0, %v4402_v57  ;;  %v4404_v60 = vpop.eup %4403 }
 0x88c   : > { %v1898_v61 = vadd.f32 1.0, %v4404_v60 }
 0x88d   : > { %4405 = vrcp.f32 %v1891_v59 }
 0x88e   : > { %4407 = vrcp.f32 %v1898_v61 }
 0x897   : > { %v4406_v63 = vpop.eup %4405 }
 0x898   : > { %v1902_v19 = vmul.f32 %v4406_v63, %v1901_v62  ;;  %v4408_v48 = vpop.eup %4407 }
 0x899   : > { %v1905_v44 = vsub.f32 1.0, %v4408_v48  ;;  %v1907_v38 = vmul.f32 %v4408_v48, %v1721_v42 }
 0x89a   : > { %v1903_v23 = vadd.f32 %v2891_v0, %v1902_v19 }
 0x89c   : > { %4409 = vtanh.f32 %v1903_v23 }
 0x8a6   : > { %v4410_v43 = vpop.eup %4409 }
 0x8a7   : > { %v1906_v45 = vmul.f32 %v4410_v43, %v1905_v44 }
 0x8a9   : > { %v1908_v33 = vadd.f32 %v1907_v38, %v1906_v45 }
 0x8ab   : > { %1927 = vst [vmem:[#allocation2] sm:$0xff] %v1908_v33  ;;  %1909 = vadd.xlane.f32.xlu1 %v1908_v33  ;;  %v1912_v26 = vmul.f32 %v1908_v33, %v1908_v33 }
 0x8af   : > { %1913 = vadd.xlane.f32.xlu1 %v1912_v26 }
 0x938   : > { %v1910_v31 = vpop.xlane.xlu1 %1909 }
 0x939   : > { %v1911_v37 = vmul.f32 0.03125, %v1910_v31 }
 0x93b   : > { %v1916_v52 = vmul.f32 %v1911_v37, %v1911_v37  ;;  %v1919_v21 = vsub.f32 %v1908_v33, %v1911_v37 }
 0x93c   : > { %v1914_v25 = vpop.xlane.xlu1 %1913 }
 0x93d   : > { %v1915_v20 = vmul.f32 0.03125, %v1914_v25 }
 0x93f   : > { %v1917_v58 = vsub.f32 %v1915_v20, %v1916_v52 }
 0x941   : > { %v1918_v15 = vmax.f32 %v1917_v58, 0.0 }
 0x943   : > { %v1920_v39 = vadd.f32 1e-05, %v1918_v15 }
 0x945   : > { %4411 = vrsqrt.f32 %v1920_v39 }
 0x94f   : > { %v4412_v32 = vpop.eup %4411 }
 0x950   : > { %v1922_v18 = vmul.f32 %v4412_v32, %v1919_v21 }
 0x952   : > { %v1923_v42 = vmul.f32 %v4964_v50, %v1922_v18 }
 0x954   : > { %v1924_v22 = vadd.f32 %v4969_v51, %v1923_v42 }
 0x956   : > { %2894 = vst [vmem:[%s4854_s13 + $0x38] sm:$0xff] %v1924_v22 }
 0x957 PF: > { %p2895_p8 = scmp.ne.s32.totalorder %s4627_s27, 1 }
 0x958   : > { %v5466_v24 = vpack.c.bf16 (!%p2895_p8), %v4868_v5, %v4862_v2  ;;  %v5470_v28 = vpack.c.bf16 (!%p2895_p8), %v4866_v4, %v4860_v1  ;;  %v5474_v27 = vpack.c.bf16 (!%p2895_p8), %v4880_v11, %v4874_v8  ;;  %v5480_v29 = vpack.c.bf16 (!%p2895_p8), %v4878_v10, %v4872_v7  ;;  %v5929_v8 = vld [vmem:[#allocation22_spill] sm:$0xff] (!%p2895_p8)  ;;  %v5930_v10 = vld [vmem:[#allocation16_spill] sm:$0xff] (!%p2895_p8)  ;;  %v5931_v11 = vld [vmem:[#allocation17_spill] sm:$0xff] (!%p2895_p8) }
 0x959   : > { %1931 = sbr.rel (%p2895_p8) target bundleno = 3634 (0xe32), region = 64  ;;  %v5484_v2 = vpack.c.bf16 (!%p2895_p8), %v4870_v6, %v4864_v3  ;;  %v5489_v1 = vpack.c.bf16 (!%p2895_p8), %v4892_v17, %v4886_v14  ;;  %v4646_v4 = vmov (!%p2895_p8), 0.0|0.0   ;;  %v5495_v5 = vpack.c.bf16 (!%p2895_p8), %v4882_v12, %v4876_v9  ;;  %v5928_v6 = vld [vmem:[#allocation19_spill] sm:$0xff] (!%p2895_p8)  ;;  %v5932_v14 = vld [vmem:[#allocation18_spill] sm:$0xff] (!%p2895_p8)  ;;  %v5933_v17 = vld [vmem:[#allocation21_spill] sm:$0xff] (!%p2895_p8) }
 0x95a   : > { %3999 = vmatprep.subr.bf16.mxu0 (!%p2895_p8), %v5466_v24  ;;  %4030 = vmatprep.subr.bf16.mxu1 (!%p2895_p8), %v4646_v4  ;;  %v4647_v7 = vmov (!%p2895_p8), 0.0   ;;  %vm4648_vm1 = vmmov (!%p2895_p8), 0   ;;  %v5504_v3 = vpack.c.bf16 (!%p2895_p8), %v4890_v16, %v4884_v13  ;;  %v5509_v9 = vpack.c.bf16 (!%p2895_p8), %v5929_v8, %v5928_v6  ;;  %v5934_v16 = vld [vmem:[#allocation25_spill] sm:$0xff] (!%p2895_p8)  ;;  %v5935_v30 = vld [vmem:[#allocation28_spill] sm:$0xff] (!%p2895_p8)  ;;  %v5937_v36 = vld [vmem:[#allocation23_spill] sm:$0xff] (!%p2895_p8) }
 0x95b   : > { %4001 = vmatpush1.bf16.msra.mxu0 (!%p2895_p8), %v5470_v28  ;;  %4032 = vmatpush3.bf16.msra.mxu1 (!%p2895_p8), %v5484_v2  ;;  %v5514_v12 = vpack.c.bf16 (!%p2895_p8), %v5931_v11, %v5930_v10  ;;  %v5520_v13 = vpack.c.bf16 (!%p2895_p8), %v5933_v17, %v5932_v14  ;;  %v5525_v34 = vpack.c.bf16 (!%p2895_p8), %v5935_v30, %v5934_v16  ;;  %v5936_v35 = vld [vmem:[#allocation20_spill] sm:$0xff] (!%p2895_p8)  ;;  %v5939_v40 = vld [vmem:[#allocation27_spill] sm:$0xff] (!%p2895_p8)  ;;  %v5941_v54 = vld [vmem:[#allocation34_spill] sm:$0xff] (!%p2895_p8) }
 0x95c   : > { %4003 = vmatprep.subr.bf16.mxu0 (!%p2895_p8), %v5474_v27  ;;  %1997 = vmatprep.mubr.f32.mxu0 (!%p2895_p8), %v4647_v7  ;;  %v5530_v41 = vpack.c.bf16 (!%p2895_p8), %v5937_v36, %v5936_v35  ;;  %v5938_v46 = vld [vmem:[#allocation24_spill] sm:$0xff] (!%p2895_p8)  ;;  %v5940_v47 = vld [vmem:[#allocation31_spill] sm:$0xff] (!%p2895_p8)  ;;  %v5942_v56 = vld [vmem:[#allocation26_spill] sm:$0xff] (!%p2895_p8) }
 0x95d   : > { %4033 = vmatprep.subr.bf16.mxu1 (!%p2895_p8), %v4646_v4  ;;  %3442 = vmatprep.mubr.msk.f32.mxu1 (!%p2895_p8), %vm4648_vm1, %v4647_v7  ;;  %v5536_v53 = vpack.c.bf16 (!%p2895_p8), %v5939_v40, %v5938_v46  ;;  %v5541_v55 = vpack.c.bf16 (!%p2895_p8), %v5941_v54, %v5940_v47  ;;  %v5943_v57 = vld [vmem:[#allocation29_spill] sm:$0xff] (!%p2895_p8)  ;;  %v5944_v60 = vld [vmem:[#allocation30_spill] sm:$0xff] (!%p2895_p8)  ;;  %v5947_v0 = vld [vmem:[#allocation40_spill] sm:$0xff] (!%p2895_p8) }
 0x95e   : > { %v5546_v59 = vpack.c.bf16 (!%p2895_p8), %v5943_v57, %v5942_v56  ;;  %v5945_v61 = vld [vmem:[#allocation33_spill] sm:$0xff] (!%p2895_p8)  ;;  %v5948_v23 = vld [vmem:[#allocation32_spill] sm:$0xff] (!%p2895_p8)  ;;  %v5949_v48 = vld [vmem:[#allocation35_spill] sm:$0xff] (!%p2895_p8) }
 0x95f   : > { %4005 = vmatpush1.bf16.msra.mxu0 (!%p2895_p8), %v5480_v29  ;;  %4035 = vmatpush3.bf16.msra.mxu1 (!%p2895_p8), %v5495_v5  ;;  %v5552_v62 = vpack.c.bf16 (!%p2895_p8), %v5945_v61, %v5944_v60  ;;  %v5946_v63 = vld [vmem:[#allocation37_spill] sm:$0xff] (!%p2895_p8)  ;;  %v5562_v44 = vpack.c.bf16 (!%p2895_p8), %v5949_v48, %v5948_v23  ;;  %v5950_v43 = vld [vmem:[#allocation36_spill] sm:$0xff] (!%p2895_p8)  ;;  %v5951_v45 = vld [vmem:[#allocation39_spill] sm:$0xff] (!%p2895_p8) }
 0x960   : > { %4007 = vmatprep.subr.bf16.mxu0 %v5489_v1  ;;  %4036 = vmatprep.subr.bf16.mxu1 %v4646_v4  ;;  %v5557_v19 = vpack.c.bf16 %v5947_v0, %v5946_v63  ;;  %v5568_v38 = vpack.c.bf16 %v5951_v45, %v5950_v43  ;;  %v5952_v33 = vld [vmem:[#allocation43_spill] sm:$0xff]  ;;  %v5953_v26 = vld [vmem:[#allocation46_spill] sm:$0xff]  ;;  %v5955_v25 = vld [vmem:[#allocation41_spill] sm:$0xff] }
 0x961   : > { %v5573_v31 = vpack.c.bf16 %v5953_v26, %v5952_v33  ;;  %v5954_v37 = vld [vmem:[#allocation38_spill] sm:$0xff]  ;;  %v5957_v58 = vld [vmem:[#allocation45_spill] sm:$0xff]  ;;  %v5958_v39 = vld [vmem:[#allocation44_spill] sm:$0xff] }
 0x962   : > { %v5578_v52 = vpack.c.bf16 %v5955_v25, %v5954_v37  ;;  %v5956_v20 = vld [vmem:[#allocation42_spill] sm:$0xff]  ;;  %v5959_v21 = vld [vmem:[#allocation47_spill] sm:$0xff]  ;;  %v2896_v10 = vld [vmem:[%s4843_s30 + $0x8] sm:$0xff] }
 0x963   : > { %4009 = vmatpush1.bf16.msra.mxu0 %v5504_v3  ;;  %4038 = vmatpush3.bf16.msra.mxu1 %v5514_v12  ;;  %v5584_v15 = vpack.c.bf16 %v5957_v58, %v5956_v20  ;;  %v5590_v32 = vpack.c.bf16 %v5959_v21, %v5958_v39  ;;  %v5594_v18 = vld [vmem:[#allocation2] sm:$0xff]  ;;  %v2074_v42 = vld [vmem:[%s4843_s30] sm:$0xff]  ;;  %v2897_v56 = vld [vmem:[%s4843_s30 + $0x10] sm:$0xff] }
 0x964   : > { %4011 = vmatprep.subr.bf16.mxu0 %v5509_v9  ;;  %4039 = vmatprep.subr.bf16.mxu1 %v4646_v4 }
 0x967   : > { %4013 = vmatpush1.bf16.msra.mxu0 %v5520_v13  ;;  %4041 = vmatpush3.bf16.msra.mxu1 %v5530_v41 }
 0x968   : > { %4015 = vmatprep.subr.bf16.mxu0 %v5525_v34  ;;  %4042 = vmatprep.subr.bf16.mxu1 %v4646_v4 }
 0x96b   : > { %4017 = vmatpush1.bf16.msra.mxu0 %v5536_v53  ;;  %4044 = vmatpush3.bf16.msra.mxu1 %v5546_v59 }
 0x96c   : > { %4019 = vmatprep.subr.bf16.mxu0 %v5541_v55  ;;  %4045 = vmatprep.subr.bf16.mxu1 %v4646_v4 }
 0x96f   : > { %4021 = vmatpush1.bf16.msra.mxu0 %v5552_v62  ;;  %4047 = vmatpush3.bf16.msra.mxu1 %v5562_v44 }
 0x970   : > { %4023 = vmatprep.subr.bf16.mxu0 %v5557_v19  ;;  %4048 = vmatprep.subr.bf16.mxu1 %v4646_v4 }
 0x973   : > { %4025 = vmatpush1.bf16.msra.mxu0 %v5568_v38  ;;  %4050 = vmatpush3.bf16.msra.mxu1 %v5578_v52 }
 0x974   : > { %4027 = vmatprep.subr.bf16.mxu0 %v5573_v31  ;;  %4051 = vmatprep.subr.bf16.mxu1 %v4646_v4 }
 0x977   : > { %4029 = vmatpush1.bf16.msra.mxu0 %v5584_v15  ;;  %4053 = vmatpush3.bf16.msra.mxu1 %v5590_v32 }
 0x978   : > { %4055 = vmatprep.subr.bf16.mxu0 %v5466_v24  ;;  %4086 = vmatprep.subr.bf16.mxu1 %v4646_v4 }
 0x97a   : > { %1998 = vmatmul.mubr.f32.vlgmr.msra.gmra.mrb[0].mxu0 %v5594_v18  ;;  %3443 = vmatmul.mubr.f32.vlgmr.msra.gmra.mrb[0].mxu1 %v5594_v18 }
 0x97b   : > { %4057 = vmatpush1.bf16.msra.mxu0 %v5470_v28  ;;  %2182 = vmatprep.mubr.f32.mxu0 %v4647_v7 }
 0x97c   : > { %4059 = vmatprep.subr.bf16.mxu0 %v5474_v27  ;;  %4088 = vmatpush3.bf16.msra.mxu1 %v5484_v2 }
 0x97d   : > { %3477 = vmatprep.mubr.msk.f32.mxu1 %vm4648_vm1, %v4647_v7  ;;  %4089 = vmatprep.subr.bf16.mxu1 %v4646_v4 }
 0x97f   : > { %4061 = vmatpush1.bf16.msra.mxu0 %v5480_v29 }
 0x980   : > { %4063 = vmatprep.subr.bf16.mxu0 %v5489_v1  ;;  %4091 = vmatpush3.bf16.msra.mxu1 %v5495_v5 }
 0x981   : > { %4092 = vmatprep.subr.bf16.mxu1 %v4646_v4 }
 0x983   : > { %4065 = vmatpush1.bf16.msra.mxu0 %v5504_v3 }
 0x984   : > { %4067 = vmatprep.subr.bf16.mxu0 %v5509_v9  ;;  %4094 = vmatpush3.bf16.msra.mxu1 %v5514_v12 }
 0x985   : > { %4095 = vmatprep.subr.bf16.mxu1 %v4646_v4 }
 0x987   : > { %4069 = vmatpush1.bf16.msra.mxu0 %v5520_v13 }
 0x988   : > { %4071 = vmatprep.subr.bf16.mxu0 %v5525_v34  ;;  %4097 = vmatpush3.bf16.msra.mxu1 %v5530_v41 }
 0x989   : > { %4098 = vmatprep.subr.bf16.mxu1 %v4646_v4 }
 0x98b   : > { %4073 = vmatpush1.bf16.msra.mxu0 %v5536_v53 }
 0x98c   : > { %4075 = vmatprep.subr.bf16.mxu0 %v5541_v55  ;;  %4100 = vmatpush3.bf16.msra.mxu1 %v5546_v59 }
 0x98d   : > { %4101 = vmatprep.subr.bf16.mxu1 %v4646_v4 }
 0x98f   : > { %4077 = vmatpush1.bf16.msra.mxu0 %v5552_v62 }
 0x990   : > { %4079 = vmatprep.subr.bf16.mxu0 %v5557_v19  ;;  %4103 = vmatpush3.bf16.msra.mxu1 %v5562_v44 }
 0x991   : > { %4104 = vmatprep.subr.bf16.mxu1 %v4646_v4 }
 0x993   : > { %4081 = vmatpush1.bf16.msra.mxu0 %v5568_v38 }
 0x994   : > { %4083 = vmatprep.subr.bf16.mxu0 %v5573_v31  ;;  %4106 = vmatpush3.bf16.msra.mxu1 %v5578_v52 }
 0x995   : > { %4107 = vmatprep.subr.bf16.mxu1 %v4646_v4 }
 0x997   : > { %4085 = vmatpush1.bf16.msra.mxu0 %v5584_v15 }
 0x998   : > { %4111 = vmatprep.subr.bf16.mxu0 %v5466_v24  ;;  %4109 = vmatpush3.bf16.msra.mxu1 %v5590_v32 }
 0x999   : > { %4142 = vmatprep.subr.bf16.mxu1 %v4646_v4 }
 0xa4d   : > { %v1999_v22 = vpop.f32.mrb[0].mxu0  ;;  %v2070_v11 = vpop.f32.mrb[0].mxu1 }
 0xa4e   : > { %v2079_v6 = vadd.f32 %v2074_v42, %v1999_v22  ;;  %v2001_v8 = vpop.f32.mrb[1].mxu0  ;;  %v3444_v17 = vpop.f32.mrb[1].mxu1  ;;  %v2093_v47 = vadd.f32 %v4959_v49, %v2070_v11 }
 0xa4f   : > { %v2086_v16 = vadd.f32 %v2896_v10, %v2001_v8  ;;  %v2900_v8 = vld [vmem:[%s4843_s30 + $0x18] sm:$0xff] }
 0xa50   : > { %v2898_v14 = vmul.f32 -1.442695, %v2079_v6 }
 0xa51   : > { %v2899_v30 = vmul.f32 -1.442695, %v2086_v16  ;;  %v2901_v16 = vld [vmem:[%s4843_s30 + $0x20] sm:$0xff] }
 0xa52   : > { %4413 = vpow2.f32 %v2898_v14 }
 0xa53   : > { %4415 = vpow2.f32 %v2899_v30 }
 0xa5c   : > { %v4414_v35 = vpop.eup %4413 }
 0xa5d   : > { %v2083_v36 = vadd.f32 1.0, %v4414_v35  ;;  %v4416_v46 = vpop.eup %4415 }
 0xa5e   : > { %v2090_v40 = vadd.f32 1.0, %v4416_v46 }
 0xa5f   : > { %4417 = vrcp.f32 %v2083_v36 }
 0xa60   : > { %4419 = vrcp.f32 %v2090_v40 }
 0xa69   : > { %v4418_v54 = vpop.eup %4417 }
 0xa6a   : > { %v2094_v57 = vmul.f32 %v4418_v54, %v2093_v47  ;;  %v4420_v61 = vpop.eup %4419 }
 0xa6b   : > { %v2097_v63 = vsub.f32 1.0, %v4420_v61  ;;  %v2099_v23 = vmul.f32 %v4420_v61, %v5594_v18  ;;  %v2902_v61 = vld [vmem:[%s4843_s30 + $0x28] sm:$0xff] }
 0xa6c   : > { %v2095_v60 = vadd.f32 %v2897_v56, %v2094_v57 }
 0xa6e   : > { %4421 = vtanh.f32 %v2095_v60 }
 0xa78   : > { %v4422_v0 = vpop.eup %4421 }
 0xa79   : > { %v2098_v48 = vmul.f32 %v4422_v0, %v2097_v63 }
 0xa7b   : > { %v5641_v43 = vadd.f32 %v2099_v23, %v2098_v48 }
 0xa7d   : > { %2101 = vadd.xlane.f32.xlu0 %v5641_v43  ;;  %2183 = vmatmul.mubr.f32.vlgmr.msra.gmra.mrb[2].mxu0 %v5641_v43  ;;  %v2104_v45 = vmul.f32 %v5641_v43, %v5641_v43 }
 0xa7e   : > { %3478 = vmatmul.mubr.f32.vlgmr.msra.gmra.mrb[2].mxu1 %v5641_v43  ;;  %4113 = vmatpush1.bf16.msra.mxu0 %v5470_v28 }
 0xa7f   : > { %4144 = vmatpush3.bf16.msra.mxu1 %v5484_v2  ;;  %4115 = vmatprep.subr.bf16.mxu0 %v5474_v27 }
 0xa80   : > { %4145 = vmatprep.subr.bf16.mxu1 %v4646_v4  ;;  %2369 = vmatprep.mubr.f32.mxu0 %v4647_v7 }
 0xa81   : > { %2105 = vadd.xlane.f32.xlu0 %v2104_v45  ;;  %3512 = vmatprep.mubr.msk.f32.mxu1 %vm4648_vm1, %v4647_v7 }
 0xa82   : > { %4117 = vmatpush1.bf16.msra.mxu0 %v5480_v29 }
 0xa83   : > { %4147 = vmatpush3.bf16.msra.mxu1 %v5495_v5  ;;  %4119 = vmatprep.subr.bf16.mxu0 %v5489_v1 }
 0xa84   : > { %4148 = vmatprep.subr.bf16.mxu1 %v4646_v4 }
 0xa86   : > { %4121 = vmatpush1.bf16.msra.mxu0 %v5504_v3 }
 0xa87   : > { %4150 = vmatpush3.bf16.msra.mxu1 %v5514_v12  ;;  %4123 = vmatprep.subr.bf16.mxu0 %v5509_v9 }
 0xa88   : > { %4151 = vmatprep.subr.bf16.mxu1 %v4646_v4 }
 0xa8a   : > { %4125 = vmatpush1.bf16.msra.mxu0 %v5520_v13 }
 0xa8b   : > { %4153 = vmatpush3.bf16.msra.mxu1 %v5530_v41  ;;  %4127 = vmatprep.subr.bf16.mxu0 %v5525_v34 }
 0xa8c   : > { %4154 = vmatprep.subr.bf16.mxu1 %v4646_v4 }
 0xa8e   : > { %4129 = vmatpush1.bf16.msra.mxu0 %v5536_v53 }
 0xa8f   : > { %4156 = vmatpush3.bf16.msra.mxu1 %v5546_v59  ;;  %4131 = vmatprep.subr.bf16.mxu0 %v5541_v55 }
 0xa90   : > { %4157 = vmatprep.subr.bf16.mxu1 %v4646_v4 }
 0xa92   : > { %4133 = vmatpush1.bf16.msra.mxu0 %v5552_v62 }
 0xa93   : > { %4159 = vmatpush3.bf16.msra.mxu1 %v5562_v44  ;;  %4135 = vmatprep.subr.bf16.mxu0 %v5557_v19 }
 0xa94   : > { %4160 = vmatprep.subr.bf16.mxu1 %v4646_v4 }
 0xa96   : > { %4137 = vmatpush1.bf16.msra.mxu0 %v5568_v38 }
 0xa97   : > { %4162 = vmatpush3.bf16.msra.mxu1 %v5578_v52  ;;  %4139 = vmatprep.subr.bf16.mxu0 %v5573_v31 }
 0xa98   : > { %4163 = vmatprep.subr.bf16.mxu1 %v4646_v4 }
 0xa9a   : > { %4141 = vmatpush1.bf16.msra.mxu0 %v5584_v15 }
 0xa9b   : > { %4165 = vmatpush3.bf16.msra.mxu1 %v5590_v32  ;;  %4167 = vmatprep.subr.bf16.mxu0 %v5466_v24 }
 0xa9c   : > { %4198 = vmatprep.subr.bf16.mxu1 %v4646_v4 }
 0xb0a   : > { %v2102_v33 = vpop.xlane.xlu0 %2101 }
 0xb0b   : > { %v2103_v26 = vmul.f32 0.03125, %v2102_v33 }
 0xb0d   : > { %v2108_v25 = vmul.f32 %v2103_v26, %v2103_v26  ;;  %v2111_v18 = vsub.f32 %v5641_v43, %v2103_v26 }
 0xb0e   : > { %v2106_v37 = vpop.xlane.xlu0 %2105 }
 0xb0f   : > { %v2107_v20 = vmul.f32 0.03125, %v2106_v37 }
 0xb11   : > { %v2109_v58 = vsub.f32 %v2107_v20, %v2108_v25 }
 0xb13   : > { %v2110_v39 = vmax.f32 %v2109_v58, 0.0 }
 0xb15   : > { %v2112_v21 = vadd.f32 1e-05, %v2110_v39 }
 0xb17   : > { %4423 = vrsqrt.f32 %v2112_v21  ;;  %v2908_v21 = vld [vmem:[%s4843_s30 + $0x40] sm:$0xff] }
 0xb21   : > { %v4424_v42 = vpop.eup %4423 }
 0xb22   : > { %v2114_v22 = vmul.f32 %v4424_v42, %v2111_v18 }
 0xb24   : > { %v2115_v24 = vmul.f32 %v4964_v50, %v2114_v22 }
 0xb26   : > { %v2116_v6 = vadd.f32 %v4969_v51, %v2115_v24 }
 0xb28   : > { %2117 = vst [vmem:[%s4854_s13] sm:$0xff] %v2116_v6 }
 0xb50   : > { %v2184_v10 = vpop.f32.mrb[2].mxu0 }
 0xb51   : > { %v2265_v11 = vadd.f32 %v2900_v8, %v2184_v10  ;;  %v2255_v14 = vpop.f32.mrb[2].mxu1  ;;  %v2186_v17 = vpop.f32.mrb[3].mxu0 }
 0xb52   : > { %v3479_v30 = vpop.f32.mrb[3].mxu1  ;;  %v2272_v36 = vadd.f32 %v2901_v16, %v2186_v17  ;;  %v2279_v57 = vadd.f32 %v4959_v49, %v2255_v14 }
 0xb53   : > { %v2903_v35 = vmul.f32 -1.442695, %v2265_v11 }
 0xb54   : > { %v2904_v46 = vmul.f32 -1.442695, %v2272_v36 }
 0xb55   : > { %4425 = vpow2.f32 %v2903_v35 }
 0xb56   : > { %4427 = vpow2.f32 %v2904_v46 }
 0xb5f   : > { %v4426_v40 = vpop.eup %4425 }
 0xb60   : > { %v2269_v47 = vadd.f32 1.0, %v4426_v40  ;;  %v4428_v54 = vpop.eup %4427 }
 0xb61   : > { %v2276_v56 = vadd.f32 1.0, %v4428_v54 }
 0xb62   : > { %4429 = vrcp.f32 %v2269_v47 }
 0xb63   : > { %4431 = vrcp.f32 %v2276_v56 }
 0xb6c   : > { %v4430_v60 = vpop.eup %4429 }
 0xb6d   : > { %v2280_v63 = vmul.f32 %v4430_v60, %v2279_v57  ;;  %v4432_v23 = vpop.eup %4431 }
 0xb6e   : > { %v2283_v48 = vsub.f32 1.0, %v4432_v23  ;;  %v2285_v26 = vmul.f32 %v4432_v23, %v5641_v43 }
 0xb6f   : > { %v2281_v0 = vadd.f32 %v2902_v61, %v2280_v63  ;;  %v2912_v63 = vld [vmem:[%s4843_s30 + $0x48] sm:$0xff] }
 0xb71   : > { %4433 = vtanh.f32 %v2281_v0 }
 0xb7b   : > { %v4434_v45 = vpop.eup %4433 }
 0xb7c   : > { %v2284_v33 = vmul.f32 %v4434_v45, %v2283_v48 }
 0xb7e   : > { %v5692_v37 = vadd.f32 %v2285_v26, %v2284_v33  ;;  %v2913_v33 = vld [vmem:[%s4843_s30 + $0x50] sm:$0xff] }
 0xb80   : > { %2370 = vmatmul.mubr.f32.vlgmr.msra.gmra.mrb[4].mxu0 %v5692_v37  ;;  %3513 = vmatmul.mubr.f32.vlgmr.msra.gmra.mrb[4].mxu1 %v5692_v37  ;;  %v2290_v25 = vmul.f32 %v5692_v37, %v5692_v37 }
 0xb81   : > { %2287 = vadd.xlane.f32.xlu0 %v5692_v37  ;;  %4169 = vmatpush1.bf16.msra.mxu0 %v5470_v28 }
 0xb82   : > { %2291 = vadd.xlane.f32.xlu1 %v2290_v25  ;;  %4200 = vmatpush3.bf16.msra.mxu1 %v5484_v2 }
 0xb83   : > { %4171 = vmatprep.subr.bf16.mxu0 %v5474_v27  ;;  %4201 = vmatprep.subr.bf16.mxu1 %v4646_v4 }
 0xb84   : > { %2556 = vmatprep.mubr.f32.mxu0 %v4647_v7  ;;  %3547 = vmatprep.mubr.msk.f32.mxu1 %vm4648_vm1, %v4647_v7 }
 0xb85   : > { %4173 = vmatpush1.bf16.msra.mxu0 %v5480_v29 }
 0xb86   : > { %4203 = vmatpush3.bf16.msra.mxu1 %v5495_v5  ;;  %4175 = vmatprep.subr.bf16.mxu0 %v5489_v1 }
 0xb87   : > { %4204 = vmatprep.subr.bf16.mxu1 %v4646_v4 }
 0xb89   : > { %4177 = vmatpush1.bf16.msra.mxu0 %v5504_v3 }
 0xb8a   : > { %4206 = vmatpush3.bf16.msra.mxu1 %v5514_v12  ;;  %4179 = vmatprep.subr.bf16.mxu0 %v5509_v9 }
 0xb8b   : > { %4207 = vmatprep.subr.bf16.mxu1 %v4646_v4 }
 0xb8d   : > { %4181 = vmatpush1.bf16.msra.mxu0 %v5520_v13 }
 0xb8e   : > { %4209 = vmatpush3.bf16.msra.mxu1 %v5530_v41  ;;  %4183 = vmatprep.subr.bf16.mxu0 %v5525_v34  ;;  %v2906_v41 = vld [vmem:[%s4843_s30 + $0x30] sm:$0xff] }
 0xb8f   : > { %4210 = vmatprep.subr.bf16.mxu1 %v4646_v4 }
 0xb91   : > { %4185 = vmatpush1.bf16.msra.mxu0 %v5536_v53 }
 0xb92   : > { %4212 = vmatpush3.bf16.msra.mxu1 %v5546_v59  ;;  %4187 = vmatprep.subr.bf16.mxu0 %v5541_v55 }
 0xb93   : > { %4213 = vmatprep.subr.bf16.mxu1 %v4646_v4 }
 0xb95   : > { %4189 = vmatpush1.bf16.msra.mxu0 %v5552_v62 }
 0xb96   : > { %4215 = vmatpush3.bf16.msra.mxu1 %v5562_v44  ;;  %4191 = vmatprep.subr.bf16.mxu0 %v5557_v19  ;;  %v2907_v19 = vld [vmem:[%s4843_s30 + $0x38] sm:$0xff] }
 0xb97   : > { %4216 = vmatprep.subr.bf16.mxu1 %v4646_v4 }
 0xb99   : > { %4193 = vmatpush1.bf16.msra.mxu0 %v5568_v38 }
 0xb9a   : > { %4218 = vmatpush3.bf16.msra.mxu1 %v5578_v52  ;;  %4195 = vmatprep.subr.bf16.mxu0 %v5573_v31 }
 0xb9b   : > { %4219 = vmatprep.subr.bf16.mxu1 %v4646_v4 }
 0xb9d   : > { %4197 = vmatpush1.bf16.msra.mxu0 %v5584_v15 }
 0xb9e   : > { %4221 = vmatpush3.bf16.msra.mxu1 %v5590_v32 }
 0xc0e   : > { %v2288_v28 = vpop.xlane.xlu0 %2287 }
 0xc0f   : > { %v2289_v27 = vmul.f32 0.03125, %v2288_v28  ;;  %v2292_v29 = vpop.xlane.xlu1 %2291 }
 0xc10   : > { %v2293_v2 = vmul.f32 0.03125, %v2292_v29 }
 0xc11   : > { %v2294_v1 = vmul.f32 %v2289_v27, %v2289_v27  ;;  %v2297_v9 = vsub.f32 %v5692_v37, %v2289_v27 }
 0xc13   : > { %v2295_v5 = vsub.f32 %v2293_v2, %v2294_v1 }
 0xc15   : > { %v2296_v7 = vmax.f32 %v2295_v5, 0.0 }
 0xc17   : > { %v2298_v3 = vadd.f32 1e-05, %v2296_v7 }
 0xc19   : > { %4435 = vrsqrt.f32 %v2298_v3  ;;  %v2914_v3 = vld [vmem:[%s4843_s30 + $0x58] sm:$0xff] }
 0xc23   : > { %v4436_v12 = vpop.eup %4435 }
 0xc24   : > { %v2300_v4 = vmul.f32 %v4436_v12, %v2297_v9 }
 0xc26   : > { %v2301_v13 = vmul.f32 %v4964_v50, %v2300_v4 }
 0xc28   : > { %v2302_v34 = vadd.f32 %v4969_v51, %v2301_v13 }
 0xc2a   : > { %2905 = vst [vmem:[%s4854_s13 + $0x8] sm:$0xff] %v2302_v34 }
 0xc53   : > { %v2371_v53 = vpop.f32.mrb[4].mxu0  ;;  %v2442_v55 = vpop.f32.mrb[4].mxu1 }
 0xc54   : > { %v2452_v59 = vadd.f32 %v2906_v41, %v2371_v53  ;;  %v2373_v62 = vpop.f32.mrb[5].mxu0  ;;  %v3514_v44 = vpop.f32.mrb[5].mxu1  ;;  %v2466_v58 = vadd.f32 %v4959_v49, %v2442_v55 }
 0xc55   : > { %v2459_v31 = vadd.f32 %v2907_v19, %v2373_v62 }
 0xc56   : > { %v2909_v38 = vmul.f32 -1.442695, %v2452_v59 }
 0xc57   : > { %v2910_v52 = vmul.f32 -1.442695, %v2459_v31 }
 0xc58   : > { %4437 = vpow2.f32 %v2909_v38 }
 0xc59   : > { %4439 = vpow2.f32 %v2910_v52 }
 0xc62   : > { %v4438_v15 = vpop.eup %4437 }
 0xc63   : > { %v2456_v32 = vadd.f32 1.0, %v4438_v15  ;;  %v4440_v43 = vpop.eup %4439 }
 0xc64   : > { %v2463_v20 = vadd.f32 1.0, %v4440_v43 }
 0xc65   : > { %4441 = vrcp.f32 %v2456_v32 }
 0xc66   : > { %4443 = vrcp.f32 %v2463_v20 }
 0xc6f   : > { %v4442_v39 = vpop.eup %4441 }
 0xc70   : > { %v2467_v18 = vmul.f32 %v4442_v39, %v2466_v58  ;;  %v4444_v22 = vpop.eup %4443 }
 0xc71   : > { %v2470_v24 = vsub.f32 1.0, %v4444_v22  ;;  %v2472_v10 = vmul.f32 %v4444_v22, %v5692_v37 }
 0xc72   : > { %v2468_v42 = vadd.f32 %v2908_v21, %v2467_v18 }
 0xc74   : > { %4445 = vtanh.f32 %v2468_v42 }
 0xc7e   : > { %v4446_v6 = vpop.eup %4445 }
 0xc7f   : > { %v2471_v8 = vmul.f32 %v4446_v6, %v2470_v24 }
 0xc81   : > { %v2473_v11 = vadd.f32 %v2472_v10, %v2471_v8 }
 0xc83   : > { %2557 = vmatmul.mubr.f32.vlgmr.msra.gmra.mrb[6].mxu0 %v2473_v11  ;;  %3548 = vmatmul.mubr.f32.vlgmr.msra.gmra.mrb[6].mxu1 %v2473_v11  ;;  %v2477_v14 = vmul.f32 %v2473_v11, %v2473_v11 }
 0xc84   : > { %2474 = vadd.xlane.f32.xlu1 %v2473_v11 }
 0xc85   : > { %2478 = vadd.xlane.f32.xlu0 %v2477_v14 }
 0xd11   : > { %v2475_v17 = vpop.xlane.xlu1 %2474 }
 0xd12   : > { %v2476_v16 = vmul.f32 0.03125, %v2475_v17  ;;  %v2479_v30 = vpop.xlane.xlu0 %2478 }
 0xd13   : > { %v2480_v35 = vmul.f32 0.03125, %v2479_v30 }
 0xd14   : > { %v2481_v36 = vmul.f32 %v2476_v16, %v2476_v16  ;;  %v2484_v54 = vsub.f32 %v2473_v11, %v2476_v16 }
 0xd16   : > { %v2482_v46 = vsub.f32 %v2480_v35, %v2481_v36 }
 0xd18   : > { %v2483_v40 = vmax.f32 %v2482_v46, 0.0 }
 0xd1a   : > { %v2485_v47 = vadd.f32 1e-05, %v2483_v40 }
 0xd1c   : > { %4447 = vrsqrt.f32 %v2485_v47 }
 0xd26   : > { %v4448_v56 = vpop.eup %4447 }
 0xd27   : > { %v2487_v57 = vmul.f32 %v4448_v56, %v2484_v54 }
 0xd29   : > { %v2488_v60 = vmul.f32 %v4964_v50, %v2487_v57 }
 0xd2b   : > { %v2489_v61 = vadd.f32 %v4969_v51, %v2488_v60 }
 0xd2d   : > { %2911 = vst [vmem:[%s4854_s13 + $0x10] sm:$0xff] %v2489_v61 }
 0xd56   : > { %v2558_v0 = vpop.f32.mrb[6].mxu0  ;;  %v2629_v23 = vpop.f32.mrb[6].mxu1 }
 0xd57   : > { %v2639_v48 = vadd.f32 %v2912_v63, %v2558_v0  ;;  %v2560_v45 = vpop.f32.mrb[7].mxu0  ;;  %v3549_v26 = vpop.f32.mrb[7].mxu1  ;;  %v2653_v5 = vadd.f32 %v4959_v49, %v2629_v23 }
 0xd58   : > { %v2646_v25 = vadd.f32 %v2913_v33, %v2560_v45 }
 0xd59   : > { %v2915_v37 = vmul.f32 -1.442695, %v2639_v48 }
 0xd5a   : > { %v2916_v28 = vmul.f32 -1.442695, %v2646_v25 }
 0xd5b   : > { %4449 = vpow2.f32 %v2915_v37 }
 0xd5c   : > { %4451 = vpow2.f32 %v2916_v28 }
 0xd65   : > { %v4450_v27 = vpop.eup %4449 }
 0xd66   : > { %v2643_v29 = vadd.f32 1.0, %v4450_v27  ;;  %v4452_v2 = vpop.eup %4451 }
 0xd67   : > { %v2650_v1 = vadd.f32 1.0, %v4452_v2 }
 0xd68   : > { %4453 = vrcp.f32 %v2643_v29 }
 0xd69   : > { %4455 = vrcp.f32 %v2650_v1 }
 0xd72   : > { %v4454_v7 = vpop.eup %4453 }
 0xd73   : > { %v2654_v9 = vmul.f32 %v4454_v7, %v2653_v5  ;;  %v4456_v4 = vpop.eup %4455 }
 0xd74   : > { %v2657_v13 = vsub.f32 1.0, %v4456_v4  ;;  %v2659_v53 = vmul.f32 %v4456_v4, %v2473_v11 }
 0xd75   : > { %v2655_v12 = vadd.f32 %v2914_v3, %v2654_v9 }
 0xd77   : > { %4457 = vtanh.f32 %v2655_v12 }
 0xd81   : > { %v4458_v34 = vpop.eup %4457 }
 0xd82   : > { %v2658_v41 = vmul.f32 %v4458_v34, %v2657_v13 }
 0xd84   : > { %v2660_v55 = vadd.f32 %v2659_v53, %v2658_v41 }
 0xd86   : > { %2679 = vst [vmem:[#allocation2] sm:$0xff] %v2660_v55  ;;  %2680 = vst [vmem:[#allocation9] sm:$0xff] %v2660_v55  ;;  %2661 = vadd.xlane.f32.xlu1 %v2660_v55  ;;  %v2664_v59 = vmul.f32 %v2660_v55, %v2660_v55 }
 0xd8a   : > { %2665 = vadd.xlane.f32.xlu1 %v2664_v59 }
 0xe13   : > { %v2662_v62 = vpop.xlane.xlu1 %2661 }
 0xe14   : > { %v2663_v49 = vmul.f32 0.03125, %v2662_v62 }
 0xe16   : > { %v2668_v44 = vmul.f32 %v2663_v49, %v2663_v49  ;;  %v2671_v32 = vsub.f32 %v2660_v55, %v2663_v49 }
 0xe17   : > { %v2666_v19 = vpop.xlane.xlu1 %2665 }
 0xe18   : > { %v2667_v38 = vmul.f32 0.03125, %v2666_v19 }
 0xe1a   : > { %v2669_v31 = vsub.f32 %v2667_v38, %v2668_v44 }
 0xe1c   : > { %v2670_v52 = vmax.f32 %v2669_v31, 0.0 }
 0xe1e   : > { %v2672_v15 = vadd.f32 1e-05, %v2670_v52 }
 0xe20   : > { %4459 = vrsqrt.f32 %v2672_v15 }
 0xe2a   : > { %v4460_v43 = vpop.eup %4459 }
 0xe2b   : > { %v2674_v20 = vmul.f32 %v4460_v43, %v2671_v32 }
 0xe2d   : > { %v2675_v58 = vmul.f32 %v4964_v50, %v2674_v20 }
 0xe2f   : > { %v2676_v39 = vadd.f32 %v4969_v51, %v2675_v58 }
 0xe31   : > { %2917 = vst [vmem:[%s4854_s13 + $0x18] sm:$0xff] %v2676_v39 }
 0xe32 PF: > { %s2925_s16 = sshll.u32 %s4627_s27, 10  ;;  %s2696_s18 = sshll.u32 %s4854_s13, 4  ;;  %s5758_s18 = int_to_ptr.vmem [resolvable:$true] %s2696_s18 }
 0xe33   : > { %s5755_s12 = scalar_lea.hbm %s5835_s6, %s2925_s16  ;;  %s2682_s19 = scalar_lea.sflag [#allocation5], %s4839_s20 }
 0xe34   : > { %s4519_s9 = scalar_lea.vmem %s5758_s18, 1024  ;;  %s4649_s11 = smov [#allocation8]  }
 0xe35   : > { %p4520_p12 = scmp.ne.s32.totalorder %s5758_s18, %s4519_s9  ;;  %s4523_s21 = sshll.u32 %s4649_s11, 4  ;;  %s4524_s21 = int_to_ptr.vmem [resolvable:$false] %s4523_s21 }
 0xe36   : > { %s4525_s27 = scalar_lea.vmem %s4524_s21, 2048  ;;  %p4526_p5 = scmp.lt.s32.totalorder %s5758_s18, %s4524_s21 }
 0xe37   : > { %p4521_p13 = pnand %p4520_p12, %p4785_p10  ;;  %p4527_p9 = scmp.lt.s32.totalorder %s4525_s27, %s4519_s9 }
 0xe39   : > { %p4522_p0 = pneg %p4521_p13  ;;  %p4528_p1 = por %p4527_p9, %p4526_p5 }
 0xe3b   : > { %p4529_p2 = pnand %p4528_p1, %p4522_p0 }
 0xe3d   : > { %4532 = shalt.err (!%p4529_p2)
}
 0xe3e   : > { %s4533_s13 = scalar_lea.hbm %s5755_s12, 1024  ;;  %s4537_s15 = scalar_lea.hbm %s5835_s6, 2048 }
 0xe3f   : > { %p4534_p3 = scmp.ne.s32.totalorder %s5755_s12, %s4533_s13  ;;  %p4538_p4 = scmp.lt.u32.totalorder %s5755_s12, %s5835_s6 }
 0xe40   : > { %p4539_p6 = scmp.lt.u32.totalorder %s4537_s15, %s4533_s13  ;;  %p4541_p12 = scmp.lt.u32.totalorder %s4533_s13, %s5755_s12 }
 0xe41   : > { %p4535_p7 = pnand %p4534_p3, %p4785_p10 }
 0xe42   : > { %p4540_p8 = por %p4539_p6, %p4538_p4 }
 0xe43   : > { %p4536_p11 = pneg %p4535_p7 }
 0xe44   : > { %p4542_p13 = por %p4541_p12, %p4540_p8 }
 0xe46   : > { %p4543_p0 = pnand %p4542_p13, %p4536_p11 }
 0xe48   : > { %4546 = shalt.err (!%p4543_p0)
}
 0xe49   : > { %s4650_s30 = smov 128   ;;  %s4651_s9 = smov 8  }
 0xe4a   : > { %4231 = dma.vmem_to_hbm [thread:$0]  (%p4785_p10), %s5758_s18, 1024, %s5755_s12, %s2682_s19, %s4650_s30, %s4650_s30, %s4651_s9  }
 0xe4b   : > { %s4652_s11 = smov [#allocation9]   ;;  %p5960_p9 = scmp.ne.s32.totalorder %s5881_s10, 0 }
 0xe4c   : > { %s2712_s21 = sshll.u32 %s4652_s11, 4  ;;  %s2713_s21 = int_to_ptr.vmem [resolvable:$true] %s2712_s21 }
 0xe4d   : > { %s4547_s27 = scalar_lea.vmem %s2713_s21, 128  ;;  %p4554_p3 = scmp.lt.s32.totalorder %s2713_s21, %s2713_s21 }
 0xe4e   : > { %p4548_p5 = scmp.ne.s32.totalorder %s2713_s21, %s4547_s27  ;;  %p4555_p7 = scmp.lt.s32.totalorder %s4547_s27, %s4547_s27 }
 0xe50   : > { %p4549_p1 = pnand %p4548_p5, %p5960_p9  ;;  %p4556_p11 = por %p4555_p7, %p4554_p3 }
 0xe52   : > { %p4550_p2 = pneg %p4549_p1 }
 0xe54   : > { %p4557_p4 = pnand %p4556_p11, %p4550_p2 }
 0xe56   : > { %4560 = shalt.err (!%p4557_p4)
}
 0xe57   : > { %s4561_s22 = scalar_lea.hbm %s5836_s7, 128 }
 0xe58   : > { %p4562_p10 = scmp.ne.s32.totalorder %s5836_s7, %s4561_s22  ;;  %p4567_p12 = scmp.lt.u32.totalorder %s4561_s22, %s5836_s7 }
 0xe5a   : > { %p4563_p6 = pnand %p4562_p10, %p5960_p9 }
 0xe5c   : > { %p4564_p8 = pneg %p4563_p6 }
 0xe5e   : > { %p4569_p13 = pnand %p4567_p12, %p4564_p8 }
 0xe60   : > { %4572 = shalt.err (!%p4569_p13)
}
 0xe61   : > { %4233 = dma.vmem_to_hbm [thread:$0]  (%p5960_p9), %s2713_s21, 128, %s5836_s7, [#allocation10]  }
 0xe62   : > { %4606 = dma.done.wait (%p5960_p9), [#allocation10], 128  }
 0xe63   : > { %4608 = vsyncadd (%p5960_p9), [#allocation10], 4294967168 }
 0xe64 PF: > { %s5961_s16 = sld [smem:[#allocation15_spill]]  ;;  %s2728_s1 = sand.u32 1, %s4615_s24  }
 0xe65   : > { %p5963_p5 = scmp.ge.s32.totalorder %s4635_s29, 2  ;;  %s2729_s30 = scalar_lea.sflag [#allocation5], %s2728_s1 }
 0xe6a   : > { %p5962_p0 = scmp.ne.s32.totalorder %s5961_s16, 0 }
 0xe6c   : > { %p4246_p1 = pnand %p5963_p5, %p5962_p0 }
 0xe6e   : > { %4610 = dma.done.wait (!%p4246_p1), %s2729_s30, 1024  }
 0xe6f   : > { %4612 = vsyncadd (!%p4246_p1), %s2729_s30, 4294966272  ;;  %s26_s29 = sadd.s32 1, %s4635_s29   ;;  %s5964_s24 = smov %s4619_s25 }
 0xe70   : > { %p23_p2 = scmp.ge.s32.totalorder %s26_s29, 4   ;;  %s5965_s25 = smov %s4623_s26 }
 0xe71   : > { %s5966_s26 = smov %s4794_s8  ;;  %s5967_s27 = smov %s4631_s28 }
 0xe72   : > { %s5968_s28 = smov %s5970_s17  ;;  %25 = sbr.rel (!%p23_p2) target bundleno = 10 (0xa), region = 161 }
 0xe79   :  { %2734 = vsyncpa [#allocation4], 1 }
 0xe7a   :  { %2736 = vsyncpa [#allocation4 + $0x1], 1 }
 0xe7b   :  { %2737 = vsyncpa [#allocation7], 1 }
 0xe7c   :  { %2738 = vsyncpa [#allocation5], 1 }
 0xe7d   :  { %2740 = vsyncpa [#allocation5 + $0x1], 1 }
 0xe7e   :  { %2741 = vsyncpa [#allocation10], 1 }

</bundles_post_ra>
